<compile_context>
chip_gen: v7x
topology: tpu7x:2x2x1
jax: 0.10.0
libtpu: 0.0.40
codegen_flags: <defaults>
</compile_context>

<pallas_src>
import jax
import jax.numpy as jnp
from jax.experimental import pallas as pl
from jax.experimental.pallas import tpu as pltpu

EPS = 1e-5

# Phase taps for ConvTranspose2d(kernel=4, stride=2, padding=1): output pixel
# (2*i + ry, 2*j + rx) receives, per axis, contributions from these
# (offset-into-1-zero-padded-input, kernel-index) pairs.
_TAPS = {0: ((1, 1), (0, 3)), 1: ((1, 2), (2, 0))}


def _vmem_specs(n):
    return [pl.BlockSpec(memory_space=pltpu.MemorySpace.VMEM) for _ in range(n)]


# ---------------------------------------------------------------------------
# Kernel 1: Linear -> ReLU -> BatchNorm1d, tiled over the 8192-feature axis.
# ---------------------------------------------------------------------------
def linear_relu_bn_kernel(x_ref, w_ref, b_ref, g_ref, beta_ref, o_ref):
    h = jnp.dot(x_ref[...], w_ref[...], preferred_element_type=jnp.float32)
    h = jnp.maximum(h + b_ref[...], 0.0)
    # training-mode (biased) batch statistics, one pass
    mean = jnp.mean(h, axis=0, keepdims=True)
    var = jnp.mean(h * h, axis=0, keepdims=True) - mean * mean
    o_ref[...] = g_ref[...] * (h - mean) * jax.lax.rsqrt(var + EPS) + beta_ref[...]


# ---------------------------------------------------------------------------
# Kernel 2: ConvT(128->64, k4, s2, p1) -> ReLU -> BatchNorm2d (batch stats).
# ---------------------------------------------------------------------------
def convt1_relu_bn_kernel(h_ref, w_ref, b_ref, g_ref, beta_ref, o_ref, hpad_ref):
    B, H, W, Cin = h_ref.shape            # (B, 8, 8, 128)
    cout4 = w_ref.shape[1]                # 4 * Cout, phase-packed on lanes
    cout = cout4 // 4                     # 64 (power of two)

    # zero-padded halo built in VMEM (no wrapper-side jnp.pad / HBM round trip)
    hpad_ref[...] = jnp.zeros(hpad_ref.shape, hpad_ref.dtype)
    hpad_ref[:, 1:H + 1, 1:W + 1, :] = h_ref[...]

    # Single matmul for the whole transposed conv: concat the 9 shifted windows
    # on the (128-lane aligned) contraction axis against the packed block weight.
    windows = [hpad_ref[:, oy:oy + H, ox:ox + W, :]
               for oy in range(3) for ox in range(3)]
    xall = jnp.concatenate(windows, axis=-1).reshape(B * H * W, 9 * Cin)
    y = jnp.dot(xall, w_ref[...], preferred_element_type=jnp.float32)
    y = jnp.maximum(y + b_ref[...], 0.0)                     # bias + ReLU

    # BatchNorm2d (training-mode batch stats), one pass.  Per-channel stats must
    # pool the 4 phase groups sitting 64 lanes apart; `pool` both sums the groups
    # and re-broadcasts the result to all 4 copies in one small matmul.
    n = float(4 * B * H * W)                                  # N * H_out * W_out
    s1 = jnp.sum(y, axis=0, keepdims=True)                    # (1, 4*Cout)
    s2 = jnp.sum(y * y, axis=0, keepdims=True)
    li = jax.lax.broadcasted_iota(jnp.int32, (cout4, cout4), 0)
    lj = jax.lax.broadcasted_iota(jnp.int32, (cout4, cout4), 1)
    pool = jnp.where((li & (cout - 1)) == (lj & (cout - 1)), 1.0, 0.0)
    mean = jnp.dot(s1, pool, preferred_element_type=jnp.float32) / n
    var = jnp.dot(s2, pool, preferred_element_type=jnp.float32) / n - mean * mean
    scale = g_ref[...] * jax.lax.rsqrt(var + EPS)             # (1, 4*Cout), hoisted
    shift = beta_ref[...] - mean * scale
    y = (y * scale + shift).reshape(B, H, W, cout4)

    # Lane-dense stores: two full 128-lane slabs.  Row-major (B, 8, 2, 8, 128)
    # == NHWC (B, 16, 16, 64) after a free reshape in the wrapper.
    o_ref[:, :, 0, :, :] = y[:, :, :, 0:2 * cout]
    o_ref[:, :, 1, :, :] = y[:, :, :, 2 * cout:4 * cout]


# ---------------------------------------------------------------------------
# Kernel 3: ConvT(64->C, k4, s2, p1) -> Tanh.
# ---------------------------------------------------------------------------
def convt2_tanh_kernel(y_ref, w_ref, b_ref, o_ref, ypad_ref):
    B, H, W, Cin = y_ref.shape            # (B, 16, 16, 64)
    cout4 = w_ref.shape[-1]               # 4 * image_channels (phase-packed)

    ypad_ref[...] = jnp.zeros(ypad_ref.shape, ypad_ref.dtype)
    ypad_ref[:, 1:H + 1, 1:W + 1, :] = y_ref[...]

    # 9 window matmuls accumulated into one phase-packed accumulator (the
    # per-window block weights are zero where a window feeds no phase).
    acc = jnp.zeros((B * H * W, cout4), jnp.float32)
    for widx in range(9):
        oy, ox = widx // 3, widx % 3
        xw = ypad_ref[:, oy:oy + H, ox:ox + W, :].reshape(B * H * W, Cin)
        acc = acc + jnp.dot(xw, w_ref[widx], preferred_element_type=jnp.float32)
    # Final store is only 4*image_channels lanes wide; it is a few KiB so we
    # keep the simple layout rather than transposing spatial into lanes.
    o_ref[...] = jnp.tanh(acc + b_ref[...]).reshape(B, H, W, cout4)


# ---------------------------------------------------------------------------
# Parameter repacking (done once, outside the kernels).
# ---------------------------------------------------------------------------
def _pack_convt_block_weight(w):
    """(4, 4, Cin, Cout) ConvT weight -> (9*Cin, 4*Cout) block weight.

    Rows:    window index widx = 3*oy + ox over the 1-zero-padded input, x Cin.
    Columns: output parity phase p = 2*ry + rx, x Cout.
    Block (widx, p) holds w[ky, kx] when that window feeds that phase, else 0.
    """
    cin, cout = w.shape[2], w.shape[3]
    blk = jnp.zeros((9 * cin, 4 * cout), jnp.float32)
    for ry in (0, 1):
        for rx in (0, 1):
            p = 2 * ry + rx
            for oy, ky in _TAPS[ry]:
                for ox, kx in _TAPS[rx]:
                    widx = 3 * oy + ox
                    blk = blk.at[widx * cin:(widx + 1) * cin,
                                 p * cout:(p + 1) * cout].set(w[ky, kx])
    return blk


def pack_params(params):
    """One-time repacking of PyTorch-layout params into kernel-friendly form."""
    feat = params["w_fc"].shape[1]                    # 128*8*8
    c_img = params["w_ct2"].shape[-1]
    # Permute FC columns so (B, feat) reshapes directly to NHWC (B, 8, 8, 128):
    # Unflatten(1,(128,8,8)) + NCHW->NHWC folded into the weights (BN1d is
    # per-feature, so permuting w/b/gamma/beta together is exact).
    perm = jnp.arange(feat).reshape(128, 8, 8).transpose(1, 2, 0).reshape(-1)
    tile4 = lambda v: jnp.tile(v.reshape(1, -1), (1, 4))
    return {
        "w_fc": params["w_fc"][:, perm],
        "b_fc": params["b_fc"][perm].reshape(1, feat),
        "bn1_gamma": params["bn1_gamma"][perm].reshape(1, feat),
        "bn1_beta": params["bn1_beta"][perm].reshape(1, feat),
        "w1_blk": _pack_convt_block_weight(params["w_ct1"]),          # (1152, 256)
        "b1": tile4(params["b_ct1"]),                                 # (1, 256)
        "bn2_gamma": tile4(params["bn2_gamma"]),
        "bn2_beta": tile4(params["bn2_beta"]),
        "w2_blk": _pack_convt_block_weight(
            params["w_ct2"]).reshape(9, 64, 4 * c_img),               # (9, 64, 4C)
        "b2": tile4(params["b_ct2"]),                                 # (1, 4C)
    }


# ---------------------------------------------------------------------------
# Forward pass.
# ---------------------------------------------------------------------------
def generator_forward(x, pp):
    B, latent = x.shape
    feat = pp["w_fc"].shape[1]
    tile_n = 2048
    assert feat % tile_n == 0

    # ---- Linear + ReLU + BatchNorm1d (feature-tiled, pipelined) ------------
    h = pl.pallas_call(
        linear_relu_bn_kernel,
        out_shape=jax.ShapeDtypeStruct((B, feat), jnp.float32),
        grid=(feat // tile_n,),
        in_specs=[
            pl.BlockSpec((B, latent), lambda i: (0, 0)),
            pl.BlockSpec((latent, tile_n), lambda i: (0, i)),
            pl.BlockSpec((1, tile_n), lambda i: (0, i)),
            pl.BlockSpec((1, tile_n), lambda i: (0, i)),
            pl.BlockSpec((1, tile_n), lambda i: (0, i)),
        ],
        out_specs=pl.BlockSpec((B, tile_n), lambda i: (0, i)),
        compiler_params=pltpu.CompilerParams(dimension_semantics=("parallel",)),
        cost_estimate=pl.CostEstimate(
            flops=int(2 * B * latent * feat + 8 * B * feat),
            transcendentals=int(feat),
            bytes_accessed=int(4 * (latent * feat + 2 * B * feat + 4 * feat))),
    )(x, pp["w_fc"], pp["b_fc"], pp["bn1_gamma"], pp["bn1_beta"])

    # FC columns are pre-permuted -> this reshape is already NHWC (B, 8, 8, 128).
    h = h.reshape(B, 8, 8, 128)

    # ---- ConvT(128->64) + ReLU + BatchNorm2d -------------------------------
    # TODO(synk): for large batches (v7x 64 MiB VMEM), tile the batch axis with
    # a two-pass BN2d (stats pass + normalize pass); whole-batch is fine here.
    y1p = pl.pallas_call(
        convt1_relu_bn_kernel,
        out_shape=jax.ShapeDtypeStruct((B, 8, 2, 8, 128), jnp.float32),
        in_specs=_vmem_specs(5),
        out_specs=pl.BlockSpec(memory_space=pltpu.MemorySpace.VMEM),
        scratch_shapes=[pltpu.VMEM((B, 10, 10, 128), jnp.float32)],
        cost_estimate=pl.CostEstimate(
            flops=int(2 * B * 64 * 1152 * 256),
            transcendentals=256,
            bytes_accessed=int(4 * (B * 64 * 128 + 1152 * 256 + 2 * B * 64 * 256))),
    )(h, pp["w1_blk"], pp["b1"], pp["bn2_gamma"], pp["bn2_beta"])

    # Row-major (B, 8, 2, 8, 128) == NHWC (B, 16, 16, 64): free reshape, no
    # transpose / pad / extra HBM pass between the two conv kernels.
    y1 = y1p.reshape(B, 16, 16, 64)

    # ---- ConvT(64->C) + Tanh ------------------------------------------------
    c4 = pp["w2_blk"].shape[-1]
    o3 = pl.pallas_call(
        convt2_tanh_kernel,
        out_shape=jax.ShapeDtypeStruct((B, 16, 16, c4), jnp.float32),
        in_specs=_vmem_specs(3),
        out_specs=pl.BlockSpec(memory_space=pltpu.MemorySpace.VMEM),
        scratch_shapes=[pltpu.VMEM((B, 18, 18, 64), jnp.float32)],
        cost_estimate=pl.CostEstimate(
            flops=int(2 * B * 256 * 9 * 64 * c4),
            transcendentals=int(B * 256 * c4),
            bytes_accessed=int(4 * (B * 256 * 64 + 9 * 64 * c4 + B * 256 * c4))),
    )(y1, pp["w2_blk"], pp["b2"])

    # (B, 16, 16, 4*C) phase-packed -> NCHW (B, C, 32, 32), like PyTorch.
    c_img = c4 // 4
    img = o3.reshape(B, 16, 16, 2, 2, c_img).transpose(0, 5, 1, 3, 2, 4)
    return img.reshape(B, c_img, 32, 32)


# ---------------------------------------------------------------------------
# PyTorch-style parameter initialization (same layout/ranges as nn defaults).
# ---------------------------------------------------------------------------
def init_params(key, latent_size, image_channels):
    ks = jax.random.split(key, 6)
    feat = 128 * 8 * 8

    def u(k, shape, fan_in):
        bound = 1.0 / float(fan_in) ** 0.5
        return jax.random.uniform(k, shape, jnp.float32, -bound, bound)

    return {
        # Linear(latent, 8192): stored transposed as (latent, 8192)
        "w_fc": u(ks[0], (latent_size, feat), latent_size),
        "b_fc": u(ks[1], (feat,), latent_size),
        "bn1_gamma": jnp.ones((feat,), jnp.float32),
        "bn1_beta": jnp.zeros((feat,), jnp.float32),
        # ConvTranspose2d weights stored as (kH, kW, Cin, Cout)
        # (PyTorch shape (Cin, Cout, kH, kW) transposed by (2, 3, 0, 1))
        "w_ct1": u(ks[2], (4, 4, 128, 64), 64 * 4 * 4),
        "b_ct1": u(ks[3], (64,), 64 * 4 * 4),
        "bn2_gamma": jnp.ones((64,), jnp.float32),
        "bn2_beta": jnp.zeros((64,), jnp.float32),
        "w_ct2": u(ks[4], (4, 4, 64, image_channels), image_channels * 4 * 4),
        "b_ct2": u(ks[5], (image_channels,), image_channels * 4 * 4),
    }


if __name__ == "__main__":
    latent_size, image_channels, batch = 32, 3, 2
    key = jax.random.PRNGKey(0)
    pkey, xkey = jax.random.split(key)
    params = init_params(pkey, latent_size, image_channels)
    packed = pack_params(params)
    x = jax.random.normal(xkey, (batch, latent_size), jnp.float32)

    fwd = jax.jit(generator_forward)
    out = jax.block_until_ready(fwd(x, packed))
    assert out.shape == (batch, image_channels, 32, 32), out.shape
    assert bool(jnp.all(jnp.isfinite(out)))
    print("KERNEL_OK")
</pallas_src>

<mosaic_0001>
module attributes {stable_mosaic.version = 11 : i64} {
  func.func @linear_relu_bn_kernel(%arg0: i32, %arg1: memref<2x32xf32, #tpu.memory_space<vmem>>, %arg2: memref<32x2048xf32, #tpu.memory_space<vmem>>, %arg3: memref<1x2048xf32, #tpu.memory_space<vmem>>, %arg4: memref<1x2048xf32, #tpu.memory_space<vmem>>, %arg5: memref<1x2048xf32, #tpu.memory_space<vmem>>, %arg6: memref<2x2048xf32, #tpu.memory_space<vmem>>) attributes {dimension_semantics = [#tpu.dimension_semantics<parallel>], iteration_bounds = array<i64: 4>, scalar_prefetch = 0 : i64, scratch_operands = 0 : i64, tpu.core_type = #tpu.core_type<tc>, window_params = [{pipeline_mode = #tpu.pipeline_mode<synchronous>, transform_indices = @transform_0, window_bounds = array<i64: 2, 32>}, {transform_indices = @transform_1, window_bounds = array<i64: 32, 2048>}, {transform_indices = @transform_2, window_bounds = array<i64: 1, 2048>}, {transform_indices = @transform_3, window_bounds = array<i64: 1, 2048>}, {transform_indices = @transform_4, window_bounds = array<i64: 1, 2048>}, {transform_indices = @transform_5, window_bounds = array<i64: 2, 2048>}]} {
    %c0 = arith.constant 0 : index
    %c0_0 = arith.constant 0 : index
    %0 = vector.load %arg1[%c0, %c0_0] : memref<2x32xf32, #tpu.memory_space<vmem>>, vector<2x32xf32>
    %c0_1 = arith.constant 0 : index
    %c0_2 = arith.constant 0 : index
    %1 = vector.load %arg2[%c0_1, %c0_2] : memref<32x2048xf32, #tpu.memory_space<vmem>>, vector<32x2048xf32>
    %cst = arith.constant dense<0.000000e+00> : vector<2x2048xf32>
    %2 = tpu.matmul %0, %1, %cst {dimension_numbers = #tpu.dot_dimension_numbers<[1], [0], [0], [1], [0, 0, 1, 1], [], []>} : vector<2x32xf32>, vector<32x2048xf32>, vector<2x2048xf32> -> vector<2x2048xf32>
    %c0_3 = arith.constant 0 : index
    %c0_4 = arith.constant 0 : index
    %3 = vector.load %arg3[%c0_3, %c0_4] : memref<1x2048xf32, #tpu.memory_space<vmem>>, vector<1x2048xf32>
    %4 = vector.broadcast %3 : vector<1x2048xf32> to vector<2x2048xf32>
    %5 = arith.addf %2, %4 : vector<2x2048xf32>
    %cst_5 = arith.constant 0.000000e+00 : f32
    %6 = vector.broadcast %cst_5 : f32 to vector<2x2048xf32>
    %7 = arith.maximumf %5, %6 : vector<2x2048xf32>
    %cst_6 = arith.constant dense<0.000000e+00> : vector<2048xf32>
    %8 = vector.multi_reduction <add>, %7, %cst_6 [0] : vector<2x2048xf32> to vector<2048xf32>
    %9 = vector.shape_cast %8 : vector<2048xf32> to vector<1x2048xf32>
    %cst_7 = arith.constant 2.000000e+00 : f32
    %10 = vector.broadcast %cst_7 : f32 to vector<1x2048xf32>
    %11 = arith.divf %9, %10 : vector<1x2048xf32>
    %12 = arith.mulf %7, %7 : vector<2x2048xf32>
    %cst_8 = arith.constant dense<0.000000e+00> : vector<2048xf32>
    %13 = vector.multi_reduction <add>, %12, %cst_8 [0] : vector<2x2048xf32> to vector<2048xf32>
    %14 = vector.shape_cast %13 : vector<2048xf32> to vector<1x2048xf32>
    %cst_9 = arith.constant 2.000000e+00 : f32
    %15 = vector.broadcast %cst_9 : f32 to vector<1x2048xf32>
    %16 = arith.divf %14, %15 : vector<1x2048xf32>
    %17 = arith.mulf %11, %11 : vector<1x2048xf32>
    %18 = arith.subf %16, %17 : vector<1x2048xf32>
    %c0_10 = arith.constant 0 : index
    %c0_11 = arith.constant 0 : index
    %19 = vector.load %arg4[%c0_10, %c0_11] : memref<1x2048xf32, #tpu.memory_space<vmem>>, vector<1x2048xf32>
    %20 = vector.broadcast %11 : vector<1x2048xf32> to vector<2x2048xf32>
    %21 = arith.subf %7, %20 : vector<2x2048xf32>
    %22 = vector.broadcast %19 : vector<1x2048xf32> to vector<2x2048xf32>
    %23 = arith.mulf %22, %21 : vector<2x2048xf32>
    %cst_12 = arith.constant 9.99999974E-6 : f32
    %24 = vector.broadcast %cst_12 : f32 to vector<1x2048xf32>
    %25 = arith.addf %18, %24 : vector<1x2048xf32>
    %26 = math.rsqrt %25 : vector<1x2048xf32>
    %27 = vector.broadcast %26 : vector<1x2048xf32> to vector<2x2048xf32>
    %28 = arith.mulf %23, %27 : vector<2x2048xf32>
    %c0_13 = arith.constant 0 : index
    %c0_14 = arith.constant 0 : index
    %29 = vector.load %arg5[%c0_13, %c0_14] : memref<1x2048xf32, #tpu.memory_space<vmem>>, vector<1x2048xf32>
    %30 = vector.broadcast %29 : vector<1x2048xf32> to vector<2x2048xf32>
    %31 = arith.addf %28, %30 : vector<2x2048xf32>
    %c0_15 = arith.constant 0 : index
    %c0_16 = arith.constant 0 : index
    %32 = vector.load %arg6[%c0_15, %c0_16] : memref<2x2048xf32, #tpu.memory_space<vmem>>, vector<2x2048xf32>
    tpu.vector_store %arg6[%c0_15, %c0_16], %31 {strides = array<i32>} : memref<2x2048xf32, #tpu.memory_space<vmem>>, vector<2x2048xf32>,
    return
  }
  func.func @transform_0(%arg0: i32) -> (i32, i32) {
    %c0_i32 = arith.constant 0 : i32
    %c0_i32_0 = arith.constant 0 : i32
    %c0_i32_1 = arith.constant 0 : i32
    return %c0_i32, %c0_i32_0 : i32, i32
  }
  func.func @transform_1(%arg0: i32) -> (i32, i32) {
    %c0_i32 = arith.constant 0 : i32
    %c0_i32_0 = arith.constant 0 : i32
    return %c0_i32, %arg0 : i32, i32
  }
  func.func @transform_2(%arg0: i32) -> (i32, i32) {
    %c0_i32 = arith.constant 0 : i32
    %c0_i32_0 = arith.constant 0 : i32
    return %c0_i32, %arg0 : i32, i32
  }
  func.func @transform_3(%arg0: i32) -> (i32, i32) {
    %c0_i32 = arith.constant 0 : i32
    %c0_i32_0 = arith.constant 0 : i32
    return %c0_i32, %arg0 : i32, i32
  }
  func.func @transform_4(%arg0: i32) -> (i32, i32) {
    %c0_i32 = arith.constant 0 : i32
    %c0_i32_0 = arith.constant 0 : i32
    return %c0_i32, %arg0 : i32, i32
  }
  func.func @transform_5(%arg0: i32) -> (i32, i32) {
    %c0_i32 = arith.constant 0 : i32
    %c0_i32_0 = arith.constant 0 : i32
    return %c0_i32, %arg0 : i32, i32
  }
}

module attributes {stable_mosaic.version = 11 : i64} {
  func.func @convt2_tanh_kernel(%arg0: memref<2x16x16x64xf32, #tpu.memory_space<vmem>>, %arg1: memref<9x64x12xf32, #tpu.memory_space<vmem>>, %arg2: memref<1x12xf32, #tpu.memory_space<vmem>>, %arg3: memref<2x16x16x12xf32, #tpu.memory_space<vmem>>, %arg4: memref<2x18x18x64xf32, #tpu.memory_space<vmem>>) attributes {dimension_semantics = [], scalar_prefetch = 0 : i64, scratch_operands = 1 : i64, tpu.core_type = #tpu.core_type<tc>} {
    %cst = arith.constant 0.000000e+00 : f32
    %0 = vector.broadcast %cst : f32 to vector<2x18x18x64xf32>
    %c0 = arith.constant 0 : index
    %c0_0 = arith.constant 0 : index
    %c0_1 = arith.constant 0 : index
    %c0_2 = arith.constant 0 : index
    %1 = vector.load %arg4[%c0, %c0_0, %c0_1, %c0_2] : memref<2x18x18x64xf32, #tpu.memory_space<vmem>>, vector<2x18x18x64xf32>
    tpu.vector_store %arg4[%c0, %c0_0, %c0_1, %c0_2], %0 {strides = array<i32>} : memref<2x18x18x64xf32, #tpu.memory_space<vmem>>, vector<2x18x18x64xf32>,
    %c0_3 = arith.constant 0 : index
    %c0_4 = arith.constant 0 : index
    %c0_5 = arith.constant 0 : index
    %c0_6 = arith.constant 0 : index
    %2 = vector.load %arg0[%c0_3, %c0_4, %c0_5, %c0_6] : memref<2x16x16x64xf32, #tpu.memory_space<vmem>>, vector<2x16x16x64xf32>
    %c0_7 = arith.constant 0 : index
    %c1 = arith.constant 1 : index
    %c1_8 = arith.constant 1 : index
    %c0_9 = arith.constant 0 : index
    %3 = vector.load %arg4[%c0_7, %c1, %c1_8, %c0_9] : memref<2x18x18x64xf32, #tpu.memory_space<vmem>>, vector<2x16x16x64xf32>
    tpu.vector_store %arg4[%c0_7, %c1, %c1_8, %c0_9], %2 {strides = array<i32>} : memref<2x18x18x64xf32, #tpu.memory_space<vmem>>, vector<2x16x16x64xf32>,
    %cst_10 = arith.constant 0.000000e+00 : f32
    %4 = vector.broadcast %cst_10 : f32 to vector<512x12xf32>
    %c0_11 = arith.constant 0 : index
    %c0_12 = arith.constant 0 : index
    %c0_13 = arith.constant 0 : index
    %c0_14 = arith.constant 0 : index
    %5 = vector.load %arg4[%c0_11, %c0_12, %c0_13, %c0_14] : memref<2x18x18x64xf32, #tpu.memory_space<vmem>>, vector<2x16x16x64xf32>
    %6 = vector.shape_cast %5 : vector<2x16x16x64xf32> to vector<512x64xf32>
    %c0_15 = arith.constant 0 : index
    %c0_16 = arith.constant 0 : index
    %c0_17 = arith.constant 0 : index
    %7 = vector.load %arg1[%c0_15, %c0_16, %c0_17] : memref<9x64x12xf32, #tpu.memory_space<vmem>>, vector<1x64x12xf32>
    %8 = vector.shape_cast %7 : vector<1x64x12xf32> to vector<64x12xf32>
    %cst_18 = arith.constant dense<0.000000e+00> : vector<512x12xf32>
    %9 = tpu.matmul %6, %8, %cst_18 {dimension_numbers = #tpu.dot_dimension_numbers<[1], [0], [0], [1], [0, 0, 1, 1], [], []>} : vector<512x64xf32>, vector<64x12xf32>, vector<512x12xf32> -> vector<512x12xf32>
    %10 = arith.addf %4, %9 : vector<512x12xf32>
    %c0_19 = arith.constant 0 : index
    %c0_20 = arith.constant 0 : index
    %c1_21 = arith.constant 1 : index
    %c0_22 = arith.constant 0 : index
    %11 = vector.load %arg4[%c0_19, %c0_20, %c1_21, %c0_22] : memref<2x18x18x64xf32, #tpu.memory_space<vmem>>, vector<2x16x16x64xf32>
    %12 = vector.shape_cast %11 : vector<2x16x16x64xf32> to vector<512x64xf32>
    %c1_23 = arith.constant 1 : index
    %c0_24 = arith.constant 0 : index
    %c0_25 = arith.constant 0 : index
    %13 = vector.load %arg1[%c1_23, %c0_24, %c0_25] : memref<9x64x12xf32, #tpu.memory_space<vmem>>, vector<1x64x12xf32>
    %14 = vector.shape_cast %13 : vector<1x64x12xf32> to vector<64x12xf32>
    %cst_26 = arith.constant dense<0.000000e+00> : vector<512x12xf32>
    %15 = tpu.matmul %12, %14, %cst_26 {dimension_numbers = #tpu.dot_dimension_numbers<[1], [0], [0], [1], [0, 0, 1, 1], [], []>} : vector<512x64xf32>, vector<64x12xf32>, vector<512x12xf32> -> vector<512x12xf32>
    %16 = arith.addf %10, %15 : vector<512x12xf32>
    %c0_27 = arith.constant 0 : index
    %c0_28 = arith.constant 0 : index
    %c2 = arith.constant 2 : index
    %c0_29 = arith.constant 0 : index
    %17 = vector.load %arg4[%c0_27, %c0_28, %c2, %c0_29] : memref<2x18x18x64xf32, #tpu.memory_space<vmem>>, vector<2x16x16x64xf32>
    %18 = vector.shape_cast %17 : vector<2x16x16x64xf32> to vector<512x64xf32>
    %c2_30 = arith.constant 2 : index
    %c0_31 = arith.constant 0 : index
    %c0_32 = arith.constant 0 : index
    %19 = vector.load %arg1[%c2_30, %c0_31, %c0_32] : memref<9x64x12xf32, #tpu.memory_space<vmem>>, vector<1x64x12xf32>
    %20 = vector.shape_cast %19 : vector<1x64x12xf32> to vector<64x12xf32>
    %cst_33 = arith.constant dense<0.000000e+00> : vector<512x12xf32>
    %21 = tpu.matmul %18, %20, %cst_33 {dimension_numbers = #tpu.dot_dimension_numbers<[1], [0], [0], [1], [0, 0, 1, 1], [], []>} : vector<512x64xf32>, vector<64x12xf32>, vector<512x12xf32> -> vector<512x12xf32>
    %22 = arith.addf %16, %21 : vector<512x12xf32>
    %c0_34 = arith.constant 0 : index
    %c1_35 = arith.constant 1 : index
    %c0_36 = arith.constant 0 : index
    %c0_37 = arith.constant 0 : index
    %23 = vector.load %arg4[%c0_34, %c1_35, %c0_36, %c0_37] : memref<2x18x18x64xf32, #tpu.memory_space<vmem>>, vector<2x16x16x64xf32>
    %24 = vector.shape_cast %23 : vector<2x16x16x64xf32> to vector<512x64xf32>
    %c3 = arith.constant 3 : index
    %c0_38 = arith.constant 0 : index
    %c0_39 = arith.constant 0 : index
    %25 = vector.load %arg1[%c3, %c0_38, %c0_39] : memref<9x64x12xf32, #tpu.memory_space<vmem>>, vector<1x64x12xf32>
    %26 = vector.shape_cast %25 : vector<1x64x12xf32> to vector<64x12xf32>
    %cst_40 = arith.constant dense<0.000000e+00> : vector<512x12xf32>
    %27 = tpu.matmul %24, %26, %cst_40 {dimension_numbers = #tpu.dot_dimension_numbers<[1], [0], [0], [1], [0, 0, 1, 1], [], []>} : vector<512x64xf32>, vector<64x12xf32>, vector<512x12xf32> -> vector<512x12xf32>
    %28 = arith.addf %22, %27 : vector<512x12xf32>
    %c0_41 = arith.constant 0 : index
    %c1_42 = arith.constant 1 : index
    %c1_43 = arith.constant 1 : index
    %c0_44 = arith.constant 0 : index
    %29 = vector.load %arg4[%c0_41, %c1_42, %c1_43, %c0_44] : memref<2x18x18x64xf32, #tpu.memory_space<vmem>>, vector<2x16x16x64xf32>
    %30 = vector.shape_cast %29 : vector<2x16x16x64xf32> to vector<512x64xf32>
    %c4 = arith.constant 4 : index
    %c0_45 = arith.constant 0 : index
    %c0_46 = arith.constant 0 : index
    %31 = vector.load %arg1[%c4, %c0_45, %c0_46] : memref<9x64x12xf32, #tpu.memory_space<vmem>>, vector<1x64x12xf32>
    %32 = vector.shape_cast %31 : vector<1x64x12xf32> to vector<64x12xf32>
    %cst_47 = arith.constant dense<0.000000e+00> : vector<512x12xf32>
    %33 = tpu.matmul %30, %32, %cst_47 {dimension_numbers = #tpu.dot_dimension_numbers<[1], [0], [0], [1], [0, 0, 1, 1], [], []>} : vector<512x64xf32>, vector<64x12xf32>, vector<512x12xf32> -> vector<512x12xf32>
    %34 = arith.addf %28, %33 : vector<512x12xf32>
    %c0_48 = arith.constant 0 : index
    %c1_49 = arith.constant 1 : index
    %c2_50 = arith.constant 2 : index
    %c0_51 = arith.constant 0 : index
    %35 = vector.load %arg4[%c0_48, %c1_49, %c2_50, %c0_51] : memref<2x18x18x64xf32, #tpu.memory_space<vmem>>, vector<2x16x16x64xf32>
    %36 = vector.shape_cast %35 : vector<2x16x16x64xf32> to vector<512x64xf32>
    %c5 = arith.constant 5 : index
    %c0_52 = arith.constant 0 : index
    %c0_53 = arith.constant 0 : index
    %37 = vector.load %arg1[%c5, %c0_52, %c0_53] : memref<9x64x12xf32, #tpu.memory_space<vmem>>, vector<1x64x12xf32>
    %38 = vector.shape_cast %37 : vector<1x64x12xf32> to vector<64x12xf32>
    %cst_54 = arith.constant dense<0.000000e+00> : vector<512x12xf32>
    %39 = tpu.matmul %36, %38, %cst_54 {dimension_numbers = #tpu.dot_dimension_numbers<[1], [0], [0], [1], [0, 0, 1, 1], [], []>} : vector<512x64xf32>, vector<64x12xf32>, vector<512x12xf32> -> vector<512x12xf32>
    %40 = arith.addf %34, %39 : vector<512x12xf32>
    %c0_55 = arith.constant 0 : index
    %c2_56 = arith.constant 2 : index
    %c0_57 = arith.constant 0 : index
    %c0_58 = arith.constant 0 : index
    %41 = vector.load %arg4[%c0_55, %c2_56, %c0_57, %c0_58] : memref<2x18x18x64xf32, #tpu.memory_space<vmem>>, vector<2x16x16x64xf32>
    %42 = vector.shape_cast %41 : vector<2x16x16x64xf32> to vector<512x64xf32>
    %c6 = arith.constant 6 : index
    %c0_59 = arith.constant 0 : index
    %c0_60 = arith.constant 0 : index
    %43 = vector.load %arg1[%c6, %c0_59, %c0_60] : memref<9x64x12xf32, #tpu.memory_space<vmem>>, vector<1x64x12xf32>
    %44 = vector.shape_cast %43 : vector<1x64x12xf32> to vector<64x12xf32>
    %cst_61 = arith.constant dense<0.000000e+00> : vector<512x12xf32>
    %45 = tpu.matmul %42, %44, %cst_61 {dimension_numbers = #tpu.dot_dimension_numbers<[1], [0], [0], [1], [0, 0, 1, 1], [], []>} : vector<512x64xf32>, vector<64x12xf32>, vector<512x12xf32> -> vector<512x12xf32>
    %46 = arith.addf %40, %45 : vector<512x12xf32>
    %c0_62 = arith.constant 0 : index
    %c2_63 = arith.constant 2 : index
    %c1_64 = arith.constant 1 : index
    %c0_65 = arith.constant 0 : index
    %47 = vector.load %arg4[%c0_62, %c2_63, %c1_64, %c0_65] : memref<2x18x18x64xf32, #tpu.memory_space<vmem>>, vector<2x16x16x64xf32>
    %48 = vector.shape_cast %47 : vector<2x16x16x64xf32> to vector<512x64xf32>
    %c7 = arith.constant 7 : index
    %c0_66 = arith.constant 0 : index
    %c0_67 = arith.constant 0 : index
    %49 = vector.load %arg1[%c7, %c0_66, %c0_67] : memref<9x64x12xf32, #tpu.memory_space<vmem>>, vector<1x64x12xf32>
    %50 = vector.shape_cast %49 : vector<1x64x12xf32> to vector<64x12xf32>
    %cst_68 = arith.constant dense<0.000000e+00> : vector<512x12xf32>
    %51 = tpu.matmul %48, %50, %cst_68 {dimension_numbers = #tpu.dot_dimension_numbers<[1], [0], [0], [1], [0, 0, 1, 1], [], []>} : vector<512x64xf32>, vector<64x12xf32>, vector<512x12xf32> -> vector<512x12xf32>
    %52 = arith.addf %46, %51 : vector<512x12xf32>
    %c0_69 = arith.constant 0 : index
    %c2_70 = arith.constant 2 : index
    %c2_71 = arith.constant 2 : index
    %c0_72 = arith.constant 0 : index
    %53 = vector.load %arg4[%c0_69, %c2_70, %c2_71, %c0_72] : memref<2x18x18x64xf32, #tpu.memory_space<vmem>>, vector<2x16x16x64xf32>
    %54 = vector.shape_cast %53 : vector<2x16x16x64xf32> to vector<512x64xf32>
    %c8 = arith.constant 8 : index
    %c0_73 = arith.constant 0 : index
    %c0_74 = arith.constant 0 : index
    %55 = vector.load %arg1[%c8, %c0_73, %c0_74] : memref<9x64x12xf32, #tpu.memory_space<vmem>>, vector<1x64x12xf32>
    %56 = vector.shape_cast %55 : vector<1x64x12xf32> to vector<64x12xf32>
    %cst_75 = arith.constant dense<0.000000e+00> : vector<512x12xf32>
    %57 = tpu.matmul %54, %56, %cst_75 {dimension_numbers = #tpu.dot_dimension_numbers<[1], [0], [0], [1], [0, 0, 1, 1], [], []>} : vector<512x64xf32>, vector<64x12xf32>, vector<512x12xf32> -> vector<512x12xf32>
    %58 = arith.addf %52, %57 : vector<512x12xf32>
    %c0_76 = arith.constant 0 : index
    %c0_77 = arith.constant 0 : index
    %59 = vector.load %arg2[%c0_76, %c0_77] : memref<1x12xf32, #tpu.memory_space<vmem>>, vector<1x12xf32>
    %60 = vector.broadcast %59 : vector<1x12xf32> to vector<512x12xf32>
    %61 = arith.addf %58, %60 : vector<512x12xf32>
    %62 = math.tanh %61 : vector<512x12xf32>
    %63 = vector.shape_cast %62 : vector<512x12xf32> to vector<2x16x16x12xf32>
    %c0_78 = arith.constant 0 : index
    %c0_79 = arith.constant 0 : index
    %c0_80 = arith.constant 0 : index
    %c0_81 = arith.constant 0 : index
    %64 = vector.load %arg3[%c0_78, %c0_79, %c0_80, %c0_81] : memref<2x16x16x12xf32, #tpu.memory_space<vmem>>, vector<2x16x16x12xf32>
    tpu.vector_store %arg3[%c0_78, %c0_79, %c0_80, %c0_81], %63 {strides = array<i32>} : memref<2x16x16x12xf32, #tpu.memory_space<vmem>>, vector<2x16x16x12xf32>,
    return
  }
}

module attributes {stable_mosaic.version = 11 : i64} {
  func.func @convt1_relu_bn_kernel(%arg0: memref<2x8x8x128xf32, #tpu.memory_space<vmem>>, %arg1: memref<1152x256xf32, #tpu.memory_space<vmem>>, %arg2: memref<1x256xf32, #tpu.memory_space<vmem>>, %arg3: memref<1x256xf32, #tpu.memory_space<vmem>>, %arg4: memref<1x256xf32, #tpu.memory_space<vmem>>, %arg5: memref<2x8x2x8x128xf32, #tpu.memory_space<vmem>>, %arg6: memref<2x10x10x128xf32, #tpu.memory_space<vmem>>) attributes {dimension_semantics = [], scalar_prefetch = 0 : i64, scratch_operands = 1 : i64, tpu.core_type = #tpu.core_type<tc>} {
    %cst = arith.constant 0.000000e+00 : f32
    %0 = vector.broadcast %cst : f32 to vector<2x10x10x128xf32>
    %c0 = arith.constant 0 : index
    %c0_0 = arith.constant 0 : index
    %c0_1 = arith.constant 0 : index
    %c0_2 = arith.constant 0 : index
    %1 = vector.load %arg6[%c0, %c0_0, %c0_1, %c0_2] : memref<2x10x10x128xf32, #tpu.memory_space<vmem>>, vector<2x10x10x128xf32>
    tpu.vector_store %arg6[%c0, %c0_0, %c0_1, %c0_2], %0 {strides = array<i32>} : memref<2x10x10x128xf32, #tpu.memory_space<vmem>>, vector<2x10x10x128xf32>,
    %c0_3 = arith.constant 0 : index
    %c0_4 = arith.constant 0 : index
    %c0_5 = arith.constant 0 : index
    %c0_6 = arith.constant 0 : index
    %2 = vector.load %arg0[%c0_3, %c0_4, %c0_5, %c0_6] : memref<2x8x8x128xf32, #tpu.memory_space<vmem>>, vector<2x8x8x128xf32>
    %c0_7 = arith.constant 0 : index
    %c1 = arith.constant 1 : index
    %c1_8 = arith.constant 1 : index
    %c0_9 = arith.constant 0 : index
    %3 = vector.load %arg6[%c0_7, %c1, %c1_8, %c0_9] : memref<2x10x10x128xf32, #tpu.memory_space<vmem>>, vector<2x8x8x128xf32>
    tpu.vector_store %arg6[%c0_7, %c1, %c1_8, %c0_9], %2 {strides = array<i32>} : memref<2x10x10x128xf32, #tpu.memory_space<vmem>>, vector<2x8x8x128xf32>,
    %c0_10 = arith.constant 0 : index
    %c0_11 = arith.constant 0 : index
    %c0_12 = arith.constant 0 : index
    %c0_13 = arith.constant 0 : index
    %4 = vector.load %arg6[%c0_10, %c0_11, %c0_12, %c0_13] : memref<2x10x10x128xf32, #tpu.memory_space<vmem>>, vector<2x8x8x128xf32>
    %c0_14 = arith.constant 0 : index
    %c0_15 = arith.constant 0 : index
    %c1_16 = arith.constant 1 : index
    %c0_17 = arith.constant 0 : index
    %5 = vector.load %arg6[%c0_14, %c0_15, %c1_16, %c0_17] : memref<2x10x10x128xf32, #tpu.memory_space<vmem>>, vector<2x8x8x128xf32>
    %c0_18 = arith.constant 0 : index
    %c0_19 = arith.constant 0 : index
    %c2 = arith.constant 2 : index
    %c0_20 = arith.constant 0 : index
    %6 = vector.load %arg6[%c0_18, %c0_19, %c2, %c0_20] : memref<2x10x10x128xf32, #tpu.memory_space<vmem>>, vector<2x8x8x128xf32>
    %c0_21 = arith.constant 0 : index
    %c1_22 = arith.constant 1 : index
    %c0_23 = arith.constant 0 : index
    %c0_24 = arith.constant 0 : index
    %7 = vector.load %arg6[%c0_21, %c1_22, %c0_23, %c0_24] : memref<2x10x10x128xf32, #tpu.memory_space<vmem>>, vector<2x8x8x128xf32>
    %c0_25 = arith.constant 0 : index
    %c1_26 = arith.constant 1 : index
    %c1_27 = arith.constant 1 : index
    %c0_28 = arith.constant 0 : index
    %8 = vector.load %arg6[%c0_25, %c1_26, %c1_27, %c0_28] : memref<2x10x10x128xf32, #tpu.memory_space<vmem>>, vector<2x8x8x128xf32>
    %c0_29 = arith.constant 0 : index
    %c1_30 = arith.constant 1 : index
    %c2_31 = arith.constant 2 : index
    %c0_32 = arith.constant 0 : index
    %9 = vector.load %arg6[%c0_29, %c1_30, %c2_31, %c0_32] : memref<2x10x10x128xf32, #tpu.memory_space<vmem>>, vector<2x8x8x128xf32>
    %c0_33 = arith.constant 0 : index
    %c2_34 = arith.constant 2 : index
    %c0_35 = arith.constant 0 : index
    %c0_36 = arith.constant 0 : index
    %10 = vector.load %arg6[%c0_33, %c2_34, %c0_35, %c0_36] : memref<2x10x10x128xf32, #tpu.memory_space<vmem>>, vector<2x8x8x128xf32>
    %c0_37 = arith.constant 0 : index
    %c2_38 = arith.constant 2 : index
    %c1_39 = arith.constant 1 : index
    %c0_40 = arith.constant 0 : index
    %11 = vector.load %arg6[%c0_37, %c2_38, %c1_39, %c0_40] : memref<2x10x10x128xf32, #tpu.memory_space<vmem>>, vector<2x8x8x128xf32>
    %c0_41 = arith.constant 0 : index
    %c2_42 = arith.constant 2 : index
    %c2_43 = arith.constant 2 : index
    %c0_44 = arith.constant 0 : index
    %12 = vector.load %arg6[%c0_41, %c2_42, %c2_43, %c0_44] : memref<2x10x10x128xf32, #tpu.memory_space<vmem>>, vector<2x8x8x128xf32>
    %13 = tpu.concatenate %4, %5, %6, %7, %8, %9, %10, %11, %12 in 3 : vector<2x8x8x128xf32>, vector<2x8x8x128xf32>, vector<2x8x8x128xf32>, vector<2x8x8x128xf32>, vector<2x8x8x128xf32>, vector<2x8x8x128xf32>, vector<2x8x8x128xf32>, vector<2x8x8x128xf32>, vector<2x8x8x128xf32> -> vector<2x8x8x1152xf32>
    %14 = vector.shape_cast %13 : vector<2x8x8x1152xf32> to vector<128x1152xf32>
    %c0_45 = arith.constant 0 : index
    %c0_46 = arith.constant 0 : index
    %15 = vector.load %arg1[%c0_45, %c0_46] : memref<1152x256xf32, #tpu.memory_space<vmem>>, vector<1152x256xf32>
    %cst_47 = arith.constant dense<0.000000e+00> : vector<128x256xf32>
    %16 = tpu.matmul %14, %15, %cst_47 {dimension_numbers = #tpu.dot_dimension_numbers<[1], [0], [0], [1], [0, 0, 1, 1], [], []>} : vector<128x1152xf32>, vector<1152x256xf32>, vector<128x256xf32> -> vector<128x256xf32>
    %c0_48 = arith.constant 0 : index
    %c0_49 = arith.constant 0 : index
    %17 = vector.load %arg2[%c0_48, %c0_49] : memref<1x256xf32, #tpu.memory_space<vmem>>, vector<1x256xf32>
    %18 = vector.broadcast %17 : vector<1x256xf32> to vector<128x256xf32>
    %19 = arith.addf %16, %18 : vector<128x256xf32>
    %cst_50 = arith.constant 0.000000e+00 : f32
    %20 = vector.broadcast %cst_50 : f32 to vector<128x256xf32>
    %21 = arith.maximumf %19, %20 : vector<128x256xf32>
    %cst_51 = arith.constant dense<0.000000e+00> : vector<256xf32>
    %22 = vector.multi_reduction <add>, %21, %cst_51 [0] : vector<128x256xf32> to vector<256xf32>
    %23 = vector.shape_cast %22 : vector<256xf32> to vector<1x256xf32>
    %24 = arith.mulf %21, %21 : vector<128x256xf32>
    %cst_52 = arith.constant dense<0.000000e+00> : vector<256xf32>
    %25 = vector.multi_reduction <add>, %24, %cst_52 [0] : vector<128x256xf32> to vector<256xf32>
    %26 = vector.shape_cast %25 : vector<256xf32> to vector<1x256xf32>
    %27 = tpu.iota {dimensions = array<i32: 0>} : vector<256x256xi32>
    %28 = tpu.iota {dimensions = array<i32: 1>} : vector<256x256xi32>
    %c63_i32 = arith.constant 63 : i32
    %29 = vector.broadcast %c63_i32 : i32 to vector<256x256xi32>
    %30 = arith.andi %27, %29 : vector<256x256xi32>
    %c63_i32_53 = arith.constant 63 : i32
    %31 = vector.broadcast %c63_i32_53 : i32 to vector<256x256xi32>
    %32 = arith.andi %28, %31 : vector<256x256xi32>
    %33 = arith.cmpi eq, %30, %32 : vector<256x256xi32>
    %cst_54 = arith.constant 1.000000e+00 : f32
    %cst_55 = arith.constant 0.000000e+00 : f32
    %34 = vector.broadcast %cst_54 : f32 to vector<256x256xf32>
    %35 = vector.broadcast %cst_55 : f32 to vector<256x256xf32>
    %36 = arith.select %33, %34, %35 : vector<256x256xi1>, vector<256x256xf32>
    %cst_56 = arith.constant dense<0.000000e+00> : vector<1x256xf32>
    %37 = tpu.matmul %23, %36, %cst_56 {dimension_numbers = #tpu.dot_dimension_numbers<[1], [0], [0], [1], [0, 0, 1, 1], [], []>} : vector<1x256xf32>, vector<256x256xf32>, vector<1x256xf32> -> vector<1x256xf32>
    %cst_57 = arith.constant 5.120000e+02 : f32
    %38 = vector.broadcast %cst_57 : f32 to vector<1x256xf32>
    %39 = arith.divf %37, %38 : vector<1x256xf32>
    %cst_58 = arith.constant dense<0.000000e+00> : vector<1x256xf32>
    %40 = tpu.matmul %26, %36, %cst_58 {dimension_numbers = #tpu.dot_dimension_numbers<[1], [0], [0], [1], [0, 0, 1, 1], [], []>} : vector<1x256xf32>, vector<256x256xf32>, vector<1x256xf32> -> vector<1x256xf32>
    %cst_59 = arith.constant 5.120000e+02 : f32
    %41 = vector.broadcast %cst_59 : f32 to vector<1x256xf32>
    %42 = arith.divf %40, %41 : vector<1x256xf32>
    %43 = arith.mulf %39, %39 : vector<1x256xf32>
    %44 = arith.subf %42, %43 : vector<1x256xf32>
    %c0_60 = arith.constant 0 : index
    %c0_61 = arith.constant 0 : index
    %45 = vector.load %arg3[%c0_60, %c0_61] : memref<1x256xf32, #tpu.memory_space<vmem>>, vector<1x256xf32>
    %cst_62 = arith.constant 9.99999974E-6 : f32
    %46 = vector.broadcast %cst_62 : f32 to vector<1x256xf32>
    %47 = arith.addf %44, %46 : vector<1x256xf32>
    %48 = math.rsqrt %47 : vector<1x256xf32>
    %49 = arith.mulf %45, %48 : vector<1x256xf32>
    %c0_63 = arith.constant 0 : index
    %c0_64 = arith.constant 0 : index
    %50 = vector.load %arg4[%c0_63, %c0_64] : memref<1x256xf32, #tpu.memory_space<vmem>>, vector<1x256xf32>
    %51 = arith.mulf %39, %49 : vector<1x256xf32>
    %52 = arith.subf %50, %51 : vector<1x256xf32>
    %53 = vector.broadcast %49 : vector<1x256xf32> to vector<128x256xf32>
    %54 = arith.mulf %21, %53 : vector<128x256xf32>
    %55 = vector.broadcast %52 : vector<1x256xf32> to vector<128x256xf32>
    %56 = arith.addf %54, %55 : vector<128x256xf32>
    %57 = vector.shape_cast %56 : vector<128x256xf32> to vector<2x8x8x256xf32>
    %58 = vector.extract_strided_slice %57 {offsets = [0, 0, 0, 0], sizes = [2, 8, 8, 128], strides = [1, 1, 1, 1]} : vector<2x8x8x256xf32> to vector<2x8x8x128xf32>
    %c0_65 = arith.constant 0 : index
    %c0_66 = arith.constant 0 : index
    %c0_67 = arith.constant 0 : index
    %c0_68 = arith.constant 0 : index
    %c0_69 = arith.constant 0 : index
    %59 = vector.load %arg5[%c0_65, %c0_66, %c0_67, %c0_68, %c0_69] : memref<2x8x2x8x128xf32, #tpu.memory_space<vmem>>, vector<2x8x1x8x128xf32>
    %60 = vector.shape_cast %59 : vector<2x8x1x8x128xf32> to vector<2x8x8x128xf32>
    %61 = vector.shape_cast %58 : vector<2x8x8x128xf32> to vector<2x8x1x8x128xf32>
    tpu.vector_store %arg5[%c0_65, %c0_66, %c0_67, %c0_68, %c0_69], %61 {strides = array<i32>} : memref<2x8x2x8x128xf32, #tpu.memory_space<vmem>>, vector<2x8x1x8x128xf32>,
    %62 = vector.extract_strided_slice %57 {offsets = [0, 0, 0, 128], sizes = [2, 8, 8, 128], strides = [1, 1, 1, 1]} : vector<2x8x8x256xf32> to vector<2x8x8x128xf32>
    %c0_70 = arith.constant 0 : index
    %c0_71 = arith.constant 0 : index
    %c1_72 = arith.constant 1 : index
    %c0_73 = arith.constant 0 : index
    %c0_74 = arith.constant 0 : index
    %63 = vector.load %arg5[%c0_70, %c0_71, %c1_72, %c0_73, %c0_74] : memref<2x8x2x8x128xf32, #tpu.memory_space<vmem>>, vector<2x8x1x8x128xf32>
    %64 = vector.shape_cast %63 : vector<2x8x1x8x128xf32> to vector<2x8x8x128xf32>
    %65 = vector.shape_cast %62 : vector<2x8x8x128xf32> to vector<2x8x1x8x128xf32>
    tpu.vector_store %arg5[%c0_70, %c0_71, %c1_72, %c0_73, %c0_74], %65 {strides = array<i32>} : memref<2x8x2x8x128xf32, #tpu.memory_space<vmem>>, vector<2x8x1x8x128xf32>,
    return
  }
}

</mosaic_0001>

<bundles_post_ra>
// kernel: generator_forward.3
= control target key start
LH: loop header
LB: loop body
LE: loop exit
PB: predicated region body
PF: predicated region fallthrough
CT: control target
= control target key end

     0   :  { %s3168_s0 = inlined_call_operand.hbm [shape: f32[2,32], index: 0, kind: input, shape index: {}]   ;;  %s3169_s1 = inlined_call_operand.hbm [shape: f32[32,8192], index: 1, kind: input, shape index: {}]   ;;  %s3170_s2 = inlined_call_operand.hbm [shape: f32[1,8192], index: 2, kind: input, shape index: {}]   ;;  %s3171_s3 = inlined_call_operand.hbm [shape: f32[1,8192], index: 3, kind: input, shape index: {}]   ;;  %s3172_s4 = inlined_call_operand.hbm [shape: f32[1,8192], index: 4, kind: input, shape index: {}]   ;;  %s3173_s5 = inlined_call_operand.vmem [shape: f32[2,8192], index: 5, kind: output, shape index: {}]  }
   0x1   :  { %3182 = sst [smem:[#allocation13_spill]] %s3169_s1 }
   0x2   :  { %3183 = sst [smem:[#allocation14_spill]] %s3170_s2 }
   0x3   :  { %10 = vsyncpa [#allocation3], 0 }
   0x4   :  { %11 = vsyncpa [#allocation5], 0 }
   0x5   :  { %13 = vsyncpa [#allocation5 + $0x1], 0 }
   0x6   :  { %14 = vsyncpa [#allocation8], 0 }
   0x7   :  { %16 = vsyncpa [#allocation8 + $0x1], 0  ;;  %s2349_s18 = smov 0   ;;  %s2351_s19 = smov 0  }
   0x8   :  { %s2353_s20 = smov 0   ;;  %s2355_s21 = smov 0  }
   0x9 LB: > { %s2370_s22 = sadd.s32 1, %s2307_s21   ;;  %s50_s23 = sadd.s32 1, %s2303_s20  ;;  %s2307_s21 = sphi %s2355_s21, %s3220_s21   ;;  %s2303_s20 = sphi %s2353_s20, %s3219_s20   ;;  %s2299_s19 = sphi %s2351_s19, %s3218_s19   ;;  %s2295_s18 = sphi %s2349_s18, %s3217_s18  }
   0xa   : > { %s47_s24 = ssub.s32 %s2307_s21, %s2370_s22  ;;  %p57_p0 = scmp.ne.s32.totalorder %s2303_s20, %s2299_s19 }
   0xb   : > { %p48_p1 = scmp.eq.s32.totalorder %s47_s24, 0  ;;  %p58_p2 = scmp.eq.s32.totalorder %s2307_s21, 0 }
   0xc   : > { %p2045_p3 = scmp.lt.s32.totalorder %s2307_s21, 4  ;;  %s202_s26 = sand.u32 1, %s2307_s21  }
   0xd   : > { %s2380_s25 = scalar_select %p48_p1, %s2303_s20, %s50_s23  }
   0xe   : > { %p59_p4 = por %p58_p2, %p57_p0  ;;  %s204_s27 = sand.u32 1, %s2303_s20  }
   0xf   : > { %s1917_s28 = sshll.u32 %s204_s27, 9  ;;  %s1947_s29 = sshll.u32 %s2307_s21, 11 }
  0x10   : > { %s3184_s1 = sld [smem:[#allocation13_spill]]  ;;  %s206_s8 = scalar_lea.vmem [#allocation4], %s1917_s28 }
  0x11   : > { %s213_s9 = sshll.u32 %s206_s8, 4  ;;  %p2390_p5 = pnand %p2045_p3, %p59_p4  ;;  %s2394_s9 = int_to_ptr.vmem [resolvable:$true] %s213_s9 }
  0x12   : > { %s2396_s11 = sshll.u32 %s204_s27, 4  ;;  %s2400_s12 = scalar_lea.sflag [#allocation5], %s202_s26 }
  0x13   : > { %s3185_s10 = scalar_select %p2390_p5, 1, 0 }
  0x14   : > { %p2406_p7 = pneg %p2390_p5 }
  0x16   : > { %s2388_s7 = scalar_lea.hbm %s3184_s1, %s1947_s29  ;;  %s2122_s17 = scalar_lea.hbm %s3184_s1, 32768 }
  0x17   : > { %s2117_s13 = scalar_lea.hbm %s2388_s7, 8192  ;;  %p2123_p10 = scmp.lt.u32.totalorder %s2388_s7, %s3184_s1 }
  0x18   : > { %p2118_p6 = scmp.ne.s32.totalorder %s2388_s7, %s2117_s13  ;;  %p2124_p11 = scmp.lt.u32.totalorder %s2122_s17, %s2117_s13 }
  0x19   : > { %s3186_s14 = scalar_select %p2406_p7, 1, 0 }
  0x1a   : > { %p2120_p8 = pnand %p2406_p7, %p2118_p6  ;;  %p2125_p12 = por %p2124_p11, %p2123_p10 }
  0x1b   : > { %p2126_p13 = scmp.lt.u32.totalorder %s2117_s13, %s2388_s7 }
  0x1c   : > { %p2121_p9 = pneg %p2120_p8 }
  0x1d   : > { %p2127_p0 = por %p2126_p13, %p2125_p12 }
  0x1f   : > { %p2128_p1 = pnand %p2127_p0, %p2121_p9 }
  0x21   : > { %2131 = shalt.err (!%p2128_p1)
}
  0x22   : > { %s2132_s27 = scalar_lea.vmem %s2394_s9, 8192  ;;  %s2309_s28 = smov [#allocation4]  }
  0x23   : > { %p2133_p2 = scmp.ne.s32.totalorder %s2394_s9, %s2132_s27  ;;  %s2137_s29 = sshll.u32 %s2309_s28, 4  ;;  %s2138_s29 = int_to_ptr.vmem [resolvable:$false] %s2137_s29 }
  0x24   : > { %s2139_s30 = scalar_lea.vmem %s2138_s29, 16384  ;;  %p2140_p6 = scmp.lt.s32.totalorder %s2394_s9, %s2138_s29 }
  0x25   : > { %p2135_p3 = pnand %p2133_p2, %p2406_p7  ;;  %p2141_p8 = scmp.lt.s32.totalorder %s2139_s30, %s2132_s27 }
  0x27   : > { %p2136_p4 = pneg %p2135_p3  ;;  %p2142_p10 = por %p2141_p8, %p2140_p6 }
  0x29   : > { %p2143_p11 = pnand %p2142_p10, %p2136_p4 }
  0x2b   : > { %2146 = shalt.err (!%p2143_p11)
}
  0x2c   : > { %s2310_s6 = smov 8192   ;;  %s2311_s8 = smov 2048  }
  0x2d   : > { %s2312_s13 = smov 128   ;;  %s2431_s15 = sshll.u32 %s2307_s21, 8 }
  0x2e   : > { %2034 = dma.hbm_to_vmem [thread:$0]  (!%p2390_p5), %s2388_s7, 8192, %s2394_s9, %s2400_s12, %s2310_s6, %s2311_s8, %s2312_s13  }
  0x2f   : > { %s2437_s23 = scalar_lea.hbm %s3171_s3, %s2431_s15  ;;  %s246_s24 = scalar_lea.vmem [#allocation7], %s2396_s11 }
  0x30   : > { %s254_s27 = sshll.u32 %s246_s24, 4  ;;  %s2442_s28 = scalar_lea.sflag [#allocation8], %s202_s26  ;;  %s255_s27 = int_to_ptr.vmem [resolvable:$true] %s254_s27 }
  0x31   : > { %s2147_s29 = scalar_lea.hbm %s2437_s23, 256  ;;  %s2152_s30 = scalar_lea.hbm %s3171_s3, 1024 }
  0x32   : > { %p2148_p9 = scmp.ne.s32.totalorder %s2437_s23, %s2147_s29  ;;  %p2153_p0 = scmp.lt.u32.totalorder %s2437_s23, %s3171_s3 }
  0x33   : > { %p2154_p1 = scmp.lt.u32.totalorder %s2152_s30, %s2147_s29  ;;  %p2156_p3 = scmp.lt.u32.totalorder %s2147_s29, %s2437_s23 }
  0x34   : > { %p2150_p12 = pnand %p2148_p9, %p2406_p7 }
  0x35   : > { %p2155_p2 = por %p2154_p1, %p2153_p0 }
  0x36   : > { %p2151_p13 = pneg %p2150_p12 }
  0x37   : > { %p2157_p4 = por %p2156_p3, %p2155_p2 }
  0x39   : > { %p2158_p6 = pnand %p2157_p4, %p2151_p13 }
  0x3b   : > { %2161 = shalt.err (!%p2158_p6)
}
  0x3c   : > { %s2162_s26 = scalar_lea.vmem %s255_s27, 256  ;;  %s2313_s13 = smov [#allocation7]  }
  0x3d   : > { %p2163_p8 = scmp.ne.s32.totalorder %s255_s27, %s2162_s26  ;;  %s2167_s16 = sshll.u32 %s2313_s13, 4  ;;  %s2168_s16 = int_to_ptr.vmem [resolvable:$false] %s2167_s16 }
  0x3e   : > { %s2169_s17 = scalar_lea.vmem %s2168_s16, 512  ;;  %p2170_p9 = scmp.lt.s32.totalorder %s255_s27, %s2168_s16 }
  0x3f   : > { %p2165_p10 = pnand %p2163_p8, %p2406_p7  ;;  %p2171_p12 = scmp.lt.s32.totalorder %s2169_s17, %s2162_s26 }
  0x41   : > { %p2166_p11 = pneg %p2165_p10  ;;  %p2172_p5 = por %p2171_p12, %p2170_p9 }
  0x43   : > { %p2173_p0 = pnand %p2172_p5, %p2166_p11 }
  0x45   : > { %2176 = shalt.err (!%p2173_p0)
}
  0x46   : > { %p3187_p1 = scmp.ne.s32.totalorder %s3185_s10, 0  ;;  %s2463_s24 = sadd.s32 4294967295, %s2307_s21  }
  0x47   : > { %p63_p13 = scmp.ne.s32.totalorder %s2299_s19, %s2295_s18  ;;  %p3176_p5 = scmp.eq.s32.totalorder %s2463_s24, 0 }
  0x48   : > { %2040 = dma.hbm_to_vmem [thread:$0]  (!%p3187_p1), %s2437_s23, 256, %s255_s27, %s2442_s28  }
  0x49   : > { %p1914_p2 = scmp.ge.s32.totalorder %s2307_s21, 1  ;;  %p178_p3 = scmp.lt.s32.totalorder %s2307_s21, 5 }
  0x4a   : > { %p2472_p4 = por %p3176_p5, %p63_p13  ;;  %s2314_s23 = smov [#allocation2]  }
  0x4b   : > { %p2476_p6 = pnand %p1914_p2, %p178_p3  ;;  %s191_s27 = sshll.u32 %s2314_s23, 4  ;;  %s2480_s27 = int_to_ptr.vmem [resolvable:$true] %s191_s27 }
  0x4c   : > { %s3188_s29 = scalar_select %p2472_p4, 1, 0 }
  0x4d   : > { %s3189_s7 = scalar_select %p2476_p6, 1, 0 }
  0x4e   : > { %p2027_p8 = pneg %p2476_p6  ;;  %s3190_s2 = sld [smem:[#allocation14_spill]] }
  0x4f   : > { %s227_s30 = scalar_lea.vmem [#allocation6], %s2396_s11 }
  0x50   : > { %s235_s6 = sshll.u32 %s227_s30, 4  ;;  %p2493_p10 = pnand %p2027_p8, %p3176_p5  ;;  %s236_s6 = int_to_ptr.vmem [resolvable:$true] %s235_s6 }
  0x52   : > { %s3191_s8 = scalar_select %p2493_p10, 1, 0 }
  0x54   : > { %s2488_s21 = scalar_lea.hbm %s3190_s2, %s2431_s15  ;;  %s2182_s17 = scalar_lea.hbm %s3190_s2, 1024 }
  0x55   : > { %s2177_s26 = scalar_lea.hbm %s2488_s21, 256  ;;  %p2183_p0 = scmp.lt.u32.totalorder %s2488_s21, %s3190_s2 }
  0x56   : > { %p2178_p11 = scmp.ne.s32.totalorder %s2488_s21, %s2177_s26  ;;  %p2184_p13 = scmp.lt.u32.totalorder %s2182_s17, %s2177_s26 }
  0x57   : > { %p2186_p3 = scmp.lt.u32.totalorder %s2177_s26, %s2488_s21 }
  0x58   : > { %p2180_p9 = pnand %p2178_p11, %p2406_p7  ;;  %p2185_p2 = por %p2184_p13, %p2183_p0 }
  0x5a   : > { %p2181_p12 = pneg %p2180_p9  ;;  %p2187_p8 = por %p2186_p3, %p2185_p2 }
  0x5c   : > { %p2188_p5 = pnand %p2187_p8, %p2181_p12 }
  0x5e   : > { %2191 = shalt.err (!%p2188_p5)
}
  0x5f   : > { %s2192_s9 = scalar_lea.vmem %s236_s6, 256  ;;  %s2315_s30 = smov [#allocation6]  }
  0x60   : > { %p2193_p4 = scmp.ne.s32.totalorder %s236_s6, %s2192_s9  ;;  %s2197_s1 = sshll.u32 %s2315_s30, 4  ;;  %s2198_s1 = int_to_ptr.vmem [resolvable:$false] %s2197_s1 }
  0x61   : > { %s2199_s13 = scalar_lea.vmem %s2198_s1, 512  ;;  %p2200_p6 = scmp.lt.s32.totalorder %s236_s6, %s2198_s1 }
  0x62   : > { %p2195_p11 = pnand %p2193_p4, %p2406_p7  ;;  %p2201_p10 = scmp.lt.s32.totalorder %s2199_s13, %s2192_s9 }
  0x64   : > { %p2196_p9 = pneg %p2195_p11  ;;  %p2202_p1 = por %p2201_p10, %p2200_p6 }
  0x66   : > { %p2203_p0 = pnand %p2202_p1, %p2196_p9 }
  0x68   : > { %2206 = shalt.err (!%p2203_p0)
}
  0x69   : > { %p3192_p13 = scmp.ne.s32.totalorder %s3185_s10, 0  ;;  %s2519_s17 = scalar_lea.hbm %s3172_s4, %s2431_s15 }
  0x6a   : > { %s2207_s1 = scalar_lea.hbm %s3168_s0, 32  ;;  %p3193_p5 = scmp.ne.s32.totalorder %s3191_s8, 0 }
  0x6b   : > { %2037 = dma.hbm_to_vmem [thread:$0]  (!%p3192_p13), %s2488_s21, 256, %s236_s6, %s2400_s12  }
  0x6c   : > { %p2208_p1 = scmp.ne.s32.totalorder %s3168_s0, %s2207_s1  ;;  %p2209_p4 = pneg %p3193_p5 }
  0x6d   : > { %p2214_p12 = scmp.lt.u32.totalorder %s2207_s1, %s3168_s0 }
  0x6e   : > { %p2210_p6 = pnand %p2209_p4, %p2208_p1 }
  0x70   : > { %p2211_p10 = pneg %p2210_p6 }
  0x72   : > { %p2216_p2 = pnand %p2214_p12, %p2211_p10 }
  0x74   : > { %2219 = shalt.err (!%p2216_p2)
}
  0x75   : > { %s2220_s12 = scalar_lea.vmem %s2480_s27, 32  ;;  %p2228_p9 = scmp.lt.s32.totalorder %s2480_s27, %s2480_s27 }
  0x76   : > { %p2221_p3 = scmp.ne.s32.totalorder %s2480_s27, %s2220_s12  ;;  %p2229_p0 = scmp.lt.s32.totalorder %s2220_s12, %s2220_s12 }
  0x78   : > { %p2223_p8 = pnand %p2221_p3, %p2209_p4  ;;  %p2230_p13 = por %p2229_p0, %p2228_p9 }
  0x7a   : > { %p2224_p11 = pneg %p2223_p8 }
  0x7c   : > { %p2231_p7 = pnand %p2230_p13, %p2224_p11 }
  0x7e   : > { %2234 = shalt.err (!%p2231_p7)
}
  0x7f   : > { %2030 = dma.hbm_to_vmem [thread:$0]  (!%p3193_p5), %s3168_s0, 32, %s2480_s27, [#allocation3]  }
  0x80   : > { %s265_s21 = scalar_lea.vmem [#allocation9], %s2396_s11  ;;  %s2235_s26 = scalar_lea.hbm %s2519_s17, 256 }
  0x81   : > { %s273_s6 = sshll.u32 %s265_s21, 4  ;;  %p2236_p1 = scmp.ne.s32.totalorder %s2519_s17, %s2235_s26  ;;  %s274_s6 = int_to_ptr.vmem [resolvable:$true] %s273_s6 }
  0x82   : > { %p3194_p13 = scmp.ne.s32.totalorder %s3186_s14, 0  ;;  %s2240_s23 = scalar_lea.hbm %s3172_s4, 1024 }
  0x83   : > { %p2241_p6 = scmp.lt.u32.totalorder %s2519_s17, %s3172_s4  ;;  %p2242_p10 = scmp.lt.u32.totalorder %s2240_s23, %s2235_s26 }
  0x84   : > { %p2238_p7 = pnand %p2236_p1, %p3194_p13  ;;  %p2244_p2 = scmp.lt.u32.totalorder %s2235_s26, %s2519_s17 }
  0x85   : > { %p2243_p12 = por %p2242_p10, %p2241_p6 }
  0x86   : > { %p2239_p4 = pneg %p2238_p7 }
  0x87   : > { %p2245_p5 = por %p2244_p2, %p2243_p12 }
  0x89   : > { %p2246_p3 = pnand %p2245_p5, %p2239_p4 }
  0x8b   : > { %2249 = shalt.err (!%p2246_p3)
}
  0x8c   : > { %s2250_s11 = scalar_lea.vmem %s274_s6, 256  ;;  %s2316_s27 = smov [#allocation9]  }
  0x8d   : > { %p2251_p8 = scmp.ne.s32.totalorder %s274_s6, %s2250_s11  ;;  %s2255_s9 = sshll.u32 %s2316_s27, 4  ;;  %s2256_s9 = int_to_ptr.vmem [resolvable:$false] %s2255_s9 }
  0x8e   : > { %s2257_s30 = scalar_lea.vmem %s2256_s9, 512  ;;  %p2258_p0 = scmp.lt.s32.totalorder %s274_s6, %s2256_s9 }
  0x8f   : > { %p2253_p11 = pnand %p2251_p8, %p3194_p13  ;;  %p2259_p1 = scmp.lt.s32.totalorder %s2257_s30, %s2250_s11 }
  0x91   : > { %p2254_p9 = pneg %p2253_p11  ;;  %p2260_p7 = por %p2259_p1, %p2258_p0 }
  0x93   : > { %p2261_p6 = pnand %p2260_p7, %p2254_p9 }
  0x95   : > { %2264 = shalt.err (!%p2261_p6)
}
  0x96   : > { %p3195_p10 = scmp.ne.s32.totalorder %s3185_s10, 0  ;;  %p3196_p4 = scmp.ne.s32.totalorder %s3189_s7, 0 }
  0x97   : > { %p3197_p13 = scmp.eq.s32.totalorder (!%p3196_p4), %s2463_s24, 0 }
  0x98   : > { %2043 = dma.hbm_to_vmem [thread:$0]  (!%p3195_p10), %s2519_s17, 256, %s274_s6, %s2442_s28  }
  0x99   : > { %282 = sbr.rel (%p3196_p4) target bundleno = 540 (0x21c), region = 40 }
  0xa0   : > { %2282 = dma.done.wait (%p3197_p13), [#allocation3], 32   ;;  %p3198_p12 = pmov %p3197_p13 }
  0xa1   : > { %s288_s14 = sand.u32 1, %s2463_s24   ;;  %s290_s13 = sand.u32 1, %s2299_s19  }
  0xa2   : > { %2284 = vsyncadd (%p3198_p12), [#allocation3], 4294967264  ;;  %s1931_s12 = sshll.u32 %s290_s13, 9  ;;  %s289_s2 = scalar_lea.sflag [#allocation5], %s288_s14 }
  0xa3   : > { %s2569_s10 = scalar_lea.vmem [#allocation4], %s1931_s12  ;;  %p3199_p2 = scmp.ne.s32.totalorder %s3188_s29, 0 }
  0xa5   : > { %2286 = dma.done.wait (%p3199_p2), %s289_s2, 8448  }
  0xa6   : > { %2288 = vsyncadd (%p3199_p2), %s289_s2, 4294958848  ;;  %s2575_s28 = sshll.u32 %s290_s13, 4  ;;  %s307_s17 = scalar_lea.sflag [#allocation8], %s288_s14 }
  0xa7   : > { %s301_s7 = scalar_lea.vmem [#allocation6], %s2575_s28  ;;  %s310_s15 = scalar_lea.vmem [#allocation7], %s2575_s28 }
  0xa8   : > { %2290 = dma.done.wait (%p3199_p2), %s307_s17, 512  }
  0xa9   : > { %2292 = vsyncadd (%p3199_p2), %s307_s17, 4294966784  ;;  %v2317_v0 = vmov 0.0   ;;  %v373_v1 = vld [vmem:[%s2569_s10 + $0x8] sm:$0xff]  ;;  %v375_v3 = vld [vmem:[%s2569_s10 + $0x18] sm:$0xff]  ;;  %vm520_vm0 = vcmask 261120   ;;  %s319_s29 = scalar_lea.vmem [#allocation9], %s2575_s28 }
  0xaa   : > { %588 = vmatprep.mubr.f32.mxu0 %v2317_v0  ;;  %659 = vmatprep.mubr.f32.mxu1 %v2317_v0  ;;  %v389_v2 = vld [vmem:[%s2569_s10 + $0x88] sm:$0xff]  ;;  %v391_v5 = vld [vmem:[%s2569_s10 + $0x98] sm:$0xff]  ;;  %v372_v6 = vld [vmem:[%s2569_s10] sm:$0xff]  ;;  %vm1108_vm1 = vcmask 1041408   ;;  %s1935_s21 = sshll.u32 %s2463_s24, 4 }
  0xab   : > { %v1951_v4 = vpack.c.bf16 %v389_v2, %v373_v1  ;;  %v388_v7 = vld [vmem:[%s2569_s10 + $0x80] sm:$0xff]  ;;  %v1959_v8 = vpack.c.bf16 %v391_v5, %v375_v3  ;;  %v374_v10 = vld [vmem:[%s2569_s10 + $0x10] sm:$0xff]  ;;  %v405_v12 = vld [vmem:[%s2569_s10 + $0x108] sm:$0xff]  ;;  %p2894_p5 = scmp.lt.s32.totalorder %s1935_s21, 63 }
  0xac   : > { %v1953_v9 = vpack.c.bf16 %v388_v7, %v372_v6  ;;  %v390_v11 = vld [vmem:[%s2569_s10 + $0x90] sm:$0xff]  ;;  %v421_v14 = vld [vmem:[%s2569_s10 + $0x188] sm:$0xff]  ;;  %v407_v15 = vld [vmem:[%s2569_s10 + $0x118] sm:$0xff] }
  0xad   : > { %1952 = vmatprep.subr.bf16.mxu0 %v1951_v4  ;;  %v1961_v13 = vpack.c.bf16 %v390_v11, %v374_v10  ;;  %v423_v16 = vld [vmem:[%s2569_s10 + $0x198] sm:$0xff]  ;;  %1960 = vmatprep.subr.bf16.mxu1 %v1959_v8  ;;  %v1955_v17 = vpack.c.bf16 %v421_v14, %v405_v12  ;;  %v404_v19 = vld [vmem:[%s2569_s10 + $0x100] sm:$0xff]  ;;  %v406_v21 = vld [vmem:[%s2569_s10 + $0x110] sm:$0xff]  ;;  %s3222_s21 = smov (!%p2894_p5, %s1935_s21), 63 }
  0xae   : > { %1954 = vmatpush1.bf16.msra.mxu0 %v1953_v9  ;;  %v1963_v18 = vpack.c.bf16 %v423_v16, %v407_v15  ;;  %v420_v20 = vld [vmem:[%s2569_s10 + $0x180] sm:$0xff]  ;;  %v422_v23 = vld [vmem:[%s2569_s10 + $0x190] sm:$0xff]  ;;  %v377_v24 = vld [vmem:[%s2569_s10 + $0x28] sm:$0xff]  ;;  %s1936_s24 = sshll.u32 %s3222_s21, 1 }
  0xaf   : > { %1962 = vmatpush1.bf16.msra.mxu1 %v1961_v13  ;;  %v1957_v22 = vpack.c.bf16 %v420_v20, %v404_v19  ;;  %1956 = vmatprep.subr.bf16.mxu0 %v1955_v17  ;;  %v1965_v25 = vpack.c.bf16 %v422_v23, %v406_v21  ;;  %v2602_v26 = vld [vmem:[#allocation2] sm:$0x3]  ;;  %v393_v27 = vld [vmem:[%s2569_s10 + $0xa8] sm:$0xff]  ;;  %v376_v32 = vld [vmem:[%s2569_s10 + $0x20] sm:$0xff]  ;;  %s2950_s16 = scalar_lea.vmem %s3173_s5, %s1936_s24 }
  0xb0   : > { %1964 = vmatprep.subr.bf16.mxu1 %v1963_v18  ;;  %v379_v28 = vld [vmem:[%s2569_s10 + $0x38] sm:$0xff]  ;;  %v1967_v30 = vpack.c.bf16 %v393_v27, %v377_v24  ;;  %v392_v33 = vld [vmem:[%s2569_s10 + $0xa0] sm:$0xff]  ;;  %v378_v34 = vld [vmem:[%s2569_s10 + $0x30] sm:$0xff] }
  0xb1   : > { %v395_v29 = vld [vmem:[%s2569_s10 + $0xb8] sm:$0xff]  ;;  %v1969_v35 = vpack.c.bf16 %v392_v33, %v376_v32  ;;  %v394_v36 = vld [vmem:[%s2569_s10 + $0xb0] sm:$0xff]  ;;  %v409_v37 = vld [vmem:[%s2569_s10 + $0x128] sm:$0xff] }
  0xb2   : > { %v1975_v31 = vpack.c.bf16 %v395_v29, %v379_v28  ;;  %1958 = vmatpush1.bf16.msra.mxu0 %v1957_v22  ;;  %v425_v38 = vld [vmem:[%s2569_s10 + $0x1a8] sm:$0xff]  ;;  %v1977_v39 = vpack.c.bf16 %v394_v36, %v378_v34  ;;  %v411_v41 = vld [vmem:[%s2569_s10 + $0x138] sm:$0xff]  ;;  %v408_v43 = vld [vmem:[%s2569_s10 + $0x120] sm:$0xff]  ;;  %v440_v36 = vlaneseq }
  0xb3   : > { %1966 = vmatpush1.bf16.msra.mxu1 %v1965_v25  ;;  %1968 = vmatprep.subr.bf16.mxu0 %v1967_v30  ;;  %v1971_v40 = vpack.c.bf16 %v425_v38, %v409_v37  ;;  %v427_v42 = vld [vmem:[%s2569_s10 + $0x1b8] sm:$0xff]  ;;  %v424_v45 = vld [vmem:[%s2569_s10 + $0x1a0] sm:$0xff]  ;;  %v410_v46 = vld [vmem:[%s2569_s10 + $0x130] sm:$0xff] }
  0xb4   : > { %1976 = vmatprep.subr.bf16.mxu1 %v1975_v31  ;;  %v1979_v44 = vpack.c.bf16 %v427_v42, %v411_v41  ;;  %v426_v47 = vld [vmem:[%s2569_s10 + $0x1b0] sm:$0xff]  ;;  %v381_v48 = vld [vmem:[%s2569_s10 + $0x48] sm:$0xff]  ;;  %v383_v50 = vld [vmem:[%s2569_s10 + $0x58] sm:$0xff]  ;;  %v1973_v51 = vpack.c.bf16 %v424_v45, %v408_v43  ;;  %v441_v37 = vshrl.u32 %v440_v36, 7 }
  0xb5   : > { %1937 = vmatmul.mubr.msk.f32.vlgmr.msra.gmra.mrb[0].mxu0 %vm520_vm0, %v2602_v26  ;;  %v397_v49 = vld [vmem:[%s2569_s10 + $0xc8] sm:$0xff]  ;;  %v399_v52 = vld [vmem:[%s2569_s10 + $0xd8] sm:$0xff]  ;;  %v1981_v53 = vpack.c.bf16 %v426_v47, %v410_v46  ;;  %v380_v55 = vld [vmem:[%s2569_s10 + $0x40] sm:$0xff] }
  0xb6   : > { %1938 = vmatmul.mubr.msk.f32.vlgmr.msra.gmra.mrb[0].mxu1 %vm520_vm0, %v2602_v26  ;;  %1970 = vmatpush1.bf16.msra.mxu0 %v1969_v35  ;;  %v1983_v54 = vpack.c.bf16 %v397_v49, %v381_v48  ;;  %v396_v56 = vld [vmem:[%s2569_s10 + $0xc0] sm:$0xff]  ;;  %v382_v57 = vld [vmem:[%s2569_s10 + $0x50] sm:$0xff]  ;;  %v1991_v58 = vpack.c.bf16 %v399_v52, %v383_v50  ;;  %v413_v60 = vld [vmem:[%s2569_s10 + $0x148] sm:$0xff]  ;;  %v2673_v38 = vsub.s32 0, %v441_v37  ;;  %v2681_v42 = vsub.s32 1, %v441_v37 }
  0xb7   : > { %1978 = vmatpush1.bf16.msra.mxu1 %v1977_v39  ;;  %1972 = vmatprep.subr.bf16.mxu0 %v1971_v40  ;;  %v398_v59 = vld [vmem:[%s2569_s10 + $0xd0] sm:$0xff]  ;;  %v429_v61 = vld [vmem:[%s2569_s10 + $0x1c8] sm:$0xff]  ;;  %v415_v62 = vld [vmem:[%s2569_s10 + $0x158] sm:$0xff]  ;;  %v1985_v1 = vpack.c.bf16 %v396_v56, %v380_v55  ;;  %v2675_v39 = vsub.s32 2, %v441_v37  ;;  %v2318_v40 = vmov 1983009808  }
  0xb8   : > { %1980 = vmatprep.subr.bf16.mxu1 %v1979_v44  ;;  %730 = vmatprep.mubr.f32.mxu0 %v2317_v0  ;;  %v431_v63 = vld [vmem:[%s2569_s10 + $0x1d8] sm:$0xff]  ;;  %v1993_v2 = vpack.c.bf16 %v398_v59, %v382_v57  ;;  %v1987_v3 = vpack.c.bf16 %v429_v61, %v413_v60  ;;  %v412_v4 = vld [vmem:[%s2569_s10 + $0x140] sm:$0xff]  ;;  %v414_v6 = vld [vmem:[%s2569_s10 + $0x150] sm:$0xff]  ;;  %v1697_v41 = vunpack.c.l.s4 %v2318_v40  ;;  %v2683_v43 = vsub.s32 3, %v441_v37 }
  0xb9   : > { %801 = vmatprep.mubr.f32.mxu1 %v2317_v0  ;;  %v428_v5 = vld [vmem:[%s2569_s10 + $0x1c0] sm:$0xff]  ;;  %v1995_v7 = vpack.c.bf16 %v431_v63, %v415_v62  ;;  %v430_v8 = vld [vmem:[%s2569_s10 + $0x1d0] sm:$0xff]  ;;  %v385_v9 = vld [vmem:[%s2569_s10 + $0x68] sm:$0xff]  ;;  %v2685_v44 = vsub.s32 4, %v441_v37  ;;  %v2693_v46 = vsub.s32 5, %v441_v37  ;;  %v2695_v47 = vsub.s32 7, %v441_v37 }
  0xba   : > { %1974 = vmatpush1.bf16.msra.mxu0 %v1973_v51  ;;  %v401_v10 = vld [vmem:[%s2569_s10 + $0xe8] sm:$0xff]  ;;  %v387_v11 = vld [vmem:[%s2569_s10 + $0x78] sm:$0xff]  ;;  %v1989_v13 = vpack.c.bf16 %v428_v5, %v412_v4  ;;  %v1997_v14 = vpack.c.bf16 %v430_v8, %v414_v6  ;;  %v384_v16 = vld [vmem:[%s2569_s10 + $0x60] sm:$0xff]  ;;  %v1698_v51 = vunpack.c.0.s8 %v1697_v41 }
  0xbb   : > { %1982 = vmatpush1.bf16.msra.mxu1 %v1981_v53  ;;  %1984 = vmatprep.subr.bf16.mxu0 %v1983_v54  ;;  %v403_v12 = vld [vmem:[%s2569_s10 + $0xf8] sm:$0xff]  ;;  %v1999_v15 = vpack.c.bf16 %v401_v10, %v385_v9  ;;  %v400_v17 = vld [vmem:[%s2569_s10 + $0xe0] sm:$0xff]  ;;  %v386_v18 = vld [vmem:[%s2569_s10 + $0x70] sm:$0xff] }
  0xbc   : > { %1992 = vmatprep.subr.bf16.mxu1 %v1991_v58  ;;  %v2007_v19 = vpack.c.bf16 %v403_v12, %v387_v11  ;;  %v402_v20 = vld [vmem:[%s2569_s10 + $0xf0] sm:$0xff]  ;;  %v417_v21 = vld [vmem:[%s2569_s10 + $0x168] sm:$0xff]  ;;  %v419_v23 = vld [vmem:[%s2569_s10 + $0x178] sm:$0xff]  ;;  %v2001_v25 = vpack.c.bf16 %v400_v17, %v384_v16 }
  0xbd   : > { %1939 = vmatmul.mubr.msk.f32.vlgmr.msra.gmra.mrb[2].mxu0 %vm520_vm0, %v2602_v26  ;;  %v433_v22 = vld [vmem:[%s2569_s10 + $0x1e8] sm:$0xff]  ;;  %v435_v24 = vld [vmem:[%s2569_s10 + $0x1f8] sm:$0xff]  ;;  %v2009_v27 = vpack.c.bf16 %v402_v20, %v386_v18  ;;  %v416_v29 = vld [vmem:[%s2569_s10 + $0x160] sm:$0xff] }
  0xbe   : > { %1940 = vmatmul.mubr.msk.f32.vlgmr.msra.gmra.mrb[2].mxu1 %vm520_vm0, %v2602_v26  ;;  %1986 = vmatpush1.bf16.msra.mxu0 %v1985_v1  ;;  %v2003_v28 = vpack.c.bf16 %v433_v22, %v417_v21  ;;  %v432_v30 = vld [vmem:[%s2569_s10 + $0x1e0] sm:$0xff]  ;;  %v2011_v31 = vpack.c.bf16 %v435_v24, %v419_v23  ;;  %v418_v32 = vld [vmem:[%s2569_s10 + $0x170] sm:$0xff]  ;;  %v2722_v59 = vld [vmem:[%s301_s7 + $0x8] sm:$0xff] }
  0xbf   : > { %1994 = vmatpush1.bf16.msra.mxu1 %v1993_v2  ;;  %1988 = vmatprep.subr.bf16.mxu0 %v1987_v3  ;;  %v434_v33 = vld [vmem:[%s2569_s10 + $0x1f0] sm:$0xff]  ;;  %v2005_v34 = vpack.c.bf16 %v432_v30, %v416_v29  ;;  %v2736_v3 = vsub.s32 %v1698_v51, %v441_v37 }
  0xc0   : > { %1996 = vmatprep.subr.bf16.mxu1 %v1995_v7  ;;  %872 = vmatprep.mubr.f32.mxu0 %v2317_v0  ;;  %v2013_v35 = vpack.c.bf16 %v434_v33, %v418_v32  ;;  %v2691_v45 = vld [vmem:[%s310_s15] sm:$0xff] }
  0xc1   : > { %943 = vmatprep.mubr.f32.mxu1 %v2317_v0  ;;  %v2702_v49 = vld [vmem:[%s319_s29] sm:$0xff]  ;;  %v1437_v55 = vrot.slane %v2691_v45, %v2673_v38  ;;  %v1445_v56 = vrot.slane %v2691_v45, %v2675_v39  ;;  %v1441_v57 = vrot.slane %v2691_v45, %v2681_v42  ;;  %v1449_v61 = vrot.slane %v2691_v45, %v2683_v43 }
  0xc2   : > { %1990 = vmatpush1.bf16.msra.mxu0 %v1989_v13  ;;  %v1585_v60 = vrot.slane %v2702_v49, %v2673_v38  ;;  %v1589_v2 = vrot.slane %v2702_v49, %v2681_v42 }
  0xc3   : > { %1998 = vmatpush1.bf16.msra.mxu1 %v1997_v14  ;;  %2000 = vmatprep.subr.bf16.mxu0 %v1999_v15  ;;  %v2752_v14 = vld [vmem:[%s310_s15 + $0x8] sm:$0xff] }
  0xc4   : > { %2008 = vmatprep.subr.bf16.mxu1 %v2007_v19 }
  0xc5   : > { %1941 = vmatmul.mubr.msk.f32.vlgmr.msra.gmra.mrb[4].mxu0 %vm520_vm0, %v2602_v26 }
  0xc6   : > { %1942 = vmatmul.mubr.msk.f32.vlgmr.msra.gmra.mrb[4].mxu1 %vm520_vm0, %v2602_v26  ;;  %2002 = vmatpush1.bf16.msra.mxu0 %v2001_v25 }
  0xc7   : > { %2010 = vmatpush1.bf16.msra.mxu1 %v2009_v27  ;;  %2004 = vmatprep.subr.bf16.mxu0 %v2003_v28 }
  0xc8   : > { %2012 = vmatprep.subr.bf16.mxu1 %v2011_v31  ;;  %1014 = vmatprep.mubr.f32.mxu0 %v2317_v0 }
  0xc9   : > { %1085 = vmatprep.mubr.f32.mxu1 %v2317_v0  ;;  %v2679_v0 = vld [vmem:[%s301_s7] sm:$0xff] }
  0xca   : > { %2006 = vmatpush1.bf16.msra.mxu0 %v2005_v34  ;;  %v443_v48 = vrot.slane %v2679_v0, %v2673_v38  ;;  %v451_v50 = vrot.slane %v2679_v0, %v2675_v39  ;;  %v447_v52 = vrot.slane %v2679_v0, %v2681_v42  ;;  %v455_v53 = vrot.slane %v2679_v0, %v2683_v43 }
  0xcb   : > { %2014 = vmatpush1.bf16.msra.mxu1 %v2013_v35  ;;  %v459_v54 = vrot.slane %v2679_v0, %v2685_v44  ;;  %v463_v62 = vrot.slane %v2679_v0, %v2693_v46  ;;  %v471_v63 = vrot.slane %v2679_v0, %v2695_v47 }
  0xcd   : > { %1943 = vmatmul.mubr.msk.f32.vlgmr.msra.gmra.mrb[6].mxu0 %vm520_vm0, %v2602_v26 }
  0xce   : > { %1944 = vmatmul.mubr.msk.f32.vlgmr.msra.gmra.mrb[6].mxu1 %vm520_vm0, %v2602_v26  ;;  %v2687_v26 = vsub.s32 6, %v441_v37 }
  0xd0   : > { %v467_v58 = vrot.slane %v2679_v0, %v2687_v26 }
 0x188   : > { %v590_v5 = vpop.f32.mrb[0].mxu0 }
 0x189   : > { %v591_v10 = vadd.f32 %v590_v5, %v443_v48  ;;  %v661_v11 = vpop.f32.mrb[0].mxu1  ;;  %v592_v12 = vpop.f32.mrb[1].mxu0 }
 0x18a   : > { %v662_v17 = vadd.f32 %v661_v11, %v451_v50  ;;  %v593_v18 = vadd.f32 %v592_v12, %v447_v52  ;;  %v663_v19 = vpop.f32.mrb[1].mxu1 }
 0x18b   : > { %v2762_v22 = vmax.f32 %v591_v10, 0.0  ;;  %v664_v23 = vadd.f32 %v663_v19, %v455_v53 }
 0x18c   : > { %v2768_v27 = vmax.f32 %v662_v17, 0.0  ;;  %v2770_v28 = vmax.f32 %v593_v18, 0.0 }
 0x18d   : > { %v1109_v31 = vsel %vm1108_vm1, %v2762_v22, 0.0  ;;  %v1238_v32 = vmul.f32 %v2762_v22, %v2762_v22  ;;  %v2780_v33 = vmax.f32 %v664_v23, 0.0 }
 0x18e   : > { %v1110_v35 = vrot.slane %v1109_v31, 4  ;;  %v1123_v36 = vsel %vm1108_vm1, %v2768_v27, 0.0  ;;  %v1240_v37 = vmul.f32 %v2768_v27, %v2768_v27  ;;  %v1116_v40 = vsel %vm1108_vm1, %v2770_v28, 0.0 }
 0x18f   : > { %v1254_v41 = vsel %vm1108_vm1, %v1238_v32, 0.0  ;;  %v1124_v48 = vrot.slane %v1123_v36, 4  ;;  %v1117_v50 = vrot.slane %v1116_v40, 4  ;;  %v1239_v51 = vmul.f32 %v2770_v28, %v2770_v28 }
 0x190   : > { %v1111_v52 = vadd.f32 %v1110_v35, %v1109_v31  ;;  %v1255_v53 = vrot.slane %v1254_v41, 4  ;;  %v1268_v5 = vsel %vm1108_vm1, %v1240_v37, 0.0  ;;  %v1130_v10 = vsel %vm1108_vm1, %v2780_v33, 0.0  ;;  %v2796_v11 = vpop.f32.mrb[2].mxu0 }
 0x191   : > { %v1125_v12 = vadd.f32 %v1124_v48, %v1123_v36  ;;  %v1269_v17 = vrot.slane %v1268_v5, 4  ;;  %v1118_v18 = vadd.f32 %v1117_v50, %v1116_v40  ;;  %v1261_v19 = vsel %vm1108_vm1, %v1239_v51, 0.0  ;;  %v2799_v23 = vpop.f32.mrb[2].mxu1  ;;  %v2801_v32 = vpop.f32.mrb[3].mxu0 }
 0x192   : > { %v1112_v30 = vrot.slane %v1111_v52, 2  ;;  %v1256_v29 = vadd.f32 %v1255_v53, %v1254_v41  ;;  %v1262_v31 = vrot.slane %v1261_v19, 4  ;;  %v1131_v35 = vrot.slane %v1130_v10, 4  ;;  %v2803_v21 = vpop.f32.mrb[3].mxu1 }
 0x193   : > { %v1126_v37 = vrot.slane %v1125_v12, 2  ;;  %v1270_v25 = vadd.f32 %v1269_v17, %v1268_v5  ;;  %v1119_v34 = vrot.slane %v1118_v18, 2  ;;  %v1241_v36 = vmul.f32 %v2780_v33, %v2780_v33 }
 0x194   : > { %v1113_v48 = vadd.f32 %v1112_v30, %v1111_v52  ;;  %v1257_v40 = vrot.slane %v1256_v29, 2  ;;  %v1263_v50 = vadd.f32 %v1262_v31, %v1261_v19  ;;  %v1132_v51 = vadd.f32 %v1131_v35, %v1130_v10 }
 0x195   : > { %v1127_v7 = vadd.f32 %v1126_v37, %v1125_v12  ;;  %v1271_v24 = vrot.slane %v1270_v25, 2  ;;  %v1120_v20 = vadd.f32 %v1119_v34, %v1118_v18  ;;  %v1275_v13 = vsel %vm1108_vm1, %v1241_v36, 0.0 }
 0x196   : > { %v1114_v41 = vrot.slane %v1113_v48, 1  ;;  %v1258_v53 = vadd.f32 %v1257_v40, %v1256_v29  ;;  %v1264_v16 = vrot.slane %v1263_v50, 2  ;;  %v1133_v15 = vrot.slane %v1132_v51, 2 }
 0x197   : > { %v1128_v9 = vrot.slane %v1127_v7, 1  ;;  %v1272_v8 = vadd.f32 %v1271_v24, %v1270_v25  ;;  %v1121_v5 = vrot.slane %v1120_v20, 1  ;;  %v1276_v17 = vrot.slane %v1275_v13, 4 }
 0x198   : > { %v1115_v4 = vadd.f32 %v1114_v41, %v1113_v48  ;;  %v1259_v6 = vrot.slane %v1258_v53, 1  ;;  %v1265_v1 = vadd.f32 %v1264_v16, %v1263_v50  ;;  %v1134_v30 = vadd.f32 %v1133_v15, %v1132_v51  ;;  %v2808_v52 = vpop.f32.mrb[4].mxu0 }
 0x199   : > { %v1129_v10 = vadd.f32 %v1128_v9, %v1127_v7  ;;  %v1273_v12 = vrot.slane %v1272_v8, 1  ;;  %v1122_v19 = vadd.f32 %v1121_v5, %v1120_v20  ;;  %v1277_v34 = vadd.f32 %v1276_v17, %v1275_v13  ;;  %v2810_v18 = vpop.f32.mrb[4].mxu1  ;;  %v2812_v31 = vpop.f32.mrb[5].mxu0 }
 0x19a   : > { %v1222_v29 = vmul.f32 0.5, %v1115_v4  ;;  %v1260_v35 = vadd.f32 %v1259_v6, %v1258_v53  ;;  %v1266_v37 = vrot.slane %v1265_v1, 1  ;;  %v1135_v24 = vrot.slane %v1134_v30, 1  ;;  %v2814_v25 = vpop.f32.mrb[5].mxu1 }
 0x19b   : > { %v1224_v36 = vmul.f32 0.5, %v1129_v10  ;;  %v1274_v48 = vadd.f32 %v1273_v12, %v1272_v8  ;;  %v1223_v16 = vmul.f32 0.5, %v1122_v19  ;;  %v1278_v15 = vrot.slane %v1277_v34, 2 }
 0x19c   : > { %v1366_v40 = vmul.f32 0.5, %v1260_v35  ;;  %v1382_v50 = vmul.f32 %v1222_v29, %v1222_v29  ;;  %v1416_v7 = vsub.f32 %v2762_v22, %v1222_v29  ;;  %v1267_v9 = vadd.f32 %v1266_v37, %v1265_v1 }
 0x19d   : > { %v1368_v13 = vmul.f32 0.5, %v1274_v48  ;;  %v1384_v20 = vmul.f32 %v1224_v36, %v1224_v36  ;;  %v1383_v51 = vmul.f32 %v1223_v16, %v1223_v16  ;;  %v499_v4 = vrot.slane %v2722_v59, %v2687_v26 }
 0x19e   : > { %v1398_v6 = vsub.f32 %v1366_v40, %v1382_v50  ;;  %v1418_v41 = vsub.f32 %v2768_v27, %v1224_v36  ;;  %v1367_v53 = vmul.f32 0.5, %v1267_v9  ;;  %v1613_v8 = vrot.slane %v2702_v49, %v2695_v47 }
 0x19f   : > { %v1514_v5 = vmul.f32 %v1437_v55, %v1416_v7  ;;  %v1400_v17 = vsub.f32 %v1368_v13, %v1384_v20  ;;  %v1136_v22 = vadd.f32 %v1135_v24, %v1134_v30  ;;  %v1279_v1 = vadd.f32 %v1278_v15, %v1277_v34 }
 0x1a0   : > { %v1530_v10 = vadd.f32 1e-05, %v1398_v6  ;;  %v1399_v12 = vsub.f32 %v1367_v53, %v1383_v51  ;;  %v1417_v19 = vsub.f32 %v2770_v28, %v1223_v16  ;;  %v733_v27 = vadd.f32 %v2796_v11, %v459_v54  ;;  %v2830_v29 = vpop.f32.mrb[6].mxu0 }
 0x1a1   : > { %v1532_v35 = vadd.f32 1e-05, %v1400_v17  ;;  %v2832_v37 = vmul.f32 0.5, %v1136_v22  ;;  %v1280_v36 = vrot.slane %v1279_v1, 1  ;;  %v804_v55 = vadd.f32 %v2799_v23, %v467_v58  ;;  %v2838_v30 = vpop.f32.mrb[6].mxu1  ;;  %v2840_v34 = vpop.f32.mrb[7].mxu0 }
 0x1a2   : > { %2085 = vrsqrt.f32 %v1530_v10  ;;  %v1531_v28 = vadd.f32 1e-05, %v1399_v12  ;;  %v2842_v24 = vmax.f32 %v733_v27, 0.0  ;;  %v735_v54 = vadd.f32 %v2801_v32, %v463_v62  ;;  %v2848_v11 = vpop.f32.mrb[7].mxu1 }
 0x1a3   : > { %v1516_v48 = vmul.f32 %v1445_v56, %v1418_v41  ;;  %2087 = vrsqrt.f32 %v1532_v35  ;;  %v1281_v58 = vadd.f32 %v1280_v36, %v1279_v1  ;;  %v1385_v23 = vmul.f32 %v2832_v37, %v2832_v37 }
 0x1a4   : > { %2089 = vrsqrt.f32 %v1531_v28  ;;  %v1137_v16 = vsel %vm1108_vm1, %v2842_v24, 0.0  ;;  %v1242_v15 = vmul.f32 %v2842_v24, %v2842_v24  ;;  %v2859_v40 = vmax.f32 %v804_v55, 0.0 }
 0x1a5   : > { %v1515_v62 = vmul.f32 %v1441_v57, %v1417_v19  ;;  %v1369_v32 = vmul.f32 0.5, %v1281_v58  ;;  %v1138_v56 = vrot.slane %v1137_v16, 4  ;;  %v2864_v50 = vmax.f32 %v735_v54, 0.0 }
 0x1a6   : > { %v1282_v7 = vsel %vm1108_vm1, %v1242_v15, 0.0  ;;  %v1151_v9 = vsel %vm1108_vm1, %v2859_v40, 0.0  ;;  %v1244_v13 = vmul.f32 %v2859_v40, %v2859_v40  ;;  %v806_v20 = vadd.f32 %v2803_v21, %v471_v63 }
 0x1a7   : > { %v1401_v51 = vsub.f32 %v1369_v32, %v1385_v23  ;;  %v1139_v6 = vadd.f32 %v1138_v56, %v1137_v16  ;;  %v1283_v57 = vrot.slane %v1282_v7, 4  ;;  %v1152_v41 = vrot.slane %v1151_v9, 4 }
 0x1a8   : > { %v1296_v53 = vsel %vm1108_vm1, %v1244_v13, 0.0  ;;  %v1144_v17 = vsel %vm1108_vm1, %v2864_v50, 0.0  ;;  %v1243_v22 = vmul.f32 %v2864_v50, %v2864_v50  ;;  %v2880_v1 = vmax.f32 %v806_v20, 0.0 }
 0x1a9   : > { %v1533_v10 = vadd.f32 1e-05, %v1401_v51  ;;  %v1140_v12 = vrot.slane %v1139_v6, 2  ;;  %v1284_v19 = vadd.f32 %v1283_v57, %v1282_v7  ;;  %v1153_v0 = vadd.f32 %v1152_v41, %v1151_v9 }
 0x1aa   : > { %v1297_v27 = vrot.slane %v1296_v53, 4  ;;  %v1145_v63 = vrot.slane %v1144_v17, 4  ;;  %v1289_v21 = vsel %vm1108_vm1, %v1243_v22, 0.0  ;;  %v1158_v35 = vsel %vm1108_vm1, %v2880_v1, 0.0 }
 0x1ab   : > { %2091 = vrsqrt.f32 %v1533_v10  ;;  %v1141_v36 = vadd.f32 %v1140_v12, %v1139_v6  ;;  %v1285_v55 = vrot.slane %v1284_v19, 2  ;;  %v1154_v28 = vrot.slane %v1153_v0, 2 }
 0x1ac   : > { %v2086_v54 = vpop.eup %2085  ;;  %v1419_v58 = vsub.f32 %v2780_v33, %v2832_v37  ;;  %v1298_v23 = vadd.f32 %v1297_v27, %v1296_v53  ;;  %v1146_v16 = vadd.f32 %v1145_v63, %v1144_v17  ;;  %v1290_v15 = vrot.slane %v1289_v21, 4 }
 0x1ad   : > { %v2088_v32 = vpop.eup %2087  ;;  %v1562_v56 = vmul.f32 %v2086_v54, %v1514_v5  ;;  %v1142_v7 = vrot.slane %v1141_v36, 1  ;;  %v1286_v9 = vadd.f32 %v1285_v55, %v1284_v19  ;;  %v1155_v13 = vadd.f32 %v1154_v28, %v1153_v0 }
 0x1ae   : > { %v2090_v20 = vpop.eup %2089  ;;  %v1299_v51 = vrot.slane %v1298_v23, 2  ;;  %v1147_v57 = vrot.slane %v1146_v16, 2  ;;  %v1291_v41 = vadd.f32 %v1290_v15, %v1289_v21  ;;  %v1159_v6 = vrot.slane %v1158_v35, 4 }
 0x1af   : > { %v1662_v22 = vadd.f32 %v1585_v60, %v1562_v56  ;;  %v1563_v10 = vmul.f32 %v2090_v20, %v1515_v62  ;;  %v1143_v33 = vadd.f32 %v1142_v7, %v1141_v36  ;;  %v1287_v37 = vrot.slane %v1286_v9, 1 }
 0x1b0   : > { %v1564_v53 = vmul.f32 %v2088_v32, %v1516_v48  ;;  %v1156_v17 = vrot.slane %v1155_v13, 1  ;;  %v1300_v12 = vadd.f32 %v1299_v51, %v1298_v23  ;;  %v1148_v5 = vadd.f32 %v1147_v57, %v1146_v16  ;;  %v2917_v57 = vld [vmem:[%s319_s29 + $0x8] sm:$0xff] }
 0x1b1   : > { %v1663_v19 = vadd.f32 %v1589_v2, %v1563_v10  ;;  %v1226_v0 = vmul.f32 0.5, %v1143_v33  ;;  %v1288_v27 = vadd.f32 %v1287_v37, %v1286_v9  ;;  %v1292_v63 = vrot.slane %v1291_v41, 2 }
 0x1b2   : > { %v1157_v60 = vadd.f32 %v1156_v17, %v1155_v13  ;;  %v1301_v62 = vrot.slane %v1300_v12, 1  ;;  %v1149_v21 = vrot.slane %v1148_v5, 1  ;;  %v1160_v36 = vadd.f32 %v1159_v6, %v1158_v35 }
 0x1b3   : > { %v1694_v48 = vcombine.low %v1662_v22, %v1663_v19  ;;  %v1517_v55 = vmul.f32 %v1449_v61, %v1419_v58  ;;  %v1370_v28 = vmul.f32 0.5, %v1288_v27  ;;  %v1386_v2 = vmul.f32 %v1226_v0, %v1226_v0 }
 0x1b4   : > { %v2901_v54 = vmul.f32 0.5, %v1157_v60  ;;  %v1302_v23 = vadd.f32 %v1301_v62, %v1300_v12  ;;  %v1150_v16 = vadd.f32 %v1149_v21, %v1148_v5  ;;  %v1293_v15 = vadd.f32 %v1292_v63, %v1291_v41 }
 0x1b5   : > { %v2092_v32 = vpop.eup %2091  ;;  %v3201_v56 = vrot.slane %v2702_v49, %v2675_v39  ;;  %v1402_v9 = vsub.f32 %v1370_v28, %v1386_v2  ;;  %v1161_v35 = vrot.slane %v1160_v36, 2  ;;  %v1473_v13 = vrot.slane %v2752_v14, %v2681_v42 }
 0x1b6   : > { %v1565_v61 = vmul.f32 %v2092_v32, %v1517_v55  ;;  %v1420_v58 = vsub.f32 %v2842_v24, %v1226_v0  ;;  %v1372_v20 = vmul.f32 0.5, %v1302_v23  ;;  %v1388_v51 = vmul.f32 %v2901_v54, %v2901_v54 }
 0x1b7   : > { %v1664_v7 = vadd.f32 %v3201_v56, %v1564_v53  ;;  %v1534_v41 = vadd.f32 1e-05, %v1402_v9  ;;  %v2919_v6 = vmul.f32 0.5, %v1150_v16  ;;  %v1294_v22 = vrot.slane %v1293_v15, 1 }
 0x1b8   : > { %v1162_v10 = vadd.f32 %v1161_v35, %v1160_v36  ;;  %v3202_v33 = vrot.slane %v2702_v49, %v2683_v43  ;;  %v1404_v53 = vsub.f32 %v1372_v20, %v1388_v51  ;;  %v1245_v24 = vmul.f32 %v2880_v1, %v2880_v1 }
 0x1b9   : > { %v495_v17 = vrot.slane %v2722_v59, %v2693_v46  ;;  %2093 = vrsqrt.f32 %v1534_v41  ;;  %v1295_v12 = vadd.f32 %v1294_v22, %v1293_v15  ;;  %v1387_v5 = vmul.f32 %v2919_v6, %v2919_v6 }
 0x1ba   : > { %v1665_v37 = vadd.f32 %v3202_v33, %v1565_v61  ;;  %v1617_v19 = vrot.slane %v2917_v57, %v2673_v38  ;;  %v1702_v0 = vrot.slane %v1694_v48, %v2736_v3  ;;  %v1163_v63 = vrot.slane %v1162_v10, 1 }
 0x1bb   : > { %v1303_v60 = vsel %vm1108_vm1, %v1245_v24, 0.0  ;;  %v3203_v62 = vrot.slane %v2691_v45, %v2685_v44  ;;  %v1371_v36 = vmul.f32 0.5, %v1295_v12  ;;  %v3204_v28 = vrot.slane %v2722_v59, %v2673_v38 }
 0x1bc   : > { %v1695_v27 = vcombine.low %v1664_v7, %v1665_v37  ;;  %v1304_v55 = vrot.slane %v1303_v60, 4  ;;  %v1536_v16 = vadd.f32 1e-05, %v1404_v53  ;;  %v1164_v48 = vadd.f32 %v1163_v63, %v1162_v10 }
 0x1bd   : > { %v1518_v21 = vmul.f32 %v3203_v62, %v1420_v58  ;;  %v875_v2 = vadd.f32 %v2808_v52, %v3204_v28  ;;  %v3205_v15 = vrot.slane %v2722_v59, %v2675_v39  ;;  %v1422_v56 = vsub.f32 %v2859_v40, %v2901_v54 }
 0x1be   : > { %v1709_v23 = vrot.slane %v1695_v27, %v2736_v3  ;;  %v1403_v7 = vsub.f32 %v1371_v36, %v1387_v5  ;;  %v1305_v52 = vadd.f32 %v1304_v55, %v1303_v60  ;;  %v2956_v61 = vmul.f32 0.5, %v1164_v48 }
 0x1bf   : > { %v946_v32 = vadd.f32 %v2810_v18, %v3205_v15  ;;  %v2954_v9 = vmax.f32 %v875_v2, 0.0  ;;  %v3206_v18 = vrot.slane %v2722_v59, %v2681_v42  ;;  %2095 = vrsqrt.f32 %v1536_v16 }
 0x1c0   : > { %v1710_v35 = vcombine.low %v1702_v0, %v1709_v23  ;;  %v1535_v51 = vadd.f32 1e-05, %v1403_v7  ;;  %v1306_v41 = vrot.slane %v1305_v52, 2  ;;  %v1421_v33 = vsub.f32 %v2864_v50, %v2919_v6 }
 0x1c1   : > { %v2958_v58 = vmax.f32 %v946_v32, 0.0  ;;  %v877_v20 = vadd.f32 %v2812_v31, %v3206_v18  ;;  %v1165_v22 = vsel %vm1108_vm1, %v2954_v9, 0.0  ;;  %v1246_v10 = vmul.f32 %v2954_v9, %v2954_v9 }
 0x1c2   : > { %1766 = vst [vmem:[%s2950_s16] sm:$0xff] %v1710_v35  ;;  %v1166_v37 = vrot.slane %v1165_v22, 4  ;;  %2097 = vrsqrt.f32 %v1535_v51  ;;  %v1307_v24 = vadd.f32 %v1306_v41, %v1305_v52  ;;  %v3207_v63 = vrot.slane %v2722_v59, %v2683_v43 }
 0x1c3   : > { %v1179_v53 = vsel %vm1108_vm1, %v2958_v58, 0.0  ;;  %v1310_v31 = vsel %vm1108_vm1, %v1246_v10, 0.0  ;;  %v1248_v27 = vmul.f32 %v2958_v58, %v2958_v58  ;;  %v2094_v50 = vpop.eup %2093  ;;  %v1389_v62 = vmul.f32 %v2956_v61, %v2956_v61 }
 0x1c4   : > { %v1180_v12 = vrot.slane %v1179_v53, 4  ;;  %v1167_v5 = vadd.f32 %v1166_v37, %v1165_v22  ;;  %v1311_v0 = vrot.slane %v1310_v31, 4  ;;  %v948_v60 = vadd.f32 %v2814_v25, %v3207_v63 }
 0x1c5   : > { %v1308_v6 = vrot.slane %v1307_v24, 1  ;;  %v2982_v55 = vmax.f32 %v877_v20, 0.0  ;;  %v1566_v28 = vmul.f32 %v2094_v50, %v1518_v21  ;;  %v1324_v16 = vsel %vm1108_vm1, %v1248_v27, 0.0 }
 0x1c6   : > { %v1181_v36 = vadd.f32 %v1180_v12, %v1179_v53  ;;  %v1168_v2 = vrot.slane %v1167_v5, 2  ;;  %v1312_v23 = vadd.f32 %v1311_v0, %v1310_v31  ;;  %v1325_v32 = vrot.slane %v1324_v16, 4 }
 0x1c7   : > { %v1309_v48 = vadd.f32 %v1308_v6, %v1307_v24  ;;  %v1172_v7 = vsel %vm1108_vm1, %v2982_v55, 0.0  ;;  %v3208_v25 = vrot.slane %v2691_v45, %v2693_v46  ;;  %v2990_v22 = vmax.f32 %v948_v60, 0.0 }
 0x1c8   : > { %v1182_v15 = vrot.slane %v1181_v36, 2  ;;  %v1169_v35 = vadd.f32 %v1168_v2, %v1167_v5  ;;  %v1313_v18 = vrot.slane %v1312_v23, 2  ;;  %v1173_v51 = vrot.slane %v1172_v7, 4 }
 0x1c9   : > { %v1519_v52 = vmul.f32 %v3208_v25, %v1421_v33  ;;  %v1373_v20 = vmul.f32 0.5, %v1309_v48  ;;  %v1326_v21 = vadd.f32 %v1325_v32, %v1324_v16  ;;  %v1247_v24 = vmul.f32 %v2982_v55, %v2982_v55  ;;  %v2096_v27 = vpop.eup %2095 }
 0x1ca   : > { %v1183_v41 = vadd.f32 %v1182_v15, %v1181_v36  ;;  %v1170_v10 = vrot.slane %v1169_v35, 1  ;;  %v1314_v37 = vadd.f32 %v1313_v18, %v1312_v23  ;;  %v1174_v53 = vadd.f32 %v1173_v51, %v1172_v7 }
 0x1cb   : > { %v3209_v31 = vrot.slane %v2702_v49, %v2685_v44  ;;  %v1405_v0 = vsub.f32 %v1373_v20, %v1389_v62  ;;  %v1327_v5 = vrot.slane %v1326_v21, 2  ;;  %v1317_v60 = vsel %vm1108_vm1, %v1247_v24, 0.0 }
 0x1cc   : > { %v1184_v33 = vrot.slane %v1183_v41, 1  ;;  %v1171_v63 = vadd.f32 %v1170_v10, %v1169_v35  ;;  %v1315_v50 = vrot.slane %v1314_v37, 1  ;;  %v1175_v6 = vrot.slane %v1174_v53, 2  ;;  %v2098_v36 = vpop.eup %2097 }
 0x1cd   : > { %v1666_v12 = vadd.f32 %v3209_v31, %v1566_v28  ;;  %v1537_v2 = vadd.f32 1e-05, %v1405_v0  ;;  %v1328_v16 = vadd.f32 %v1327_v5, %v1326_v21  ;;  %v1318_v48 = vrot.slane %v1317_v60, 4 }
 0x1ce   : > { %v1185_v23 = vadd.f32 %v1184_v33, %v1183_v41  ;;  %v1567_v15 = vmul.f32 %v2098_v36, %v1519_v52  ;;  %v2998_v32 = vmul.f32 0.5, %v1171_v63  ;;  %v1316_v7 = vadd.f32 %v1315_v50, %v1314_v37 }
 0x1cf   : > { %v1176_v25 = vadd.f32 %v1175_v6, %v1174_v53  ;;  %2099 = vrsqrt.f32 %v1537_v2  ;;  %v1329_v28 = vrot.slane %v1328_v16, 1  ;;  %v1319_v18 = vadd.f32 %v1318_v48, %v1317_v60 }
 0x1d0   : > { %v3000_v62 = vmul.f32 0.5, %v1185_v23  ;;  %v3210_v35 = vrot.slane %v2702_v49, %v2693_v46  ;;  %v1374_v20 = vmul.f32 0.5, %v1316_v7  ;;  %v1390_v41 = vmul.f32 %v2998_v32, %v2998_v32 }
 0x1d1   : > { %v503_v52 = vrot.slane %v2722_v59, %v2695_v47  ;;  %v3211_v21 = vrot.slane %v2691_v45, %v2687_v26  ;;  %v1330_v37 = vadd.f32 %v1329_v28, %v1328_v16  ;;  %v1177_v24 = vrot.slane %v1176_v25, 1 }
 0x1d2   : > { %v1667_v51 = vadd.f32 %v3210_v35, %v1567_v15  ;;  %v1392_v53 = vmul.f32 %v3000_v62, %v3000_v62  ;;  %v1423_v0 = vsub.f32 %v2880_v1, %v2956_v61  ;;  %v1406_v33 = vsub.f32 %v1374_v20, %v1390_v41 }
 0x1d3   : > { %v1520_v10 = vmul.f32 %v3211_v21, %v1422_v56  ;;  %v1320_v5 = vrot.slane %v1319_v18, 2  ;;  %v1376_v50 = vmul.f32 0.5, %v1330_v37  ;;  %v1178_v6 = vadd.f32 %v1177_v24, %v1176_v25 }
 0x1d4   : > { %v1711_v31 = vcombine.low %v1666_v12, %v1667_v51  ;;  %v1186_v40 = vsel %vm1108_vm1, %v2990_v22, 0.0  ;;  %v1538_v54 = vadd.f32 1e-05, %v1406_v33  ;;  %v1621_v56 = vrot.slane %v2917_v57, %v2681_v42 }
 0x1d5   : > { %v1568_v63 = vmul.f32 %v2096_v27, %v1520_v10  ;;  %v1321_v60 = vadd.f32 %v1320_v5, %v1319_v18  ;;  %v1187_v36 = vrot.slane %v1186_v40, 4  ;;  %v1408_v2 = vsub.f32 %v1376_v50, %v1392_v53 }
 0x1d6   : > { %v3023_v23 = vmul.f32 0.5, %v1178_v6  ;;  %v1249_v1 = vmul.f32 %v2990_v22, %v2990_v22  ;;  %v3212_v61 = vrot.slane %v2722_v59, %v2685_v44  ;;  %v3213_v27 = vrot.slane %v2691_v45, %v2695_v47 }
 0x1d7   : > { %v1322_v48 = vrot.slane %v1321_v60, 1  ;;  %v1188_v15 = vadd.f32 %v1187_v36, %v1186_v40  ;;  %v1088_v7 = vadd.f32 %v2838_v30, %v499_v4  ;;  %v3214_v25 = vrot.slane %v2702_v49, %v2687_v26 }
 0x1d8   : > { %v1017_v12 = vadd.f32 %v2830_v29, %v3212_v61  ;;  %v1521_v16 = vmul.f32 %v3213_v27, %v1423_v0  ;;  %v1424_v18 = vsub.f32 %v2954_v9, %v2998_v32  ;;  %v1391_v29 = vmul.f32 %v3023_v23, %v3023_v23 }
 0x1d9   : > { %v1668_v28 = vadd.f32 %v3214_v25, %v1568_v63  ;;  %v1331_v45 = vsel %vm1108_vm1, %v1249_v1, 0.0  ;;  %v1323_v35 = vadd.f32 %v1322_v48, %v1321_v60  ;;  %v1189_v51 = vrot.slane %v1188_v15, 2  ;;  %v2100_v21 = vpop.eup %2099 }
 0x1da   : > { %v1332_v20 = vrot.slane %v1331_v45, 4  ;;  %v3046_v41 = vmax.f32 %v1017_v12, 0.0  ;;  %v1719_v4 = vrot.slane %v1711_v31, %v2736_v3  ;;  %2101 = vrsqrt.f32 %v1538_v54 }
 0x1db   : > { %v1540_v30 = vadd.f32 1e-05, %v1408_v2  ;;  %v3049_v10 = vmax.f32 %v1088_v7, 0.0  ;;  %v1569_v37 = vmul.f32 %v2100_v21, %v1521_v16  ;;  %v1375_v53 = vmul.f32 0.5, %v1323_v35 }
 0x1dc   : > { %v1190_v9 = vadd.f32 %v1189_v51, %v1188_v15  ;;  %v1333_v32 = vadd.f32 %v1332_v20, %v1331_v45  ;;  %v1193_v24 = vsel %vm1108_vm1, %v3046_v41, 0.0  ;;  %v1250_v0 = vmul.f32 %v3046_v41, %v3046_v41 }
 0x1dd   : > { %v1207_v33 = vsel %vm1108_vm1, %v3049_v10, 0.0  ;;  %v1252_v31 = vmul.f32 %v3049_v10, %v3049_v10  ;;  %v1669_v5 = vadd.f32 %v1613_v8, %v1569_v37  ;;  %v1407_v63 = vsub.f32 %v1375_v53, %v1391_v29 }
 0x1de   : > { %v1191_v50 = vrot.slane %v1190_v9, 1  ;;  %v1334_v6 = vrot.slane %v1333_v32, 2  ;;  %v1194_v40 = vrot.slane %v1193_v24, 4  ;;  %v1338_v54 = vsel %vm1108_vm1, %v1250_v0, 0.0 }
 0x1df   : > { %v1208_v60 = vrot.slane %v1207_v33, 4  ;;  %v1352_v36 = vsel %vm1108_vm1, %v1252_v31, 0.0  ;;  %v1712_v2 = vcombine.low %v1668_v28, %v1669_v5  ;;  %v1539_v1 = vadd.f32 1e-05, %v1407_v63 }
 0x1e0   : > { %v1192_v61 = vadd.f32 %v1191_v50, %v1190_v9  ;;  %v1335_v12 = vadd.f32 %v1334_v6, %v1333_v32  ;;  %v1195_v27 = vadd.f32 %v1194_v40, %v1193_v24  ;;  %v1339_v16 = vrot.slane %v1338_v54, 4 }
 0x1e1   : > { %v1209_v48 = vadd.f32 %v1208_v60, %v1207_v33  ;;  %v1353_v15 = vrot.slane %v1352_v36, 4  ;;  %v1726_v49 = vrot.slane %v1712_v2, %v2736_v3  ;;  %2103 = vrsqrt.f32 %v1539_v1 }
 0x1e2   : > { %v3065_v8 = vmul.f32 0.5, %v1192_v61  ;;  %v1336_v7 = vrot.slane %v1335_v12, 1  ;;  %v1196_v25 = vrot.slane %v1195_v27, 2  ;;  %v1340_v29 = vadd.f32 %v1339_v16, %v1338_v54 }
 0x1e3   : > { %v1210_v45 = vrot.slane %v1209_v48, 2  ;;  %v1019_v28 = vadd.f32 %v2840_v34, %v495_v17  ;;  %v1727_v35 = vcombine.low %v1719_v4, %v1726_v49  ;;  %v1425_v51 = vsub.f32 %v2982_v55, %v3023_v23 }
 0x1e4   : > { %v1337_v20 = vadd.f32 %v1336_v7, %v1335_v12  ;;  %v1393_v21 = vmul.f32 %v3065_v8, %v3065_v8  ;;  %v2102_v37 = vpop.eup %2101  ;;  %2105 = vrsqrt.f32 %v1540_v30  ;;  %v1197_v53 = vadd.f32 %v1196_v25, %v1195_v27 }
 0x1e5   : > { %v1341_v9 = vrot.slane %v1340_v29, 2  ;;  %v1211_v32 = vadd.f32 %v1210_v45, %v1209_v48  ;;  %1767 = vst [vmem:[%s2950_s16 + $0x8] sm:$0xff] %v1727_v35  ;;  %v3215_v24 = vrot.slane %v2752_v14, %v2673_v38  ;;  %v1426_v34 = vsub.f32 %v2958_v58, %v3000_v62 }
 0x1e6   : > { %v1377_v17 = vmul.f32 0.5, %v1337_v20  ;;  %v1354_v4 = vadd.f32 %v1353_v15, %v1352_v36  ;;  %v1198_v55 = vrot.slane %v1197_v53, 1  ;;  %v3081_v31 = vmax.f32 %v1019_v28, 0.0 }
 0x1e7   : > { %v1522_v0 = vmul.f32 %v3215_v24, %v1424_v18  ;;  %v1342_v23 = vadd.f32 %v1341_v9, %v1340_v29  ;;  %v1212_v33 = vrot.slane %v1211_v32, 1  ;;  %v1523_v30 = vmul.f32 %v1473_v13, %v1425_v51 }
 0x1e8   : > { %v1409_v5 = vsub.f32 %v1377_v17, %v1393_v21  ;;  %v1355_v63 = vrot.slane %v1354_v4, 2  ;;  %v1090_v18 = vadd.f32 %v2848_v11, %v503_v52  ;;  %v1199_v58 = vadd.f32 %v1198_v55, %v1197_v53 }
 0x1e9   : > { %v1570_v50 = vmul.f32 %v2102_v37, %v1522_v0  ;;  %v1343_v62 = vrot.slane %v1342_v23, 1  ;;  %v1200_v6 = vsel %vm1108_vm1, %v3081_v31, 0.0  ;;  %v1251_v36 = vmul.f32 %v3081_v31, %v3081_v31 }
 0x1ea   : > { %v1541_v40 = vadd.f32 1e-05, %v1409_v5  ;;  %v1356_v54 = vadd.f32 %v1355_v63, %v1354_v4  ;;  %v1201_v60 = vrot.slane %v1200_v6, 4  ;;  %v3094_v13 = vmul.f32 0.5, %v1199_v58 }
 0x1eb   : > { %v1344_v2 = vadd.f32 %v1343_v62, %v1342_v23  ;;  %v1213_v1 = vadd.f32 %v1212_v33, %v1211_v32  ;;  %v3096_v61 = vmax.f32 %v1090_v18, 0.0  ;;  %v2104_v59 = vpop.eup %2103  ;;  %v1345_v12 = vsel %vm1108_vm1, %v1251_v36, 0.0 }
 0x1ec   : > { %2107 = vrsqrt.f32 %v1541_v40  ;;  %v1357_v11 = vrot.slane %v1356_v54, 1  ;;  %v1202_v52 = vadd.f32 %v1201_v60, %v1200_v6  ;;  %v1670_v27 = vadd.f32 %v1617_v19, %v1570_v50 }
 0x1ed   : > { %v1571_v16 = vmul.f32 %v2104_v59, %v1523_v30  ;;  %v1625_v48 = vrot.slane %v2917_v57, %v2675_v39  ;;  %v1378_v15 = vmul.f32 0.5, %v1344_v2  ;;  %v1394_v49 = vmul.f32 %v3094_v13, %v3094_v13 }
 0x1ee   : > { %v1203_v7 = vrot.slane %v1202_v52, 2  ;;  %v2106_v25 = vpop.eup %2105  ;;  %v3216_v29 = vrot.slane %v2752_v14, %v2675_v39  ;;  %v1481_v38 = vrot.slane %v2752_v14, %v2683_v43  ;;  %v1346_v19 = vrot.slane %v1345_v12, 4 }
 0x1ef   : > { %v1671_v28 = vadd.f32 %v1621_v56, %v1571_v16  ;;  %v3114_v35 = vmul.f32 0.5, %v1213_v1  ;;  %v1358_v51 = vadd.f32 %v1357_v11, %v1356_v54  ;;  %v1214_v21 = vsel %vm1108_vm1, %v3096_v61, 0.0 }
 0x1f0   : > { %v1524_v45 = vmul.f32 %v3216_v29, %v1426_v34  ;;  %v1204_v20 = vadd.f32 %v1203_v7, %v1202_v52  ;;  %v1427_v39 = vsub.f32 %v2990_v22, %v3065_v8  ;;  %v1347_v53 = vadd.f32 %v1346_v19, %v1345_v12 }
 0x1f1   : > { %v1728_v37 = vcombine.low %v1670_v27, %v1671_v28  ;;  %v1215_v9 = vrot.slane %v1214_v21, 4  ;;  %v1410_v42 = vsub.f32 %v1378_v15, %v1394_v49  ;;  %v1253_v24 = vmul.f32 %v3096_v61, %v3096_v61 }
 0x1f2   : > { %v1572_v32 = vmul.f32 %v2106_v25, %v1524_v45  ;;  %v1205_v56 = vrot.slane %v1204_v20, 1  ;;  %v1629_v0 = vrot.slane %v2917_v57, %v2683_v43  ;;  %v1348_v34 = vrot.slane %v1347_v53, 2 }
 0x1f3   : > { %v1216_v17 = vadd.f32 %v1215_v9, %v1214_v21  ;;  %v1380_v4 = vmul.f32 0.5, %v1358_v51  ;;  %v1396_v55 = vmul.f32 %v3114_v35, %v3114_v35  ;;  %v1359_v22 = vsel %vm1108_vm1, %v1253_v24, 0.0 }
 0x1f4   : > { %v1206_v23 = vadd.f32 %v1205_v56, %v1204_v20  ;;  %v1525_v8 = vmul.f32 %v1481_v38, %v1427_v39  ;;  %v1349_v33 = vadd.f32 %v1348_v34, %v1347_v53  ;;  %v1360_v5 = vrot.slane %v1359_v22, 4 }
 0x1f5   : > { %v1217_v30 = vrot.slane %v1216_v17, 2  ;;  %v1672_v18 = vadd.f32 %v1625_v48, %v1572_v32  ;;  %v1542_v50 = vadd.f32 1e-05, %v1410_v42  ;;  %v1412_v54 = vsub.f32 %v1380_v4, %v1396_v55 }
 0x1f6   : > { %v2108_v63 = vpop.eup %2107  ;;  %v1235_v58 = vmul.f32 0.5, %v1206_v23  ;;  %v1350_v6 = vrot.slane %v1349_v33, 1  ;;  %v1361_v40 = vadd.f32 %v1360_v5, %v1359_v22  ;;  %v1736_v11 = vrot.slane %v1728_v37, %v2736_v3 }
 0x1f7   : > { %v1573_v62 = vmul.f32 %v2108_v63, %v1525_v8  ;;  %v1218_v43 = vadd.f32 %v1217_v30, %v1216_v17  ;;  %2109 = vrsqrt.f32 %v1542_v50  ;;  %v1544_v48 = vadd.f32 1e-05, %v1412_v54 }
 0x1f8   : > { %v1395_v60 = vmul.f32 %v1235_v58, %v1235_v58  ;;  %v1351_v2 = vadd.f32 %v1350_v6, %v1349_v33  ;;  %v1362_v59 = vrot.slane %v1361_v40, 2  ;;  %v1428_v51 = vsub.f32 %v3046_v41, %v3094_v13 }
 0x1f9   : > { %v1673_v36 = vadd.f32 %v1629_v0, %v1573_v62  ;;  %v1219_v1 = vrot.slane %v1218_v43, 1  ;;  %2111 = vrsqrt.f32 %v1544_v48  ;;  %v1485_v20 = vrot.slane %v2752_v14, %v2685_v44 }
 0x1fa   : > { %v1379_v12 = vmul.f32 0.5, %v1351_v2  ;;  %v1363_v16 = vadd.f32 %v1362_v59, %v1361_v40  ;;  %v1429_v9 = vsub.f32 %v3081_v31, %v1235_v58  ;;  %v1489_v32 = vrot.slane %v2752_v14, %v2693_v46 }
 0x1fb   : > { %v1729_v52 = vcombine.low %v1672_v18, %v1673_v36  ;;  %v1220_v27 = vadd.f32 %v1219_v1, %v1218_v43  ;;  %v1526_v53 = vmul.f32 %v1485_v20, %v1428_v51  ;;  %v1633_v56 = vrot.slane %v2917_v57, %v2685_v44 }
 0x1fc   : > { %v1411_v49 = vsub.f32 %v1379_v12, %v1395_v60  ;;  %v1364_v25 = vrot.slane %v1363_v16, 1  ;;  %v1430_v41 = vsub.f32 %v3049_v10, %v3114_v35  ;;  %v1493_v13 = vrot.slane %v2752_v14, %v2687_v26 }
 0x1fd   : > { %v1743_v15 = vrot.slane %v1729_v52, %v2736_v3  ;;  %v1237_v7 = vmul.f32 0.5, %v1220_v27  ;;  %v1527_v0 = vmul.f32 %v1489_v32, %v1429_v9  ;;  %v1637_v34 = vrot.slane %v2917_v57, %v2693_v46 }
 0x1fe   : > { %v1543_v45 = vadd.f32 1e-05, %v1411_v49  ;;  %v1365_v28 = vadd.f32 %v1364_v25, %v1363_v16  ;;  %v1497_v17 = vrot.slane %v2752_v14, %v2695_v47  ;;  %v1528_v55 = vmul.f32 %v1493_v13, %v1430_v41 }
 0x1ff   : > { %v1744_v29 = vcombine.low %v1736_v11, %v1743_v15  ;;  %v1397_v38 = vmul.f32 %v1237_v7, %v1237_v7  ;;  %v1431_v44 = vsub.f32 %v3096_v61, %v1237_v7  ;;  %v1641_v10 = vrot.slane %v2917_v57, %v2687_v26 }
 0x200   : > { %2113 = vrsqrt.f32 %v1543_v45  ;;  %v1381_v19 = vmul.f32 0.5, %v1365_v28  ;;  %v1645_v46 = vrot.slane %v2917_v57, %v2695_v47 }
 0x201   : > { %1768 = vst [vmem:[%s2950_s16 + $0x10] sm:$0xff] %v1744_v29  ;;  %v2110_v37 = vpop.eup %2109  ;;  %v1529_v33 = vmul.f32 %v1497_v17, %v1431_v44 }
 0x202   : > { %v1413_v21 = vsub.f32 %v1381_v19, %v1397_v38  ;;  %v1574_v42 = vmul.f32 %v2110_v37, %v1526_v53 }
 0x203   : > { %v2112_v24 = vpop.eup %2111 }
 0x204   : > { %v1545_v39 = vadd.f32 1e-05, %v1413_v21  ;;  %v1674_v4 = vadd.f32 %v1633_v56, %v1574_v42  ;;  %v1576_v22 = vmul.f32 %v2112_v24, %v1528_v55 }
 0x206   : > { %2115 = vrsqrt.f32 %v1545_v39  ;;  %v1676_v5 = vadd.f32 %v1641_v10, %v1576_v22 }
 0x20a   : > { %v2114_v31 = vpop.eup %2113 }
 0x20b   : > { %v1575_v23 = vmul.f32 %v2114_v31, %v1527_v0 }
 0x20d   : > { %v1675_v35 = vadd.f32 %v1637_v34, %v1575_v23 }
 0x20f   : > { %v1745_v8 = vcombine.low %v1674_v4, %v1675_v35 }
 0x210   : > { %v2116_v30 = vpop.eup %2115 }
 0x211   : > { %v1577_v63 = vmul.f32 %v2116_v30, %v1529_v33  ;;  %v1753_v18 = vrot.slane %v1745_v8, %v2736_v3 }
 0x213   : > { %v1677_v14 = vadd.f32 %v1645_v46, %v1577_v63 }
 0x215   : > { %v1746_v50 = vcombine.low %v1676_v5, %v1677_v14 }
 0x217   : > { %v1760_v58 = vrot.slane %v1746_v50, %v2736_v3 }
 0x219   : > { %v1761_v61 = vcombine.low %v1753_v18, %v1760_v58 }
 0x21b   : > { %1769 = vst [vmem:[%s2950_s16 + $0x18] sm:$0xff] %v1761_v61 }
 0x21c PF: > { %p19_p3 = scmp.ge.s32.totalorder %s2370_s22, 6   ;;  %s3217_s18 = smov %s2299_s19 }
 0x21d   : > { %s3218_s19 = smov %s2303_s20  ;;  %s3219_s20 = smov %s2380_s25 }
 0x21e   : > { %s3220_s21 = smov %s2370_s22  ;;  %21 = sbr.rel (!%p19_p3) target bundleno = 9 (0x9), region = 120 }
 0x225   :  { %1792 = vsyncpa [#allocation3], 1 }
 0x226   :  { %1794 = vsyncpa [#allocation3 + $0x1], 1 }
 0x227   :  { %1795 = vsyncpa [#allocation5], 1 }
 0x228   :  { %1797 = vsyncpa [#allocation5 + $0x1], 1 }
 0x229   :  { %1798 = vsyncpa [#allocation8], 1 }
 0x22a   :  { %1800 = vsyncpa [#allocation8 + $0x1], 1 }

// kernel: generator_forward.4
= control target key start
LH: loop header
LB: loop body
LE: loop exit
PB: predicated region body
PF: predicated region fallthrough
CT: control target
= control target key end

     0   :  { %10 = vsyncpa [#allocation4], 0  ;;  %s5399_s0 = inlined_call_operand.vmem [shape: f32[2,8,8,128], index: 0, kind: input, shape index: {}]   ;;  %s5400_s1 = inlined_call_operand.vmem [shape: f32[1152,256], index: 1, kind: input, shape index: {}]   ;;  %s5401_s2 = inlined_call_operand.hbm [shape: f32[1,256], index: 2, kind: input, shape index: {}]   ;;  %s5402_s3 = inlined_call_operand.hbm [shape: f32[1,256], index: 3, kind: input, shape index: {}]   ;;  %s5403_s4 = inlined_call_operand.hbm [shape: f32[1,256], index: 4, kind: input, shape index: {}]   ;;  %s5404_s5 = inlined_call_operand.vmem [shape: f32[2,8,2,8,128], index: 5, kind: output, shape index: {}]  }
   0x1   :  { %11 = vsyncpa [#allocation6], 0  ;;  %s2847_s18 = smov [#allocation5]   ;;  %s2848_s20 = smov [#allocation3]  }
   0x2   :  { %s32_s19 = sshll.u32 %s2847_s18, 4  ;;  %s22_s21 = sshll.u32 %s2848_s20, 4  ;;  %s33_s19 = int_to_ptr.vmem [resolvable:$true] %s32_s19  ;;  %s23_s21 = int_to_ptr.vmem [resolvable:$true] %s22_s21 }
   0x3   :  { %s2777_s24 = scalar_lea.hbm %s5402_s3, 32 }
   0x4   :  { %p2778_p0 = scmp.ne.s32.totalorder %s5402_s3, %s2777_s24  ;;  %p2781_p1 = scmp.lt.u32.totalorder %s2777_s24, %s5402_s3 }
   0x6   :  { %p2783_p2 = pnand %p2781_p1, %p2778_p0 }
   0x8   :  { %2786 = shalt.err (!%p2783_p2)
}
   0x9   :  { %s2787_s29 = scalar_lea.vmem %s33_s19, 32  ;;  %p2792_p4 = scmp.lt.s32.totalorder %s33_s19, %s33_s19 }
   0xa   :  { %p2788_p3 = scmp.ne.s32.totalorder %s33_s19, %s2787_s29  ;;  %p2793_p5 = scmp.lt.s32.totalorder %s2787_s29, %s2787_s29 }
   0xc   :  { %p2794_p6 = por %p2793_p5, %p2792_p4 }
   0xe   :  { %p2795_p7 = pnand %p2794_p6, %p2788_p3 }
  0x10   :  { %2798 = shalt.err (!%p2795_p7)
}
  0x11   :  { %35 = dma.hbm_to_vmem [thread:$0]  %s5402_s3, 32, %s33_s19, [#allocation6]  }
  0x12   :  { %s2799_s9 = scalar_lea.hbm %s5401_s2, 32 }
  0x13   :  { %p2800_p8 = scmp.ne.s32.totalorder %s5401_s2, %s2799_s9  ;;  %p2803_p9 = scmp.lt.u32.totalorder %s2799_s9, %s5401_s2 }
  0x15   :  { %p2805_p10 = pnand %p2803_p9, %p2800_p8 }
  0x17   :  { %2808 = shalt.err (!%p2805_p10)
}
  0x18   :  { %s2809_s14 = scalar_lea.vmem %s23_s21, 32  ;;  %p2814_p12 = scmp.lt.s32.totalorder %s23_s21, %s23_s21 }
  0x19   :  { %p2810_p11 = scmp.ne.s32.totalorder %s23_s21, %s2809_s14  ;;  %p2815_p13 = scmp.lt.s32.totalorder %s2809_s14, %s2809_s14 }
  0x1b   :  { %p2816_p0 = por %p2815_p13, %p2814_p12 }
  0x1d   :  { %p2817_p1 = pnand %p2816_p0, %p2810_p11 }
  0x1f   :  { %2820 = shalt.err (!%p2817_p1)
}
  0x20   :  { %25 = dma.hbm_to_vmem [thread:$0]  %s5401_s2, 32, %s23_s21, [#allocation4]  }
  0x21   :  { %s2849_s16 = smov [#allocation7]   ;;  %s2821_s20 = scalar_lea.hbm %s5403_s4, 32 }
  0x22   :  { %s42_s17 = sshll.u32 %s2849_s16, 4  ;;  %p2822_p2 = scmp.ne.s32.totalorder %s5403_s4, %s2821_s20  ;;  %s43_s17 = int_to_ptr.vmem [resolvable:$true] %s42_s17 }
  0x23   :  { %p2825_p3 = scmp.lt.u32.totalorder %s2821_s20, %s5403_s4 }
  0x25   :  { %p2827_p4 = pnand %p2825_p3, %p2822_p2 }
  0x27   :  { %2830 = shalt.err (!%p2827_p4)
}
  0x28   :  { %s2831_s26 = scalar_lea.vmem %s43_s17, 32  ;;  %p2836_p6 = scmp.lt.s32.totalorder %s43_s17, %s43_s17 }
  0x29   :  { %p2832_p5 = scmp.ne.s32.totalorder %s43_s17, %s2831_s26  ;;  %p2837_p7 = scmp.lt.s32.totalorder %s2831_s26, %s2831_s26 }
  0x2b   :  { %p2838_p8 = por %p2837_p7, %p2836_p6 }
  0x2d   :  { %p2839_p9 = pnand %p2838_p8, %p2832_p5 }
  0x2f   :  { %2842 = shalt.err (!%p2839_p9)
}
  0x30   :  { %45 = dma.hbm_to_vmem [thread:$0]  %s5403_s4, 32, %s43_s17, [#allocation6]  }
  0x31   :  { %2843 = dma.done.wait [#allocation4], 32  }
  0x32   :  { %2844 = vsyncadd [#allocation4], 4294967264 }
  0x33   :  { %2845 = dma.done.wait [#allocation6], 64  }
  0x34   :  { %2846 = vsyncadd [#allocation6], 4294967232  ;;  %v2850_v0 = vmov 0.0   ;;  %v274_v1 = vld [vmem:[%s5400_s1 + $0x8] sm:$0xff]  ;;  %v276_v2 = vld [vmem:[%s5400_s1 + $0x18] sm:$0xff] }
  0x35   :  { %55 = vst [vmem:[#allocation2] sm:$0xff] %v2850_v0  ;;  %56 = vst [vmem:[#allocation2 + $0x8] sm:$0x3] %v2850_v0  ;;  %v402_v3 = vld [vmem:[%s5400_s1 + $0x408] sm:$0xff]  ;;  %v2190_v4 = vpack.c.bf16 %v276_v2, %v274_v1  ;;  %v404_v5 = vld [vmem:[%s5400_s1 + $0x418] sm:$0xff] }
  0x36   :  { %57 = vst [vmem:[#allocation2 + $0x10] sm:$0xff] %v2850_v0  ;;  %58 = vst [vmem:[#allocation2 + $0x18] sm:$0x3] %v2850_v0  ;;  %v273_v6 = vld [vmem:[%s5400_s1] sm:$0xff]  ;;  %v275_v7 = vld [vmem:[%s5400_s1 + $0x10] sm:$0xff]  ;;  %v2318_v8 = vpack.c.bf16 %v404_v5, %v402_v3 }
  0x37   :  { %59 = vst [vmem:[#allocation2 + $0x20] sm:$0xff] %v2850_v0  ;;  %60 = vst [vmem:[#allocation2 + $0x28] sm:$0x3] %v2850_v0  ;;  %v2192_v9 = vpack.c.bf16 %v275_v7, %v273_v6  ;;  %v401_v10 = vld [vmem:[%s5400_s1 + $0x400] sm:$0xff]  ;;  %v403_v11 = vld [vmem:[%s5400_s1 + $0x410] sm:$0xff]  ;;  %2191 = vmatprep.subr.bf16.mxu1 %v2190_v4 }
  0x38   :  { %61 = vst [vmem:[#allocation2 + $0x30] sm:$0xff] %v2850_v0  ;;  %62 = vst [vmem:[#allocation2 + $0x38] sm:$0x3] %v2850_v0  ;;  %v278_v12 = vld [vmem:[%s5400_s1 + $0x28] sm:$0xff]  ;;  %v2320_v13 = vpack.c.bf16 %v403_v11, %v401_v10  ;;  %v280_v14 = vld [vmem:[%s5400_s1 + $0x38] sm:$0xff]  ;;  %2319 = vmatprep.subr.bf16.mxu0 %v2318_v8 }
  0x39   :  { %63 = vst [vmem:[#allocation2 + $0x40] sm:$0xff] %v2850_v0  ;;  %64 = vst [vmem:[#allocation2 + $0x48] sm:$0x3] %v2850_v0  ;;  %v406_v15 = vld [vmem:[%s5400_s1 + $0x428] sm:$0xff]  ;;  %v408_v16 = vld [vmem:[%s5400_s1 + $0x438] sm:$0xff]  ;;  %2193 = vmatpush1.bf16.msra.mxu1 %v2192_v9  ;;  %v2194_v17 = vpack.c.bf16 %v280_v14, %v278_v12 }
  0x3a   :  { %65 = vst [vmem:[#allocation2 + $0x50] sm:$0xff] %v2850_v0  ;;  %66 = vst [vmem:[#allocation2 + $0x58] sm:$0x3] %v2850_v0  ;;  %v2322_v18 = vpack.c.bf16 %v408_v16, %v406_v15  ;;  %v277_v19 = vld [vmem:[%s5400_s1 + $0x20] sm:$0xff]  ;;  %v279_v20 = vld [vmem:[%s5400_s1 + $0x30] sm:$0xff]  ;;  %2321 = vmatpush1.bf16.msra.mxu0 %v2320_v13 }
  0x3b   :  { %67 = vst [vmem:[#allocation2 + $0x60] sm:$0xff] %v2850_v0  ;;  %68 = vst [vmem:[#allocation2 + $0x68] sm:$0x3] %v2850_v0  ;;  %v405_v21 = vld [vmem:[%s5400_s1 + $0x420] sm:$0xff]  ;;  %v2196_v22 = vpack.c.bf16 %v279_v20, %v277_v19  ;;  %v407_v23 = vld [vmem:[%s5400_s1 + $0x430] sm:$0xff]  ;;  %2195 = vmatprep.subr.bf16.mxu1 %v2194_v17 }
  0x3c   :  { %69 = vst [vmem:[#allocation2 + $0x70] sm:$0xff] %v2850_v0  ;;  %70 = vst [vmem:[#allocation2 + $0x78] sm:$0x3] %v2850_v0  ;;  %v282_v24 = vld [vmem:[%s5400_s1 + $0x48] sm:$0xff]  ;;  %v284_v25 = vld [vmem:[%s5400_s1 + $0x58] sm:$0xff]  ;;  %2323 = vmatprep.subr.bf16.mxu0 %v2322_v18  ;;  %v2324_v26 = vpack.c.bf16 %v407_v23, %v405_v21 }
  0x3d   :  { %71 = vst [vmem:[#allocation2 + $0x80] sm:$0xff] %v2850_v0  ;;  %72 = vst [vmem:[#allocation2 + $0x88] sm:$0x3] %v2850_v0  ;;  %v2198_v27 = vpack.c.bf16 %v284_v25, %v282_v24  ;;  %v410_v28 = vld [vmem:[%s5400_s1 + $0x448] sm:$0xff]  ;;  %v412_v29 = vld [vmem:[%s5400_s1 + $0x458] sm:$0xff]  ;;  %2197 = vmatpush1.bf16.msra.mxu1 %v2196_v22 }
  0x3e   :  { %73 = vst [vmem:[#allocation2 + $0x90] sm:$0xff] %v2850_v0  ;;  %74 = vst [vmem:[#allocation2 + $0x98] sm:$0x3] %v2850_v0  ;;  %v281_v30 = vld [vmem:[%s5400_s1 + $0x40] sm:$0xff]  ;;  %v2326_v31 = vpack.c.bf16 %v412_v29, %v410_v28  ;;  %v283_v32 = vld [vmem:[%s5400_s1 + $0x50] sm:$0xff]  ;;  %2325 = vmatpush1.bf16.msra.mxu0 %v2324_v26 }
  0x3f   :  { %75 = vst [vmem:[#allocation2 + $0xa0] sm:$0xff] %v2850_v0  ;;  %76 = vst [vmem:[#allocation2 + $0xa8] sm:$0x3] %v2850_v0  ;;  %v409_v33 = vld [vmem:[%s5400_s1 + $0x440] sm:$0xff]  ;;  %v411_v34 = vld [vmem:[%s5400_s1 + $0x450] sm:$0xff]  ;;  %v2200_v35 = vpack.c.bf16 %v283_v32, %v281_v30  ;;  %2199 = vmatprep.subr.bf16.mxu1 %v2198_v27 }
  0x40   :  { %77 = vst [vmem:[#allocation2 + $0xb0] sm:$0xff] %v2850_v0  ;;  %78 = vst [vmem:[#allocation2 + $0xb8] sm:$0x3] %v2850_v0  ;;  %v286_v36 = vld [vmem:[%s5400_s1 + $0x68] sm:$0xff]  ;;  %v288_v37 = vld [vmem:[%s5400_s1 + $0x78] sm:$0xff]  ;;  %v2328_v39 = vpack.c.bf16 %v411_v34, %v409_v33  ;;  %2327 = vmatprep.subr.bf16.mxu0 %v2326_v31 }
  0x41   :  { %79 = vst [vmem:[#allocation2 + $0xc0] sm:$0xff] %v2850_v0  ;;  %80 = vst [vmem:[#allocation2 + $0xc8] sm:$0x3] %v2850_v0  ;;  %v414_v38 = vld [vmem:[%s5400_s1 + $0x468] sm:$0xff]  ;;  %v2202_v40 = vpack.c.bf16 %v288_v37, %v286_v36  ;;  %v416_v41 = vld [vmem:[%s5400_s1 + $0x478] sm:$0xff]  ;;  %2201 = vmatpush1.bf16.msra.mxu1 %v2200_v35 }
  0x42   :  { %81 = vst [vmem:[#allocation2 + $0xd0] sm:$0xff] %v2850_v0  ;;  %82 = vst [vmem:[#allocation2 + $0xd8] sm:$0x3] %v2850_v0  ;;  %v285_v42 = vld [vmem:[%s5400_s1 + $0x60] sm:$0xff]  ;;  %v287_v43 = vld [vmem:[%s5400_s1 + $0x70] sm:$0xff]  ;;  %v2330_v44 = vpack.c.bf16 %v416_v41, %v414_v38  ;;  %2329 = vmatpush1.bf16.msra.mxu0 %v2328_v39 }
  0x43   :  { %83 = vst [vmem:[#allocation2 + $0xe0] sm:$0xff] %v2850_v0  ;;  %84 = vst [vmem:[#allocation2 + $0xe8] sm:$0x3] %v2850_v0  ;;  %v413_v45 = vld [vmem:[%s5400_s1 + $0x460] sm:$0xff]  ;;  %v415_v46 = vld [vmem:[%s5400_s1 + $0x470] sm:$0xff]  ;;  %v2204_v51 = vpack.c.bf16 %v287_v43, %v285_v42  ;;  %2203 = vmatprep.subr.bf16.mxu1 %v2202_v40 }
  0x44   :  { %85 = vst [vmem:[#allocation2 + $0xf0] sm:$0xff] %v2850_v0  ;;  %86 = vst [vmem:[#allocation2 + $0xf8] sm:$0x3] %v2850_v0  ;;  %v290_v47 = vld [vmem:[%s5400_s1 + $0x88] sm:$0xff]  ;;  %v292_v48 = vld [vmem:[%s5400_s1 + $0x98] sm:$0xff]  ;;  %v2332_v52 = vpack.c.bf16 %v415_v46, %v413_v45  ;;  %2331 = vmatprep.subr.bf16.mxu0 %v2330_v44 }
  0x45   :  { %87 = vst [vmem:[#allocation2 + $0x100] sm:$0xff] %v2850_v0  ;;  %88 = vst [vmem:[#allocation2 + $0x108] sm:$0x3] %v2850_v0  ;;  %v418_v49 = vld [vmem:[%s5400_s1 + $0x488] sm:$0xff]  ;;  %v420_v50 = vld [vmem:[%s5400_s1 + $0x498] sm:$0xff]  ;;  %v2206_v53 = vpack.c.bf16 %v292_v48, %v290_v47  ;;  %2205 = vmatpush1.bf16.msra.mxu1 %v2204_v51 }
  0x46   :  { %89 = vst [vmem:[#allocation2 + $0x110] sm:$0xff] %v2850_v0  ;;  %90 = vst [vmem:[#allocation2 + $0x118] sm:$0x3] %v2850_v0  ;;  %v289_v54 = vld [vmem:[%s5400_s1 + $0x80] sm:$0xff]  ;;  %v291_v55 = vld [vmem:[%s5400_s1 + $0x90] sm:$0xff]  ;;  %v2334_v57 = vpack.c.bf16 %v420_v50, %v418_v49  ;;  %2333 = vmatpush1.bf16.msra.mxu0 %v2332_v52 }
  0x47   :  { %91 = vst [vmem:[#allocation2 + $0x120] sm:$0xff] %v2850_v0  ;;  %92 = vst [vmem:[#allocation2 + $0x128] sm:$0x3] %v2850_v0  ;;  %v417_v56 = vld [vmem:[%s5400_s1 + $0x480] sm:$0xff]  ;;  %v419_v58 = vld [vmem:[%s5400_s1 + $0x490] sm:$0xff]  ;;  %v2208_v63 = vpack.c.bf16 %v291_v55, %v289_v54  ;;  %2207 = vmatprep.subr.bf16.mxu1 %v2206_v53 }
  0x48   :  { %93 = vst [vmem:[#allocation2 + $0x130] sm:$0xff] %v2850_v0  ;;  %94 = vst [vmem:[#allocation2 + $0x138] sm:$0x3] %v2850_v0  ;;  %v294_v59 = vld [vmem:[%s5400_s1 + $0xa8] sm:$0xff]  ;;  %v296_v60 = vld [vmem:[%s5400_s1 + $0xb8] sm:$0xff]  ;;  %v2336_v1 = vpack.c.bf16 %v419_v58, %v417_v56  ;;  %2335 = vmatprep.subr.bf16.mxu0 %v2334_v57 }
  0x49   :  { %v422_v61 = vld [vmem:[%s5400_s1 + $0x4a8] sm:$0xff]  ;;  %v424_v62 = vld [vmem:[%s5400_s1 + $0x4b8] sm:$0xff]  ;;  %v2210_v2 = vpack.c.bf16 %v296_v60, %v294_v59  ;;  %v293_v3 = vld [vmem:[%s5400_s1 + $0xa0] sm:$0xff]  ;;  %2209 = vmatpush1.bf16.msra.mxu1 %v2208_v63 }
  0x4a   :  { %v295_v4 = vld [vmem:[%s5400_s1 + $0xb0] sm:$0xff]  ;;  %v421_v5 = vld [vmem:[%s5400_s1 + $0x4a0] sm:$0xff]  ;;  %v2338_v6 = vpack.c.bf16 %v424_v62, %v422_v61  ;;  %v298_v8 = vld [vmem:[%s5400_s1 + $0xc8] sm:$0xff]  ;;  %2337 = vmatpush1.bf16.msra.mxu0 %v2336_v1 }
  0x4b   :  { %v423_v7 = vld [vmem:[%s5400_s1 + $0x4b0] sm:$0xff]  ;;  %v300_v9 = vld [vmem:[%s5400_s1 + $0xd8] sm:$0xff]  ;;  %v426_v10 = vld [vmem:[%s5400_s1 + $0x4c8] sm:$0xff]  ;;  %v2212_v12 = vpack.c.bf16 %v295_v4, %v293_v3  ;;  %2211 = vmatprep.subr.bf16.mxu1 %v2210_v2 }
  0x4c   :  { %v428_v11 = vld [vmem:[%s5400_s1 + $0x4d8] sm:$0xff]  ;;  %v2340_v13 = vpack.c.bf16 %v423_v7, %v421_v5  ;;  %v2214_v14 = vpack.c.bf16 %v300_v9, %v298_v8  ;;  %v297_v15 = vld [vmem:[%s5400_s1 + $0xc0] sm:$0xff]  ;;  %v299_v16 = vld [vmem:[%s5400_s1 + $0xd0] sm:$0xff]  ;;  %2339 = vmatprep.subr.bf16.mxu0 %v2338_v6 }
  0x4d   :  { %v425_v17 = vld [vmem:[%s5400_s1 + $0x4c0] sm:$0xff]  ;;  %v2342_v18 = vpack.c.bf16 %v428_v11, %v426_v10  ;;  %v427_v19 = vld [vmem:[%s5400_s1 + $0x4d0] sm:$0xff]  ;;  %v302_v20 = vld [vmem:[%s5400_s1 + $0xe8] sm:$0xff]  ;;  %2213 = vmatpush1.bf16.msra.mxu1 %v2212_v12  ;;  %v2216_v24 = vpack.c.bf16 %v299_v16, %v297_v15 }
  0x4e   :  { %v304_v21 = vld [vmem:[%s5400_s1 + $0xf8] sm:$0xff]  ;;  %v430_v22 = vld [vmem:[%s5400_s1 + $0x4e8] sm:$0xff]  ;;  %2341 = vmatpush1.bf16.msra.mxu0 %v2340_v13  ;;  %2215 = vmatprep.subr.bf16.mxu1 %v2214_v14  ;;  %v2344_v25 = vpack.c.bf16 %v427_v19, %v425_v17  ;;  %v301_v27 = vld [vmem:[%s5400_s1 + $0xe0] sm:$0xff] }
  0x4f   :  { %v432_v23 = vld [vmem:[%s5400_s1 + $0x4f8] sm:$0xff]  ;;  %v2218_v26 = vpack.c.bf16 %v304_v21, %v302_v20  ;;  %v303_v28 = vld [vmem:[%s5400_s1 + $0xf0] sm:$0xff]  ;;  %v429_v29 = vld [vmem:[%s5400_s1 + $0x4e0] sm:$0xff]  ;;  %2343 = vmatprep.subr.bf16.mxu0 %v2342_v18 }
  0x50   :  { %v2346_v30 = vpack.c.bf16 %v432_v23, %v430_v22  ;;  %v431_v31 = vld [vmem:[%s5400_s1 + $0x4f0] sm:$0xff]  ;;  %v306_v32 = vld [vmem:[%s5400_s1 + $0x108] sm:$0xff]  ;;  %v308_v33 = vld [vmem:[%s5400_s1 + $0x118] sm:$0xff]  ;;  %v2220_v36 = vpack.c.bf16 %v303_v28, %v301_v27 }
  0x51   :  { %v434_v34 = vld [vmem:[%s5400_s1 + $0x508] sm:$0xff]  ;;  %v436_v35 = vld [vmem:[%s5400_s1 + $0x518] sm:$0xff]  ;;  %2217 = vmatpush1.bf16.msra.mxu1 %v2216_v24  ;;  %v2348_v37 = vpack.c.bf16 %v431_v31, %v429_v29  ;;  %v2222_v38 = vpack.c.bf16 %v308_v33, %v306_v32  ;;  %v305_v39 = vld [vmem:[%s5400_s1 + $0x100] sm:$0xff] }
  0x52   :  { %2345 = vmatpush1.bf16.msra.mxu0 %v2344_v25  ;;  %2219 = vmatprep.subr.bf16.mxu1 %v2218_v26  ;;  %v307_v40 = vld [vmem:[%s5400_s1 + $0x110] sm:$0xff]  ;;  %v433_v41 = vld [vmem:[%s5400_s1 + $0x500] sm:$0xff]  ;;  %v2350_v42 = vpack.c.bf16 %v436_v35, %v434_v34  ;;  %v310_v44 = vld [vmem:[%s5400_s1 + $0x128] sm:$0xff] }
  0x53   :  { %2347 = vmatprep.subr.bf16.mxu0 %v2346_v30  ;;  %v435_v43 = vld [vmem:[%s5400_s1 + $0x510] sm:$0xff]  ;;  %v312_v45 = vld [vmem:[%s5400_s1 + $0x138] sm:$0xff]  ;;  %v438_v46 = vld [vmem:[%s5400_s1 + $0x528] sm:$0xff]  ;;  %v2224_v48 = vpack.c.bf16 %v307_v40, %v305_v39 }
  0x54   :  { %v440_v47 = vld [vmem:[%s5400_s1 + $0x538] sm:$0xff]  ;;  %v2352_v49 = vpack.c.bf16 %v435_v43, %v433_v41  ;;  %v2226_v50 = vpack.c.bf16 %v312_v45, %v310_v44  ;;  %v309_v51 = vld [vmem:[%s5400_s1 + $0x120] sm:$0xff]  ;;  %v311_v52 = vld [vmem:[%s5400_s1 + $0x130] sm:$0xff] }
  0x55   :  { %2221 = vmatpush1.bf16.msra.mxu1 %v2220_v36  ;;  %v437_v53 = vld [vmem:[%s5400_s1 + $0x520] sm:$0xff]  ;;  %v2354_v54 = vpack.c.bf16 %v440_v47, %v438_v46  ;;  %v439_v55 = vld [vmem:[%s5400_s1 + $0x530] sm:$0xff]  ;;  %v314_v56 = vld [vmem:[%s5400_s1 + $0x148] sm:$0xff]  ;;  %v2228_v60 = vpack.c.bf16 %v311_v52, %v309_v51 }
  0x56   :  { %2349 = vmatpush1.bf16.msra.mxu0 %v2348_v37  ;;  %2223 = vmatprep.subr.bf16.mxu1 %v2222_v38  ;;  %v316_v57 = vld [vmem:[%s5400_s1 + $0x158] sm:$0xff]  ;;  %v442_v58 = vld [vmem:[%s5400_s1 + $0x548] sm:$0xff]  ;;  %v2356_v61 = vpack.c.bf16 %v439_v55, %v437_v53  ;;  %v313_v63 = vld [vmem:[%s5400_s1 + $0x140] sm:$0xff] }
  0x57   :  { %2351 = vmatprep.subr.bf16.mxu0 %v2350_v42  ;;  %v444_v59 = vld [vmem:[%s5400_s1 + $0x558] sm:$0xff]  ;;  %v2230_v62 = vpack.c.bf16 %v316_v57, %v314_v56  ;;  %v315_v1 = vld [vmem:[%s5400_s1 + $0x150] sm:$0xff]  ;;  %v441_v2 = vld [vmem:[%s5400_s1 + $0x540] sm:$0xff] }
  0x58   :  { %v2358_v3 = vpack.c.bf16 %v444_v59, %v442_v58  ;;  %v443_v4 = vld [vmem:[%s5400_s1 + $0x550] sm:$0xff]  ;;  %v318_v5 = vld [vmem:[%s5400_s1 + $0x168] sm:$0xff]  ;;  %v320_v6 = vld [vmem:[%s5400_s1 + $0x178] sm:$0xff]  ;;  %v2232_v9 = vpack.c.bf16 %v315_v1, %v313_v63 }
  0x59   :  { %2225 = vmatpush1.bf16.msra.mxu1 %v2224_v48  ;;  %v446_v7 = vld [vmem:[%s5400_s1 + $0x568] sm:$0xff]  ;;  %v448_v8 = vld [vmem:[%s5400_s1 + $0x578] sm:$0xff]  ;;  %v317_v10 = vld [vmem:[%s5400_s1 + $0x160] sm:$0xff]  ;;  %v2360_v11 = vpack.c.bf16 %v443_v4, %v441_v2  ;;  %v2234_v12 = vpack.c.bf16 %v320_v6, %v318_v5 }
  0x5a   :  { %2353 = vmatpush1.bf16.msra.mxu0 %v2352_v49  ;;  %2227 = vmatprep.subr.bf16.mxu1 %v2226_v50  ;;  %v319_v13 = vld [vmem:[%s5400_s1 + $0x170] sm:$0xff]  ;;  %v445_v14 = vld [vmem:[%s5400_s1 + $0x560] sm:$0xff]  ;;  %v2362_v16 = vpack.c.bf16 %v448_v8, %v446_v7  ;;  %v322_v17 = vld [vmem:[%s5400_s1 + $0x188] sm:$0xff] }
  0x5b   :  { %2355 = vmatprep.subr.bf16.mxu0 %v2354_v54  ;;  %v447_v15 = vld [vmem:[%s5400_s1 + $0x570] sm:$0xff]  ;;  %v324_v18 = vld [vmem:[%s5400_s1 + $0x198] sm:$0xff]  ;;  %v450_v20 = vld [vmem:[%s5400_s1 + $0x588] sm:$0xff]  ;;  %v2236_v23 = vpack.c.bf16 %v319_v13, %v317_v10 }
  0x5c   :  { %v144_v19 = vld [vmem:[#allocation2 + $0x1] sm:$0xff]  ;;  %v3262_v22 = vld [vmem:[%s5399_s0] sm:$0xff]  ;;  %v2364_v25 = vpack.c.bf16 %v447_v15, %v445_v14  ;;  %v2238_v26 = vpack.c.bf16 %v324_v18, %v322_v17  ;;  %v326_v31 = vld [vmem:[%s5400_s1 + $0x1a8] sm:$0xff] }
  0x5d   :  { %2229 = vmatpush1.bf16.msra.mxu1 %v2228_v60  ;;  %v452_v21 = vld [vmem:[%s5400_s1 + $0x598] sm:$0xff]  ;;  %637 = vmatprep.mubr.f32.mxu1 %v144_v19  ;;  %v321_v24 = vld [vmem:[%s5400_s1 + $0x180] sm:$0xff]  ;;  %112 = vst [vmem:[#allocation2 + $0x11] sm:$0xff] %v3262_v22  ;;  %v323_v27 = vld [vmem:[%s5400_s1 + $0x190] sm:$0xff] }
  0x5e   :  { %2357 = vmatpush1.bf16.msra.mxu0 %v2356_v61  ;;  %2231 = vmatprep.subr.bf16.mxu1 %v2230_v62  ;;  %v449_v28 = vld [vmem:[%s5400_s1 + $0x580] sm:$0xff]  ;;  %v451_v29 = vld [vmem:[%s5400_s1 + $0x590] sm:$0xff]  ;;  %v2366_v30 = vpack.c.bf16 %v452_v21, %v450_v20  ;;  %v328_v32 = vld [vmem:[%s5400_s1 + $0x1b8] sm:$0xff]  ;;  %v2240_v36 = vpack.c.bf16 %v323_v27, %v321_v24 }
  0x5f   :  { %2359 = vmatprep.subr.bf16.mxu0 %v2358_v3  ;;  %v3286_v33 = vld [vmem:[%s5399_s0 + $0x8] sm:$0xff]  ;;  %v456_v35 = vld [vmem:[%s5400_s1 + $0x5b8] sm:$0xff]  ;;  %v325_v37 = vld [vmem:[%s5400_s1 + $0x1a0] sm:$0xff]  ;;  %v2368_v38 = vpack.c.bf16 %v451_v29, %v449_v28  ;;  %v2242_v39 = vpack.c.bf16 %v328_v32, %v326_v31 }
  0x60   :  { %v454_v34 = vld [vmem:[%s5400_s1 + $0x5a8] sm:$0xff]  ;;  %113 = vst [vmem:[#allocation2 + $0x21] sm:$0xff] %v3286_v33  ;;  %v327_v40 = vld [vmem:[%s5400_s1 + $0x1b0] sm:$0xff]  ;;  %v453_v41 = vld [vmem:[%s5400_s1 + $0x5a0] sm:$0xff] }
  0x61   :  { %2233 = vmatpush1.bf16.msra.mxu1 %v2232_v9  ;;  %v3307_v42 = vld [vmem:[%s5399_s0 + $0x10] sm:$0xff]  ;;  %v2370_v43 = vpack.c.bf16 %v456_v35, %v454_v34  ;;  %v330_v45 = vld [vmem:[%s5400_s1 + $0x1c8] sm:$0xff]  ;;  %v332_v46 = vld [vmem:[%s5400_s1 + $0x1d8] sm:$0xff]  ;;  %v2244_v50 = vpack.c.bf16 %v327_v40, %v325_v37 }
  0x62   :  { %2361 = vmatpush1.bf16.msra.mxu0 %v2360_v11  ;;  %2235 = vmatprep.subr.bf16.mxu1 %v2234_v12  ;;  %v455_v44 = vld [vmem:[%s5400_s1 + $0x5b0] sm:$0xff]  ;;  %114 = vst [vmem:[#allocation2 + $0x31] sm:$0xff] %v3307_v42  ;;  %v458_v47 = vld [vmem:[%s5400_s1 + $0x5c8] sm:$0xff]  ;;  %v460_v48 = vld [vmem:[%s5400_s1 + $0x5d8] sm:$0xff]  ;;  %v2246_v53 = vpack.c.bf16 %v332_v46, %v330_v45 }
  0x63   :  { %2363 = vmatprep.subr.bf16.mxu0 %v2362_v16  ;;  %v3331_v51 = vld [vmem:[%s5399_s0 + $0x18] sm:$0xff]  ;;  %v2372_v52 = vpack.c.bf16 %v455_v44, %v453_v41  ;;  %v329_v54 = vld [vmem:[%s5400_s1 + $0x1c0] sm:$0xff]  ;;  %v331_v55 = vld [vmem:[%s5400_s1 + $0x1d0] sm:$0xff]  ;;  %v2374_v57 = vpack.c.bf16 %v460_v48, %v458_v47 }
  0x64   :  { %v3325_v49 = vld [vmem:[#allocation2 + $0x12] sm:$0xff]  ;;  %115 = vst [vmem:[#allocation2 + $0x41] sm:$0xff] %v3331_v51  ;;  %v459_v58 = vld [vmem:[%s5400_s1 + $0x5d0] sm:$0xff]  ;;  %v336_v60 = vld [vmem:[%s5400_s1 + $0x1f8] sm:$0xff]  ;;  %v2248_v63 = vpack.c.bf16 %v331_v55, %v329_v54 }
  0x65   :  { %2237 = vmatpush1.bf16.msra.mxu1 %v2236_v23  ;;  %959 = vmatprep.mubr.f32.mxu0 %v3325_v49  ;;  %v457_v56 = vld [vmem:[%s5400_s1 + $0x5c0] sm:$0xff]  ;;  %v334_v59 = vld [vmem:[%s5400_s1 + $0x1e8] sm:$0xff]  ;;  %v464_v62 = vld [vmem:[%s5400_s1 + $0x5f8] sm:$0xff] }
  0x66   :  { %2365 = vmatpush1.bf16.msra.mxu0 %v2364_v25  ;;  %2239 = vmatprep.subr.bf16.mxu1 %v2238_v26  ;;  %v462_v61 = vld [vmem:[%s5400_s1 + $0x5e8] sm:$0xff]  ;;  %v3361_v1 = vld [vmem:[%s5399_s0 + $0x20] sm:$0xff]  ;;  %v2376_v2 = vpack.c.bf16 %v459_v58, %v457_v56  ;;  %v2250_v3 = vpack.c.bf16 %v336_v60, %v334_v59  ;;  %v335_v5 = vld [vmem:[%s5400_s1 + $0x1f0] sm:$0xff] }
  0x67   :  { %2367 = vmatprep.subr.bf16.mxu0 %v2366_v30  ;;  %v333_v4 = vld [vmem:[%s5400_s1 + $0x1e0] sm:$0xff]  ;;  %116 = vst [vmem:[#allocation2 + $0x51] sm:$0xff] %v3361_v1  ;;  %v2378_v7 = vpack.c.bf16 %v464_v62, %v462_v61  ;;  %v463_v8 = vld [vmem:[%s5400_s1 + $0x5f0] sm:$0xff]  ;;  %v338_v9 = vld [vmem:[%s5400_s1 + $0x208] sm:$0xff] }
  0x68   :  { %v461_v6 = vld [vmem:[%s5400_s1 + $0x5e0] sm:$0xff]  ;;  %v340_v10 = vld [vmem:[%s5400_s1 + $0x218] sm:$0xff]  ;;  %v466_v11 = vld [vmem:[%s5400_s1 + $0x608] sm:$0xff]  ;;  %v2252_v13 = vpack.c.bf16 %v335_v5, %v333_v4 }
  0x69   :  { %2241 = vmatpush1.bf16.msra.mxu1 %v2240_v36  ;;  %v468_v12 = vld [vmem:[%s5400_s1 + $0x618] sm:$0xff]  ;;  %v3391_v14 = vld [vmem:[%s5399_s0 + $0x28] sm:$0xff]  ;;  %v2380_v15 = vpack.c.bf16 %v463_v8, %v461_v6  ;;  %v2254_v16 = vpack.c.bf16 %v340_v10, %v338_v9  ;;  %v337_v17 = vld [vmem:[%s5400_s1 + $0x200] sm:$0xff] }
  0x6a   :  { %2369 = vmatpush1.bf16.msra.mxu0 %v2368_v38  ;;  %2243 = vmatprep.subr.bf16.mxu1 %v2242_v39  ;;  %v339_v18 = vld [vmem:[%s5400_s1 + $0x210] sm:$0xff]  ;;  %117 = vst [vmem:[#allocation2 + $0x61] sm:$0xff] %v3391_v14  ;;  %v2382_v19 = vpack.c.bf16 %v468_v12, %v466_v11  ;;  %v465_v20 = vld [vmem:[%s5400_s1 + $0x600] sm:$0xff]  ;;  %v342_v23 = vld [vmem:[%s5400_s1 + $0x228] sm:$0xff] }
  0x6b   :  { %2371 = vmatprep.subr.bf16.mxu0 %v2370_v43  ;;  %v467_v21 = vld [vmem:[%s5400_s1 + $0x610] sm:$0xff]  ;;  %v344_v24 = vld [vmem:[%s5400_s1 + $0x238] sm:$0xff]  ;;  %v2256_v26 = vpack.c.bf16 %v339_v18, %v337_v17  ;;  %v470_v27 = vld [vmem:[%s5400_s1 + $0x628] sm:$0xff] }
  0x6c   :  { %v3415_v25 = vld [vmem:[%s5399_s0 + $0x30] sm:$0xff]  ;;  %v472_v28 = vld [vmem:[%s5400_s1 + $0x638] sm:$0xff]  ;;  %v2384_v29 = vpack.c.bf16 %v467_v21, %v465_v20  ;;  %v341_v30 = vld [vmem:[%s5400_s1 + $0x220] sm:$0xff]  ;;  %v2258_v32 = vpack.c.bf16 %v344_v24, %v342_v23 }
  0x6d   :  { %2245 = vmatpush1.bf16.msra.mxu1 %v2244_v50  ;;  %118 = vst [vmem:[#allocation2 + $0x71] sm:$0xff] %v3415_v25  ;;  %v343_v31 = vld [vmem:[%s5400_s1 + $0x230] sm:$0xff]  ;;  %v469_v34 = vld [vmem:[%s5400_s1 + $0x620] sm:$0xff]  ;;  %v346_v36 = vld [vmem:[%s5400_s1 + $0x248] sm:$0xff]  ;;  %v2386_v38 = vpack.c.bf16 %v472_v28, %v470_v27 }
  0x6e   :  { %2373 = vmatpush1.bf16.msra.mxu0 %v2372_v52  ;;  %2247 = vmatprep.subr.bf16.mxu1 %v2246_v53  ;;  %v471_v35 = vld [vmem:[%s5400_s1 + $0x630] sm:$0xff]  ;;  %v348_v39 = vld [vmem:[%s5400_s1 + $0x258] sm:$0xff]  ;;  %v3451_v41 = vld [vmem:[#allocation2 + $0x10] sm:$0xff]  ;;  %v2260_v43 = vpack.c.bf16 %v343_v31, %v341_v30 }
  0x6f   :  { %2375 = vmatprep.subr.bf16.mxu0 %v2374_v57  ;;  %v3440_v37 = vld [vmem:[#allocation2 + $0x22] sm:$0xff]  ;;  %v2388_v45 = vpack.c.bf16 %v471_v35, %v469_v34  ;;  %v345_v46 = vld [vmem:[%s5400_s1 + $0x240] sm:$0xff]  ;;  %v2262_v48 = vpack.c.bf16 %v348_v39, %v346_v36  ;;  %v350_v52 = vld [vmem:[%s5400_s1 + $0x268] sm:$0xff] }
  0x70   :  { %v3448_v40 = vld [vmem:[%s5399_s0 + $0x38] sm:$0xff]  ;;  %v347_v47 = vld [vmem:[%s5400_s1 + $0x250] sm:$0xff]  ;;  %v473_v50 = vld [vmem:[%s5400_s1 + $0x640] sm:$0xff] }
  0x71   :  { %2249 = vmatpush1.bf16.msra.mxu1 %v2248_v63  ;;  %v476_v44 = vld [vmem:[%s5400_s1 + $0x658] sm:$0xff]  ;;  %119 = vst [vmem:[#allocation2 + $0x81] sm:$0xff] %v3448_v40  ;;  %v3478_v53 = vld [vmem:[#allocation2 + $0x32] sm:$0xff]  ;;  %v3487_v57 = vld [vmem:[#allocation2 + $0x20] sm:$0xff]  ;;  %v2264_v58 = vpack.c.bf16 %v347_v47, %v345_v46 }
  0x72   :  { %2377 = vmatpush1.bf16.msra.mxu0 %v2376_v2  ;;  %2251 = vmatprep.subr.bf16.mxu1 %v2250_v3  ;;  %v352_v55 = vld [vmem:[%s5400_s1 + $0x278] sm:$0xff]  ;;  %v478_v56 = vld [vmem:[%s5400_s1 + $0x668] sm:$0xff]  ;;  %v3495_v60 = vld [vmem:[%s5399_s0 + $0x40] sm:$0xff] }
  0x73   :  { %2379 = vmatprep.subr.bf16.mxu0 %v2378_v7  ;;  %v480_v59 = vld [vmem:[%s5400_s1 + $0x678] sm:$0xff]  ;;  %v349_v62 = vld [vmem:[%s5400_s1 + $0x260] sm:$0xff]  ;;  %v351_v63 = vld [vmem:[%s5400_s1 + $0x270] sm:$0xff]  ;;  %120 = vst [vmem:[#allocation2 + $0xb1] sm:$0xff] %v3495_v60  ;;  %v2266_v2 = vpack.c.bf16 %v352_v55, %v350_v52 }
  0x74   :  { %v477_v3 = vld [vmem:[%s5400_s1 + $0x660] sm:$0xff]  ;;  %v479_v4 = vld [vmem:[%s5400_s1 + $0x670] sm:$0xff]  ;;  %v354_v5 = vld [vmem:[%s5400_s1 + $0x288] sm:$0xff]  ;;  %v2394_v7 = vpack.c.bf16 %v480_v59, %v478_v56  ;;  %v2268_v11 = vpack.c.bf16 %v351_v63, %v349_v62 }
  0x75   :  { %2253 = vmatpush1.bf16.msra.mxu1 %v2252_v13  ;;  %v3516_v6 = vld [vmem:[#allocation2 + $0x42] sm:$0xff]  ;;  %v3524_v9 = vld [vmem:[%s5399_s0 + $0x48] sm:$0xff]  ;;  %v3527_v10 = vld [vmem:[#allocation2 + $0x30] sm:$0xff] }
  0x76   :  { %2381 = vmatpush1.bf16.msra.mxu0 %v2380_v15  ;;  %2255 = vmatprep.subr.bf16.mxu1 %v2254_v16  ;;  %v356_v8 = vld [vmem:[%s5400_s1 + $0x298] sm:$0xff]  ;;  %v482_v12 = vld [vmem:[%s5400_s1 + $0x688] sm:$0xff]  ;;  %121 = vst [vmem:[#allocation2 + $0xc1] sm:$0xff] %v3524_v9  ;;  %v2396_v15 = vpack.c.bf16 %v479_v4, %v477_v3  ;;  %v353_v16 = vld [vmem:[%s5400_s1 + $0x280] sm:$0xff] }
  0x77   :  { %2383 = vmatprep.subr.bf16.mxu0 %v2382_v19  ;;  %v484_v13 = vld [vmem:[%s5400_s1 + $0x698] sm:$0xff]  ;;  %v355_v17 = vld [vmem:[%s5400_s1 + $0x290] sm:$0xff]  ;;  %v2270_v18 = vpack.c.bf16 %v356_v8, %v354_v5  ;;  %v481_v19 = vld [vmem:[%s5400_s1 + $0x680] sm:$0xff] }
  0x78   :  { %638 = vmatmul.mubr.f32.vlgmr.msra.gmra.mrb[0].mxu1 %v2850_v0  ;;  %v474_v0 = vld [vmem:[%s5400_s1 + $0x648] sm:$0xff]  ;;  %v483_v20 = vld [vmem:[%s5400_s1 + $0x690] sm:$0xff]  ;;  %v2398_v24 = vpack.c.bf16 %v484_v13, %v482_v12  ;;  %v360_v27 = vld [vmem:[%s5400_s1 + $0x2b8] sm:$0xff] }
  0x79   :  { %960 = vmatmul.mubr.f32.vlgmr.msra.gmra.mrb[0].mxu0 %v3262_v22  ;;  %2257 = vmatpush1.bf16.msra.mxu1 %v2256_v26  ;;  %v2390_v54 = vpack.c.bf16 %v476_v44, %v474_v0  ;;  %v3553_v21 = vld [vmem:[%s5399_s0 + $0x50] sm:$0xff]  ;;  %v3556_v23 = vld [vmem:[#allocation2 + $0x52] sm:$0xff]  ;;  %v488_v31 = vld [vmem:[%s5400_s1 + $0x6b8] sm:$0xff] }
  0x7a   :  { %2385 = vmatpush1.bf16.msra.mxu0 %v2384_v29  ;;  %643 = vmatprep.mubr.f32.mxu1 %v3262_v22  ;;  %v475_v22 = vld [vmem:[%s5400_s1 + $0x650] sm:$0xff]  ;;  %v358_v26 = vld [vmem:[%s5400_s1 + $0x2a8] sm:$0xff]  ;;  %122 = vst [vmem:[#allocation2 + $0xd1] sm:$0xff] %v3553_v21  ;;  %v2272_v29 = vpack.c.bf16 %v355_v17, %v353_v16  ;;  %v357_v34 = vld [vmem:[%s5400_s1 + $0x2a0] sm:$0xff] }
  0x7b   :  { %965 = vmatprep.mubr.f32.mxu0 %v3440_v37  ;;  %2259 = vmatprep.subr.bf16.mxu1 %v2258_v32  ;;  %v2392_v61 = vpack.c.bf16 %v475_v22, %v473_v50  ;;  %v3566_v28 = vld [vmem:[#allocation2 + $0x40] sm:$0xff]  ;;  %v486_v30 = vld [vmem:[%s5400_s1 + $0x6a8] sm:$0xff]  ;;  %v2400_v32 = vpack.c.bf16 %v483_v20, %v481_v19  ;;  %v2274_v36 = vpack.c.bf16 %v360_v27, %v358_v26  ;;  %v364_v46 = vld [vmem:[%s5400_s1 + $0x2d8] sm:$0xff] }
  0x7c   :  { %644 = vmatmul.mubr.f32.gmra.mrb[2].mxu1 %v3451_v41  ;;  %2387 = vmatprep.subr.bf16.mxu0 %v2386_v38  ;;  %v359_v35 = vld [vmem:[%s5400_s1 + $0x2b0] sm:$0xff]  ;;  %v485_v38 = vld [vmem:[%s5400_s1 + $0x6a0] sm:$0xff]  ;;  %v2402_v44 = vpack.c.bf16 %v488_v31, %v486_v30  ;;  %v490_v50 = vld [vmem:[%s5400_s1 + $0x6c8] sm:$0xff] }
  0x7d   :  { %966 = vmatmul.mubr.f32.gmra.mrb[2].mxu0 %v3286_v33  ;;  %2261 = vmatpush1.bf16.msra.mxu1 %v2260_v43  ;;  %v487_v39 = vld [vmem:[%s5400_s1 + $0x6b0] sm:$0xff]  ;;  %v3591_v43 = vld [vmem:[%s5399_s0 + $0x58] sm:$0xff]  ;;  %v3604_v47 = vld [vmem:[#allocation2 + $0x50] sm:$0xff] }
  0x7e   :  { %2389 = vmatpush1.bf16.msra.mxu0 %v2388_v45  ;;  %649 = vmatprep.mubr.f32.mxu1 %v3286_v33  ;;  %v3594_v0 = vld [vmem:[#allocation2 + $0x62] sm:$0xff]  ;;  %v362_v45 = vld [vmem:[%s5400_s1 + $0x2c8] sm:$0xff]  ;;  %123 = vst [vmem:[#allocation2 + $0xe1] sm:$0xff] %v3591_v43  ;;  %v2404_v52 = vpack.c.bf16 %v487_v39, %v485_v38  ;;  %v3622_v56 = vld [vmem:[%s5399_s0 + $0x60] sm:$0xff] }
  0x7f   :  { %971 = vmatprep.mubr.f32.mxu0 %v3478_v53  ;;  %2263 = vmatprep.subr.bf16.mxu1 %v2262_v48  ;;  %v2276_v48 = vpack.c.bf16 %v359_v35, %v357_v34  ;;  %v492_v22 = vld [vmem:[%s5400_s1 + $0x6d8] sm:$0xff]  ;;  %v363_v55 = vld [vmem:[%s5400_s1 + $0x2d0] sm:$0xff]  ;;  %v489_v59 = vld [vmem:[%s5400_s1 + $0x6c0] sm:$0xff]  ;;  %124 = vst [vmem:[#allocation2 + $0xf1] sm:$0xff] %v3622_v56 }
  0x80   :  { %650 = vmatmul.mubr.f32.gmra.mrb[4].mxu1 %v3487_v57  ;;  %2391 = vmatprep.subr.bf16.mxu0 %v2390_v54  ;;  %v361_v54 = vld [vmem:[%s5400_s1 + $0x2c0] sm:$0xff]  ;;  %v2406_v63 = vpack.c.bf16 %v492_v22, %v490_v50  ;;  %v368_v3 = vld [vmem:[%s5400_s1 + $0x2f8] sm:$0xff]  ;;  %v3642_v4 = vld [vmem:[#allocation2 + $0x60] sm:$0xff] }
  0x81   :  { %972 = vmatmul.mubr.f32.gmra.mrb[4].mxu0 %v3307_v42  ;;  %2265 = vmatpush1.bf16.msra.mxu1 %v2264_v58  ;;  %v2278_v58 = vpack.c.bf16 %v364_v46, %v362_v45  ;;  %v3633_v62 = vld [vmem:[#allocation2 + $0x72] sm:$0xff]  ;;  %v2280_v5 = vpack.c.bf16 %v363_v55, %v361_v54  ;;  %v496_v8 = vld [vmem:[%s5400_s1 + $0x6f8] sm:$0xff]  ;;  %v367_v13 = vld [vmem:[%s5400_s1 + $0x2f0] sm:$0xff] }
  0x82   :  { %2393 = vmatpush1.bf16.msra.mxu0 %v2392_v61  ;;  %655 = vmatprep.mubr.f32.mxu1 %v3307_v42  ;;  %v491_v61 = vld [vmem:[%s5400_s1 + $0x6d0] sm:$0xff]  ;;  %v365_v12 = vld [vmem:[%s5400_s1 + $0x2e0] sm:$0xff]  ;;  %v372_v26 = vld [vmem:[%s5400_s1 + $0x318] sm:$0xff] }
  0x83   :  { %977 = vmatprep.mubr.f32.mxu0 %v3516_v6  ;;  %2267 = vmatprep.subr.bf16.mxu1 %v2266_v2  ;;  %v366_v2 = vld [vmem:[%s5400_s1 + $0x2e8] sm:$0xff]  ;;  %v493_v17 = vld [vmem:[%s5400_s1 + $0x6e0] sm:$0xff]  ;;  %v3671_v19 = vld [vmem:[#allocation2 + $0x82] sm:$0xff] }
  0x84   :  { %656 = vmatmul.mubr.f32.gmra.mrb[6].mxu1 %v3527_v10  ;;  %2395 = vmatprep.subr.bf16.mxu0 %v2394_v7  ;;  %v494_v7 = vld [vmem:[%s5400_s1 + $0x6e8] sm:$0xff]  ;;  %v2282_v16 = vpack.c.bf16 %v368_v3, %v366_v2  ;;  %v3680_v27 = vld [vmem:[#allocation2 + $0x70] sm:$0xff]  ;;  %v500_v31 = vld [vmem:[%s5400_s1 + $0x718] sm:$0xff] }
  0x85   :  { %978 = vmatmul.mubr.f32.gmra.mrb[6].mxu0 %v3331_v51  ;;  %2269 = vmatpush1.bf16.msra.mxu1 %v2268_v11  ;;  %v2408_v11 = vpack.c.bf16 %v491_v61, %v489_v59  ;;  %v2410_v20 = vpack.c.bf16 %v496_v8, %v494_v7  ;;  %v498_v30 = vld [vmem:[%s5400_s1 + $0x708] sm:$0xff]  ;;  %v369_v34 = vld [vmem:[%s5400_s1 + $0x300] sm:$0xff]  ;;  %v371_v35 = vld [vmem:[%s5400_s1 + $0x310] sm:$0xff] }
  0x86   :  { %2397 = vmatpush1.bf16.msra.mxu0 %v2396_v15  ;;  %661 = vmatprep.mubr.f32.mxu1 %v3331_v51  ;;  %v3660_v15 = vld [vmem:[%s5399_s0 + $0x68] sm:$0xff]  ;;  %v152_v38 = vld [vmem:[#allocation2 + $0xa1] sm:$0xff]  ;;  %v373_v61 = vld [vmem:[%s5400_s1 + $0x320] sm:$0xff] }
  0x87   :  { %983 = vmatprep.mubr.f32.mxu0 %v3556_v23  ;;  %2271 = vmatprep.subr.bf16.mxu1 %v2270_v18  ;;  %v495_v18 = vld [vmem:[%s5400_s1 + $0x6f0] sm:$0xff]  ;;  %125 = vst [vmem:[#allocation2 + $0x101] sm:$0xff] %v3660_v15  ;;  %v3709_v46 = vld [vmem:[#allocation2 + $0xb2] sm:$0xff]  ;;  %v376_v22 = vld [vmem:[%s5400_s1 + $0x338] sm:$0xff] }
  0x88   :  { %662 = vmatmul.mubr.f32.gmra.mrb[8].mxu1 %v3566_v28  ;;  %2399 = vmatprep.subr.bf16.mxu0 %v2398_v24  ;;  %v370_v24 = vld [vmem:[%s5400_s1 + $0x308] sm:$0xff]  ;;  %v499_v45 = vld [vmem:[%s5400_s1 + $0x710] sm:$0xff]  ;;  %v504_v55 = vld [vmem:[%s5400_s1 + $0x738] sm:$0xff] }
  0x89   :  { %984 = vmatmul.mubr.f32.gmra.mrb[8].mxu0 %v3361_v1  ;;  %2273 = vmatpush1.bf16.msra.mxu1 %v2272_v29  ;;  %v2284_v29 = vpack.c.bf16 %v367_v13, %v365_v12  ;;  %v2286_v39 = vpack.c.bf16 %v372_v26, %v370_v24  ;;  %v374_v50 = vld [vmem:[%s5400_s1 + $0x328] sm:$0xff]  ;;  %v501_v3 = vld [vmem:[%s5400_s1 + $0x720] sm:$0xff]  ;;  %v3743_v7 = vld [vmem:[#allocation2] sm:$0xff] }
  0x8a   :  { %2401 = vmatpush1.bf16.msra.mxu0 %v2400_v32  ;;  %667 = vmatprep.mubr.f32.mxu1 %v3361_v1  ;;  %v2412_v32 = vpack.c.bf16 %v495_v18, %v493_v17  ;;  %v502_v54 = vld [vmem:[%s5400_s1 + $0x728] sm:$0xff]  ;;  %v2290_v2 = vpack.c.bf16 %v376_v22, %v374_v50  ;;  %v3746_v8 = vld [vmem:[#allocation2 + $0xc2] sm:$0xff]  ;;  %v377_v26 = vld [vmem:[%s5400_s1 + $0x340] sm:$0xff] }
  0x8b   :  { %989 = vmatprep.mubr.f32.mxu0 %v3594_v0  ;;  %2275 = vmatprep.subr.bf16.mxu1 %v2274_v36  ;;  %v3698_v36 = vld [vmem:[%s5399_s0 + $0x70] sm:$0xff]  ;;  %v378_v12 = vld [vmem:[%s5400_s1 + $0x348] sm:$0xff]  ;;  %v380_v13 = vld [vmem:[%s5400_s1 + $0x358] sm:$0xff] }
  0x8c   :  { %668 = vmatmul.mubr.f32.gmra.mrb[10].mxu1 %v3604_v47  ;;  %2403 = vmatprep.subr.bf16.mxu0 %v2402_v44  ;;  %v497_v44 = vld [vmem:[%s5400_s1 + $0x700] sm:$0xff]  ;;  %126 = vst [vmem:[#allocation2 + $0x111] sm:$0xff] %v3698_v36  ;;  %v506_v18 = vld [vmem:[%s5400_s1 + $0x748] sm:$0xff] }
  0x8d   :  { %990 = vmatmul.mubr.f32.gmra.mrb[10].mxu0 %v3391_v14  ;;  %2277 = vmatpush1.bf16.msra.mxu1 %v2276_v48  ;;  %v2414_v48 = vpack.c.bf16 %v500_v31, %v498_v30  ;;  %v2416_v59 = vpack.c.bf16 %v499_v45, %v497_v44  ;;  %v2294_v30 = vpack.c.bf16 %v380_v13, %v378_v12  ;;  %v505_v31 = vld [vmem:[%s5400_s1 + $0x740] sm:$0xff]  ;;  %v510_v45 = vld [vmem:[%s5400_s1 + $0x768] sm:$0xff]  ;;  %v516_v13 = vld [vmem:[%s5400_s1 + $0x798] sm:$0xff] }
  0x8e   :  { %2405 = vmatpush1.bf16.msra.mxu0 %v2404_v52  ;;  %673 = vmatprep.mubr.f32.mxu1 %v3391_v14  ;;  %v2288_v52 = vpack.c.bf16 %v371_v35, %v369_v34  ;;  %v382_v35 = vld [vmem:[%s5400_s1 + $0x368] sm:$0xff]  ;;  %v381_v22 = vld [vmem:[%s5400_s1 + $0x360] sm:$0xff] }
  0x8f   :  { %995 = vmatprep.mubr.f32.mxu0 %v3633_v62  ;;  %2279 = vmatprep.subr.bf16.mxu1 %v2278_v58  ;;  %v3727_v58 = vld [vmem:[%s5399_s0 + $0x78] sm:$0xff]  ;;  %v514_v12 = vld [vmem:[%s5400_s1 + $0x788] sm:$0xff] }
  0x90   :  { %674 = vmatmul.mubr.f32.gmra.mrb[12].mxu1 %v3642_v4  ;;  %2407 = vmatprep.subr.bf16.mxu0 %v2406_v63  ;;  %v375_v63 = vld [vmem:[%s5400_s1 + $0x330] sm:$0xff]  ;;  %127 = vst [vmem:[#allocation2 + $0x121] sm:$0xff] %v3727_v58 }
  0x91   :  { %996 = vmatmul.mubr.f32.gmra.mrb[12].mxu0 %v3415_v25  ;;  %2281 = vmatpush1.bf16.msra.mxu1 %v2280_v5  ;;  %v503_v5 = vld [vmem:[%s5400_s1 + $0x730] sm:$0xff]  ;;  %v2292_v17 = vpack.c.bf16 %v375_v63, %v373_v61 }
  0x92   :  { %2409 = vmatpush1.bf16.msra.mxu0 %v2408_v11  ;;  %679 = vmatprep.mubr.f32.mxu1 %v3415_v25  ;;  %v2418_v11 = vpack.c.bf16 %v504_v55, %v502_v54  ;;  %v2420_v24 = vpack.c.bf16 %v503_v5, %v501_v3  ;;  %v509_v55 = vld [vmem:[%s5400_s1 + $0x760] sm:$0xff]  ;;  %v3810_v61 = vld [vmem:[#allocation2 + $0xe2] sm:$0xff] }
  0x93   :  { %1001 = vmatprep.mubr.f32.mxu0 %v3671_v19  ;;  %2283 = vmatprep.subr.bf16.mxu1 %v2282_v16  ;;  %v3755_v16 = vld [vmem:[#allocation2 + $0xb0] sm:$0xff]  ;;  %v388_v3 = vld [vmem:[%s5400_s1 + $0x398] sm:$0xff] }
  0x94   :  { %680 = vmatmul.mubr.f32.gmra.mrb[14].mxu1 %v3680_v27  ;;  %2411 = vmatprep.subr.bf16.mxu0 %v2410_v20  ;;  %v508_v20 = vld [vmem:[%s5400_s1 + $0x758] sm:$0xff]  ;;  %v3819_v5 = vld [vmem:[#allocation2 + $0xd0] sm:$0xff] }
  0x95   :  { %1002 = vmatmul.mubr.f32.gmra.mrb[14].mxu0 %v3448_v40  ;;  %2285 = vmatpush1.bf16.msra.mxu1 %v2284_v29  ;;  %v379_v29 = vld [vmem:[%s5400_s1 + $0x350] sm:$0xff]  ;;  %v2422_v34 = vpack.c.bf16 %v508_v20, %v506_v18  ;;  %v385_v18 = vld [vmem:[%s5400_s1 + $0x380] sm:$0xff] }
  0x96   :  { %2413 = vmatpush1.bf16.msra.mxu0 %v2412_v32  ;;  %685 = vmatprep.mubr.f32.mxu1 %v152_v38  ;;  %v3778_v32 = vld [vmem:[#allocation2 + $0xd2] sm:$0xff]  ;;  %v384_v38 = vld [vmem:[%s5400_s1 + $0x378] sm:$0xff]  ;;  %v2296_v44 = vpack.c.bf16 %v379_v29, %v377_v26  ;;  %v387_v20 = vld [vmem:[%s5400_s1 + $0x390] sm:$0xff] }
  0x97   :  { %1007 = vmatprep.mubr.f32.mxu0 %v3709_v46  ;;  %2287 = vmatprep.subr.bf16.mxu1 %v2286_v39  ;;  %v3787_v39 = vld [vmem:[#allocation2 + $0xc0] sm:$0xff]  ;;  %v2298_v54 = vpack.c.bf16 %v384_v38, %v382_v35  ;;  %v513_v26 = vld [vmem:[%s5400_s1 + $0x780] sm:$0xff]  ;;  %v2304_v38 = vpack.c.bf16 %v387_v20, %v385_v18 }
  0x98   :  { %686 = vmatmul.mubr.f32.gmra.mrb[16].mxu1 %v3743_v7  ;;  %2415 = vmatprep.subr.bf16.mxu0 %v2414_v48  ;;  %v512_v48 = vld [vmem:[%s5400_s1 + $0x778] sm:$0xff]  ;;  %v515_v29 = vld [vmem:[%s5400_s1 + $0x790] sm:$0xff]  ;;  %v393_v20 = vld [vmem:[%s5400_s1 + $0x3c0] sm:$0xff] }
  0x99   :  { %1008 = vmatmul.mubr.f32.gmra.mrb[16].mxu0 %v3495_v60  ;;  %2289 = vmatpush1.bf16.msra.mxu1 %v2288_v52  ;;  %v383_v52 = vld [vmem:[%s5400_s1 + $0x370] sm:$0xff]  ;;  %v2426_v63 = vpack.c.bf16 %v512_v48, %v510_v45  ;;  %v520_v45 = vld [vmem:[%s5400_s1 + $0x7b8] sm:$0xff]  ;;  %v2432_v48 = vpack.c.bf16 %v515_v29, %v513_v26  ;;  %v521_v29 = vld [vmem:[%s5400_s1 + $0x7c0] sm:$0xff] }
  0x9a   :  { %2417 = vmatpush1.bf16.msra.mxu0 %v2416_v59  ;;  %691 = vmatprep.mubr.f32.mxu1 %v3495_v60  ;;  %v507_v60 = vld [vmem:[%s5400_s1 + $0x750] sm:$0xff] }
  0x9b   :  { %1013 = vmatprep.mubr.f32.mxu0 %v3746_v8  ;;  %2291 = vmatprep.subr.bf16.mxu1 %v2290_v2  ;;  %v2424_v50 = vpack.c.bf16 %v507_v60, %v505_v31  ;;  %v511_v59 = vld [vmem:[%s5400_s1 + $0x770] sm:$0xff]  ;;  %v386_v2 = vld [vmem:[%s5400_s1 + $0x388] sm:$0xff]  ;;  %v2430_v31 = vpack.c.bf16 %v516_v13, %v514_v12 }
  0x9c   :  { %692 = vmatmul.mubr.f32.gmra.mrb[18].mxu1 %v3755_v16  ;;  %2419 = vmatprep.subr.bf16.mxu0 %v2418_v11  ;;  %v2300_v11 = vpack.c.bf16 %v383_v52, %v381_v22  ;;  %v390_v60 = vld [vmem:[%s5400_s1 + $0x3a8] sm:$0xff]  ;;  %v3851_v35 = vld [vmem:[#allocation2 + $0xe0] sm:$0xff] }
  0x9d   :  { %1014 = vmatmul.mubr.f32.gmra.mrb[18].mxu0 %v3524_v9  ;;  %2293 = vmatpush1.bf16.msra.mxu1 %v2292_v17  ;;  %v2428_v17 = vpack.c.bf16 %v511_v59, %v509_v55  ;;  %v391_v22 = vld [vmem:[%s5400_s1 + $0x3b0] sm:$0xff]  ;;  %v522_v13 = vld [vmem:[%s5400_s1 + $0x7c8] sm:$0xff] }
  0x9e   :  { %2421 = vmatpush1.bf16.msra.mxu0 %v2420_v24  ;;  %697 = vmatprep.mubr.f32.mxu1 %v3524_v9  ;;  %v2302_v24 = vpack.c.bf16 %v388_v3, %v386_v2  ;;  %v519_v55 = vld [vmem:[%s5400_s1 + $0x7b0] sm:$0xff]  ;;  %v394_v2 = vld [vmem:[%s5400_s1 + $0x3c8] sm:$0xff]  ;;  %v396_v3 = vld [vmem:[%s5400_s1 + $0x3d8] sm:$0xff] }
  0x9f   :  { %1019 = vmatprep.mubr.f32.mxu0 %v3778_v32  ;;  %2295 = vmatprep.subr.bf16.mxu1 %v2294_v30  ;;  %v3842_v30 = vld [vmem:[#allocation2 + $0xf2] sm:$0xff]  ;;  %v3874_v59 = vld [vmem:[#allocation2 + $0x102] sm:$0xff]  ;;  %v2310_v26 = vpack.c.bf16 %v396_v3, %v394_v2 }
  0xa0   :  { %698 = vmatmul.mubr.f32.gmra.mrb[20].mxu1 %v3787_v39  ;;  %2423 = vmatprep.subr.bf16.mxu0 %v2422_v34  ;;  %v392_v34 = vld [vmem:[%s5400_s1 + $0x3b8] sm:$0xff]  ;;  %v525_v2 = vld [vmem:[%s5400_s1 + $0x7e0] sm:$0xff]  ;;  %v527_v3 = vld [vmem:[%s5400_s1 + $0x7f0] sm:$0xff] }
  0xa1   :  { %1020 = vmatmul.mubr.f32.gmra.mrb[20].mxu0 %v3553_v21  ;;  %2297 = vmatpush1.bf16.msra.mxu1 %v2296_v44  ;;  %v518_v44 = vld [vmem:[%s5400_s1 + $0x7a8] sm:$0xff]  ;;  %v2306_v52 = vpack.c.bf16 %v392_v34, %v390_v60 }
  0xa2   :  { %2425 = vmatpush1.bf16.msra.mxu0 %v2424_v50  ;;  %703 = vmatprep.mubr.f32.mxu1 %v3553_v21  ;;  %v389_v50 = vld [vmem:[%s5400_s1 + $0x3a0] sm:$0xff] }
  0xa3   :  { %1025 = vmatprep.mubr.f32.mxu0 %v3810_v61  ;;  %2299 = vmatprep.subr.bf16.mxu1 %v2298_v54  ;;  %v517_v54 = vld [vmem:[%s5400_s1 + $0x7a0] sm:$0xff]  ;;  %v2308_v12 = vpack.c.bf16 %v391_v22, %v389_v50  ;;  %v526_v50 = vld [vmem:[%s5400_s1 + $0x7e8] sm:$0xff]  ;;  %v528_v22 = vld [vmem:[%s5400_s1 + $0x7f8] sm:$0xff] }
  0xa4   :  { %704 = vmatmul.mubr.f32.gmra.mrb[22].mxu1 %v3819_v5  ;;  %2427 = vmatprep.subr.bf16.mxu0 %v2426_v63  ;;  %v2434_v63 = vpack.c.bf16 %v520_v45, %v518_v44  ;;  %v2436_v18 = vpack.c.bf16 %v519_v55, %v517_v54  ;;  %v3906_v60 = vld [vmem:[#allocation2 + $0x112] sm:$0xff]  ;;  %v400_v44 = vld [vmem:[%s5400_s1 + $0x3f8] sm:$0xff]  ;;  %v3915_v45 = vld [vmem:[#allocation2 + $0x100] sm:$0xff] }
  0xa5   :  { %1026 = vmatmul.mubr.f32.gmra.mrb[22].mxu0 %v3591_v43  ;;  %2301 = vmatpush1.bf16.msra.mxu1 %v2300_v11  ;;  %v3883_v11 = vld [vmem:[#allocation2 + $0xf0] sm:$0xff]  ;;  %v399_v55 = vld [vmem:[%s5400_s1 + $0x3f0] sm:$0xff] }
  0xa6   :  { %2429 = vmatpush1.bf16.msra.mxu0 %v2428_v17  ;;  %709 = vmatprep.mubr.f32.mxu1 %v3591_v43  ;;  %v524_v17 = vld [vmem:[%s5400_s1 + $0x7d8] sm:$0xff]  ;;  %v397_v54 = vld [vmem:[%s5400_s1 + $0x3e0] sm:$0xff] }
  0xa7   :  { %1031 = vmatprep.mubr.f32.mxu0 %v3842_v30  ;;  %2303 = vmatprep.subr.bf16.mxu1 %v2302_v24  ;;  %v395_v24 = vld [vmem:[%s5400_s1 + $0x3d0] sm:$0xff]  ;;  %v2438_v34 = vpack.c.bf16 %v524_v17, %v522_v13  ;;  %v2442_v13 = vpack.c.bf16 %v528_v22, %v526_v50  ;;  %v530_v17 = vld [vmem:[%s5400_s1 + $0x808] sm:$0xff] }
  0xa8   :  { %710 = vmatmul.mubr.f32.gmra.mrb[24].mxu1 %v3851_v35  ;;  %2431 = vmatprep.subr.bf16.mxu0 %v2430_v31  ;;  %v523_v31 = vld [vmem:[%s5400_s1 + $0x7d0] sm:$0xff] }
  0xa9   :  { %1032 = vmatmul.mubr.f32.gmra.mrb[24].mxu0 %v3622_v56  ;;  %2305 = vmatpush1.bf16.msra.mxu1 %v2304_v38  ;;  %v398_v38 = vld [vmem:[%s5400_s1 + $0x3e8] sm:$0xff] }
  0xaa   :  { %2433 = vmatpush1.bf16.msra.mxu0 %v2432_v48  ;;  %715 = vmatprep.mubr.f32.mxu1 %v3622_v56  ;;  %v2312_v48 = vpack.c.bf16 %v395_v24, %v393_v20  ;;  %v3947_v20 = vld [vmem:[#allocation2 + $0x110] sm:$0xff]  ;;  %v2316_v24 = vpack.c.bf16 %v399_v55, %v397_v54  ;;  %v535_v54 = vld [vmem:[%s5400_s1 + $0x830] sm:$0xff]  ;;  %v538_v55 = vld [vmem:[%s5400_s1 + $0x848] sm:$0xff] }
  0xab   :  { %1037 = vmatprep.mubr.f32.mxu0 %v3874_v59  ;;  %2307 = vmatprep.subr.bf16.mxu1 %v2306_v52  ;;  %v2440_v52 = vpack.c.bf16 %v523_v31, %v521_v29  ;;  %v529_v31 = vld [vmem:[%s5400_s1 + $0x800] sm:$0xff] }
  0xac   :  { %716 = vmatmul.mubr.f32.gmra.mrb[26].mxu1 %v3883_v11  ;;  %2435 = vmatprep.subr.bf16.mxu0 %v2434_v63  ;;  %v2314_v63 = vpack.c.bf16 %v400_v44, %v398_v38  ;;  %v534_v38 = vld [vmem:[%s5400_s1 + $0x828] sm:$0xff]  ;;  %v536_v44 = vld [vmem:[%s5400_s1 + $0x838] sm:$0xff] }
  0xad   :  { %1038 = vmatmul.mubr.f32.gmra.mrb[26].mxu0 %v3660_v15  ;;  %2309 = vmatpush1.bf16.msra.mxu1 %v2308_v12  ;;  %v3938_v12 = vld [vmem:[#allocation2 + $0x122] sm:$0xff]  ;;  %v2450_v22 = vpack.c.bf16 %v536_v44, %v534_v38 }
  0xae   :  { %2437 = vmatpush1.bf16.msra.mxu0 %v2436_v18  ;;  %721 = vmatprep.mubr.f32.mxu1 %v3660_v15  ;;  %v532_v18 = vld [vmem:[%s5400_s1 + $0x818] sm:$0xff]  ;;  %v551_v38 = vld [vmem:[%s5400_s1 + $0x8b0] sm:$0xff] }
  0xaf   :  { %1043 = vmatprep.mubr.f32.mxu0 %v3906_v60  ;;  %2311 = vmatprep.subr.bf16.mxu1 %v2310_v26  ;;  %v2444_v26 = vpack.c.bf16 %v527_v3, %v525_v2  ;;  %v2446_v29 = vpack.c.bf16 %v532_v18, %v530_v17  ;;  %v537_v2 = vld [vmem:[%s5400_s1 + $0x840] sm:$0xff]  ;;  %v539_v3 = vld [vmem:[%s5400_s1 + $0x850] sm:$0xff] }
  0xb0   :  { %722 = vmatmul.mubr.f32.gmra.mrb[28].mxu1 %v3915_v45  ;;  %2439 = vmatprep.subr.bf16.mxu0 %v2438_v34  ;;  %v531_v34 = vld [vmem:[%s5400_s1 + $0x810] sm:$0xff] }
  0xb1   :  { %1044 = vmatmul.mubr.f32.gmra.mrb[28].mxu0 %v3698_v36  ;;  %2313 = vmatpush1.bf16.msra.mxu1 %v2312_v48  ;;  %v160_v48 = vld [vmem:[#allocation2 + $0x2] sm:$0xff]  ;;  %v2448_v50 = vpack.c.bf16 %v531_v34, %v529_v31 }
  0xb2   :  { %2441 = vmatpush1.bf16.msra.mxu0 %v2440_v52  ;;  %727 = vmatprep.mubr.f32.mxu1 %v3698_v36  ;;  %v533_v52 = vld [vmem:[%s5400_s1 + $0x820] sm:$0xff]  ;;  %v543_v18 = vld [vmem:[%s5400_s1 + $0x870] sm:$0xff] }
  0xb3   :  { %1049 = vmatprep.mubr.f32.mxu0 %v3938_v12  ;;  %2315 = vmatprep.subr.bf16.mxu1 %v2314_v63 }
  0xb4   :  { %728 = vmatmul.mubr.f32.gmra.mrb[30].mxu1 %v3947_v20  ;;  %2443 = vmatprep.subr.bf16.mxu0 %v2442_v13  ;;  %v2456_v13 = vpack.c.bf16 %v539_v3, %v537_v2 }
  0xb5   :  { %1050 = vmatmul.mubr.f32.gmra.mrb[30].mxu0 %v3727_v58  ;;  %2317 = vmatpush1.bf16.msra.mxu1 %v2316_v24 }
  0xb6   :  { %2445 = vmatpush1.bf16.msra.mxu0 %v2444_v26  ;;  %798 = vmatprep.mubr.f32.mxu1 %v3451_v41  ;;  %v540_v41 = vld [vmem:[%s5400_s1 + $0x858] sm:$0xff] }
  0xb7   :  { %1120 = vmatprep.mubr.f32.mxu0 %v3286_v33  ;;  %2447 = vmatprep.subr.bf16.mxu0 %v2446_v29  ;;  %v2452_v33 = vpack.c.bf16 %v535_v54, %v533_v52  ;;  %v2454_v63 = vpack.c.bf16 %v540_v41, %v538_v55  ;;  %v547_v29 = vld [vmem:[%s5400_s1 + $0x890] sm:$0xff]  ;;  %v248_v54 = vld [vmem:[#allocation2 + $0x91] sm:$0xff] }
  0xb8   :  { %799 = vmatmul.mubr.f32.vlgmr.msra.gmra.mrb[0].mxu1 %v160_v48  ;;  %v557_v41 = vld [vmem:[%s5400_s1 + $0x8e0] sm:$0xff] }
  0xb9   :  { %1121 = vmatmul.mubr.f32.vlgmr.msra.gmra.mrb[0].mxu0 %v3487_v57  ;;  %804 = vmatprep.mubr.f32.mxu1 %v3487_v57  ;;  %v542_v57 = vld [vmem:[%s5400_s1 + $0x868] sm:$0xff] }
  0xba   :  { %2449 = vmatpush1.bf16.msra.mxu0 %v2448_v50  ;;  %1126 = vmatprep.mubr.f32.mxu0 %v3307_v42  ;;  %v544_v42 = vld [vmem:[%s5400_s1 + $0x878] sm:$0xff]  ;;  %v555_v50 = vld [vmem:[%s5400_s1 + $0x8d0] sm:$0xff] }
  0xbb   :  { %2451 = vmatprep.subr.bf16.mxu0 %v2450_v22  ;;  %v2458_v17 = vpack.c.bf16 %v544_v42, %v542_v57  ;;  %v231_v22 = vld [vmem:[#allocation2 + $0x80] sm:$0xff] }
  0xbc   :  { %805 = vmatmul.mubr.f32.gmra.mrb[2].mxu1 %v3325_v49  ;;  %v541_v49 = vld [vmem:[%s5400_s1 + $0x860] sm:$0xff] }
  0xbd   :  { %1127 = vmatmul.mubr.f32.gmra.mrb[2].mxu0 %v3527_v10  ;;  %810 = vmatprep.mubr.f32.mxu1 %v3527_v10  ;;  %v546_v10 = vld [vmem:[%s5400_s1 + $0x888] sm:$0xff]  ;;  %v2460_v24 = vpack.c.bf16 %v543_v18, %v541_v49 }
  0xbe   :  { %1132 = vmatprep.mubr.f32.mxu0 %v3331_v51  ;;  %2453 = vmatpush1.bf16.msra.mxu0 %v2452_v33  ;;  %v548_v51 = vld [vmem:[%s5400_s1 + $0x898] sm:$0xff]  ;;  %v559_v33 = vld [vmem:[%s5400_s1 + $0x8f0] sm:$0xff] }
  0xbf   :  { %2455 = vmatprep.subr.bf16.mxu0 %v2454_v63  ;;  %v2462_v26 = vpack.c.bf16 %v548_v51, %v546_v10  ;;  %v5568_v51 = vmov 0 }
  0xc0   :  { %811 = vmatmul.mubr.f32.gmra.mrb[4].mxu1 %v3440_v37  ;;  %v545_v37 = vld [vmem:[%s5400_s1 + $0x880] sm:$0xff] }
  0xc1   :  { %1133 = vmatmul.mubr.f32.gmra.mrb[4].mxu0 %v3566_v28  ;;  %816 = vmatprep.mubr.f32.mxu1 %v3566_v28  ;;  %v550_v28 = vld [vmem:[%s5400_s1 + $0x8a8] sm:$0xff]  ;;  %v2464_v31 = vpack.c.bf16 %v547_v29, %v545_v37  ;;  %v5572_v29 = vmov 0 }
  0xc2   :  { %1138 = vmatprep.mubr.f32.mxu0 %v3361_v1  ;;  %2457 = vmatpush1.bf16.msra.mxu0 %v2456_v13  ;;  %v552_v1 = vld [vmem:[%s5400_s1 + $0x8b8] sm:$0xff] }
  0xc3   :  { %2459 = vmatprep.subr.bf16.mxu0 %v2458_v17  ;;  %v2466_v34 = vpack.c.bf16 %v552_v1, %v550_v28  ;;  %v5564_v17 = vmov 0  ;;  %v5574_v28 = vmov 0 }
  0xc4   :  { %817 = vmatmul.mubr.f32.gmra.mrb[6].mxu1 %v3478_v53  ;;  %v549_v53 = vld [vmem:[%s5400_s1 + $0x8a0] sm:$0xff] }
  0xc5   :  { %1139 = vmatmul.mubr.f32.gmra.mrb[6].mxu0 %v3604_v47  ;;  %822 = vmatprep.mubr.f32.mxu1 %v3604_v47  ;;  %v554_v47 = vld [vmem:[%s5400_s1 + $0x8c8] sm:$0xff]  ;;  %v2468_v44 = vpack.c.bf16 %v551_v38, %v549_v53  ;;  %v5579_v53 = vmov 0 }
  0xc6   :  { %1144 = vmatprep.mubr.f32.mxu0 %v3391_v14  ;;  %2461 = vmatpush1.bf16.msra.mxu0 %v2460_v24  ;;  %v556_v14 = vld [vmem:[%s5400_s1 + $0x8d8] sm:$0xff]  ;;  %v5570_v24 = vmov 0 }
  0xc7   :  { %2463 = vmatprep.subr.bf16.mxu0 %v2462_v26  ;;  %v2470_v48 = vpack.c.bf16 %v556_v14, %v554_v47  ;;  %v5581_v14 = vmov 0 }
  0xc8   :  { %823 = vmatmul.mubr.f32.gmra.mrb[8].mxu1 %v3516_v6  ;;  %v553_v6 = vld [vmem:[%s5400_s1 + $0x8c0] sm:$0xff] }
  0xc9   :  { %1145 = vmatmul.mubr.f32.gmra.mrb[8].mxu0 %v3642_v4  ;;  %828 = vmatprep.mubr.f32.mxu1 %v3642_v4  ;;  %v558_v4 = vld [vmem:[%s5400_s1 + $0x8e8] sm:$0xff]  ;;  %v2472_v52 = vpack.c.bf16 %v555_v50, %v553_v6  ;;  %v5587_v50 = vmov 0 }
  0xca   :  { %1150 = vmatprep.mubr.f32.mxu0 %v3415_v25  ;;  %2465 = vmatpush1.bf16.msra.mxu0 %v2464_v31  ;;  %v560_v25 = vld [vmem:[%s5400_s1 + $0x8f8] sm:$0xff] }
  0xcb   :  { %2467 = vmatprep.subr.bf16.mxu0 %v2466_v34  ;;  %v2474_v55 = vpack.c.bf16 %v560_v25, %v558_v4  ;;  %v5576_v34 = vmov 0  ;;  %v5590_v4 = vmov 0 }
  0xcc   :  { %829 = vmatmul.mubr.f32.gmra.mrb[10].mxu1 %v3556_v23 }
  0xcd   :  { %1151 = vmatmul.mubr.f32.gmra.mrb[10].mxu0 %v3680_v27  ;;  %834 = vmatprep.mubr.f32.mxu1 %v3680_v27  ;;  %v168_v27 = vld [vmem:[#allocation2 + $0xa2] sm:$0xff] }
  0xce   :  { %1156 = vmatprep.mubr.f32.mxu0 %v3448_v40  ;;  %2469 = vmatpush1.bf16.msra.mxu0 %v2468_v44  ;;  %v2476_v40 = vpack.c.bf16 %v559_v33, %v557_v41  ;;  %v5584_v44 = vmov 0  ;;  %v5599_v33 = vmov 0 }
  0xcf   :  { %2471 = vmatprep.subr.bf16.mxu0 %v2470_v48 }
  0xd0   :  { %835 = vmatmul.mubr.f32.gmra.mrb[12].mxu1 %v3594_v0 }
  0xd1   :  { %1157 = vmatmul.mubr.f32.gmra.mrb[12].mxu0 %v231_v22  ;;  %840 = vmatprep.mubr.f32.mxu1 %v231_v22 }
  0xd2   :  { %1162 = vmatprep.mubr.f32.mxu0 %v248_v54  ;;  %2473 = vmatpush1.bf16.msra.mxu0 %v2472_v52  ;;  %v5593_v52 = vmov 0  ;;  %v5596_v54 = vmov 0 }
  0xd3   :  { %2475 = vmatprep.subr.bf16.mxu0 %v2474_v55 }
  0xd4   :  { %841 = vmatmul.mubr.f32.gmra.mrb[14].mxu1 %v3633_v62 }
  0xd5   :  { %1163 = vmatmul.mubr.f32.gmra.mrb[14].mxu0 %v3743_v7  ;;  %846 = vmatprep.mubr.f32.mxu1 %v3755_v16 }
  0xd6   :  { %1168 = vmatprep.mubr.f32.mxu0 %v3524_v9  ;;  %2477 = vmatpush1.bf16.msra.mxu0 %v2476_v40  ;;  %v239_v9 = vld [vmem:[#allocation2 + $0x120] sm:$0xff]  ;;  %v5602_v40 = vmov 0 }
  0xd8   :  { %847 = vmatmul.mubr.f32.gmra.mrb[16].mxu1 %v168_v27 }
  0xd9   :  { %1169 = vmatmul.mubr.f32.gmra.mrb[16].mxu0 %v3787_v39  ;;  %852 = vmatprep.mubr.f32.mxu1 %v3787_v39 }
  0xda   :  { %1174 = vmatprep.mubr.f32.mxu0 %v3553_v21  ;;  %v256_v21 = vld [vmem:[#allocation2 + $0x131] sm:$0xff] }
  0xdc   :  { %853 = vmatmul.mubr.f32.gmra.mrb[18].mxu1 %v3709_v46 }
  0xdd   :  { %1175 = vmatmul.mubr.f32.gmra.mrb[18].mxu0 %v3819_v5  ;;  %858 = vmatprep.mubr.f32.mxu1 %v3819_v5 }
  0xde   :  { %1180 = vmatprep.mubr.f32.mxu0 %v3591_v43  ;;  %v257_v43 = vld [vmem:[#allocation2 + $0x22] sm:$0xff] }
  0xe0   :  { %859 = vmatmul.mubr.f32.gmra.mrb[20].mxu1 %v3746_v8 }
  0xe1   :  { %1181 = vmatmul.mubr.f32.gmra.mrb[20].mxu0 %v3851_v35  ;;  %864 = vmatprep.mubr.f32.mxu1 %v3851_v35 }
  0xe2   :  { %1186 = vmatprep.mubr.f32.mxu0 %v3622_v56  ;;  %v258_v56 = vld [vmem:[#allocation2 + $0x32] sm:$0xff] }
  0xe4   :  { %865 = vmatmul.mubr.f32.gmra.mrb[22].mxu1 %v3778_v32 }
  0xe5   :  { %1187 = vmatmul.mubr.f32.gmra.mrb[22].mxu0 %v3883_v11  ;;  %870 = vmatprep.mubr.f32.mxu1 %v3883_v11  ;;  %v5472_v11 = vmov 1.0|1.0  }
  0xe6   :  { %1192 = vmatprep.mubr.f32.mxu0 %v3660_v15  ;;  %v259_v15 = vld [vmem:[#allocation2 + $0x42] sm:$0xff] }
  0xe8   :  { %871 = vmatmul.mubr.f32.gmra.mrb[24].mxu1 %v3810_v61 }
  0xe9   :  { %1193 = vmatmul.mubr.f32.gmra.mrb[24].mxu0 %v3915_v45  ;;  %876 = vmatprep.mubr.f32.mxu1 %v3915_v45 }
  0xea   :  { %1198 = vmatprep.mubr.f32.mxu0 %v3698_v36  ;;  %v264_v36 = vld [vmem:[#allocation2 + $0x92] sm:$0xff] }
  0xec   :  { %877 = vmatmul.mubr.f32.gmra.mrb[26].mxu1 %v3842_v30 }
  0xed   :  { %1199 = vmatmul.mubr.f32.gmra.mrb[26].mxu0 %v3947_v20  ;;  %882 = vmatprep.mubr.f32.mxu1 %v3947_v20 }
  0xee   :  { %1204 = vmatprep.mubr.f32.mxu0 %v3727_v58 }
  0xf0   :  { %883 = vmatmul.mubr.f32.gmra.mrb[28].mxu1 %v3874_v59 }
  0xf1   :  { %1205 = vmatmul.mubr.f32.gmra.mrb[28].mxu0 %v239_v9  ;;  %888 = vmatprep.mubr.f32.mxu1 %v239_v9 }
  0xf2   :  { %1210 = vmatprep.mubr.f32.mxu0 %v256_v21  ;;  %v5605_v21 = vmov 0 }
  0xf4   :  { %889 = vmatmul.mubr.f32.gmra.mrb[30].mxu1 %v3906_v60 }
  0xf5   :  { %1211 = vmatmul.mubr.f32.gmra.mrb[30].mxu0 %v3743_v7 }
  0xf6   :  { %1281 = vmatprep.mubr.f32.mxu0 %v3743_v7 }
  0xf9   :  { %1282 = vmatmul.mubr.f32.vlgmr.msra.gmra.mrb[0].mxu0 %v257_v43  ;;  %v5608_v43 = vmov 0 }
  0xfa   :  { %1287 = vmatprep.mubr.f32.mxu0 %v3743_v7 }
  0xfd   :  { %1288 = vmatmul.mubr.f32.gmra.mrb[2].mxu0 %v258_v56 }
  0xfe   :  { %1293 = vmatprep.mubr.f32.mxu0 %v3743_v7 }
 0x101   :  { %1294 = vmatmul.mubr.f32.gmra.mrb[4].mxu0 %v259_v15 }
 0x102   :  { %1299 = vmatprep.mubr.f32.mxu0 %v3743_v7 }
 0x105   :  { %1300 = vmatmul.mubr.f32.gmra.mrb[6].mxu0 %v3556_v23  ;;  %v272_v23 = vld [vmem:[#allocation2 + $0x132] sm:$0xff] }
 0x106   :  { %1305 = vmatprep.mubr.f32.mxu0 %v3743_v7 }
 0x109   :  { %1306 = vmatmul.mubr.f32.gmra.mrb[8].mxu0 %v3594_v0  ;;  %v563_v0 = vlaneseq }
 0x10a   :  { %1311 = vmatprep.mubr.f32.mxu0 %v3743_v7 }
 0x10d   :  { %1312 = vmatmul.mubr.f32.gmra.mrb[10].mxu0 %v3633_v62  ;;  %v4126_v62 = vshrl.u32 %v563_v0, 7 }
 0x10e   :  { %1317 = vmatprep.mubr.f32.mxu0 %v3743_v7 }
 0x10f   :  { %5547 = vst [vmem:[#allocation10_spill] sm:$0xff] %v4126_v62  ;;  %v1528_v46 = vadd.s32 8, %v4126_v62  ;;  %v1529_v5 = vadd.s32 16, %v4126_v62  ;;  %v1531_v63 = vadd.s32 32, %v4126_v62  ;;  %v1532_v2 = vadd.s32 40, %v4126_v62 }
 0x110   :  { %v1533_v18 = vadd.s32 48, %v4126_v62  ;;  %v1534_v10 = vadd.s32 56, %v4126_v62  ;;  %v1535_v1 = vadd.s32 64, %v4126_v62  ;;  %v1536_v31 = vadd.s32 72, %v4126_v62 }
 0x111   :  { %1318 = vmatmul.mubr.f32.gmra.mrb[12].mxu0 %v3671_v19  ;;  %v1560_v19 = vand.u32 127, %v563_v0  ;;  %v1563_v16 = vand.u32 63, %v1528_v46  ;;  %v1566_v42 = vand.u32 63, %v1531_v63  ;;  %v1567_v13 = vand.u32 63, %v1532_v2 }
 0x112   :  { %1323 = vmatprep.mubr.f32.mxu0 %v3743_v7  ;;  %v1568_v26 = vand.u32 63, %v1533_v18  ;;  %v1569_v37 = vand.u32 63, %v1534_v10  ;;  %v1570_v38 = vand.u32 63, %v1535_v1  ;;  %v1571_v47 = vand.u32 63, %v1536_v31 }
 0x113   :  { %v1561_v58 = vadd.s32 128, %v1560_v19  ;;  %v4132_v39 = vand.u32 63, %v1560_v19  ;;  %v1537_v48 = vadd.s32 80, %v4126_v62  ;;  %v1538_v6 = vadd.s32 88, %v4126_v62 }
 0x114   :  { %v1539_v55 = vadd.s32 96, %v4126_v62  ;;  %v1540_v41 = vadd.s32 104, %v4126_v62  ;;  %v1541_v56 = vadd.s32 112, %v4126_v62  ;;  %v1542_v15 = vadd.s32 120, %v4126_v62 }
 0x115   :  { %1324 = vmatmul.mubr.f32.gmra.mrb[14].mxu0 %v264_v36  ;;  %vm4156_vm4 = vcmp.eq.s32.totalorder %v1563_v16, %v4132_v39  ;;  %vm4235_vm15 = vcmp.eq.s32.totalorder %v1566_v42, %v4132_v39  ;;  %v1572_v25 = vand.u32 63, %v1537_v48  ;;  %v1573_v22 = vand.u32 63, %v1538_v6 }
 0x116   :  { %1329 = vmatprep.mubr.f32.mxu0 %v3743_v7  ;;  %v5569_v51 = vsel %vm4235_vm15, 4294967295, %v5568_v51  ;;  %v1574_v27 = vand.u32 63, %v1539_v55  ;;  %v1575_v9 = vand.u32 63, %v1540_v41  ;;  %v5611_v36 = vmov 0 }
 0x117   :  { %v1576_v0 = vand.u32 63, %v1541_v56  ;;  %v1577_v19 = vand.u32 63, %v1542_v15  ;;  %v5617_v46 = vmov 0  ;;  %v5629_v63 = vmov 0 }
 0x118   :  { %v5632_v2 = vmov 0  ;;  %v5635_v18 = vmov 0  ;;  %v5638_v10 = vmov 0  ;;  %v5641_v1 = vmov 0 }
 0x119   :  { %1330 = vmatmul.mubr.f32.gmra.mrb[16].mxu0 %v3746_v8  ;;  %v1562_v8 = vand.u32 63, %v4126_v62  ;;  %v5644_v31 = vmov 0  ;;  %v5647_v48 = vmov 0  ;;  %v5650_v6 = vmov 0 }
 0x11a   :  { %1335 = vmatprep.mubr.f32.mxu0 %v3743_v7  ;;  %v5653_v55 = vmov 0  ;;  %v5656_v41 = vmov 0  ;;  %v5659_v56 = vmov 0  ;;  %v5662_v15 = vmov 0 }
 0x11b   :  { %vm4151_vm3 = vcmp.eq.s32.totalorder %v1562_v8, %v4132_v39 }
 0x11c   :  { %vm5407_vm5 = vmpackc.low %vm4156_vm4, %vm4151_vm3 }
 0x11d   :  { %1336 = vmatmul.mubr.f32.gmra.mrb[18].mxu0 %v3778_v32  ;;  %v4130_v32 = vand.u32 63, %v1561_v58  ;;  %v5620_v58 = vmov 0 }
 0x11e   :  { %1341 = vmatprep.mubr.f32.mxu0 %v3743_v7 }
 0x11f   :  { %vm4135_vm0 = vcmp.eq.s32.totalorder %v1562_v8, %v4130_v32  ;;  %vm4140_vm1 = vcmp.eq.s32.totalorder %v1563_v16, %v4130_v32  ;;  %vm4219_vm12 = vcmp.eq.s32.totalorder %v1566_v42, %v4130_v32  ;;  %vm4224_vm13 = vcmp.eq.s32.totalorder %v1567_v13, %v4130_v32 }
 0x120   :  { %vm5409_vm2 = vmpackc.low %vm4140_vm1, %vm4135_vm0  ;;  %v5565_v17 = vsel %vm4219_vm12, 4294967295, %v5564_v17  ;;  %v1543_v8 = vadd.s32 128, %v4126_v62  ;;  %v1544_v16 = vadd.s32 136, %v4126_v62  ;;  %v1545_v42 = vadd.s32 144, %v4126_v62 }
 0x121   :  { %1342 = vmatmul.mubr.f32.gmra.mrb[20].mxu0 %v3810_v61  ;;  %2479 = vmatprep.subr.msk.bf16.mxu1 %vm5409_vm2, %v5472_v11  ;;  %vm5408_vm14 = vmpackc.low %vm4224_vm13, %vm4219_vm12  ;;  %vm4303_vm12 = vcmp.eq.s32.totalorder %v1570_v38, %v4130_v32 }
 0x122   :  { %1347 = vmatprep.mubr.f32.mxu0 %v3743_v7  ;;  %2481 = vmatpush1.bf16.msk.msra.mxu1 %vm5407_vm5, %v5472_v11  ;;  %vm4261_vm5 = vcmp.eq.s32.totalorder %v1568_v26, %v4130_v32  ;;  %v5582_v14 = vsel %vm4303_vm12, 4294967295, %v5581_v14 }
 0x123   :  { %v5573_v29 = vsel %vm4261_vm5, 4294967295, %v5572_v29  ;;  %5583 = vst [vmem:[#allocation12_spill] sm:$0xff] %v5582_v14 }
 0x125   :  { %1348 = vmatmul.mubr.f32.gmra.mrb[22].mxu0 %v3842_v30  ;;  %v1530_v30 = vadd.s32 24, %v4126_v62 }
 0x126   :  { %1353 = vmatprep.mubr.f32.mxu0 %v3743_v7 }
 0x127   :  { %v1565_v45 = vand.u32 63, %v1530_v30  ;;  %v5626_v30 = vmov 0 }
 0x129   :  { %1354 = vmatmul.mubr.f32.gmra.mrb[24].mxu0 %v3874_v59  ;;  %vm4182_vm7 = vcmp.eq.s32.totalorder %v1565_v45, %v4130_v32  ;;  %vm4198_vm10 = vcmp.eq.s32.totalorder %v1565_v45, %v4132_v39  ;;  %v1579_v45 = vand.u32 63, %v1544_v16  ;;  %v5668_v16 = vmov 0 }
 0x12a   :  { %1359 = vmatprep.mubr.f32.mxu0 %v3743_v7 }
 0x12d   :  { %1360 = vmatmul.mubr.f32.gmra.mrb[26].mxu0 %v3906_v60  ;;  %v1564_v60 = vand.u32 63, %v1529_v5  ;;  %v5623_v5 = vmov 0 }
 0x12e   :  { %1365 = vmatprep.mubr.f32.mxu0 %v3743_v7 }
 0x12f   :  { %vm4177_vm6 = vcmp.eq.s32.totalorder %v1564_v60, %v4130_v32  ;;  %vm4193_vm9 = vcmp.eq.s32.totalorder %v1564_v60, %v4132_v39  ;;  %v1578_v60 = vand.u32 63, %v1543_v8  ;;  %v5665_v8 = vmov 0 }
 0x130   :  { %vm5406_vm8 = vmpackc.low %vm4182_vm7, %vm4177_vm6 }
 0x131   :  { %1366 = vmatmul.mubr.f32.gmra.mrb[28].mxu0 %v3938_v12  ;;  %2483 = vmatprep.subr.msk.bf16.mxu1 %vm5406_vm8, %v5472_v11  ;;  %vm5405_vm11 = vmpackc.low %vm4198_vm10, %vm4193_vm9 }
 0x132   :  { %1371 = vmatprep.mubr.f32.mxu0 %v3743_v7  ;;  %2485 = vmatpush1.bf16.msk.msra.mxu1 %vm5405_vm11, %v5472_v11  ;;  %vm4240_vm11 = vcmp.eq.s32.totalorder %v1567_v13, %v4132_v39  ;;  %v1546_v13 = vadd.s32 152, %v4126_v62 }
 0x133   :  { %v5571_v24 = vsel %vm4240_vm11, 4294967295, %v5570_v24  ;;  %2487 = vmatprep.subr.msk.bf16.mxu1 %vm5408_vm14, %v5472_v11  ;;  %vm5410_vm8 = vmpackc.low %vm4240_vm11, %vm4235_vm15  ;;  %vm4266_vm14 = vcmp.eq.s32.totalorder %v1569_v37, %v4130_v32  ;;  %vm4282_vm15 = vcmp.eq.s32.totalorder %v1569_v37, %v4132_v39 }
 0x134   :  { %v5575_v28 = vsel %vm4266_vm14, 4294967295, %v5574_v28  ;;  %vm5414_vm2 = vmpackc.low %vm4266_vm14, %vm4261_vm5  ;;  %v5580_v53 = vsel %vm4282_vm15, 4294967295, %v5579_v53  ;;  %vm4345_vm14 = vcmp.eq.s32.totalorder %v1572_v25, %v4130_v32  ;;  %v1581_v37 = vand.u32 63, %v1546_v13 }
 0x135   :  { %1372 = vmatmul.mubr.f32.gmra.mrb[30].mxu0 %v272_v23  ;;  %v5594_v52 = vsel %vm4345_vm14, 4294967295, %v5593_v52  ;;  %v5614_v23 = vmov 0  ;;  %v5674_v13 = vmov 0 }
 0x136   :  { %2489 = vmatpush1.bf16.msk.msra.mxu1 %vm5410_vm8, %v5472_v11  ;;  %vm4277_vm8 = vcmp.eq.s32.totalorder %v1568_v26, %v4132_v39  ;;  %5595 = vst [vmem:[#allocation16_spill] sm:$0xff] %v5594_v52  ;;  %v1580_v26 = vand.u32 63, %v1545_v42  ;;  %v5671_v42 = vmov 0 }
 0x137   :  { %v5577_v34 = vsel %vm4277_vm8, 4294967295, %v5576_v34  ;;  %2491 = vmatprep.subr.msk.bf16.mxu1 %vm5414_vm2, %v5472_v11  ;;  %vm5416_vm11 = vmpackc.low %vm4282_vm15, %vm4277_vm8  ;;  %vm4308_vm2 = vcmp.eq.s32.totalorder %v1571_v47, %v4130_v32  ;;  %vm4324_vm15 = vcmp.eq.s32.totalorder %v1571_v47, %v4132_v39  ;;  %v1548_v47 = vadd.s32 168, %v4126_v62 }
 0x138   :  { %5578 = vst [vmem:[#allocation11_spill] sm:$0xff] %v5577_v34  ;;  %v5585_v44 = vsel %vm4308_vm2, 4294967295, %v5584_v44  ;;  %vm5420_vm8 = vmpackc.low %vm4308_vm2, %vm4303_vm12  ;;  %v5591_v4 = vsel %vm4324_vm15, 4294967295, %v5590_v4  ;;  %vm4387_vm2 = vcmp.eq.s32.totalorder %v1574_v27, %v4130_v32 }
 0x139   :  { %5586 = vst [vmem:[#allocation13_spill] sm:$0xff] %v5585_v44  ;;  %5592 = vst [vmem:[#allocation15_spill] sm:$0xff] %v5591_v4  ;;  %v5606_v21 = vsel %vm4387_vm2, 4294967295, %v5605_v21 }
 0x13a   :  { %2493 = vmatpush1.bf16.msk.msra.mxu1 %vm5416_vm11, %v5472_v11  ;;  %vm4319_vm11 = vcmp.eq.s32.totalorder %v1570_v38, %v4132_v39  ;;  %5607 = vst [vmem:[#allocation20_spill] sm:$0xff] %v5606_v21  ;;  %v1547_v38 = vadd.s32 160, %v4126_v62 }
 0x13b   :  { %v5588_v50 = vsel %vm4319_vm11, 4294967295, %v5587_v50  ;;  %2495 = vmatprep.subr.msk.bf16.mxu1 %vm5420_vm8, %v5472_v11  ;;  %vm5422_vm5 = vmpackc.low %vm4324_vm15, %vm4319_vm11  ;;  %vm4350_vm8 = vcmp.eq.s32.totalorder %v1573_v22, %v4130_v32  ;;  %vm4366_vm15 = vcmp.eq.s32.totalorder %v1573_v22, %v4132_v39  ;;  %v1583_v22 = vand.u32 63, %v1548_v47 }
 0x13c   :  { %5589 = vst [vmem:[#allocation14_spill] sm:$0xff] %v5588_v50  ;;  %v5597_v54 = vsel %vm4350_vm8, 4294967295, %v5596_v54  ;;  %vm5426_vm11 = vmpackc.low %vm4350_vm8, %vm4345_vm14  ;;  %v5603_v40 = vsel %vm4366_vm15, 4294967295, %v5602_v40  ;;  %vm4429_vm8 = vcmp.eq.s32.totalorder %v1576_v0, %v4130_v32  ;;  %v5680_v47 = vmov 0 }
 0x13d   :  { %5598 = vst [vmem:[#allocation17_spill] sm:$0xff] %v5597_v54  ;;  %5604 = vst [vmem:[#allocation19_spill] sm:$0xff] %v5603_v40  ;;  %v5618_v46 = vsel %vm4429_vm8, 4294967295, %v5617_v46 }
 0x13e   :  { %2497 = vmatpush1.bf16.msk.msra.mxu1 %vm5422_vm5, %v5472_v11  ;;  %vm4361_vm5 = vcmp.eq.s32.totalorder %v1572_v25, %v4132_v39  ;;  %5619 = vst [vmem:[#allocation24_spill] sm:$0xff] %v5618_v46  ;;  %v1582_v25 = vand.u32 63, %v1547_v38  ;;  %v5677_v38 = vmov 0 }
 0x13f   :  { %v5600_v33 = vsel %vm4361_vm5, 4294967295, %v5599_v33  ;;  %2499 = vmatprep.subr.msk.bf16.mxu1 %vm5426_vm11, %v5472_v11  ;;  %vm5428_vm12 = vmpackc.low %vm4366_vm15, %vm4361_vm5  ;;  %vm4392_vm11 = vcmp.eq.s32.totalorder %v1575_v9, %v4130_v32  ;;  %vm4408_vm15 = vcmp.eq.s32.totalorder %v1575_v9, %v4132_v39  ;;  %v1550_v9 = vadd.s32 184, %v4126_v62  ;;  %v5746_v49 = vld [vmem:[#allocation11_spill] sm:$0xff] }
 0x140   :  { %5601 = vst [vmem:[#allocation18_spill] sm:$0xff] %v5600_v33  ;;  %v5609_v43 = vsel %vm4392_vm11, 4294967295, %v5608_v43  ;;  %vm5432_vm5 = vmpackc.low %vm4392_vm11, %vm4387_vm2  ;;  %v5615_v23 = vsel %vm4408_vm15, 4294967295, %v5614_v23  ;;  %vm4471_vm11 = vcmp.eq.s32.totalorder %v1578_v60, %v4130_v32 }
 0x141   :  { %5610 = vst [vmem:[#allocation21_spill] sm:$0xff] %v5609_v43  ;;  %5616 = vst [vmem:[#allocation23_spill] sm:$0xff] %v5615_v23  ;;  %v5630_v63 = vsel %vm4471_vm11, 4294967295, %v5629_v63 }
 0x142   :  { %2501 = vmatpush1.bf16.msk.msra.mxu1 %vm5428_vm12, %v5472_v11  ;;  %vm4403_vm12 = vcmp.eq.s32.totalorder %v1574_v27, %v4132_v39  ;;  %5631 = vst [vmem:[#allocation28_spill] sm:$0xff] %v5630_v63  ;;  %v1549_v27 = vadd.s32 176, %v4126_v62  ;;  %v561_v63 = vld [vmem:[#allocation3] sm:$0x3] }
 0x143   :  { %v5612_v36 = vsel %vm4403_vm12, 4294967295, %v5611_v36  ;;  %2503 = vmatprep.subr.msk.bf16.mxu1 %vm5432_vm5, %v5472_v11  ;;  %vm5434_vm14 = vmpackc.low %vm4408_vm15, %vm4403_vm12  ;;  %vm4434_vm5 = vcmp.eq.s32.totalorder %v1577_v19, %v4130_v32  ;;  %vm4450_vm15 = vcmp.eq.s32.totalorder %v1577_v19, %v4132_v39  ;;  %v1585_v19 = vand.u32 63, %v1550_v9 }
 0x144   :  { %5613 = vst [vmem:[#allocation22_spill] sm:$0xff] %v5612_v36  ;;  %v5621_v58 = vsel %vm4434_vm5, 4294967295, %v5620_v58  ;;  %vm5438_vm12 = vmpackc.low %vm4434_vm5, %vm4429_vm8  ;;  %v5627_v30 = vsel %vm4450_vm15, 4294967295, %v5626_v30  ;;  %vm4513_vm5 = vcmp.eq.s32.totalorder %v1580_v26, %v4130_v32  ;;  %v5683_v9 = vmov 0 }
 0x145   :  { %5622 = vst [vmem:[#allocation25_spill] sm:$0xff] %v5621_v58  ;;  %5628 = vst [vmem:[#allocation27_spill] sm:$0xff] %v5627_v30  ;;  %v5642_v1 = vsel %vm4513_vm5, 4294967295, %v5641_v1 }
 0x146   :  { %2505 = vmatpush1.bf16.msk.msra.mxu1 %vm5434_vm14, %v5472_v11  ;;  %vm4445_vm14 = vcmp.eq.s32.totalorder %v1576_v0, %v4132_v39  ;;  %5643 = vst [vmem:[#allocation32_spill] sm:$0xff] %v5642_v1  ;;  %v1584_v0 = vand.u32 63, %v1549_v27 }
 0x147   :  { %v5624_v5 = vsel %vm4445_vm14, 4294967295, %v5623_v5  ;;  %2507 = vmatprep.subr.msk.bf16.mxu1 %vm5438_vm12, %v5472_v11  ;;  %vm5440_vm2 = vmpackc.low %vm4450_vm15, %vm4445_vm14  ;;  %vm4476_vm12 = vcmp.eq.s32.totalorder %v1579_v45, %v4130_v32  ;;  %vm4492_vm15 = vcmp.eq.s32.totalorder %v1579_v45, %v4132_v39  ;;  %v1552_v45 = vadd.s32 200, %v4126_v62 }
 0x148   :  { %5625 = vst [vmem:[#allocation26_spill] sm:$0xff] %v5624_v5  ;;  %v5633_v2 = vsel %vm4476_vm12, 4294967295, %v5632_v2  ;;  %vm5444_vm14 = vmpackc.low %vm4476_vm12, %vm4471_vm11  ;;  %v5639_v10 = vsel %vm4492_vm15, 4294967295, %v5638_v10  ;;  %vm4555_vm12 = vcmp.eq.s32.totalorder %v1582_v25, %v4130_v32 }
 0x149   :  { %5634 = vst [vmem:[#allocation29_spill] sm:$0xff] %v5633_v2  ;;  %5640 = vst [vmem:[#allocation31_spill] sm:$0xff] %v5639_v10  ;;  %v5654_v55 = vsel %vm4555_vm12, 4294967295, %v5653_v55  ;;  %v4852_v2 = vsub.s32 1, %v4126_v62 }
 0x14a   :  { %2509 = vmatpush1.bf16.msk.msra.mxu1 %vm5440_vm2, %v5472_v11  ;;  %vm4487_vm2 = vcmp.eq.s32.totalorder %v1578_v60, %v4132_v39  ;;  %5655 = vst [vmem:[#allocation36_spill] sm:$0xff] %v5654_v55  ;;  %v1551_v60 = vadd.s32 192, %v4126_v62 }
 0x14b   :  { %v5636_v18 = vsel %vm4487_vm2, 4294967295, %v5635_v18  ;;  %2511 = vmatprep.subr.msk.bf16.mxu1 %vm5444_vm14, %v5472_v11  ;;  %vm5446_vm8 = vmpackc.low %vm4492_vm15, %vm4487_vm2  ;;  %vm4518_vm14 = vcmp.eq.s32.totalorder %v1581_v37, %v4130_v32  ;;  %vm4534_vm15 = vcmp.eq.s32.totalorder %v1581_v37, %v4132_v39  ;;  %v1587_v37 = vand.u32 63, %v1552_v45  ;;  %5728 = vst [vmem:[#allocation61_spill] sm:$0xff] %v4852_v2 }
 0x14c   :  { %5637 = vst [vmem:[#allocation30_spill] sm:$0xff] %v5636_v18  ;;  %v5645_v31 = vsel %vm4518_vm14, 4294967295, %v5644_v31  ;;  %vm5450_vm2 = vmpackc.low %vm4518_vm14, %vm4513_vm5  ;;  %v5651_v6 = vsel %vm4534_vm15, 4294967295, %v5650_v6  ;;  %vm4597_vm14 = vcmp.eq.s32.totalorder %v1584_v0, %v4130_v32  ;;  %v4847_v18 = vsub.s32 0, %v4126_v62 }
 0x14d   :  { %5646 = vst [vmem:[#allocation33_spill] sm:$0xff] %v5645_v31  ;;  %5652 = vst [vmem:[#allocation35_spill] sm:$0xff] %v5651_v6  ;;  %v5666_v8 = vsel %vm4597_vm14, 4294967295, %v5665_v8  ;;  %v4862_v58 = vrot.slane %v561_v63, %v4852_v2 }
 0x14e   :  { %2513 = vmatpush1.bf16.msk.msra.mxu1 %vm5446_vm8, %v5472_v11  ;;  %vm4529_vm8 = vcmp.eq.s32.totalorder %v1580_v26, %v4132_v39  ;;  %5667 = vst [vmem:[#allocation40_spill] sm:$0xff] %v5666_v8  ;;  %v1586_v26 = vand.u32 63, %v1551_v60  ;;  %5727 = vst [vmem:[#allocation60_spill] sm:$0xff] %v4847_v18  ;;  %v4857_v30 = vrot.slane %v561_v63, %v4847_v18 }
 0x14f   :  { %v5648_v48 = vsel %vm4529_vm8, 4294967295, %v5647_v48  ;;  %2515 = vmatprep.subr.msk.bf16.mxu1 %vm5450_vm2, %v5472_v11  ;;  %vm5452_vm11 = vmpackc.low %vm4534_vm15, %vm4529_vm8  ;;  %vm4560_vm2 = vcmp.eq.s32.totalorder %v1583_v22, %v4130_v32  ;;  %vm4576_vm15 = vcmp.eq.s32.totalorder %v1583_v22, %v4132_v39  ;;  %v1554_v22 = vadd.s32 216, %v4126_v62 }
 0x150   :  { %5649 = vst [vmem:[#allocation34_spill] sm:$0xff] %v5648_v48  ;;  %v5657_v41 = vsel %vm4560_vm2, 4294967295, %v5656_v41  ;;  %vm5456_vm8 = vmpackc.low %vm4560_vm2, %vm4555_vm12  ;;  %v5663_v15 = vsel %vm4576_vm15, 4294967295, %v5662_v15  ;;  %vm4639_vm2 = vcmp.eq.s32.totalorder %v1586_v26, %v4130_v32 }
 0x151   :  { %5658 = vst [vmem:[#allocation37_spill] sm:$0xff] %v5657_v41  ;;  %5664 = vst [vmem:[#allocation39_spill] sm:$0xff] %v5663_v15  ;;  %v5678_v38 = vsel %vm4639_vm2, 4294967295, %v5677_v38  ;;  %v1589_v45 = vand.u32 63, %v1554_v22  ;;  %v1556_v22 = vadd.s32 232, %v4126_v62 }
 0x152   :  { %2517 = vmatpush1.bf16.msk.msra.mxu1 %vm5452_vm11, %v5472_v11  ;;  %vm4571_vm11 = vcmp.eq.s32.totalorder %v1582_v25, %v4132_v39  ;;  %5679 = vst [vmem:[#allocation44_spill] sm:$0xff] %v5678_v38  ;;  %v1553_v25 = vadd.s32 208, %v4126_v62 }
 0x153   :  { %v5660_v56 = vsel %vm4571_vm11, 4294967295, %v5659_v56  ;;  %2519 = vmatprep.subr.msk.bf16.mxu1 %vm5456_vm8, %v5472_v11  ;;  %vm5458_vm5 = vmpackc.low %vm4576_vm15, %vm4571_vm11  ;;  %vm4602_vm8 = vcmp.eq.s32.totalorder %v1585_v19, %v4130_v32  ;;  %vm4618_vm15 = vcmp.eq.s32.totalorder %v1585_v19, %v4132_v39 }
 0x154   :  { %5661 = vst [vmem:[#allocation38_spill] sm:$0xff] %v5660_v56  ;;  %v5669_v16 = vsel %vm4602_vm8, 4294967295, %v5668_v16  ;;  %vm5462_vm11 = vmpackc.low %vm4602_vm8, %vm4597_vm14  ;;  %v5675_v13 = vsel %vm4618_vm15, 4294967295, %v5674_v13  ;;  %v1588_v60 = vand.u32 63, %v1553_v25  ;;  %v1555_v25 = vadd.s32 224, %v4126_v62 }
 0x155   :  { %5670 = vst [vmem:[#allocation41_spill] sm:$0xff] %v5669_v16  ;;  %5676 = vst [vmem:[#allocation43_spill] sm:$0xff] %v5675_v13 }
 0x156   :  { %2521 = vmatpush1.bf16.msk.msra.mxu1 %vm5458_vm5, %v5472_v11  ;;  %vm4613_vm5 = vcmp.eq.s32.totalorder %v1584_v0, %v4132_v39  ;;  %v5686_v0 = vmov 0  ;;  %vm4685_vm8 = vcmp.eq.s32.totalorder %v1588_v60, %v4130_v32 }
 0x157   :  { %v5672_v42 = vsel %vm4613_vm5, 4294967295, %v5671_v42  ;;  %2523 = vmatprep.subr.msk.bf16.mxu1 %vm5462_vm11, %v5472_v11  ;;  %vm5463_vm12 = vmpackc.low %vm4618_vm15, %vm4613_vm5  ;;  %vm4644_vm11 = vcmp.eq.s32.totalorder %v1587_v37, %v4130_v32  ;;  %vm4657_vm5 = vcmp.eq.s32.totalorder %v1586_v26, %v4132_v39  ;;  %vm4662_vm15 = vcmp.eq.s32.totalorder %v1587_v37, %v4132_v39 }
 0x158   :  { %5673 = vst [vmem:[#allocation42_spill] sm:$0xff] %v5672_v42  ;;  %v5681_v47 = vsel %vm4644_vm11, 4294967295, %v5680_v47  ;;  %v5684_v9 = vsel %vm4657_vm5, 4294967295, %v5683_v9  ;;  %v5687_v0 = vsel %vm4662_vm15, 4294967295, %v5686_v0  ;;  %vm5470_vm14 = vmpackc.low %vm4662_vm15, %vm4657_vm5  ;;  %v5689_v26 = vmov 0 }
 0x159   :  { %5682 = vst [vmem:[#allocation45_spill] sm:$0xff] %v5681_v47  ;;  %5685 = vst [vmem:[#allocation46_spill] sm:$0xff] %v5684_v9  ;;  %v5690_v26 = vsel %vm4685_vm8, 4294967295, %v5689_v26  ;;  %v5692_v37 = vmov 0  ;;  %vm4703_vm5 = vcmp.eq.s32.totalorder %v1588_v60, %v4132_v39  ;;  %vm4708_vm15 = vcmp.eq.s32.totalorder %v1589_v45, %v4132_v39 }
 0x15a   :  { %2525 = vmatpush1.bf16.msk.msra.mxu1 %vm5463_vm12, %v5472_v11  ;;  %vm5468_vm12 = vmpackc.low %vm4644_vm11, %vm4639_vm2  ;;  %5688 = vst [vmem:[#allocation47_spill] sm:$0xff] %v5687_v0  ;;  %v5698_v9 = vmov 0  ;;  %v5701_v47 = vmov 1.0|1.0   ;;  %v1590_v60 = vand.u32 63, %v1555_v25  ;;  %v1591_v42 = vand.u32 63, %v1556_v22 }
 0x15b   :  { %2527 = vmatprep.subr.msk.bf16.mxu1 %vm5468_vm12, %v5472_v11  ;;  %5691 = vst [vmem:[#allocation48_spill] sm:$0xff] %v5690_v26  ;;  %vm4690_vm12 = vcmp.eq.s32.totalorder %v1589_v45, %v4130_v32  ;;  %v5699_v9 = vsel %vm4708_vm15, 4294967295, %v5698_v9  ;;  %vm5484_vm2 = vmpackc.low %vm4708_vm15, %vm4703_vm5  ;;  %v5702_v45 = vmov 0  ;;  %v5705_v26 = vmov 0 }
 0x15c   :  { %v5693_v37 = vsel %vm4690_vm12, 4294967295, %v5692_v37  ;;  %5700 = vst [vmem:[#allocation51_spill] sm:$0xff] %v5699_v9  ;;  %vm4731_vm11 = vcmp.eq.s32.totalorder %v1590_v60, %v4130_v32  ;;  %v1557_v25 = vadd.s32 240, %v4126_v62  ;;  %v1558_v22 = vadd.s32 248, %v4126_v62 }
 0x15d   :  { %5694 = vst [vmem:[#allocation49_spill] sm:$0xff] %v5693_v37  ;;  %v5703_v45 = vsel %vm4731_vm11, 4294967295, %v5702_v45  ;;  %vm4752_vm15 = vcmp.eq.s32.totalorder %v1591_v42, %v4132_v39  ;;  %v5711_v9 = vmov 0 }
 0x15e   :  { %2529 = vmatpush1.bf16.msk.msra.mxu1 %vm5470_vm14, %v5472_v11  ;;  %vm5481_vm14 = vmpackc.low %vm4690_vm12, %vm4685_vm8  ;;  %v5695_v11 = vmov 0  ;;  %5704 = vst [vmem:[#allocation52_spill] sm:$0xff] %v5703_v45  ;;  %v5712_v9 = vsel %vm4752_vm15, 4294967295, %v5711_v9  ;;  %v1593_v8 = vand.u32 63, %v1558_v22  ;;  %v5717_v45 = vmov 0 }
 0x15f   :  { %v5696_v11 = vsel %vm4703_vm5, 4294967295, %v5695_v11  ;;  %2531 = vmatprep.subr.msk.bf16.mxu1 %vm5481_vm14, %v5701_v47  ;;  %vm4736_vm14 = vcmp.eq.s32.totalorder %v1591_v42, %v4130_v32  ;;  %vm4747_vm5 = vcmp.eq.s32.totalorder %v1590_v60, %v4132_v39  ;;  %5713 = vst [vmem:[#allocation55_spill] sm:$0xff] %v5712_v9  ;;  %v1592_v60 = vand.u32 63, %v1557_v25 }
 0x160   :  { %5697 = vst [vmem:[#allocation50_spill] sm:$0xff] %v5696_v11  ;;  %v5706_v26 = vsel %vm4736_vm14, 4294967295, %v5705_v26  ;;  %v5708_v11 = vmov 0  ;;  %vm5498_vm8 = vmpackc.low %vm4752_vm15, %vm4747_vm5  ;;  %v5714_v42 = vmov 0  ;;  %v5720_v25 = vmov 0 }
 0x161   :  { %5707 = vst [vmem:[#allocation53_spill] sm:$0xff] %v5706_v26  ;;  %v5709_v11 = vsel %vm4747_vm5, 4294967295, %v5708_v11  ;;  %vm4773_vm12 = vcmp.eq.s32.totalorder %v1592_v60, %v4130_v32  ;;  %v5723_v22 = vmov 0  ;;  %vm5726_vm15 = vmpackc.low %vm4140_vm1, %vm4135_vm0 }
 0x162   :  { %2533 = vmatpush1.bf16.msk.msra.mxu1 %vm5484_vm2, %v5701_v47  ;;  %vm5493_vm2 = vmpackc.low %vm4736_vm14, %vm4731_vm11  ;;  %5710 = vst [vmem:[#allocation54_spill] sm:$0xff] %v5709_v11  ;;  %v5715_v42 = vsel %vm4773_vm12, 4294967295, %v5714_v42  ;;  %vm4787_vm14 = vcmp.eq.s32.totalorder %v1592_v60, %v4132_v39 }
 0x163   :  { %2535 = vmatprep.subr.msk.bf16.mxu1 %vm5493_vm2, %v5701_v47  ;;  %5716 = vst [vmem:[#allocation56_spill] sm:$0xff] %v5715_v42  ;;  %vm4778_vm2 = vcmp.eq.s32.totalorder %v1593_v8, %v4130_v32  ;;  %v5721_v25 = vsel %vm4787_vm14, 4294967295, %v5720_v25  ;;  %vm5734_vm0 = vmpackc.low %vm4156_vm4, %vm4151_vm3  ;;  %vm5737_vm3 = vnez %v5565_v17 }
 0x164   :  { %v5718_v45 = vsel %vm4778_vm2, 4294967295, %v5717_v45  ;;  %vm2538_vm11 = vmpackc.low %vm4778_vm2, %vm4773_vm12  ;;  %5722 = vst [vmem:[#allocation58_spill] sm:$0xff] %v5721_v25 }
 0x165   :  { %5719 = vst [vmem:[#allocation57_spill] sm:$0xff] %v5718_v45  ;;  %vm5735_vm1 = vmpackc.low %vm4182_vm7, %vm4177_vm6  ;;  %vm5739_vm6 = vnez %v5571_v24  ;;  %vm5740_vm7 = vnez %v5569_v51 }
 0x166   :  { %2537 = vmatpush1.bf16.msk.msra.mxu1 %vm5498_vm8, %v5701_v47  ;;  %vm4792_vm8 = vcmp.eq.s32.totalorder %v1593_v8, %v4132_v39  ;;  %vm5738_vm4 = vmpackc.low %vm4224_vm13, %vm5737_vm3  ;;  %vm5743_vm13 = vnez %v5573_v29  ;;  %v5751_v29 = vld [vmem:[#allocation12_spill] sm:$0xff] }
 0x167   :  { %v5724_v22 = vsel %vm4792_vm8, 4294967295, %v5723_v22  ;;  %2539 = vmatprep.subr.msk.bf16.mxu1 %vm2538_vm11, %v5701_v47  ;;  %vm2540_vm5 = vmpackc.low %vm4792_vm8, %vm4787_vm14 }
 0x168   :  { %5725 = vst [vmem:[#allocation59_spill] sm:$0xff] %v5724_v22 }
 0x16a   :  { %2541 = vmatpush1.bf16.msk.msra.mxu1 %vm2540_vm5, %v5701_v47 }
 0x16b   :  { %2543 = vmatprep.subr.msk.bf16.mxu1 %vm5726_vm15, %v5701_v47  ;;  %vm5736_vm15 = vmpackc.low %vm4198_vm10, %vm4193_vm9  ;;  %vm5742_vm10 = vnez %v5575_v28  ;;  %v5749_v28 = vld [vmem:[#allocation13_spill] sm:$0xff] }
 0x16c   :  { %vm5741_vm9 = vmpackc.low %vm5739_vm6, %vm5740_vm7  ;;  %vm5752_vm6 = vnez %v5751_v29  ;;  %v5796_v29 = vld [vmem:[#allocation30_spill] sm:$0xff] }
 0x18b   :  { %v4650_v27 = vpop.f32.mrb[0].mxu1 }
 0x18c   :  { %v4666_v19 = vpop.f32.mrb[1].mxu1  ;;  %v2606_v23 = vadd.f32 %v4650_v27, %v4857_v30 }
 0x18d   :  { %v2608_v21 = vadd.f32 %v4666_v19, %v4862_v58 }
 0x18f   :  { %v4696_v38 = vpop.f32.mrb[2].mxu1 }
 0x190   :  { %v4712_v0 = vpop.f32.mrb[3].mxu1  ;;  %v2610_v18 = vadd.f32 %v4696_v38, %v4857_v30 }
 0x191   :  { %v2612_v52 = vadd.f32 %v4712_v0, %v4862_v58 }
 0x193   :  { %v812_v37 = vpop.f32.mrb[4].mxu1 }
 0x194   :  { %v814_v13 = vpop.f32.mrb[5].mxu1  ;;  %v2614_v4 = vadd.f32 %v812_v37, %v4857_v30 }
 0x195   :  { %v2616_v27 = vadd.f32 %v814_v13, %v4862_v58 }
 0x197   :  { %v818_v26 = vpop.f32.mrb[6].mxu1 }
 0x198   :  { %v820_v32 = vpop.f32.mrb[7].mxu1 }
 0x19b   :  { %v824_v39 = vpop.f32.mrb[8].mxu1 }
 0x19c   :  { %v826_v8 = vpop.f32.mrb[9].mxu1 }
 0x19f   :  { %v830_v60 = vpop.f32.mrb[10].mxu1 }
 0x1a0   :  { %v832_v42 = vpop.f32.mrb[11].mxu1 }
 0x1a3   :  { %v836_v45 = vpop.f32.mrb[12].mxu1 }
 0x1a4   :  { %v838_v11 = vpop.f32.mrb[13].mxu1 }
 0x1a7   :  { %v4818_v9 = vpop.f32.mrb[14].mxu1 }
 0x1a8   :  { %v4820_v22 = vpop.f32.mrb[15].mxu1 }
 0x1ab   :  { %v4822_v25 = vpop.f32.mrb[16].mxu1 }
 0x1ac   :  { %v4824_v16 = vpop.f32.mrb[17].mxu1 }
 0x1af   :  { %v4826_v56 = vpop.f32.mrb[18].mxu1 }
 0x1b0   :  { %v4828_v7 = vpop.f32.mrb[19].mxu1 }
 0x1b3   :  { %v4830_v61 = vpop.f32.mrb[20].mxu1 }
 0x1b4   :  { %v4832_v15 = vpop.f32.mrb[21].mxu1 }
 0x1b7   :  { %v4834_v55 = vpop.f32.mrb[22].mxu1 }
 0x1b8   :  { %v4836_v41 = vpop.f32.mrb[23].mxu1 }
 0x1bb   :  { %v4838_v48 = vpop.f32.mrb[24].mxu1 }
 0x1bc   :  { %v4840_v6 = vpop.f32.mrb[25].mxu1 }
 0x1bf   :  { %v4842_v1 = vpop.f32.mrb[26].mxu1 }
 0x1c0   :  { %v4844_v31 = vpop.f32.mrb[27].mxu1 }
 0x1c3   :  { %v4849_v10 = vpop.f32.mrb[28].mxu1 }
 0x1c4   :  { %v4854_v5 = vpop.f32.mrb[29].mxu1 }
 0x1c7   :  { %v4859_v46 = vpop.f32.mrb[30].mxu1 }
 0x1c8   :  { %v4864_v36 = vpop.f32.mrb[31].mxu1 }
 0x1cc   :  { %v1283_v62 = vpop.f32.mrb[0].mxu0 }
 0x1cd   :  { %v2607_v43 = vadd.f32 %v2606_v23, %v1283_v62  ;;  %v1285_v33 = vpop.f32.mrb[1].mxu0 }
 0x1ce   :  { %v2609_v40 = vadd.f32 %v2608_v21, %v1285_v33  ;;  %v2618_v33 = vadd.f32 %v818_v26, %v4857_v30  ;;  %v2620_v21 = vadd.f32 %v820_v32, %v4862_v58 }
 0x1d0   :  { %v1289_v63 = vpop.f32.mrb[2].mxu0 }
 0x1d1   :  { %v2611_v2 = vadd.f32 %v2610_v18, %v1289_v63  ;;  %v1291_v54 = vpop.f32.mrb[3].mxu0  ;;  %v2622_v18 = vadd.f32 %v824_v39, %v4857_v30 }
 0x1d2   :  { %v2613_v50 = vadd.f32 %v2612_v52, %v1291_v54  ;;  %v2624_v52 = vadd.f32 %v826_v8, %v4862_v58 }
 0x1d4   :  { %v1295_v14 = vpop.f32.mrb[4].mxu0 }
 0x1d5   :  { %v2615_v19 = vadd.f32 %v2614_v4, %v1295_v14  ;;  %v1297_v44 = vpop.f32.mrb[5].mxu0  ;;  %v2626_v14 = vadd.f32 %v830_v60, %v4857_v30  ;;  %v2636_v60 = vadd.f32 %v4820_v22, %v4862_v58 }
 0x1d6   :  { %v2617_v62 = vadd.f32 %v2616_v27, %v1297_v44  ;;  %v2628_v44 = vadd.f32 %v832_v42, %v4862_v58 }
 0x1d8   :  { %v1301_v23 = vpop.f32.mrb[6].mxu0 }
 0x1d9   :  { %v2619_v38 = vadd.f32 %v2618_v33, %v1301_v23  ;;  %v1303_v34 = vpop.f32.mrb[7].mxu0  ;;  %v2630_v33 = vadd.f32 %v836_v45, %v4857_v30  ;;  %v2638_v45 = vadd.f32 %v4822_v25, %v4857_v30  ;;  %v2642_v25 = vadd.f32 %v4826_v56, %v4857_v30 }
 0x1da   :  { %v2621_v0 = vadd.f32 %v2620_v21, %v1303_v34  ;;  %v2632_v34 = vadd.f32 %v838_v11, %v4862_v58  ;;  %v2640_v11 = vadd.f32 %v4824_v16, %v4862_v58  ;;  %v2644_v16 = vadd.f32 %v4828_v7, %v4862_v58 }
 0x1db   :  { %v4922_v56 = vmax.f32 %v2619_v38, 0.0 }
 0x1dc   :  { %v1307_v54 = vpop.f32.mrb[8].mxu0 }
 0x1dd   :  { %v2623_v37 = vadd.f32 %v2622_v18, %v1307_v54  ;;  %v1309_v63 = vpop.f32.mrb[9].mxu0  ;;  %v2634_v18 = vadd.f32 %v4818_v9, %v4857_v30  ;;  %v1458_v3 = vmul.f32 %v4922_v56, %v4922_v56 }
 0x1de   :  { %v2625_v13 = vadd.f32 %v2624_v52, %v1309_v63  ;;  %v4888_v63 = vmax.f32 %v2613_v50, 0.0 }
 0x1e0   :  { %v1313_v4 = vpop.f32.mrb[10].mxu0  ;;  %5729 = vst [vmem:[#allocation62_spill] sm:$0xff] %v4888_v63  ;;  %v1455_v50 = vmul.f32 %v4888_v63, %v4888_v63 }
 0x1e1   :  { %v2627_v26 = vadd.f32 %v2626_v14, %v1313_v4  ;;  %v1315_v27 = vpop.f32.mrb[11].mxu0  ;;  %v4896_v4 = vmax.f32 %v2617_v62, 0.0 }
 0x1e2   :  { %v2629_v32 = vadd.f32 %v2628_v44, %v1315_v27  ;;  %v4894_v44 = vmax.f32 %v2609_v40, 0.0  ;;  %v4898_v27 = vmax.f32 %v2611_v2, 0.0  ;;  %v4908_v40 = vmax.f32 %v2615_v19, 0.0 }
 0x1e3   :  { %5730 = vst [vmem:[#allocation63_spill] sm:$0xff] %v4896_v4  ;;  %v1457_v62 = vmul.f32 %v4896_v4, %v4896_v4 }
 0x1e4   :  { %v1319_v21 = vpop.f32.mrb[12].mxu0  ;;  %v1453_v2 = vmul.f32 %v4894_v44, %v4894_v44  ;;  %v1454_v35 = vmul.f32 %v4898_v27, %v4898_v27  ;;  %v1456_v12 = vmul.f32 %v4908_v40, %v4908_v40 }
 0x1e5   :  { %v2631_v39 = vadd.f32 %v2630_v33, %v1319_v21  ;;  %v1321_v23 = vpop.f32.mrb[13].mxu0 }
 0x1e6   :  { %v2633_v8 = vadd.f32 %v2632_v34, %v1321_v23  ;;  %v4902_v34 = vmax.f32 %v2621_v0, 0.0  ;;  %v4906_v23 = vmax.f32 %v2607_v43, 0.0  ;;  %v1431_v43 = vadd.f32 %v4888_v63, %v4894_v44 }
 0x1e7   :  { %v1505_v7 = vadd.f32 %v1455_v50, %v1453_v2  ;;  %v4933_v63 = vmax.f32 %v2623_v37, 0.0 }
 0x1e8   :  { %v1325_v52 = vpop.f32.mrb[14].mxu0  ;;  %v1432_v38 = vadd.f32 %v1431_v43, %v4896_v4  ;;  %v4938_v2 = vmax.f32 %v2633_v8, 0.0  ;;  %v1452_v59 = vmul.f32 %v4906_v23, %v4906_v23 }
 0x1e9   :  { %v2635_v42 = vadd.f32 %v2634_v18, %v1325_v52  ;;  %v1327_v54 = vpop.f32.mrb[15].mxu0  ;;  %v4916_v18 = vmax.f32 %v2625_v13, 0.0  ;;  %v2646_v13 = vadd.f32 %v4830_v61, %v4857_v30  ;;  %v1460_v17 = vmul.f32 %v4933_v63, %v4933_v63 }
 0x1ea   :  { %v2637_v14 = vadd.f32 %v2636_v60, %v1327_v54  ;;  %v1410_v60 = vadd.f32 %v4898_v27, %v4906_v23  ;;  %v1459_v54 = vmul.f32 %v4902_v34, %v4902_v34  ;;  %v1484_v20 = vadd.f32 %v1454_v35, %v1452_v59 }
 0x1eb   :  { %v1461_v50 = vmul.f32 %v4916_v18, %v4916_v18 }
 0x1ec   :  { %v1331_v9 = vpop.f32.mrb[16].mxu0  ;;  %v4951_v4 = vmax.f32 %v2637_v14, 0.0  ;;  %v1485_v57 = vadd.f32 %v1484_v20, %v1456_v12  ;;  %v5784_v12 = vld [vmem:[#allocation27_spill] sm:$0xff]  ;;  %v5786_v20 = vld [vmem:[#allocation26_spill] sm:$0xff] }
 0x1ed   :  { %v2639_v22 = vadd.f32 %v2638_v45, %v1331_v9  ;;  %v1333_v33 = vpop.f32.mrb[17].mxu0  ;;  %v4926_v45 = vmax.f32 %v2629_v32, 0.0  ;;  %v2648_v9 = vadd.f32 %v4832_v15, %v4862_v58  ;;  %v1433_v15 = vadd.f32 %v1432_v38, %v4902_v34 }
 0x1ee   :  { %v2641_v21 = vadd.f32 %v2640_v11, %v1333_v33  ;;  %v1411_v33 = vadd.f32 %v1410_v60, %v4908_v40  ;;  %v1486_v51 = vadd.f32 %v1485_v57, %v1458_v3 }
 0x1ef   :  { %v1463_v37 = vmul.f32 %v4926_v45, %v4926_v45 }
 0x1f0   :  { %v1337_v0 = vpop.f32.mrb[18].mxu0 }
 0x1f1   :  { %v2643_v19 = vadd.f32 %v2642_v25, %v1337_v0  ;;  %v1339_v52 = vpop.f32.mrb[19].mxu0  ;;  %v1506_v25 = vadd.f32 %v1505_v7, %v1457_v62  ;;  %v4941_v0 = vmax.f32 %v2627_v26, 0.0  ;;  %v2650_v62 = vadd.f32 %v4834_v55, %v4857_v30 }
 0x1f2   :  { %v2645_v11 = vadd.f32 %v2644_v16, %v1339_v52  ;;  %v1412_v16 = vadd.f32 %v1411_v33, %v4922_v56  ;;  %v4949_v7 = vmax.f32 %v2631_v39, 0.0  ;;  %v2652_v26 = vadd.f32 %v4836_v41, %v4862_v58 }
 0x1f3   :  { %v1507_v60 = vadd.f32 %v1506_v25, %v1459_v54  ;;  %v1465_v54 = vmul.f32 %v4938_v2, %v4938_v2  ;;  %v4959_v25 = vmax.f32 %v2635_v42, 0.0  ;;  %v4961_v55 = vmax.f32 %v2641_v21, 0.0 }
 0x1f4   :  { %v1343_v32 = vpop.f32.mrb[20].mxu0  ;;  %v1413_v8 = vadd.f32 %v1412_v16, %v4933_v63  ;;  %v2654_v41 = vadd.f32 %v4838_v48, %v4857_v30  ;;  %v2656_v42 = vadd.f32 %v4840_v6, %v4862_v58  ;;  %v1462_v24 = vmul.f32 %v4941_v0, %v4941_v0 }
 0x1f5   :  { %v2647_v61 = vadd.f32 %v2646_v13, %v1343_v32  ;;  %v1345_v52 = vpop.f32.mrb[21].mxu0  ;;  %v1434_v13 = vadd.f32 %v1433_v15, %v4916_v18  ;;  %v1508_v33 = vadd.f32 %v1507_v60, %v1461_v50  ;;  %v1467_v15 = vmul.f32 %v4951_v4, %v4951_v4 }
 0x1f6   :  { %v2649_v43 = vadd.f32 %v2648_v9, %v1345_v52  ;;  %v1414_v9 = vadd.f32 %v1413_v8, %v4941_v0  ;;  %v4969_v60 = vmax.f32 %v2639_v22, 0.0  ;;  %v4974_v8 = vmax.f32 %v2645_v11, 0.0 }
 0x1f7   :  { %v1435_v14 = vadd.f32 %v1434_v13, %v4926_v45  ;;  %v1509_v16 = vadd.f32 %v1508_v33, %v1463_v37  ;;  %v1469_v48 = vmul.f32 %v4961_v55, %v4961_v55  ;;  %v4979_v13 = vmax.f32 %v2643_v19, 0.0 }
 0x1f8   :  { %v1349_v38 = vpop.f32.mrb[22].mxu0  ;;  %v1415_v50 = vadd.f32 %v1414_v9, %v4949_v7  ;;  %v4982_v9 = vmax.f32 %v2649_v43, 0.0 }
 0x1f9   :  { %v2651_v39 = vadd.f32 %v2650_v62, %v1349_v38  ;;  %v1351_v32 = vpop.f32.mrb[23].mxu0  ;;  %v1436_v21 = vadd.f32 %v1435_v14, %v4938_v2  ;;  %v1510_v62 = vadd.f32 %v1509_v16, %v1465_v54  ;;  %v2658_v54 = vadd.f32 %v4842_v1, %v4857_v30 }
 0x1fa   :  { %v2653_v52 = vadd.f32 %v2652_v26, %v1351_v32  ;;  %v1416_v26 = vadd.f32 %v1415_v50, %v4959_v25  ;;  %v4987_v14 = vmax.f32 %v2647_v61, 0.0  ;;  %v2660_v16 = vadd.f32 %v4844_v31, %v4862_v58 }
 0x1fb   :  { %v1437_v22 = vadd.f32 %v1436_v21, %v4951_v4  ;;  %v1511_v11 = vadd.f32 %v1510_v62, %v1467_v15  ;;  %v4997_v1 = vmax.f32 %v2651_v39, 0.0  ;;  %v1473_v31 = vmul.f32 %v4982_v9, %v4982_v9 }
 0x1fc   :  { %v1355_v37 = vpop.f32.mrb[24].mxu0  ;;  %v1417_v32 = vadd.f32 %v1416_v26, %v4969_v60  ;;  %v4994_v50 = vmax.f32 %v2653_v52, 0.0  ;;  %v2662_v52 = vadd.f32 %v4849_v10, %v4857_v30 }
 0x1fd   :  { %v2655_v33 = vadd.f32 %v2654_v41, %v1355_v37  ;;  %v1357_v38 = vpop.f32.mrb[25].mxu0  ;;  %v1438_v19 = vadd.f32 %v1437_v22, %v4961_v55  ;;  %v1471_v41 = vmul.f32 %v4974_v8, %v4974_v8 }
 0x1fe   :  { %v2657_v6 = vadd.f32 %v2656_v42, %v1357_v38  ;;  %v1512_v42 = vadd.f32 %v1511_v11, %v1469_v48  ;;  %v1418_v21 = vadd.f32 %v1417_v32, %v4979_v13  ;;  %v2664_v48 = vadd.f32 %v4854_v5, %v4862_v58 }
 0x1ff   :  { %v1439_v61 = vadd.f32 %v1438_v19, %v4974_v8  ;;  %v5009_v39 = vmax.f32 %v2655_v33, 0.0  ;;  %v1475_v11 = vmul.f32 %v4994_v50, %v4994_v50 }
 0x200   :  { %v1361_v43 = vpop.f32.mrb[26].mxu0  ;;  %v5002_v37 = vmax.f32 %v2657_v6, 0.0  ;;  %v1419_v38 = vadd.f32 %v1418_v21, %v4987_v14  ;;  %v1513_v22 = vadd.f32 %v1512_v42, %v1471_v41  ;;  %v2666_v42 = vadd.f32 %v4859_v46, %v4857_v30 }
 0x201   :  { %v2659_v15 = vadd.f32 %v2658_v54, %v1361_v43  ;;  %v1363_v62 = vpop.f32.mrb[27].mxu0  ;;  %v1440_v54 = vadd.f32 %v1439_v61, %v4982_v9  ;;  %v1476_v59 = vmul.f32 %v5009_v39, %v5009_v39 }
 0x202   :  { %v2661_v26 = vadd.f32 %v2660_v16, %v1363_v62  ;;  %v1420_v16 = vadd.f32 %v1419_v38, %v4997_v1  ;;  %v1514_v5 = vadd.f32 %v1513_v22, %v1473_v31  ;;  %v1477_v33 = vmul.f32 %v5002_v37, %v5002_v37 }
 0x203   :  { %v5017_v19 = vmax.f32 %v2659_v15, 0.0  ;;  %v1441_v21 = vadd.f32 %v1440_v54, %v4994_v50  ;;  %v2668_v62 = vadd.f32 %v4864_v36, %v4862_v58 }
 0x204   :  { %v5014_v32 = vmax.f32 %v2661_v26, 0.0  ;;  %v1367_v6 = vpop.f32.mrb[28].mxu0  ;;  %v1421_v61 = vadd.f32 %v1420_v16, %v5009_v39  ;;  %v1515_v15 = vadd.f32 %v1514_v5, %v1475_v11 }
 0x205   :  { %v2663_v10 = vadd.f32 %v2662_v52, %v1367_v6  ;;  %v1369_v43 = vpop.f32.mrb[29].mxu0  ;;  %v1442_v52 = vadd.f32 %v1441_v21, %v5002_v37  ;;  %v1478_v57 = vmul.f32 %v5017_v19, %v5017_v19 }
 0x206   :  { %5731 = vst [vmem:[#allocation64_spill] sm:$0xff] %v5014_v32  ;;  %v2665_v41 = vadd.f32 %v2664_v48, %v1369_v43  ;;  %v1479_v31 = vmul.f32 %v5014_v32, %v5014_v32  ;;  %v1422_v48 = vadd.f32 %v1421_v61, %v5017_v19  ;;  %v1516_v30 = vadd.f32 %v1515_v15, %v1477_v33 }
 0x207   :  { %v5027_v26 = vmax.f32 %v2663_v10, 0.0  ;;  %v1443_v36 = vadd.f32 %v1442_v52, %v5014_v32 }
 0x208   :  { %v5032_v38 = vmax.f32 %v2665_v41, 0.0  ;;  %v1373_v22 = vpop.f32.mrb[30].mxu0  ;;  %v1517_v10 = vadd.f32 %v1516_v30, %v1479_v31 }
 0x209   :  { %v2667_v54 = vadd.f32 %v2666_v42, %v1373_v22  ;;  %v1375_v46 = vpop.f32.mrb[31].mxu0  ;;  %v1423_v11 = vadd.f32 %v1422_v48, %v5027_v26 }
 0x20a   :  { %5732 = vst [vmem:[#allocation65_spill] sm:$0xff] %v5032_v38  ;;  %v1481_v58 = vmul.f32 %v5032_v38, %v5032_v38  ;;  %v2669_v6 = vadd.f32 %v2668_v62, %v1375_v46  ;;  %v1444_v43 = vadd.f32 %v1443_v36, %v5032_v38 }
 0x20b   :  { %v5039_v16 = vmax.f32 %v2667_v54, 0.0 }
 0x20c   :  { %v5042_v5 = vmax.f32 %v2669_v6, 0.0  ;;  %v1518_v41 = vadd.f32 %v1517_v10, %v1481_v58 }
 0x20d   :  { %v1424_v21 = vadd.f32 %v1423_v11, %v5039_v16 }
 0x20e   :  { %5733 = vst [vmem:[#allocation66_spill] sm:$0xff] %v5042_v5  ;;  %v1445_v33 = vadd.f32 %v1444_v43, %v5042_v5  ;;  %v1483_v42 = vmul.f32 %v5042_v5, %v5042_v5 }
 0x20f   :  { %v1425_v61 = vrot.slane %v1424_v21, 4 }
 0x210   :  { %v1446_v15 = vrot.slane %v1445_v33, 4  ;;  %v1519_v62 = vadd.f32 %v1518_v41, %v1483_v42  ;;  %v1466_v41 = vmul.f32 %v4959_v25, %v4959_v25  ;;  %v5761_v42 = vld [vmem:[#allocation16_spill] sm:$0xff] }
 0x211   :  { %v1426_v52 = vadd.f32 %v1425_v61, %v1424_v21 }
 0x212   :  { %v1447_v22 = vadd.f32 %v1446_v15, %v1445_v33  ;;  %v1520_v48 = vrot.slane %v1519_v62, 4  ;;  %v5759_v33 = vld [vmem:[#allocation17_spill] sm:$0xff]  ;;  %v1468_v15 = vmul.f32 %v4969_v60, %v4969_v60 }
 0x213   :  { %v1427_v54 = vrot.slane %v1426_v52, 2 }
 0x214   :  { %v1448_v31 = vrot.slane %v1447_v22, 2  ;;  %v1521_v46 = vadd.f32 %v1520_v48, %v1519_v62  ;;  %v5764_v62 = vld [vmem:[#allocation19_spill] sm:$0xff]  ;;  %v1470_v48 = vmul.f32 %v4979_v13, %v4979_v13 }
 0x215   :  { %v1428_v30 = vadd.f32 %v1427_v54, %v1426_v52  ;;  %v5766_v52 = vld [vmem:[#allocation18_spill] sm:$0xff]  ;;  %v5769_v54 = vld [vmem:[#allocation21_spill] sm:$0xff] }
 0x216   :  { %v1449_v36 = vadd.f32 %v1448_v31, %v1447_v22  ;;  %v1522_v6 = vrot.slane %v1521_v46, 2  ;;  %v5771_v31 = vld [vmem:[#allocation20_spill] sm:$0xff] }
 0x217   :  { %v1429_v38 = vrot.slane %v1428_v30, 1 }
 0x218   :  { %v1450_v11 = vrot.slane %v1449_v36, 1  ;;  %v1523_v58 = vadd.f32 %v1522_v6, %v1521_v46  ;;  %v5776_v6 = vld [vmem:[#allocation22_spill] sm:$0xff] }
 0x219   :  { %v1430_v32 = vadd.f32 %v1429_v38, %v1428_v30  ;;  %v1464_v38 = vmul.f32 %v4949_v7, %v4949_v7  ;;  %v1472_v30 = vmul.f32 %v4987_v14, %v4987_v14 }
 0x21a   :  { %v1451_v10 = vadd.f32 %v1450_v11, %v1449_v36  ;;  %v1524_v43 = vrot.slane %v1523_v58, 1  ;;  %v5774_v36 = vld [vmem:[#allocation23_spill] sm:$0xff] }
 0x21c   :  { %1788 = vmatprep.mubr.f32.mxu1 %v1451_v10  ;;  %v1525_v5 = vadd.f32 %v1524_v43, %v1523_v58  ;;  %v1474_v58 = vmul.f32 %v4997_v1, %v4997_v1  ;;  %v5779_v10 = vld [vmem:[#allocation25_spill] sm:$0xff]  ;;  %v5781_v43 = vld [vmem:[#allocation24_spill] sm:$0xff] }
 0x21d   :  { %1789 = vmatmul.mubr.f32.vlgmr.msra.gmra.mrb[32].mxu1 %v1430_v32  ;;  %v1487_v32 = vadd.f32 %v1486_v51, %v1460_v17  ;;  %v5789_v17 = vld [vmem:[#allocation29_spill] sm:$0xff] }
 0x21e   :  { %2545 = vmatpush1.bf16.msk.msra.mxu1 %vm5734_vm0, %v5701_v47  ;;  %1862 = vmatprep.mubr.f32.mxu1 %v1525_v5  ;;  %vm5744_vm0 = vmpackc.low %vm5742_vm10, %vm5743_vm13  ;;  %v5756_v5 = vld [vmem:[#allocation14_spill] sm:$0xff] }
 0x21f   :  { %2547 = vmatprep.subr.msk.bf16.mxu1 %vm5735_vm1, %v5701_v47  ;;  %vm5745_vm1 = vnez %v5580_v53  ;;  %v5754_v53 = vld [vmem:[#allocation15_spill] sm:$0xff]  ;;  %vm5757_vm10 = vnez %v5756_v5  ;;  %v1488_v21 = vadd.f32 %v1487_v32, %v1462_v24  ;;  %v1480_v24 = vmul.f32 %v5027_v26, %v5027_v26  ;;  %v5801_v5 = vld [vmem:[#allocation32_spill] sm:$0xff] }
 0x221   :  { %v1489_v61 = vadd.f32 %v1488_v21, %v1464_v38  ;;  %v1482_v38 = vmul.f32 %v5039_v16, %v5039_v16 }
 0x222   :  { %2549 = vmatpush1.bf16.msk.msra.mxu1 %vm5736_vm15, %v5701_v47  ;;  %vm5747_vm15 = vnez %v5746_v49  ;;  %v5791_v49 = vld [vmem:[#allocation28_spill] sm:$0xff] }
 0x223   :  { %2551 = vmatprep.subr.msk.bf16.mxu1 %vm5738_vm4, %v5701_v47  ;;  %vm5748_vm3 = vmpackc.low %vm5745_vm1, %vm5747_vm15  ;;  %vm5750_vm4 = vnez %v5749_v28  ;;  %vm5762_vm1 = vnez %v5761_v42  ;;  %v1490_v22 = vadd.f32 %v1489_v61, %v1466_v41  ;;  %v5794_v28 = vld [vmem:[#allocation31_spill] sm:$0xff]  ;;  %v5809_v61 = vld [vmem:[#allocation37_spill] sm:$0xff] }
 0x224   :  { %vm5753_vm7 = vmpackc.low %vm5750_vm4, %vm5752_vm6  ;;  %vm5767_vm4 = vnez %v5766_v52  ;;  %v5804_v41 = vld [vmem:[#allocation35_spill] sm:$0xff]  ;;  %v5816_v52 = vld [vmem:[#allocation38_spill] sm:$0xff] }
 0x225   :  { %v1491_v46 = vadd.f32 %v1490_v22, %v1468_v15  ;;  %v5811_v15 = vld [vmem:[#allocation36_spill] sm:$0xff] }
 0x226   :  { %2553 = vmatpush1.bf16.msk.msra.mxu1 %vm5741_vm9, %v5701_v47  ;;  %vm5755_vm9 = vnez %v5754_v53  ;;  %v5799_v53 = vld [vmem:[#allocation33_spill] sm:$0xff] }
 0x227   :  { %2555 = vmatprep.subr.msk.bf16.mxu1 %vm5744_vm0, %v5701_v47  ;;  %vm5758_vm13 = vmpackc.low %vm5755_vm9, %vm5757_vm10  ;;  %vm5760_vm0 = vnez %v5759_v33  ;;  %vm5772_vm9 = vnez %v5771_v31  ;;  %v1492_v11 = vadd.f32 %v1491_v46, %v1470_v48  ;;  %v5806_v33 = vld [vmem:[#allocation34_spill] sm:$0xff]  ;;  %v5819_v48 = vld [vmem:[#allocation41_spill] sm:$0xff] }
 0x228   :  { %vm5763_vm15 = vmpackc.low %vm5760_vm0, %vm5762_vm1  ;;  %vm5777_vm0 = vnez %v5776_v6  ;;  %v5824_v31 = vld [vmem:[#allocation43_spill] sm:$0xff]  ;;  %v5826_v46 = vld [vmem:[#allocation42_spill] sm:$0xff] }
 0x229   :  { %v1493_v35 = vadd.f32 %v1492_v11, %v1472_v30  ;;  %v5831_v6 = vld [vmem:[#allocation44_spill] sm:$0xff]  ;;  %v5834_v11 = vld [vmem:[#allocation47_spill] sm:$0xff] }
 0x22a   :  { %2557 = vmatpush1.bf16.msk.msra.mxu1 %vm5748_vm3, %v5701_v47  ;;  %vm5765_vm3 = vnez %v5764_v62  ;;  %v5814_v62 = vld [vmem:[#allocation39_spill] sm:$0xff] }
 0x22b   :  { %2559 = vmatprep.subr.msk.bf16.mxu1 %vm5753_vm7, %v5701_v47  ;;  %vm5768_vm6 = vmpackc.low %vm5765_vm3, %vm5767_vm4  ;;  %vm5770_vm7 = vnez %v5769_v54  ;;  %vm5782_vm3 = vnez %v5781_v43  ;;  %v1494_v3 = vadd.f32 %v1493_v35, %v1474_v58  ;;  %v5821_v54 = vld [vmem:[#allocation40_spill] sm:$0xff]  ;;  %v5836_v58 = vld [vmem:[#allocation46_spill] sm:$0xff] }
 0x22c   :  { %vm5773_vm10 = vmpackc.low %vm5770_vm7, %vm5772_vm9  ;;  %vm5787_vm7 = vnez %v5786_v20  ;;  %v5841_v43 = vld [vmem:[#allocation48_spill] sm:$0xff]  ;;  %v5849_v20 = vld [vmem:[#allocation53_spill] sm:$0xff] }
 0x22d   :  { %v1495_v51 = vadd.f32 %v1494_v3, %v1476_v59  ;;  %v5844_v59 = vld [vmem:[#allocation51_spill] sm:$0xff]  ;;  %v5851_v3 = vld [vmem:[#allocation52_spill] sm:$0xff] }
 0x22e   :  { %2561 = vmatpush1.bf16.msk.msra.mxu1 %vm5758_vm13, %v5701_v47  ;;  %vm5775_vm13 = vnez %v5774_v36  ;;  %v5829_v36 = vld [vmem:[#allocation45_spill] sm:$0xff] }
 0x22f   :  { %2563 = vmatprep.subr.msk.bf16.mxu1 %vm5763_vm15, %v5701_v47  ;;  %vm5778_vm1 = vmpackc.low %vm5775_vm13, %vm5777_vm0  ;;  %vm5780_vm15 = vnez %v5779_v10  ;;  %vm5792_vm13 = vnez %v5791_v49  ;;  %v1496_v32 = vadd.f32 %v1495_v51, %v1478_v57  ;;  %v5839_v10 = vld [vmem:[#allocation49_spill] sm:$0xff]  ;;  %v5856_v49 = vld [vmem:[#allocation54_spill] sm:$0xff] }
 0x230   :  { %vm5783_vm4 = vmpackc.low %vm5780_vm15, %vm5782_vm3  ;;  %vm5797_vm15 = vnez %v5796_v29 }
 0x231   :  { %v1497_v21 = vadd.f32 %v1496_v32, %v1480_v24 }
 0x232   :  { %2565 = vmatpush1.bf16.msk.msra.mxu1 %vm5768_vm6, %v5701_v47  ;;  %vm5785_vm6 = vnez %v5784_v12  ;;  %v5846_v12 = vld [vmem:[#allocation50_spill] sm:$0xff] }
 0x233   :  { %2567 = vmatprep.subr.msk.bf16.mxu1 %vm5773_vm10, %v5701_v47  ;;  %vm5788_vm9 = vmpackc.low %vm5785_vm6, %vm5787_vm7  ;;  %vm5790_vm10 = vnez %v5789_v17  ;;  %vm5802_vm6 = vnez %v5801_v5  ;;  %v1498_v42 = vadd.f32 %v1497_v21, %v1482_v38  ;;  %v5854_v17 = vld [vmem:[#allocation55_spill] sm:$0xff] }
 0x234   :  { %vm5793_vm0 = vmpackc.low %vm5790_vm10, %vm5792_vm13  ;;  %vm5807_vm10 = vnez %v5806_v33 }
 0x235   :  { %v1499_v22 = vrot.slane %v1498_v42, 4 }
 0x236   :  { %2569 = vmatpush1.bf16.msk.msra.mxu1 %vm5778_vm1, %v5701_v47  ;;  %vm5795_vm1 = vnez %v5794_v28 }
 0x237   :  { %2571 = vmatprep.subr.msk.bf16.mxu1 %vm5783_vm4, %v5701_v47  ;;  %vm5798_vm3 = vmpackc.low %vm5795_vm1, %vm5797_vm15  ;;  %vm5800_vm4 = vnez %v5799_v53  ;;  %vm5812_vm1 = vnez %v5811_v15  ;;  %v1500_v30 = vadd.f32 %v1499_v22, %v1498_v42 }
 0x238   :  { %vm5803_vm7 = vmpackc.low %vm5800_vm4, %vm5802_vm6  ;;  %vm5817_vm4 = vnez %v5816_v52 }
 0x239   :  { %v1501_v35 = vrot.slane %v1500_v30, 2 }
 0x23a   :  { %2573 = vmatpush1.bf16.msk.msra.mxu1 %vm5788_vm9, %v5701_v47  ;;  %vm5805_vm9 = vnez %v5804_v41 }
 0x23b   :  { %2575 = vmatprep.subr.msk.bf16.mxu1 %vm5793_vm0, %v5701_v47  ;;  %vm5808_vm13 = vmpackc.low %vm5805_vm9, %vm5807_vm10  ;;  %vm5810_vm0 = vnez %v5809_v61  ;;  %vm5822_vm9 = vnez %v5821_v54  ;;  %v1502_v57 = vadd.f32 %v1501_v35, %v1500_v30  ;;  %v1875_v35 = vld [vmem:[#allocation5] sm:$0x3] }
 0x23c   :  { %vm5813_vm15 = vmpackc.low %vm5810_vm0, %vm5812_vm1  ;;  %vm5827_vm0 = vnez %v5826_v46  ;;  %v2852_v46 = vmov 1966171168  }
 0x23d   :  { %v1503_v28 = vrot.slane %v1502_v57, 1 }
 0x23e   :  { %2577 = vmatpush1.bf16.msk.msra.mxu1 %vm5798_vm3, %v5701_v47  ;;  %vm5815_vm3 = vnez %v5814_v62 }
 0x23f   :  { %2579 = vmatprep.subr.msk.bf16.mxu1 %vm5803_vm7, %v5701_v47  ;;  %vm5818_vm6 = vmpackc.low %vm5815_vm3, %vm5817_vm4  ;;  %vm5820_vm7 = vnez %v5819_v48  ;;  %vm5832_vm3 = vnez %v5831_v6  ;;  %v1504_v38 = vadd.f32 %v1503_v28, %v1502_v57  ;;  %v5863_v6 = vld [vmem:[#allocation10_spill] sm:$0xff]  ;;  %v5865_v57 = vld [vmem:[#allocation61_spill] sm:$0xff] }
 0x240   :  { %vm5823_vm10 = vmpackc.low %vm5820_vm7, %vm5822_vm9  ;;  %vm5837_vm7 = vnez %v5836_v58 }
 0x242   :  { %2581 = vmatpush1.bf16.msk.msra.mxu1 %vm5808_vm13, %v5701_v47  ;;  %vm5825_vm13 = vnez %v5824_v31 }
 0x243   :  { %2583 = vmatprep.subr.msk.bf16.mxu1 %vm5813_vm15, %v5701_v47  ;;  %vm5828_vm1 = vmpackc.low %vm5825_vm13, %vm5827_vm0  ;;  %vm5830_vm15 = vnez %v5829_v36  ;;  %vm5842_vm13 = vnez %v5841_v43 }
 0x244   :  { %vm5833_vm4 = vmpackc.low %vm5830_vm15, %vm5832_vm3  ;;  %vm5847_vm15 = vnez %v5846_v12 }
 0x246   :  { %2585 = vmatpush1.bf16.msk.msra.mxu1 %vm5818_vm6, %v5701_v47  ;;  %vm5835_vm6 = vnez %v5834_v11 }
 0x247   :  { %2587 = vmatprep.subr.msk.bf16.mxu1 %vm5823_vm10, %v5701_v47  ;;  %vm5838_vm9 = vmpackc.low %vm5835_vm6, %vm5837_vm7  ;;  %vm5840_vm10 = vnez %v5839_v10  ;;  %vm5852_vm6 = vnez %v5851_v3 }
 0x248   :  { %vm5843_vm0 = vmpackc.low %vm5840_vm10, %vm5842_vm13  ;;  %vm5857_vm10 = vnez %v5856_v49 }
 0x24a   :  { %2589 = vmatpush1.bf16.msk.msra.mxu1 %vm5828_vm1, %v5701_v47  ;;  %vm5845_vm1 = vnez %v5844_v59 }
 0x24b   :  { %2591 = vmatprep.subr.msk.bf16.mxu1 %vm5833_vm4, %v5701_v47  ;;  %vm5848_vm3 = vmpackc.low %vm5845_vm1, %vm5847_vm15  ;;  %vm5850_vm4 = vnez %v5849_v20  ;;  %v5864_v20 = vld [vmem:[#allocation60_spill] sm:$0xff] }
 0x24c   :  { %vm5853_vm7 = vmpackc.low %vm5850_vm4, %vm5852_vm6 }
 0x24e   :  { %2593 = vmatpush1.bf16.msk.msra.mxu1 %vm5838_vm9, %v5701_v47  ;;  %vm5855_vm9 = vnez %v5854_v17 }
 0x24f   :  { %2595 = vmatprep.subr.msk.bf16.mxu1 %vm5843_vm0, %v5701_v47  ;;  %vm5858_vm13 = vmpackc.low %vm5855_vm9, %vm5857_vm10 }
 0x252   :  { %2597 = vmatpush1.bf16.msk.msra.mxu1 %vm5848_vm3, %v5701_v47 }
 0x253   :  { %2599 = vmatprep.subr.msk.bf16.mxu1 %vm5853_vm7, %v5701_v47 }
 0x256   :  { %2601 = vmatpush1.bf16.msk.msra.mxu1 %vm5858_vm13, %v5701_v47 }
 0x257   :  { %2603 = vmatprep.subr.msk.bf16.mxu1 %vm2538_vm11, %v5701_v47 }
 0x25a   :  { %2605 = vmatpush1.bf16.msk.msra.mxu1 %vm2540_vm5, %v5701_v47  ;;  %v1884_v47 = vunpack.c.l.s4 %v2852_v46 }
 0x25c   :  { %v1885_v30 = vunpack.c.0.s8 %v1884_v47  ;;  %v5869_v47 = vld [vmem:[#allocation65_spill] sm:$0xff] }
 0x25d   :  { %1863 = vmatmul.mubr.f32.vlgmr.msra.gmra.mrb[34].mxu1 %v1504_v38  ;;  %v5866_v38 = vld [vmem:[#allocation62_spill] sm:$0xff] }
 0x25e   :  { %v1888_v11 = vsub.s32 %v1885_v30, %v5863_v6  ;;  %v5870_v30 = vld [vmem:[#allocation66_spill] sm:$0xff] }
 0x2f0   :  { %v1790_v53 = vpop.f32.mrb[32].mxu1 }
 0x2f1   :  { %v1792_v5 = vpop.f32.mrb[33].mxu1  ;;  %v1796_v21 = vmul.f32 0.001953125, %v1790_v53 }
 0x2f2   :  { %v1797_v41 = vmul.f32 0.001953125, %v1792_v5 }
 0x2f3   :  { %v1871_v42 = vmul.f32 %v1796_v21, %v1796_v21 }
 0x2f4   :  { %v1872_v62 = vmul.f32 %v1797_v41, %v1797_v41 }
 0x330   :  { %v1864_v33 = vpop.f32.mrb[34].mxu1 }
 0x331   :  { %v1869_v61 = vmul.f32 0.001953125, %v1864_v33  ;;  %v1866_v15 = vpop.f32.mrb[35].mxu1 }
 0x332   :  { %v1870_v52 = vmul.f32 0.001953125, %v1866_v15 }
 0x333   :  { %v1873_v22 = vsub.f32 %v1869_v61, %v1871_v42  ;;  %v5867_v42 = vld [vmem:[#allocation63_spill] sm:$0xff] }
 0x334   :  { %v1874_v48 = vsub.f32 %v1870_v52, %v1872_v62 }
 0x335   :  { %v1876_v54 = vadd.f32 1e-05, %v1873_v22 }
 0x336   :  { %v1877_v31 = vadd.f32 1e-05, %v1874_v48 }
 0x337   :  { %2772 = vrsqrt.f32 %v1876_v54 }
 0x338   :  { %2774 = vrsqrt.f32 %v1877_v31 }
 0x341   :  { %v2773_v36 = vpop.eup %2772 }
 0x342   :  { %v2775_v58 = vpop.eup %2774 }
 0x343   :  { %v1882_v10 = vcombine.low %v2773_v36, %v2775_v58 }
 0x345   :  { %v1889_v43 = vrot.slane %v1882_v10, %v1888_v11 }
 0x347   :  { %v1896_v59 = vrot.slane %v1889_v43, %v1888_v11 }
 0x349   :  { %v1898_v12 = vmul.f32 %v1896_v59, %v1875_v35 }
 0x34b   :  { %v1904_v3 = vrot.slane %v1898_v12, %v5864_v20  ;;  %v1908_v17 = vrot.slane %v1898_v12, %v5865_v57 }
 0x34d   :  { %v1911_v49 = vmul.f32 %v1904_v3, %v1796_v21  ;;  %v1912_v51 = vmul.f32 %v1908_v17, %v1797_v41  ;;  %v1932_v28 = vmul.f32 %v1904_v3, %v4906_v23  ;;  %v1933_v29 = vmul.f32 %v1908_v17, %v4894_v44  ;;  %v1899_v21 = vld [vmem:[#allocation7] sm:$0x3] }
 0x34e   :  { %v1934_v32 = vmul.f32 %v1904_v3, %v4898_v27  ;;  %v1935_v53 = vmul.f32 %v1908_v17, %v5866_v38  ;;  %v1936_v5 = vmul.f32 %v1904_v3, %v4908_v40  ;;  %v1937_v61 = vmul.f32 %v1908_v17, %v5867_v42 }
 0x34f   :  { %v1915_v24 = vcombine.low %v1911_v49, %v1912_v51  ;;  %v1938_v15 = vmul.f32 %v1904_v3, %v4922_v56  ;;  %v1939_v62 = vmul.f32 %v1908_v17, %v4902_v34  ;;  %v1940_v41 = vmul.f32 %v1904_v3, %v4933_v63 }
 0x350   :  { %v1941_v23 = vmul.f32 %v1908_v17, %v4916_v18  ;;  %v1942_v44 = vmul.f32 %v1904_v3, %v4941_v0  ;;  %v1943_v27 = vmul.f32 %v1908_v17, %v4926_v45  ;;  %v1944_v22 = vmul.f32 %v1904_v3, %v4949_v7 }
 0x351   :  { %v1922_v33 = vrot.slane %v1915_v24, %v1888_v11  ;;  %v1945_v40 = vmul.f32 %v1908_v17, %v4938_v2  ;;  %v1946_v48 = vmul.f32 %v1904_v3, %v4959_v25  ;;  %v1947_v56 = vmul.f32 %v1908_v17, %v4951_v4 }
 0x352   :  { %v1948_v34 = vmul.f32 %v1904_v3, %v4969_v60  ;;  %v1949_v54 = vmul.f32 %v1908_v17, %v4961_v55  ;;  %v1950_v63 = vmul.f32 %v1904_v3, %v4979_v13  ;;  %v1951_v0 = vmul.f32 %v1908_v17, %v4974_v8  ;;  %v5868_v55 = vld [vmem:[#allocation64_spill] sm:$0xff] }
 0x353   :  { %v1929_v52 = vrot.slane %v1922_v33, %v1888_v11  ;;  %v1952_v45 = vmul.f32 %v1904_v3, %v4987_v14  ;;  %v1953_v31 = vmul.f32 %v1908_v17, %v4982_v9  ;;  %v1954_v7 = vmul.f32 %v1904_v3, %v4997_v1 }
 0x354   :  { %v1955_v2 = vmul.f32 %v1908_v17, %v4994_v50  ;;  %v1956_v25 = vmul.f32 %v1904_v3, %v5009_v39  ;;  %v1957_v4 = vmul.f32 %v1908_v17, %v5002_v37  ;;  %v1958_v60 = vmul.f32 %v1904_v3, %v5017_v19 }
 0x355   :  { %v1931_v18 = vsub.f32 %v1899_v21, %v1929_v52  ;;  %v1959_v46 = vmul.f32 %v1908_v17, %v5868_v55  ;;  %v1960_v14 = vmul.f32 %v1904_v3, %v5027_v26  ;;  %v1961_v9 = vmul.f32 %v1908_v17, %v5869_v47 }
 0x356   :  { %v1962_v1 = vmul.f32 %v1904_v3, %v5039_v16  ;;  %v1963_v50 = vmul.f32 %v1908_v17, %v5870_v30 }
 0x357   :  { %v1968_v13 = vrot.slane %v1931_v18, %v5864_v20  ;;  %v1972_v8 = vrot.slane %v1931_v18, %v5865_v57 }
 0x359   :  { %v1975_v36 = vadd.f32 %v1968_v13, %v1932_v28  ;;  %v1976_v39 = vadd.f32 %v1972_v8, %v1933_v29  ;;  %v1977_v6 = vadd.f32 %v1968_v13, %v1934_v32  ;;  %v1978_v37 = vadd.f32 %v1972_v8, %v1935_v53 }
 0x35a   :  { %v1979_v11 = vadd.f32 %v1968_v13, %v1936_v5  ;;  %v1980_v19 = vadd.f32 %v1972_v8, %v1937_v61  ;;  %v1981_v58 = vadd.f32 %v1968_v13, %v1938_v15  ;;  %v1982_v10 = vadd.f32 %v1972_v8, %v1939_v62 }
 0x35b   :  { %v1983_v43 = vadd.f32 %v1968_v13, %v1940_v41  ;;  %v1984_v35 = vadd.f32 %v1972_v8, %v1941_v23  ;;  %v1985_v59 = vadd.f32 %v1968_v13, %v1942_v44  ;;  %v1986_v12 = vadd.f32 %v1972_v8, %v1943_v27  ;;  %2007 = vst [vmem:[%s5404_s5] sm:$0xff] %v1975_v36 }
 0x35c   :  { %2008 = vst [vmem:[%s5404_s5 + $0x10] sm:$0xff] %v1977_v6  ;;  %2174 = vst [vmem:[%s5404_s5 + $0x8] sm:$0xff] %v1976_v39  ;;  %v1987_v26 = vadd.f32 %v1968_v13, %v1944_v22  ;;  %v1988_v16 = vadd.f32 %v1972_v8, %v1945_v40  ;;  %v1989_v20 = vadd.f32 %v1968_v13, %v1946_v48 }
 0x35d   :  { %2175 = vst [vmem:[%s5404_s5 + $0x18] sm:$0xff] %v1978_v37  ;;  %v1990_v3 = vadd.f32 %v1972_v8, %v1947_v56  ;;  %2009 = vst [vmem:[%s5404_s5 + $0x20] sm:$0xff] %v1979_v11  ;;  %v1991_v57 = vadd.f32 %v1968_v13, %v1948_v34  ;;  %v1992_v17 = vadd.f32 %v1972_v8, %v1949_v54 }
 0x35e   :  { %2010 = vst [vmem:[%s5404_s5 + $0x30] sm:$0xff] %v1981_v58  ;;  %2176 = vst [vmem:[%s5404_s5 + $0x28] sm:$0xff] %v1980_v19  ;;  %v1993_v49 = vadd.f32 %v1968_v13, %v1950_v63  ;;  %v1994_v51 = vadd.f32 %v1972_v8, %v1951_v0  ;;  %v1995_v24 = vadd.f32 %v1968_v13, %v1952_v45 }
 0x35f   :  { %2177 = vst [vmem:[%s5404_s5 + $0x38] sm:$0xff] %v1982_v10  ;;  %2011 = vst [vmem:[%s5404_s5 + $0x40] sm:$0xff] %v1983_v43  ;;  %v1996_v28 = vadd.f32 %v1972_v8, %v1953_v31  ;;  %v1997_v29 = vadd.f32 %v1968_v13, %v1954_v7  ;;  %v1998_v32 = vadd.f32 %v1972_v8, %v1955_v2 }
 0x360   :  { %2012 = vst [vmem:[%s5404_s5 + $0x50] sm:$0xff] %v1985_v59  ;;  %2178 = vst [vmem:[%s5404_s5 + $0x48] sm:$0xff] %v1984_v35  ;;  %v1999_v38 = vadd.f32 %v1968_v13, %v1956_v25  ;;  %v2000_v53 = vadd.f32 %v1972_v8, %v1957_v4  ;;  %v2001_v5 = vadd.f32 %v1968_v13, %v1958_v60 }
 0x361   :  { %2179 = vst [vmem:[%s5404_s5 + $0x58] sm:$0xff] %v1986_v12  ;;  %2013 = vst [vmem:[%s5404_s5 + $0x60] sm:$0xff] %v1987_v26  ;;  %v2002_v33 = vadd.f32 %v1972_v8, %v1959_v46  ;;  %v2003_v42 = vadd.f32 %v1968_v13, %v1960_v14  ;;  %v2004_v61 = vadd.f32 %v1972_v8, %v1961_v9 }
 0x362   :  { %2014 = vst [vmem:[%s5404_s5 + $0x70] sm:$0xff] %v1989_v20  ;;  %2180 = vst [vmem:[%s5404_s5 + $0x68] sm:$0xff] %v1988_v16  ;;  %v2005_v15 = vadd.f32 %v1968_v13, %v1962_v1  ;;  %v2006_v62 = vadd.f32 %v1972_v8, %v1963_v50 }
 0x363   :  { %2181 = vst [vmem:[%s5404_s5 + $0x78] sm:$0xff] %v1990_v3  ;;  %2015 = vst [vmem:[%s5404_s5 + $0x80] sm:$0xff] %v1991_v57 }
 0x364   :  { %2016 = vst [vmem:[%s5404_s5 + $0x90] sm:$0xff] %v1993_v49  ;;  %2182 = vst [vmem:[%s5404_s5 + $0x88] sm:$0xff] %v1992_v17 }
 0x365   :  { %2183 = vst [vmem:[%s5404_s5 + $0x98] sm:$0xff] %v1994_v51  ;;  %2017 = vst [vmem:[%s5404_s5 + $0xa0] sm:$0xff] %v1995_v24 }
 0x366   :  { %2018 = vst [vmem:[%s5404_s5 + $0xb0] sm:$0xff] %v1997_v29  ;;  %2184 = vst [vmem:[%s5404_s5 + $0xa8] sm:$0xff] %v1996_v28 }
 0x367   :  { %2185 = vst [vmem:[%s5404_s5 + $0xb8] sm:$0xff] %v1998_v32  ;;  %2019 = vst [vmem:[%s5404_s5 + $0xc0] sm:$0xff] %v1999_v38 }
 0x368   :  { %2020 = vst [vmem:[%s5404_s5 + $0xd0] sm:$0xff] %v2001_v5  ;;  %2186 = vst [vmem:[%s5404_s5 + $0xc8] sm:$0xff] %v2000_v53 }
 0x369   :  { %2187 = vst [vmem:[%s5404_s5 + $0xd8] sm:$0xff] %v2002_v33  ;;  %2021 = vst [vmem:[%s5404_s5 + $0xe0] sm:$0xff] %v2003_v42 }
 0x36a   :  { %2022 = vst [vmem:[%s5404_s5 + $0xf0] sm:$0xff] %v2005_v15  ;;  %2188 = vst [vmem:[%s5404_s5 + $0xe8] sm:$0xff] %v2004_v61 }
 0x36b   :  { %2189 = vst [vmem:[%s5404_s5 + $0xf8] sm:$0xff] %v2006_v62 }
 0x36c   :  { %2044 = vsyncpa [#allocation4], 1 }
 0x36d   :  { %2045 = vsyncpa [#allocation6], 1 }

// kernel: generator_forward.5
= control target key start
LH: loop header
LB: loop body
LE: loop exit
PB: predicated region body
PF: predicated region fallthrough
CT: control target
= control target key end

     0   :  { %vm14_vm0 = vcmask 523264   ;;  %vm17_vm1 = vcmask 517120   ;;  %v9845_v3 = vmov 0.0   ;;  %vm6686_vm2 = vcmask 97280   ;;  %s12172_s1 = inlined_call_operand.vmem [shape: f32[9,64,12], index: 1, kind: input, shape index: {}]   ;;  %s12173_s0 = inlined_call_operand.vmem [shape: f32[2,16,16,64], index: 0, kind: input, shape index: {}]   ;;  %s12174_s2 = inlined_call_operand.vmem [shape: f32[1,12], index: 2, kind: input, shape index: {}]   ;;  %s12175_s3 = inlined_call_operand.vmem [shape: f32[2,16,16,12], index: 3, kind: output, shape index: {}]  }
   0x1   :  { %v9869_v0 = vld [vmem:[%s12172_s1 + $0x40] sm:$0xff]  ;;  %v9874_v1 = vld [vmem:[%s12172_s1 + $0x48] sm:$0xff]  ;;  %15 = vst.msk [vmem:[#allocation2] sm:$0xff] %vm14_vm0, %v9845_v3  ;;  %16 = vst.msk [vmem:[#allocation2 + $0x8] sm:$0xff] %vm14_vm0, %v9845_v3 }
   0x2   :  { %v9879_v2 = vld [vmem:[%s12172_s1 + $0x100] sm:$0xff]  ;;  %19 = vst.msk [vmem:[#allocation2 + $0x18] sm:$0xff] %vm14_vm0, %v9845_v3  ;;  %20 = vst.msk [vmem:[#allocation2 + $0x20] sm:$0xff] %vm14_vm0, %v9845_v3  ;;  %v9052_v4 = vpack.c.bf16 %v9874_v1, %v9869_v0  ;;  %v7036_v5 = vld [vmem:[%s12172_s1 + $0x108] sm:$0xff] }
   0x3   :  { %22 = vst.msk [vmem:[#allocation2 + $0x30] sm:$0xff] %vm14_vm0, %v9845_v3  ;;  %23 = vst.msk [vmem:[#allocation2 + $0x38] sm:$0xff] %vm14_vm0, %v9845_v3  ;;  %v6757_v6 = vld [vmem:[%s12172_s1 + $0x50] sm:$0xff]  ;;  %v6758_v7 = vld [vmem:[%s12172_s1 + $0x58] sm:$0xff]  ;;  %v10109_v8 = vpack.c.bf16 %v7036_v5, %v9879_v2 }
   0x4   :  { %25 = vst.msk [vmem:[#allocation2 + $0x48] sm:$0xff] %vm14_vm0, %v9845_v3  ;;  %26 = vst.msk [vmem:[#allocation2 + $0x50] sm:$0xff] %vm14_vm0, %v9845_v3  ;;  %v9056_v9 = vpack.c.bf16 %v6758_v7, %v6757_v6  ;;  %v7037_v10 = vld [vmem:[%s12172_s1 + $0x110] sm:$0xff]  ;;  %v7038_v11 = vld [vmem:[%s12172_s1 + $0x118] sm:$0xff]  ;;  %9053 = vmatprep.subr.bf16.mxu1 %v9052_v4 }
   0x5   :  { %28 = vst.msk [vmem:[#allocation2 + $0x60] sm:$0xff] %vm14_vm0, %v9845_v3  ;;  %29 = vst.msk [vmem:[#allocation2 + $0x68] sm:$0xff] %vm14_vm0, %v9845_v3  ;;  %v6759_v12 = vld [vmem:[%s12172_s1 + $0x60] sm:$0xff]  ;;  %v10120_v13 = vpack.c.bf16 %v7038_v11, %v7037_v10  ;;  %v6760_v14 = vld [vmem:[%s12172_s1 + $0x68] sm:$0xff]  ;;  %9117 = vmatprep.subr.bf16.mxu0 %v10109_v8  ;;  %9055 = vmatpush3.bf16.msra.mxu1 %v9052_v4 }
   0x6   :  { %31 = vst.msk [vmem:[#allocation2 + $0x78] sm:$0xff] %vm14_vm0, %v9845_v3  ;;  %32 = vst.msk [vmem:[#allocation2 + $0x80] sm:$0xff] %vm14_vm0, %v9845_v3  ;;  %v7039_v15 = vld [vmem:[%s12172_s1 + $0x120] sm:$0xff]  ;;  %v7040_v16 = vld [vmem:[%s12172_s1 + $0x128] sm:$0xff]  ;;  %9119 = vmatpush3.bf16.msra.mxu0 %v10109_v8  ;;  %9057 = vmatprep.subr.bf16.mxu1 %v9056_v9  ;;  %v9060_v17 = vpack.c.bf16 %v6760_v14, %v6759_v12 }
   0x7   :  { %34 = vst.msk [vmem:[#allocation2 + $0x90] sm:$0xff] %vm14_vm0, %v9845_v3  ;;  %35 = vst.msk [vmem:[#allocation2 + $0x98] sm:$0xff] %vm14_vm0, %v9845_v3  ;;  %v124_v18 = vld [vmem:[%s12173_s0] sm:$0xff]  ;;  %9121 = vmatprep.subr.bf16.mxu0 %v10120_v13  ;;  %v10137_v19 = vpack.c.bf16 %v7040_v16, %v7039_v15  ;;  %v6761_v20 = vld [vmem:[%s12172_s1 + $0x70] sm:$0xff] }
   0x8   :  { %37 = vst.msk [vmem:[#allocation2 + $0xa8] sm:$0xff] %vm14_vm0, %v9845_v3  ;;  %38 = vst.msk [vmem:[#allocation2 + $0xb0] sm:$0xff] %vm14_vm0, %v9845_v3  ;;  %v6762_v21 = vld [vmem:[%s12172_s1 + $0x78] sm:$0xff]  ;;  %v125_v22 = vld [vmem:[%s12173_s0 + $0x8] sm:$0xff] }
   0x9   :  { %40 = vst.msk [vmem:[#allocation2 + $0xc0] sm:$0xff] %vm14_vm0, %v9845_v3  ;;  %41 = vst.msk [vmem:[#allocation2 + $0xc8] sm:$0xff] %vm14_vm0, %v9845_v3  ;;  %v7041_v23 = vld [vmem:[%s12172_s1 + $0x130] sm:$0xff]  ;;  %v7042_v24 = vld [vmem:[%s12172_s1 + $0x138] sm:$0xff]  ;;  %9059 = vmatpush3.bf16.msra.mxu1 %v9056_v9  ;;  %v9064_v31 = vpack.c.bf16 %v6762_v21, %v6761_v20 }
   0xa   :  { %43 = vst.msk [vmem:[#allocation2 + $0xd8] sm:$0xff] %vm14_vm0, %v9845_v3  ;;  %44 = vst.msk [vmem:[#allocation2 + $0xe0] sm:$0xff] %vm14_vm0, %v9845_v3  ;;  %v325_v25 = vld [vmem:[#allocation2 + $0x1] sm:$0xff]  ;;  %v317_v26 = vld [vmem:[%s12172_s1] sm:$0xff]  ;;  %9123 = vmatpush3.bf16.msra.mxu0 %v10120_v13  ;;  %9061 = vmatprep.subr.bf16.mxu1 %v9060_v17  ;;  %v10186_v35 = vpack.c.bf16 %v7042_v24, %v7041_v23 }
   0xb   :  { %46 = vst.msk [vmem:[#allocation2 + $0xf0] sm:$0xff] %vm14_vm0, %v9845_v3  ;;  %47 = vst.msk [vmem:[#allocation2 + $0xf8] sm:$0xff] %vm14_vm0, %v9845_v3  ;;  %8060 = vmatprep.mubr.msk.f32.mxu1 %vm14_vm0, %v325_v25  ;;  %v318_v27 = vld [vmem:[%s12172_s1 + $0x8] sm:$0xff]  ;;  %v126_v28 = vld [vmem:[%s12173_s0 + $0x10] sm:$0xff]  ;;  %9125 = vmatprep.subr.bf16.mxu0 %v10137_v19 }
   0xc   :  { %49 = vst.msk [vmem:[#allocation2 + $0x108] sm:$0xff] %vm14_vm0, %v9845_v3  ;;  %50 = vst.msk [vmem:[#allocation2 + $0x110] sm:$0xff] %vm14_vm0, %v9845_v3  ;;  %v127_v29 = vld [vmem:[%s12173_s0 + $0x18] sm:$0xff]  ;;  %v128_v30 = vld [vmem:[%s12173_s0 + $0x20] sm:$0xff]  ;;  %v9068_v46 = vpack.c.bf16 %v318_v27, %v317_v26 }
   0xd   :  { %52 = vst.msk [vmem:[#allocation2 + $0x120] sm:$0xff] %vm14_vm0, %v9845_v3  ;;  %53 = vst.msk [vmem:[#allocation2 + $0x128] sm:$0xff] %vm14_vm0, %v9845_v3  ;;  %v129_v32 = vld [vmem:[%s12173_s0 + $0x28] sm:$0xff]  ;;  %v130_v33 = vld [vmem:[%s12173_s0 + $0x30] sm:$0xff]  ;;  %9063 = vmatpush3.bf16.msra.mxu1 %v9060_v17 }
   0xe   :  { %55 = vst.msk [vmem:[#allocation2 + $0x138] sm:$0xff] %vm14_vm0, %v9845_v3  ;;  %56 = vst.msk [vmem:[#allocation2 + $0x140] sm:$0xff] %vm14_vm0, %v9845_v3  ;;  %v131_v34 = vld [vmem:[%s12173_s0 + $0x38] sm:$0xff]  ;;  %v7107_v36 = vld [vmem:[%s12172_s1 + $0x140] sm:$0xff]  ;;  %9127 = vmatpush3.bf16.msra.mxu0 %v10137_v19  ;;  %9065 = vmatprep.subr.bf16.mxu1 %v9064_v31 }
   0xf   :  { %58 = vst.msk [vmem:[#allocation2 + $0x150] sm:$0xff] %vm14_vm0, %v9845_v3  ;;  %59 = vst.msk [vmem:[#allocation2 + $0x158] sm:$0xff] %vm14_vm0, %v9845_v3  ;;  %v132_v37 = vld [vmem:[%s12173_s0 + $0x40] sm:$0xff]  ;;  %v133_v38 = vld [vmem:[%s12173_s0 + $0x48] sm:$0xff]  ;;  %9129 = vmatprep.subr.bf16.mxu0 %v10186_v35 }
  0x10   :  { %61 = vst.msk [vmem:[#allocation2 + $0x168] sm:$0xff] %vm14_vm0, %v9845_v3  ;;  %62 = vst.msk [vmem:[#allocation2 + $0x170] sm:$0xff] %vm14_vm0, %v9845_v3  ;;  %v7108_v39 = vld [vmem:[%s12172_s1 + $0x148] sm:$0xff]  ;;  %v134_v40 = vld [vmem:[%s12173_s0 + $0x50] sm:$0xff] }
  0x11   :  { %64 = vst.msk [vmem:[#allocation2 + $0x180] sm:$0xff] %vm14_vm0, %v9845_v3  ;;  %65 = vst.msk [vmem:[#allocation2 + $0x188] sm:$0xff] %vm14_vm0, %v9845_v3  ;;  %v135_v41 = vld [vmem:[%s12173_s0 + $0x58] sm:$0xff]  ;;  %v136_v42 = vld [vmem:[%s12173_s0 + $0x60] sm:$0xff]  ;;  %v9132_v49 = vpack.c.bf16 %v7108_v39, %v7107_v36  ;;  %9067 = vmatpush3.bf16.msra.mxu1 %v9064_v31 }
  0x12   :  { %67 = vst.msk [vmem:[#allocation2 + $0x198] sm:$0xff] %vm14_vm0, %v9845_v3  ;;  %68 = vst.msk [vmem:[#allocation2 + $0x1a0] sm:$0xff] %vm14_vm0, %v9845_v3  ;;  %v137_v43 = vld [vmem:[%s12173_s0 + $0x68] sm:$0xff]  ;;  %v138_v44 = vld [vmem:[%s12173_s0 + $0x70] sm:$0xff]  ;;  %9131 = vmatpush3.bf16.msra.mxu0 %v10186_v35  ;;  %9069 = vmatprep.subr.bf16.mxu1 %v9068_v46 }
  0x13   :  { %70 = vst.msk [vmem:[#allocation2 + $0x1b0] sm:$0xff] %vm14_vm0, %v9845_v3  ;;  %71 = vst.msk [vmem:[#allocation2 + $0x1b8] sm:$0xff] %vm14_vm0, %v9845_v3  ;;  %v139_v47 = vld [vmem:[%s12173_s0 + $0x78] sm:$0xff]  ;;  %v140_v48 = vld [vmem:[%s12173_s0 + $0x80] sm:$0xff]  ;;  %9133 = vmatprep.subr.bf16.mxu0 %v9132_v49 }
  0x14   :  { %73 = vst.msk [vmem:[#allocation2 + $0x1c8] sm:$0xff] %vm14_vm0, %v9845_v3  ;;  %74 = vst.msk [vmem:[#allocation2 + $0x1d0] sm:$0xff] %vm14_vm0, %v9845_v3  ;;  %v7109_v50 = vld [vmem:[%s12172_s1 + $0x150] sm:$0xff]  ;;  %v7110_v51 = vld [vmem:[%s12172_s1 + $0x158] sm:$0xff] }
  0x15   :  { %76 = vst.msk [vmem:[#allocation2 + $0x1e0] sm:$0xff] %vm14_vm0, %v9845_v3  ;;  %77 = vst.msk [vmem:[#allocation2 + $0x1e8] sm:$0xff] %vm14_vm0, %v9845_v3  ;;  %v141_v52 = vld [vmem:[%s12173_s0 + $0x88] sm:$0xff]  ;;  %v319_v54 = vld [vmem:[%s12172_s1 + $0x10] sm:$0xff]  ;;  %v9136_v57 = vpack.c.bf16 %v7110_v51, %v7109_v50 }
  0x16   :  { %79 = vst.msk [vmem:[#allocation2 + $0x1f8] sm:$0xff] %vm14_vm0, %v9845_v3  ;;  %80 = vst.msk [vmem:[#allocation2 + $0x200] sm:$0xff] %vm14_vm0, %v9845_v3  ;;  %v320_v55 = vld [vmem:[%s12172_s1 + $0x18] sm:$0xff]  ;;  %v7111_v58 = vld [vmem:[%s12172_s1 + $0x160] sm:$0xff] }
  0x17   :  { %82 = vst.msk [vmem:[#allocation2 + $0x210] sm:$0xff] %vm14_vm0, %v9845_v3  ;;  %83 = vst.msk [vmem:[#allocation2 + $0x218] sm:$0xff] %vm14_vm0, %v9845_v3  ;;  %v142_v59 = vld [vmem:[%s12173_s0 + $0x90] sm:$0xff]  ;;  %v9072_v61 = vpack.c.bf16 %v320_v55, %v319_v54  ;;  %v7112_v62 = vld [vmem:[%s12172_s1 + $0x168] sm:$0xff] }
  0x18   :  { %85 = vst.msk [vmem:[#allocation2 + $0x228] sm:$0xff] %vm14_vm0, %v9845_v3  ;;  %86 = vst.msk [vmem:[#allocation2 + $0x230] sm:$0xff] %vm14_vm0, %v9845_v3  ;;  %v143_v63 = vld [vmem:[%s12173_s0 + $0x98] sm:$0xff]  ;;  %v144_v2 = vld [vmem:[%s12173_s0 + $0xa0] sm:$0xff] }
  0x19   :  { %88 = vst.msk [vmem:[#allocation2 + $0x240] sm:$0xff] %vm14_vm0, %v9845_v3  ;;  %89 = vst.msk [vmem:[#allocation2 + $0x248] sm:$0xff] %vm14_vm0, %v9845_v3  ;;  %v145_v4 = vld [vmem:[%s12173_s0 + $0xa8] sm:$0xff]  ;;  %v146_v5 = vld [vmem:[%s12173_s0 + $0xb0] sm:$0xff] }
  0x1a   :  { %91 = vst.msk [vmem:[#allocation2 + $0x258] sm:$0xff] %vm14_vm0, %v9845_v3  ;;  %92 = vst.msk [vmem:[#allocation2 + $0x260] sm:$0xff] %vm14_vm0, %v9845_v3  ;;  %v147_v6 = vld [vmem:[%s12173_s0 + $0xb8] sm:$0xff]  ;;  %v148_v9 = vld [vmem:[%s12173_s0 + $0xc0] sm:$0xff] }
  0x1b   :  { %94 = vst.msk [vmem:[#allocation2 + $0x270] sm:$0xff] %vm14_vm0, %v9845_v3  ;;  %95 = vst.msk [vmem:[#allocation2 + $0x278] sm:$0xff] %vm14_vm0, %v9845_v3  ;;  %v149_v10 = vld [vmem:[%s12173_s0 + $0xc8] sm:$0xff]  ;;  %v7113_v11 = vld [vmem:[%s12172_s1 + $0x170] sm:$0xff] }
  0x1c   :  { %97 = vst.msk [vmem:[#allocation2 + $0x288] sm:$0xff] %vm14_vm0, %v9845_v3  ;;  %98 = vst.msk [vmem:[#allocation2 + $0x290] sm:$0xff] %vm14_vm0, %v9845_v3  ;;  %v7114_v12 = vld [vmem:[%s12172_s1 + $0x178] sm:$0xff]  ;;  %v150_v14 = vld [vmem:[%s12173_s0 + $0xd0] sm:$0xff] }
  0x1d   :  { %100 = vst.msk [vmem:[#allocation2 + $0x2a0] sm:$0xff] %vm14_vm0, %v9845_v3  ;;  %101 = vst.msk [vmem:[#allocation2 + $0x2a8] sm:$0xff] %vm14_vm0, %v9845_v3  ;;  %v151_v15 = vld [vmem:[%s12173_s0 + $0xd8] sm:$0xff]  ;;  %v152_v16 = vld [vmem:[%s12173_s0 + $0xe0] sm:$0xff]  ;;  %v9144_v20 = vpack.c.bf16 %v7114_v12, %v7113_v11 }
  0x1e   :  { %103 = vst.msk [vmem:[#allocation2 + $0x2b8] sm:$0xff] %vm14_vm0, %v9845_v3  ;;  %104 = vst.msk [vmem:[#allocation2 + $0x2c0] sm:$0xff] %vm14_vm0, %v9845_v3  ;;  %v153_v17 = vld [vmem:[%s12173_s0 + $0xe8] sm:$0xff]  ;;  %v154_v21 = vld [vmem:[%s12173_s0 + $0xf0] sm:$0xff] }
  0x1f   :  { %106 = vst.msk [vmem:[#allocation2 + $0x2d0] sm:$0xff] %vm14_vm0, %v9845_v3  ;;  %107 = vst.msk [vmem:[#allocation2 + $0x2d8] sm:$0xff] %vm14_vm0, %v9845_v3  ;;  %v321_v23 = vld [vmem:[%s12172_s1 + $0x20] sm:$0xff]  ;;  %v322_v24 = vld [vmem:[%s12172_s1 + $0x28] sm:$0xff] }
  0x20   :  { %109 = vst.msk [vmem:[#allocation2 + $0x2e8] sm:$0xff] %vm14_vm0, %v9845_v3  ;;  %110 = vst.msk [vmem:[#allocation2 + $0x2f0] sm:$0xff] %vm14_vm0, %v9845_v3  ;;  %v9076_v26 = vpack.c.bf16 %v322_v24, %v321_v23  ;;  %v7179_v27 = vld [vmem:[%s12172_s1 + $0x180] sm:$0xff]  ;;  %v158_v36 = vld [vmem:[%s12173_s0 + $0x110] sm:$0xff] }
  0x21   :  { %112 = vst.msk [vmem:[#allocation2 + $0x300] sm:$0xff] %vm14_vm0, %v9845_v3  ;;  %113 = vst.msk [vmem:[#allocation2 + $0x308] sm:$0xff] %vm14_vm0, %v9845_v3  ;;  %v156_v31 = vld [vmem:[%s12173_s0 + $0x100] sm:$0xff]  ;;  %v169_v51 = vld [vmem:[%s12173_s0 + $0x168] sm:$0xff] }
  0x22   :  { %115 = vst.msk [vmem:[#allocation2 + $0x318] sm:$0xff] %vm14_vm0, %v9845_v3  ;;  %116 = vst.msk [vmem:[#allocation2 + $0x320] sm:$0xff] %vm14_vm0, %v9845_v3  ;;  %v168_v50 = vld [vmem:[%s12173_s0 + $0x160] sm:$0xff]  ;;  %v171_v55 = vld [vmem:[%s12173_s0 + $0x178] sm:$0xff] }
  0x23   :  { %118 = vst.msk [vmem:[#allocation2 + $0x330] sm:$0xff] %vm14_vm0, %v9845_v3  ;;  %119 = vst.msk [vmem:[#allocation2 + $0x338] sm:$0xff] %vm14_vm0, %v9845_v3  ;;  %v182_v12 = vld [vmem:[%s12173_s0 + $0x1d0] sm:$0xff] }
  0x24   :  { %121 = vst.msk [vmem:[#allocation2 + $0x348] sm:$0xff] %vm14_vm0, %v9845_v3  ;;  %122 = vst.msk [vmem:[#allocation2 + $0x350] sm:$0xff] %vm14_vm0, %v9845_v3 }
  0x25   :  { %18 = vst.msk [vmem:[#allocation2 + $0x10] sm:$0x3] %vm17_vm1, %v9845_v3  ;;  %21 = vst.msk [vmem:[#allocation2 + $0x28] sm:$0x3] %vm17_vm1, %v9845_v3 }
  0x26   :  { %24 = vst.msk [vmem:[#allocation2 + $0x40] sm:$0x3] %vm17_vm1, %v9845_v3  ;;  %27 = vst.msk [vmem:[#allocation2 + $0x58] sm:$0x3] %vm17_vm1, %v9845_v3 }
  0x27   :  { %30 = vst.msk [vmem:[#allocation2 + $0x70] sm:$0x3] %vm17_vm1, %v9845_v3  ;;  %33 = vst.msk [vmem:[#allocation2 + $0x88] sm:$0x3] %vm17_vm1, %v9845_v3 }
  0x28   :  { %36 = vst.msk [vmem:[#allocation2 + $0xa0] sm:$0x3] %vm17_vm1, %v9845_v3  ;;  %39 = vst.msk [vmem:[#allocation2 + $0xb8] sm:$0x3] %vm17_vm1, %v9845_v3 }
  0x29   :  { %42 = vst.msk [vmem:[#allocation2 + $0xd0] sm:$0x3] %vm17_vm1, %v9845_v3  ;;  %45 = vst.msk [vmem:[#allocation2 + $0xe8] sm:$0x3] %vm17_vm1, %v9845_v3 }
  0x2a   :  { %48 = vst.msk [vmem:[#allocation2 + $0x100] sm:$0x3] %vm17_vm1, %v9845_v3  ;;  %51 = vst.msk [vmem:[#allocation2 + $0x118] sm:$0x3] %vm17_vm1, %v9845_v3 }
  0x2b   :  { %54 = vst.msk [vmem:[#allocation2 + $0x130] sm:$0x3] %vm17_vm1, %v9845_v3  ;;  %57 = vst.msk [vmem:[#allocation2 + $0x148] sm:$0x3] %vm17_vm1, %v9845_v3 }
  0x2c   :  { %60 = vst.msk [vmem:[#allocation2 + $0x160] sm:$0x3] %vm17_vm1, %v9845_v3  ;;  %63 = vst.msk [vmem:[#allocation2 + $0x178] sm:$0x3] %vm17_vm1, %v9845_v3  ;;  %v326_v53 = vld [vmem:[#allocation2 + $0x9] sm:$0xff] }
  0x2d   :  { %66 = vst.msk [vmem:[#allocation2 + $0x190] sm:$0x3] %vm17_vm1, %v9845_v3  ;;  %69 = vst.msk [vmem:[#allocation2 + $0x1a8] sm:$0x3] %vm17_vm1, %v9845_v3  ;;  %8061 = vmatmul.mubr.msk.f32.vlgmr.msra.gmra.mrb[0].mxu1 %vm14_vm0, %v326_v53  ;;  %v170_v53 = vld [vmem:[%s12173_s0 + $0x170] sm:$0xff] }
  0x2e   :  { %72 = vst.msk [vmem:[#allocation2 + $0x1c0] sm:$0x3] %vm17_vm1, %v9845_v3  ;;  %75 = vst.msk [vmem:[#allocation2 + $0x1d8] sm:$0x3] %vm17_vm1, %v9845_v3  ;;  %9071 = vmatpush3.bf16.msra.mxu1 %v9068_v46 }
  0x2f   :  { %78 = vst.msk [vmem:[#allocation2 + $0x1f0] sm:$0x3] %vm17_vm1, %v9845_v3  ;;  %81 = vst.msk [vmem:[#allocation2 + $0x208] sm:$0x3] %vm17_vm1, %v9845_v3  ;;  %9073 = vmatprep.subr.bf16.mxu1 %v9072_v61 }
  0x30   :  { %84 = vst.msk [vmem:[#allocation2 + $0x220] sm:$0x3] %vm17_vm1, %v9845_v3  ;;  %87 = vst.msk [vmem:[#allocation2 + $0x238] sm:$0x3] %vm17_vm1, %v9845_v3 }
  0x31   :  { %90 = vst.msk [vmem:[#allocation2 + $0x250] sm:$0x3] %vm17_vm1, %v9845_v3  ;;  %93 = vst.msk [vmem:[#allocation2 + $0x268] sm:$0x3] %vm17_vm1, %v9845_v3 }
  0x32   :  { %96 = vst.msk [vmem:[#allocation2 + $0x280] sm:$0x3] %vm17_vm1, %v9845_v3  ;;  %99 = vst.msk [vmem:[#allocation2 + $0x298] sm:$0x3] %vm17_vm1, %v9845_v3  ;;  %9075 = vmatpush3.bf16.msra.mxu1 %v9072_v61  ;;  %v172_v61 = vld [vmem:[%s12173_s0 + $0x180] sm:$0xff] }
  0x33   :  { %102 = vst.msk [vmem:[#allocation2 + $0x2b0] sm:$0x3] %vm17_vm1, %v9845_v3  ;;  %105 = vst.msk [vmem:[#allocation2 + $0x2c8] sm:$0x3] %vm17_vm1, %v9845_v3  ;;  %9077 = vmatprep.subr.bf16.mxu1 %v9076_v26 }
  0x34   :  { %108 = vst.msk [vmem:[#allocation2 + $0x2e0] sm:$0x3] %vm17_vm1, %v9845_v3  ;;  %111 = vst.msk [vmem:[#allocation2 + $0x2f8] sm:$0x3] %vm17_vm1, %v9845_v3 }
  0x35   :  { %114 = vst.msk [vmem:[#allocation2 + $0x310] sm:$0x3] %vm17_vm1, %v9845_v3  ;;  %117 = vst.msk [vmem:[#allocation2 + $0x328] sm:$0x3] %vm17_vm1, %v9845_v3 }
  0x36   :  { %120 = vst.msk [vmem:[#allocation2 + $0x340] sm:$0x3] %vm17_vm1, %v9845_v3  ;;  %123 = vst.msk [vmem:[#allocation2 + $0x358] sm:$0x3] %vm17_vm1, %v9845_v3  ;;  %v9140_v3 = vpack.c.bf16 %v7112_v62, %v7111_v58  ;;  %9079 = vmatpush3.bf16.msra.mxu1 %v9076_v26  ;;  %v173_v62 = vld [vmem:[%s12173_s0 + $0x188] sm:$0xff] }
  0x37   :  { %12218 = vst [vmem:[#allocation3_spill] sm:$0xff] %v10120_v13  ;;  %12219 = vst [vmem:[#allocation4_spill] sm:$0xff] %v10137_v19 }
  0x38   :  { %189 = vst.msk [vmem:[#allocation2 + $0x19] sm:$0xff] %vm14_vm0, %v124_v18  ;;  %190 = vst.msk [vmem:[#allocation2 + $0x21] sm:$0xff] %vm14_vm0, %v125_v22  ;;  %v155_v22 = vld [vmem:[%s12173_s0 + $0xf8] sm:$0xff] }
  0x39   :  { %191 = vst.msk [vmem:[#allocation2 + $0x31] sm:$0xff] %vm14_vm0, %v126_v28  ;;  %192 = vst.msk [vmem:[#allocation2 + $0x39] sm:$0xff] %vm14_vm0, %v127_v29  ;;  %v7180_v29 = vld [vmem:[%s12172_s1 + $0x188] sm:$0xff] }
  0x3a   :  { %193 = vst.msk [vmem:[#allocation2 + $0x49] sm:$0xff] %vm14_vm0, %v128_v30  ;;  %12220 = vst [vmem:[#allocation5_spill] sm:$0xff] %v10186_v35  ;;  %v10348_v30 = vpack.c.bf16 %v7180_v29, %v7179_v27 }
  0x3b   :  { %194 = vst.msk [vmem:[#allocation2 + $0x51] sm:$0xff] %vm14_vm0, %v129_v32  ;;  %195 = vst.msk [vmem:[#allocation2 + $0x61] sm:$0xff] %vm14_vm0, %v130_v33 }
  0x3c   :  { %196 = vst.msk [vmem:[#allocation2 + $0x69] sm:$0xff] %vm14_vm0, %v131_v34  ;;  %197 = vst.msk [vmem:[#allocation2 + $0x79] sm:$0xff] %vm14_vm0, %v132_v37  ;;  %v157_v34 = vld [vmem:[%s12173_s0 + $0x108] sm:$0xff]  ;;  %v159_v37 = vld [vmem:[%s12173_s0 + $0x118] sm:$0xff] }
  0x3d   :  { %198 = vst.msk [vmem:[#allocation2 + $0x81] sm:$0xff] %vm14_vm0, %v133_v38  ;;  %199 = vst.msk [vmem:[#allocation2 + $0x91] sm:$0xff] %vm14_vm0, %v134_v40  ;;  %v160_v38 = vld [vmem:[%s12173_s0 + $0x120] sm:$0xff]  ;;  %v161_v40 = vld [vmem:[%s12173_s0 + $0x128] sm:$0xff] }
  0x3e   :  { %200 = vst.msk [vmem:[#allocation2 + $0x99] sm:$0xff] %vm14_vm0, %v135_v41  ;;  %201 = vst.msk [vmem:[#allocation2 + $0xa9] sm:$0xff] %vm14_vm0, %v136_v42  ;;  %v162_v42 = vld [vmem:[%s12173_s0 + $0x130] sm:$0xff] }
  0x3f   :  { %v2980_v45 = vld [vmem:[#allocation2 + $0x19] sm:$0xff]  ;;  %202 = vst.msk [vmem:[#allocation2 + $0xb1] sm:$0xff] %vm14_vm0, %v137_v43  ;;  %203 = vst.msk [vmem:[#allocation2 + $0xc1] sm:$0xff] %vm14_vm0, %v138_v44  ;;  %v2981_v56 = vld [vmem:[#allocation2 + $0x21] sm:$0xff] }
  0x40   :  { %8508 = vmatprep.mubr.msk.f32.mxu0 %vm14_vm0, %v2980_v45  ;;  %204 = vst.msk [vmem:[#allocation2 + $0xc9] sm:$0xff] %vm14_vm0, %v139_v47  ;;  %205 = vst.msk [vmem:[#allocation2 + $0xd9] sm:$0xff] %vm14_vm0, %v140_v48  ;;  %v2982_v60 = vld [vmem:[#allocation2 + $0x31] sm:$0xff]  ;;  %8063 = vmatprep.mubr.msk.f32.mxu1 %vm14_vm0, %v2980_v45  ;;  %v2983_v0 = vld [vmem:[#allocation2 + $0x39] sm:$0xff] }
  0x41   :  { %206 = vst.msk [vmem:[#allocation2 + $0xe1] sm:$0xff] %vm14_vm0, %v141_v52  ;;  %207 = vst.msk [vmem:[#allocation2 + $0xf1] sm:$0xff] %vm14_vm0, %v142_v59  ;;  %8509 = vmatmul.mubr.msk.f32.vlgmr.msra.gmra.mrb[0].mxu0 %vm14_vm0, %v2981_v56  ;;  %v2984_v1 = vld [vmem:[#allocation2 + $0x49] sm:$0xff]  ;;  %8064 = vmatmul.mubr.msk.f32.gmra.mrb[2].mxu1 %vm14_vm0, %v2981_v56  ;;  %v165_v45 = vld [vmem:[%s12173_s0 + $0x148] sm:$0xff] }
  0x42   :  { %208 = vst.msk [vmem:[#allocation2 + $0xf9] sm:$0xff] %vm14_vm0, %v143_v63  ;;  %9135 = vmatpush3.bf16.msra.mxu0 %v9132_v49  ;;  %8511 = vmatprep.mubr.msk.f32.mxu0 %vm14_vm0, %v2982_v60  ;;  %209 = vst.msk [vmem:[#allocation2 + $0x109] sm:$0xff] %vm14_vm0, %v144_v2  ;;  %v2985_v7 = vld [vmem:[#allocation2 + $0x51] sm:$0xff]  ;;  %v2986_v18 = vld [vmem:[#allocation2 + $0x61] sm:$0xff] }
  0x43   :  { %9137 = vmatprep.subr.bf16.mxu0 %v9136_v57  ;;  %210 = vst.msk [vmem:[#allocation2 + $0x111] sm:$0xff] %vm14_vm0, %v145_v4  ;;  %211 = vst.msk [vmem:[#allocation2 + $0x121] sm:$0xff] %vm14_vm0, %v146_v5  ;;  %8066 = vmatprep.mubr.msk.f32.mxu1 %vm14_vm0, %v2982_v60  ;;  %v2987_v25 = vld [vmem:[#allocation2 + $0x69] sm:$0xff]  ;;  %v2988_v28 = vld [vmem:[#allocation2 + $0x79] sm:$0xff] }
  0x44   :  { %212 = vst.msk [vmem:[#allocation2 + $0x129] sm:$0xff] %vm14_vm0, %v147_v6  ;;  %213 = vst.msk [vmem:[#allocation2 + $0x139] sm:$0xff] %vm14_vm0, %v148_v9  ;;  %v2989_v32 = vld [vmem:[#allocation2 + $0x81] sm:$0xff]  ;;  %v2990_v33 = vld [vmem:[#allocation2 + $0x91] sm:$0xff] }
  0x45   :  { %8512 = vmatmul.mubr.msk.f32.gmra.mrb[2].mxu0 %vm14_vm0, %v2983_v0  ;;  %214 = vst.msk [vmem:[#allocation2 + $0x141] sm:$0xff] %vm14_vm0, %v149_v10  ;;  %215 = vst.msk [vmem:[#allocation2 + $0x151] sm:$0xff] %vm14_vm0, %v150_v14  ;;  %8067 = vmatmul.mubr.msk.f32.gmra.mrb[4].mxu1 %vm14_vm0, %v2983_v0  ;;  %v2991_v39 = vld [vmem:[#allocation2 + $0x99] sm:$0xff]  ;;  %v2992_v41 = vld [vmem:[#allocation2 + $0xa9] sm:$0xff] }
  0x46   :  { %8514 = vmatprep.mubr.msk.f32.mxu0 %vm14_vm0, %v2984_v1  ;;  %9139 = vmatpush3.bf16.msra.mxu0 %v9136_v57  ;;  %216 = vst.msk [vmem:[#allocation2 + $0x159] sm:$0xff] %vm14_vm0, %v151_v15  ;;  %217 = vst.msk [vmem:[#allocation2 + $0x169] sm:$0xff] %vm14_vm0, %v152_v16  ;;  %v163_v43 = vld [vmem:[%s12173_s0 + $0x138] sm:$0xff]  ;;  %v164_v44 = vld [vmem:[%s12173_s0 + $0x140] sm:$0xff] }
  0x47   :  { %9141 = vmatprep.subr.bf16.mxu0 %v9140_v3  ;;  %218 = vst.msk [vmem:[#allocation2 + $0x171] sm:$0xff] %vm14_vm0, %v153_v17  ;;  %219 = vst.msk [vmem:[#allocation2 + $0x181] sm:$0xff] %vm14_vm0, %v154_v21  ;;  %8069 = vmatprep.mubr.msk.f32.mxu1 %vm14_vm0, %v2984_v1  ;;  %v2993_v46 = vld [vmem:[#allocation2 + $0xb1] sm:$0xff]  ;;  %v166_v47 = vld [vmem:[%s12173_s0 + $0x150] sm:$0xff] }
  0x48   :  { %220 = vst.msk [vmem:[#allocation2 + $0x189] sm:$0xff] %vm14_vm0, %v155_v22  ;;  %221 = vst.msk [vmem:[#allocation2 + $0x1c9] sm:$0xff] %vm14_vm0, %v156_v31  ;;  %v167_v48 = vld [vmem:[%s12173_s0 + $0x158] sm:$0xff]  ;;  %v2996_v54 = vld [vmem:[#allocation2 + $0xd9] sm:$0xff] }
  0x49   :  { %8515 = vmatmul.mubr.msk.f32.gmra.mrb[4].mxu0 %vm14_vm0, %v2985_v7  ;;  %8070 = vmatmul.mubr.msk.f32.gmra.mrb[6].mxu1 %vm14_vm0, %v2985_v7  ;;  %222 = vst.msk [vmem:[#allocation2 + $0x1d1] sm:$0xff] %vm14_vm0, %v157_v34  ;;  %223 = vst.msk [vmem:[#allocation2 + $0x1e1] sm:$0xff] %vm14_vm0, %v158_v36  ;;  %v2994_v49 = vld [vmem:[#allocation2 + $0xc1] sm:$0xff]  ;;  %v2995_v52 = vld [vmem:[#allocation2 + $0xc9] sm:$0xff] }
  0x4a   :  { %8517 = vmatprep.mubr.msk.f32.mxu0 %vm14_vm0, %v2986_v18  ;;  %9143 = vmatpush3.bf16.msra.mxu0 %v9140_v3  ;;  %224 = vst.msk [vmem:[#allocation2 + $0x1e9] sm:$0xff] %vm14_vm0, %v159_v37  ;;  %225 = vst.msk [vmem:[#allocation2 + $0x1f9] sm:$0xff] %vm14_vm0, %v160_v38  ;;  %v323_v56 = vld [vmem:[%s12172_s1 + $0x30] sm:$0xff]  ;;  %v324_v57 = vld [vmem:[%s12172_s1 + $0x38] sm:$0xff] }
  0x4b   :  { %9145 = vmatprep.subr.bf16.mxu0 %v9144_v20  ;;  %8072 = vmatprep.mubr.msk.f32.mxu1 %vm14_vm0, %v2986_v18  ;;  %226 = vst.msk [vmem:[#allocation2 + $0x201] sm:$0xff] %vm14_vm0, %v161_v40  ;;  %227 = vst.msk [vmem:[#allocation2 + $0x211] sm:$0xff] %vm14_vm0, %v162_v42  ;;  %v9080_v58 = vpack.c.bf16 %v324_v57, %v323_v56  ;;  %v2997_v59 = vld [vmem:[#allocation2 + $0xe1] sm:$0xff]  ;;  %v2998_v60 = vld [vmem:[#allocation2 + $0xf1] sm:$0xff] }
  0x4c   :  { %228 = vst.msk [vmem:[#allocation2 + $0x219] sm:$0xff] %vm14_vm0, %v163_v43  ;;  %229 = vst.msk [vmem:[#allocation2 + $0x229] sm:$0xff] %vm14_vm0, %v164_v44  ;;  %v174_v63 = vld [vmem:[%s12173_s0 + $0x190] sm:$0xff]  ;;  %v175_v0 = vld [vmem:[%s12173_s0 + $0x198] sm:$0xff] }
  0x4d   :  { %8518 = vmatmul.mubr.msk.f32.gmra.mrb[6].mxu0 %vm14_vm0, %v2987_v25  ;;  %8073 = vmatmul.mubr.msk.f32.gmra.mrb[8].mxu1 %vm14_vm0, %v2987_v25  ;;  %230 = vst.msk [vmem:[#allocation2 + $0x231] sm:$0xff] %vm14_vm0, %v165_v45  ;;  %231 = vst.msk [vmem:[#allocation2 + $0x241] sm:$0xff] %vm14_vm0, %v166_v47  ;;  %v2999_v1 = vld [vmem:[#allocation2 + $0xf9] sm:$0xff]  ;;  %v176_v2 = vld [vmem:[%s12173_s0 + $0x1a0] sm:$0xff] }
  0x4e   :  { %8520 = vmatprep.mubr.msk.f32.mxu0 %vm14_vm0, %v2988_v28  ;;  %9147 = vmatpush3.bf16.msra.mxu0 %v9144_v20  ;;  %232 = vst.msk [vmem:[#allocation2 + $0x249] sm:$0xff] %vm14_vm0, %v167_v48  ;;  %233 = vst.msk [vmem:[#allocation2 + $0x259] sm:$0xff] %vm14_vm0, %v168_v50  ;;  %v3000_v3 = vld [vmem:[#allocation2 + $0x109] sm:$0xff]  ;;  %v177_v4 = vld [vmem:[%s12173_s0 + $0x1a8] sm:$0xff] }
  0x4f   :  { %9149 = vmatprep.subr.bf16.mxu0 %v10348_v30  ;;  %8075 = vmatprep.mubr.msk.f32.mxu1 %vm14_vm0, %v2988_v28  ;;  %234 = vst.msk [vmem:[#allocation2 + $0x261] sm:$0xff] %vm14_vm0, %v169_v51  ;;  %235 = vst.msk [vmem:[#allocation2 + $0x271] sm:$0xff] %vm14_vm0, %v170_v53  ;;  %v178_v5 = vld [vmem:[%s12173_s0 + $0x1b0] sm:$0xff]  ;;  %v179_v6 = vld [vmem:[%s12173_s0 + $0x1b8] sm:$0xff] }
  0x50   :  { %236 = vst.msk [vmem:[#allocation2 + $0x279] sm:$0xff] %vm14_vm0, %v171_v55  ;;  %9081 = vmatprep.subr.bf16.mxu1 %v9080_v58  ;;  %237 = vst.msk [vmem:[#allocation2 + $0x289] sm:$0xff] %vm14_vm0, %v172_v61  ;;  %v180_v7 = vld [vmem:[%s12173_s0 + $0x1c0] sm:$0xff]  ;;  %v181_v10 = vld [vmem:[%s12173_s0 + $0x1c8] sm:$0xff] }
  0x51   :  { %8521 = vmatmul.mubr.msk.f32.gmra.mrb[8].mxu0 %vm14_vm0, %v2989_v32  ;;  %8076 = vmatmul.mubr.msk.f32.gmra.mrb[10].mxu1 %vm14_vm0, %v2989_v32  ;;  %238 = vst.msk [vmem:[#allocation2 + $0x291] sm:$0xff] %vm14_vm0, %v173_v62  ;;  %239 = vst.msk [vmem:[#allocation2 + $0x2a1] sm:$0xff] %vm14_vm0, %v174_v63  ;;  %v3001_v9 = vld [vmem:[#allocation2 + $0x111] sm:$0xff]  ;;  %v3002_v11 = vld [vmem:[#allocation2 + $0x121] sm:$0xff] }
  0x52   :  { %8523 = vmatprep.mubr.msk.f32.mxu0 %vm14_vm0, %v2990_v33  ;;  %8078 = vmatprep.mubr.msk.f32.mxu1 %vm14_vm0, %v2990_v33  ;;  %240 = vst.msk [vmem:[#allocation2 + $0x2a9] sm:$0xff] %vm14_vm0, %v175_v0  ;;  %241 = vst.msk [vmem:[#allocation2 + $0x2b9] sm:$0xff] %vm14_vm0, %v176_v2  ;;  %v183_v14 = vld [vmem:[%s12173_s0 + $0x1d8] sm:$0xff]  ;;  %v184_v15 = vld [vmem:[%s12173_s0 + $0x1e0] sm:$0xff] }
  0x53   :  { %9083 = vmatpush3.bf16.msra.mxu1 %v9080_v58  ;;  %242 = vst.msk [vmem:[#allocation2 + $0x2c1] sm:$0xff] %vm14_vm0, %v177_v4  ;;  %243 = vst.msk [vmem:[#allocation2 + $0x2d1] sm:$0xff] %vm14_vm0, %v178_v5  ;;  %v3003_v16 = vld [vmem:[#allocation2 + $0x129] sm:$0xff]  ;;  %v185_v17 = vld [vmem:[%s12173_s0 + $0x1e8] sm:$0xff] }
  0x54   :  { %244 = vst.msk [vmem:[#allocation2 + $0x2d9] sm:$0xff] %vm14_vm0, %v179_v6  ;;  %245 = vst.msk [vmem:[#allocation2 + $0x2e9] sm:$0xff] %vm14_vm0, %v180_v7  ;;  %v3004_v18 = vld [vmem:[#allocation2 + $0x139] sm:$0xff]  ;;  %v6891_v20 = vld [vmem:[%s12172_s1 + $0x80] sm:$0xff] }
  0x55   :  { %8524 = vmatmul.mubr.msk.f32.gmra.mrb[10].mxu0 %vm14_vm0, %v2991_v39  ;;  %8079 = vmatmul.mubr.msk.f32.gmra.mrb[12].mxu1 %vm14_vm0, %v2991_v39  ;;  %246 = vst.msk [vmem:[#allocation2 + $0x2f1] sm:$0xff] %vm14_vm0, %v181_v10  ;;  %247 = vst.msk [vmem:[#allocation2 + $0x301] sm:$0xff] %vm14_vm0, %v182_v12  ;;  %v3005_v21 = vld [vmem:[#allocation2 + $0x141] sm:$0xff]  ;;  %v6892_v22 = vld [vmem:[%s12172_s1 + $0x88] sm:$0xff] }
  0x56   :  { %8526 = vmatprep.mubr.msk.f32.mxu0 %vm14_vm0, %v2992_v41  ;;  %8081 = vmatprep.mubr.msk.f32.mxu1 %vm14_vm0, %v2992_v41  ;;  %248 = vst.msk [vmem:[#allocation2 + $0x309] sm:$0xff] %vm14_vm0, %v183_v14  ;;  %249 = vst.msk [vmem:[#allocation2 + $0x319] sm:$0xff] %vm14_vm0, %v184_v15  ;;  %v3006_v23 = vld [vmem:[#allocation2 + $0x151] sm:$0xff]  ;;  %v10516_v24 = vpack.c.bf16 %v6892_v22, %v6891_v20  ;;  %v3007_v25 = vld [vmem:[#allocation2 + $0x159] sm:$0xff] }
  0x57   :  { %250 = vst.msk [vmem:[#allocation2 + $0x321] sm:$0xff] %vm14_vm0, %v185_v17  ;;  %v3008_v26 = vld [vmem:[#allocation2 + $0x169] sm:$0xff]  ;;  %v3009_v27 = vld [vmem:[#allocation2 + $0x171] sm:$0xff]  ;;  %v3010_v28 = vld [vmem:[#allocation2 + $0x181] sm:$0xff] }
  0x58   :  { %9085 = vmatprep.subr.bf16.mxu1 %v10516_v24  ;;  %v3011_v29 = vld [vmem:[#allocation2 + $0x189] sm:$0xff]  ;;  %v357_v31 = vld [vmem:[#allocation2 + $0x1b1] sm:$0xff]  ;;  %v3694_v32 = vld [vmem:[#allocation2 + $0x1a] sm:$0xff] }
  0x59   :  { %8527 = vmatmul.mubr.msk.f32.gmra.mrb[12].mxu0 %vm14_vm0, %v2993_v46  ;;  %8082 = vmatmul.mubr.msk.f32.gmra.mrb[14].mxu1 %vm14_vm0, %v2993_v46  ;;  %v7181_v33 = vld [vmem:[%s12172_s1 + $0x190] sm:$0xff]  ;;  %v7182_v34 = vld [vmem:[%s12172_s1 + $0x198] sm:$0xff]  ;;  %v10541_v39 = vld [vmem:[#allocation2 + $0x32] sm:$0xff] }
  0x5a   :  { %8529 = vmatprep.mubr.msk.f32.mxu0 %vm14_vm0, %v2994_v49  ;;  %8084 = vmatprep.mubr.msk.f32.mxu1 %vm14_vm0, %v2994_v49  ;;  %v358_v36 = vld [vmem:[#allocation2 + $0x1b9] sm:$0xff]  ;;  %v3695_v37 = vld [vmem:[#allocation2 + $0x22] sm:$0xff]  ;;  %v9152_v40 = vpack.c.bf16 %v7182_v34, %v7181_v33  ;;  %v7183_v41 = vld [vmem:[%s12172_s1 + $0x1a0] sm:$0xff] }
  0x5b   :  { %v359_v38 = vld [vmem:[#allocation2 + $0x1c9] sm:$0xff]  ;;  %v7184_v42 = vld [vmem:[%s12172_s1 + $0x1a8] sm:$0xff]  ;;  %v361_v45 = vld [vmem:[#allocation2 + $0x1e1] sm:$0xff] }
  0x5c   :  { %v360_v43 = vld [vmem:[#allocation2 + $0x1d1] sm:$0xff]  ;;  %v10555_v44 = vld [vmem:[#allocation2 + $0x3a] sm:$0xff]  ;;  %v9156_v47 = vpack.c.bf16 %v7184_v42, %v7183_v41  ;;  %v362_v49 = vld [vmem:[#allocation2 + $0x1e9] sm:$0xff] }
  0x5d   :  { %8530 = vmatmul.mubr.msk.f32.gmra.mrb[14].mxu0 %vm14_vm0, %v2995_v52  ;;  %8085 = vmatmul.mubr.msk.f32.gmra.mrb[16].mxu1 %vm14_vm0, %v2995_v52  ;;  %v10557_v46 = vld [vmem:[#allocation2 + $0x4a] sm:$0xff]  ;;  %v7185_v48 = vld [vmem:[%s12172_s1 + $0x1b0] sm:$0xff]  ;;  %v10577_v52 = vld [vmem:[#allocation2 + $0x52] sm:$0xff] }
  0x5e   :  { %8532 = vmatprep.mubr.msk.f32.mxu0 %vm14_vm0, %v2996_v54  ;;  %8087 = vmatprep.mubr.msk.f32.mxu1 %vm14_vm0, %v2996_v54  ;;  %v186_v50 = vld [vmem:[%s12173_s0 + $0x1f0] sm:$0xff]  ;;  %v187_v51 = vld [vmem:[%s12173_s0 + $0x1f8] sm:$0xff]  ;;  %v7251_v56 = vld [vmem:[%s12172_s1 + $0x1c0] sm:$0xff] }
  0x5f   :  { %v363_v53 = vld [vmem:[#allocation2 + $0x1f9] sm:$0xff]  ;;  %251 = vst.msk [vmem:[#allocation2 + $0x331] sm:$0xff] %vm14_vm0, %v186_v50  ;;  %252 = vst.msk [vmem:[#allocation2 + $0x339] sm:$0xff] %vm14_vm0, %v187_v51  ;;  %v10581_v54 = vld [vmem:[#allocation2 + $0x62] sm:$0xff] }
  0x60   :  { %v7252_v57 = vld [vmem:[%s12172_s1 + $0x1c8] sm:$0xff]  ;;  %v364_v58 = vld [vmem:[#allocation2 + $0x201] sm:$0xff]  ;;  %v10620_v6 = vld [vmem:[#allocation2 + $0xaa] sm:$0xff] }
  0x61   :  { %8533 = vmatmul.mubr.msk.f32.gmra.mrb[16].mxu0 %vm14_vm0, %v2997_v59  ;;  %8088 = vmatmul.mubr.msk.f32.gmra.mrb[18].mxu1 %vm14_vm0, %v2997_v59  ;;  %v10595_v59 = vld [vmem:[#allocation2 + $0x6a] sm:$0xff]  ;;  %v10597_v61 = vld [vmem:[#allocation2 + $0x7a] sm:$0xff]  ;;  %v10599_v62 = vpack.c.bf16 %v7252_v57, %v7251_v56  ;;  %v10607_v0 = vld [vmem:[#allocation2 + $0x82] sm:$0xff] }
  0x62   :  { %8535 = vmatprep.mubr.msk.f32.mxu0 %vm14_vm0, %v2998_v60  ;;  %8090 = vmatprep.mubr.msk.f32.mxu1 %vm14_vm0, %v2998_v60  ;;  %v365_v60 = vld [vmem:[#allocation2 + $0x211] sm:$0xff]  ;;  %v366_v63 = vld [vmem:[#allocation2 + $0x219] sm:$0xff]  ;;  %v369_v5 = vld [vmem:[#allocation2 + $0x241] sm:$0xff] }
  0x63   :  { %v10609_v2 = vld [vmem:[#allocation2 + $0x92] sm:$0xff]  ;;  %v10618_v4 = vld [vmem:[#allocation2 + $0x9a] sm:$0xff]  ;;  %v370_v7 = vld [vmem:[#allocation2 + $0x249] sm:$0xff] }
  0x64   :  { %v371_v10 = vld [vmem:[#allocation2 + $0x259] sm:$0xff]  ;;  %v372_v12 = vld [vmem:[#allocation2 + $0x261] sm:$0xff]  ;;  %v10638_v14 = vld [vmem:[#allocation2 + $0xca] sm:$0xff] }
  0x65   :  { %8536 = vmatmul.mubr.msk.f32.gmra.mrb[18].mxu0 %vm14_vm0, %v2999_v1  ;;  %8091 = vmatmul.mubr.msk.f32.gmra.mrb[20].mxu1 %vm14_vm0, %v2999_v1  ;;  %v367_v1 = vld [vmem:[#allocation2 + $0x229] sm:$0xff]  ;;  %v373_v15 = vld [vmem:[#allocation2 + $0x271] sm:$0xff]  ;;  %v374_v17 = vld [vmem:[#allocation2 + $0x279] sm:$0xff] }
  0x66   :  { %8538 = vmatprep.mubr.msk.f32.mxu0 %vm14_vm0, %v3000_v3  ;;  %8093 = vmatprep.mubr.msk.f32.mxu1 %vm14_vm0, %v3000_v3  ;;  %v368_v3 = vld [vmem:[#allocation2 + $0x231] sm:$0xff]  ;;  %v375_v20 = vld [vmem:[#allocation2 + $0x289] sm:$0xff]  ;;  %v388_v51 = vld [vmem:[#allocation2 + $0x321] sm:$0xff] }
  0x67   :  { %v376_v22 = vld [vmem:[#allocation2 + $0x291] sm:$0xff]  ;;  %v3724_v50 = vld [vmem:[#allocation2 + $0x182] sm:$0xff] }
  0x68   :  { %v10678_v33 = vld [vmem:[#allocation2 + $0x12a] sm:$0xff]  ;;  %v10690_v41 = vld [vmem:[#allocation2 + $0x152] sm:$0xff]  ;;  %v6893_v57 = vld [vmem:[%s12172_s1 + $0x90] sm:$0xff] }
  0x69   :  { %8539 = vmatmul.mubr.msk.f32.gmra.mrb[20].mxu0 %vm14_vm0, %v3001_v9  ;;  %8094 = vmatmul.mubr.msk.f32.gmra.mrb[22].mxu1 %vm14_vm0, %v3001_v9  ;;  %v10628_v9 = vld [vmem:[#allocation2 + $0xb2] sm:$0xff]  ;;  %12221 = vst [vmem:[#allocation6_spill] sm:$0xff] %v10690_v41  ;;  %v10715_v56 = vld [vmem:[#allocation2 + $0x1ca] sm:$0xff] }
  0x6a   :  { %8541 = vmatprep.mubr.msk.f32.mxu0 %vm14_vm0, %v3002_v11  ;;  %8096 = vmatprep.mubr.msk.f32.mxu1 %vm14_vm0, %v3002_v11  ;;  %v10630_v11 = vld [vmem:[#allocation2 + $0xc2] sm:$0xff]  ;;  %v381_v34 = vld [vmem:[#allocation2 + $0x2d1] sm:$0xff]  ;;  %12225 = vst [vmem:[#allocation10_spill] sm:$0xff] %v10715_v56 }
  0x6b   :  { %v384_v42 = vld [vmem:[#allocation2 + $0x2f1] sm:$0xff]  ;;  %v10867_v35 = vld [vmem:[#allocation2 + $0xc8] sm:$0xff] }
  0x6c   :  { %v10871_v19 = vld [vmem:[#allocation2 + $0x292] sm:$0xff] }
  0x6d   :  { %8542 = vmatmul.mubr.msk.f32.gmra.mrb[22].mxu0 %vm14_vm0, %v3003_v16  ;;  %8097 = vmatmul.mubr.msk.f32.gmra.mrb[24].mxu1 %vm14_vm0, %v3003_v16  ;;  %v10640_v16 = vld [vmem:[#allocation2 + $0xda] sm:$0xff]  ;;  %12242 = vst [vmem:[#allocation27_spill] sm:$0xff] %v10871_v19 }
  0x6e   :  { %8544 = vmatprep.mubr.msk.f32.mxu0 %vm14_vm0, %v3004_v18  ;;  %8099 = vmatprep.mubr.msk.f32.mxu1 %vm14_vm0, %v3004_v18  ;;  %v10648_v18 = vld [vmem:[#allocation2 + $0xe2] sm:$0xff]  ;;  %v10873_v13 = vld [vmem:[#allocation2 + $0xd8] sm:$0xff] }
  0x71   :  { %8545 = vmatmul.mubr.msk.f32.gmra.mrb[24].mxu0 %vm14_vm0, %v3005_v21  ;;  %8100 = vmatmul.mubr.msk.f32.gmra.mrb[26].mxu1 %vm14_vm0, %v3005_v21  ;;  %v10650_v21 = vld [vmem:[#allocation2 + $0xf2] sm:$0xff] }
  0x72   :  { %8547 = vmatprep.mubr.msk.f32.mxu0 %vm14_vm0, %v3006_v23  ;;  %8102 = vmatprep.mubr.msk.f32.mxu1 %vm14_vm0, %v3006_v23  ;;  %v10658_v23 = vld [vmem:[#allocation2 + $0xfa] sm:$0xff] }
  0x75   :  { %8548 = vmatmul.mubr.msk.f32.gmra.mrb[26].mxu0 %vm14_vm0, %v3007_v25  ;;  %8103 = vmatmul.mubr.msk.f32.gmra.mrb[28].mxu1 %vm14_vm0, %v3007_v25  ;;  %v377_v25 = vld [vmem:[#allocation2 + $0x2a1] sm:$0xff] }
  0x76   :  { %8550 = vmatprep.mubr.msk.f32.mxu0 %vm14_vm0, %v3008_v26  ;;  %8105 = vmatprep.mubr.msk.f32.mxu1 %vm14_vm0, %v3008_v26  ;;  %v10660_v26 = vld [vmem:[#allocation2 + $0x10a] sm:$0xff] }
  0x79   :  { %8551 = vmatmul.mubr.msk.f32.gmra.mrb[28].mxu0 %vm14_vm0, %v3009_v27  ;;  %8106 = vmatmul.mubr.msk.f32.gmra.mrb[30].mxu1 %vm14_vm0, %v3009_v27  ;;  %v378_v27 = vld [vmem:[#allocation2 + $0x2a9] sm:$0xff] }
  0x7a   :  { %8553 = vmatprep.mubr.msk.f32.mxu0 %vm14_vm0, %v3010_v28  ;;  %8108 = vmatprep.mubr.msk.f32.mxu1 %vm14_vm0, %v357_v31  ;;  %v10668_v28 = vld [vmem:[#allocation2 + $0x112] sm:$0xff]  ;;  %v10670_v31 = vld [vmem:[#allocation2 + $0x122] sm:$0xff] }
  0x7d   :  { %8554 = vmatmul.mubr.msk.f32.gmra.mrb[30].mxu0 %vm14_vm0, %v3011_v29  ;;  %8109 = vmatmul.mubr.msk.f32.gmra.mrb[32].mxu1 %vm14_vm0, %v358_v36  ;;  %v379_v29 = vld [vmem:[#allocation2 + $0x2b9] sm:$0xff] }
  0x7e   :  { %8620 = vmatprep.mubr.msk.f32.mxu0 %vm14_vm0, %v3694_v32  ;;  %8111 = vmatprep.mubr.msk.f32.mxu1 %vm14_vm0, %v359_v38  ;;  %v380_v32 = vld [vmem:[#allocation2 + $0x2c1] sm:$0xff] }
  0x7f   :  { %v10680_v36 = vld [vmem:[#allocation2 + $0x13a] sm:$0xff]  ;;  %v10688_v38 = vld [vmem:[#allocation2 + $0x142] sm:$0xff] }
  0x81   :  { %8621 = vmatmul.mubr.msk.f32.vlgmr.msra.gmra.mrb[0].mxu0 %vm14_vm0, %v3695_v37  ;;  %8112 = vmatmul.mubr.msk.f32.gmra.mrb[34].mxu1 %vm14_vm0, %v360_v43  ;;  %v382_v37 = vld [vmem:[#allocation2 + $0x2d9] sm:$0xff] }
  0x82   :  { %9151 = vmatpush3.bf16.msra.mxu0 %v10348_v30  ;;  %8623 = vmatprep.mubr.msk.f32.mxu0 %vm14_vm0, %v10541_v39  ;;  %v7186_v30 = vld [vmem:[%s12172_s1 + $0x1b8] sm:$0xff]  ;;  %v10698_v43 = vld [vmem:[#allocation2 + $0x15a] sm:$0xff] }
  0x83   :  { %9153 = vmatprep.subr.bf16.mxu0 %v9152_v40  ;;  %8114 = vmatprep.mubr.msk.f32.mxu1 %vm14_vm0, %v361_v45  ;;  %v9160_v55 = vpack.c.bf16 %v7186_v30, %v7185_v48  ;;  %12222 = vst [vmem:[#allocation7_spill] sm:$0xff] %v10698_v43  ;;  %v385_v45 = vld [vmem:[#allocation2 + $0x301] sm:$0xff]  ;;  %v386_v48 = vld [vmem:[#allocation2 + $0x309] sm:$0xff]  ;;  %v10708_v30 = vld [vmem:[#allocation2 + $0x172] sm:$0xff] }
  0x84   :  { %12224 = vst [vmem:[#allocation9_spill] sm:$0xff] %v10708_v30 }
  0x85   :  { %8624 = vmatmul.mubr.msk.f32.gmra.mrb[2].mxu0 %vm14_vm0, %v10555_v44  ;;  %8115 = vmatmul.mubr.msk.f32.gmra.mrb[36].mxu1 %vm14_vm0, %v362_v49  ;;  %v387_v49 = vld [vmem:[#allocation2 + $0x319] sm:$0xff] }
  0x86   :  { %8626 = vmatprep.mubr.msk.f32.mxu0 %vm14_vm0, %v10557_v46  ;;  %9155 = vmatpush3.bf16.msra.mxu0 %v9152_v40  ;;  %v383_v40 = vld [vmem:[#allocation2 + $0x2e9] sm:$0xff] }
  0x87   :  { %9157 = vmatprep.subr.bf16.mxu0 %v9156_v47  ;;  %8117 = vmatprep.mubr.msk.f32.mxu1 %vm14_vm0, %v363_v53  ;;  %v3725_v53 = vld [vmem:[#allocation2 + $0x18a] sm:$0xff] }
  0x89   :  { %8627 = vmatmul.mubr.msk.f32.gmra.mrb[4].mxu0 %vm14_vm0, %v10577_v52  ;;  %8118 = vmatmul.mubr.msk.f32.gmra.mrb[38].mxu1 %vm14_vm0, %v364_v58  ;;  %v6894_v58 = vld [vmem:[%s12172_s1 + $0x98] sm:$0xff] }
  0x8a   :  { %8629 = vmatprep.mubr.msk.f32.mxu0 %vm14_vm0, %v10581_v54  ;;  %9159 = vmatpush3.bf16.msra.mxu0 %v9156_v47  ;;  %v10700_v47 = vld [vmem:[#allocation2 + $0x16a] sm:$0xff] }
  0x8b   :  { %9161 = vmatprep.subr.bf16.mxu0 %v9160_v55  ;;  %8120 = vmatprep.mubr.msk.f32.mxu1 %vm14_vm0, %v365_v60  ;;  %12223 = vst [vmem:[#allocation8_spill] sm:$0xff] %v10700_v47  ;;  %v254_v60 = vld [vmem:[#allocation2 + $0x8] sm:$0xff] }
  0x8d   :  { %8630 = vmatmul.mubr.msk.f32.gmra.mrb[6].mxu0 %vm14_vm0, %v10595_v59  ;;  %8121 = vmatmul.mubr.msk.f32.gmra.mrb[40].mxu1 %vm14_vm0, %v366_v63  ;;  %v10728_v63 = vld [vmem:[#allocation2 + $0x1d2] sm:$0xff] }
  0x8e   :  { %8632 = vmatprep.mubr.msk.f32.mxu0 %vm14_vm0, %v10597_v61  ;;  %9163 = vmatpush3.bf16.msra.mxu0 %v9160_v55  ;;  %v253_v55 = vld [vmem:[#allocation2] sm:$0xff]  ;;  %12226 = vst [vmem:[#allocation11_spill] sm:$0xff] %v10728_v63 }
  0x8f   :  { %9165 = vmatprep.subr.bf16.mxu0 %v10599_v62  ;;  %8123 = vmatprep.mubr.msk.f32.mxu1 %vm14_vm0, %v367_v1  ;;  %v255_v1 = vld [vmem:[#allocation2 + $0x18] sm:$0xff] }
  0x91   :  { %8633 = vmatmul.mubr.msk.f32.gmra.mrb[8].mxu0 %vm14_vm0, %v10607_v0  ;;  %8124 = vmatmul.mubr.msk.f32.gmra.mrb[42].mxu1 %vm14_vm0, %v368_v3  ;;  %v10730_v3 = vld [vmem:[#allocation2 + $0x1e2] sm:$0xff] }
  0x92   :  { %8635 = vmatprep.mubr.msk.f32.mxu0 %vm14_vm0, %v10609_v2  ;;  %8126 = vmatprep.mubr.msk.f32.mxu1 %vm14_vm0, %v369_v5  ;;  %12227 = vst [vmem:[#allocation12_spill] sm:$0xff] %v10730_v3  ;;  %v9088_v5 = vpack.c.bf16 %v6894_v58, %v6893_v57  ;;  %v10808_v57 = vld [vmem:[#allocation2 + $0x78] sm:$0xff]  ;;  %v10810_v58 = vld [vmem:[#allocation2 + $0x242] sm:$0xff] }
  0x93   :  { %12235 = vst [vmem:[#allocation20_spill] sm:$0xff] %v10810_v58 }
  0x95   :  { %8636 = vmatmul.mubr.msk.f32.gmra.mrb[10].mxu0 %vm14_vm0, %v10618_v4  ;;  %8127 = vmatmul.mubr.msk.f32.gmra.mrb[44].mxu1 %vm14_vm0, %v370_v7  ;;  %v6895_v7 = vld [vmem:[%s12172_s1 + $0xa0] sm:$0xff] }
  0x96   :  { %8638 = vmatprep.mubr.msk.f32.mxu0 %vm14_vm0, %v10620_v6  ;;  %8129 = vmatprep.mubr.msk.f32.mxu1 %vm14_vm0, %v371_v10  ;;  %v6896_v10 = vld [vmem:[%s12172_s1 + $0xa8] sm:$0xff] }
  0x99   :  { %8639 = vmatmul.mubr.msk.f32.gmra.mrb[12].mxu0 %vm14_vm0, %v10628_v9  ;;  %8130 = vmatmul.mubr.msk.f32.gmra.mrb[46].mxu1 %vm14_vm0, %v372_v12  ;;  %v256_v12 = vld [vmem:[#allocation2 + $0x20] sm:$0xff] }
  0x9a   :  { %8641 = vmatprep.mubr.msk.f32.mxu0 %vm14_vm0, %v10630_v11  ;;  %8132 = vmatprep.mubr.msk.f32.mxu1 %vm14_vm0, %v373_v15  ;;  %v10745_v15 = vld [vmem:[#allocation2 + $0x1ea] sm:$0xff] }
  0x9b   :  { %12228 = vst [vmem:[#allocation13_spill] sm:$0xff] %v10745_v15 }
  0x9d   :  { %8642 = vmatmul.mubr.msk.f32.gmra.mrb[14].mxu0 %vm14_vm0, %v10638_v14  ;;  %8133 = vmatmul.mubr.msk.f32.gmra.mrb[48].mxu1 %vm14_vm0, %v374_v17  ;;  %v10747_v17 = vld [vmem:[#allocation2 + $0x30] sm:$0xff] }
  0x9e   :  { %8644 = vmatprep.mubr.msk.f32.mxu0 %vm14_vm0, %v10640_v16  ;;  %8135 = vmatprep.mubr.msk.f32.mxu1 %vm14_vm0, %v375_v20  ;;  %v10749_v20 = vld [vmem:[#allocation2 + $0x1fa] sm:$0xff] }
  0x9f   :  { %12229 = vst [vmem:[#allocation14_spill] sm:$0xff] %v10749_v20 }
  0xa1   :  { %8645 = vmatmul.mubr.msk.f32.gmra.mrb[16].mxu0 %vm14_vm0, %v10648_v18  ;;  %8136 = vmatmul.mubr.msk.f32.gmra.mrb[50].mxu1 %vm14_vm0, %v376_v22  ;;  %v9092_v22 = vpack.c.bf16 %v6896_v10, %v6895_v7  ;;  %v10827_v7 = vld [vmem:[#allocation2 + $0x25a] sm:$0xff] }
  0xa2   :  { %8647 = vmatprep.mubr.msk.f32.mxu0 %vm14_vm0, %v10650_v21  ;;  %8138 = vmatprep.mubr.msk.f32.mxu1 %vm14_vm0, %v377_v25  ;;  %v6898_v25 = vld [vmem:[%s12172_s1 + $0xb8] sm:$0xff]  ;;  %12237 = vst [vmem:[#allocation22_spill] sm:$0xff] %v10827_v7  ;;  %v10835_v10 = vld [vmem:[#allocation2 + $0x98] sm:$0xff] }
  0xa5   :  { %8648 = vmatmul.mubr.msk.f32.gmra.mrb[18].mxu0 %vm14_vm0, %v10658_v23  ;;  %8139 = vmatmul.mubr.msk.f32.gmra.mrb[52].mxu1 %vm14_vm0, %v378_v27  ;;  %v10762_v27 = vld [vmem:[#allocation2 + $0x38] sm:$0xff] }
  0xa6   :  { %8650 = vmatprep.mubr.msk.f32.mxu0 %vm14_vm0, %v10660_v26  ;;  %8141 = vmatprep.mubr.msk.f32.mxu1 %vm14_vm0, %v379_v29  ;;  %v10766_v29 = vld [vmem:[#allocation2 + $0x202] sm:$0xff] }
  0xa7   :  { %12230 = vst [vmem:[#allocation15_spill] sm:$0xff] %v10766_v29 }
  0xa9   :  { %8651 = vmatmul.mubr.msk.f32.gmra.mrb[20].mxu0 %vm14_vm0, %v10668_v28  ;;  %8142 = vmatmul.mubr.msk.f32.gmra.mrb[54].mxu1 %vm14_vm0, %v380_v32  ;;  %v10768_v32 = vld [vmem:[#allocation2 + $0x48] sm:$0xff] }
  0xaa   :  { %8653 = vmatprep.mubr.msk.f32.mxu0 %vm14_vm0, %v10670_v31  ;;  %8144 = vmatprep.mubr.msk.f32.mxu1 %vm14_vm0, %v381_v34  ;;  %v10770_v34 = vld [vmem:[#allocation2 + $0x212] sm:$0xff] }
  0xab   :  { %12231 = vst [vmem:[#allocation16_spill] sm:$0xff] %v10770_v34 }
  0xad   :  { %8654 = vmatmul.mubr.msk.f32.gmra.mrb[22].mxu0 %vm14_vm0, %v10678_v33  ;;  %8145 = vmatmul.mubr.msk.f32.gmra.mrb[56].mxu1 %vm14_vm0, %v382_v37 }
  0xae   :  { %8656 = vmatprep.mubr.msk.f32.mxu0 %vm14_vm0, %v10680_v36  ;;  %8147 = vmatprep.mubr.msk.f32.mxu1 %vm14_vm0, %v383_v40  ;;  %v6963_v40 = vld [vmem:[%s12172_s1 + $0xc0] sm:$0xff] }
  0xb1   :  { %8657 = vmatmul.mubr.msk.f32.gmra.mrb[24].mxu0 %vm14_vm0, %v10688_v38  ;;  %8148 = vmatmul.mubr.msk.f32.gmra.mrb[58].mxu1 %vm14_vm0, %v384_v42  ;;  %v6964_v42 = vld [vmem:[%s12172_s1 + $0xc8] sm:$0xff] }
  0xb2   :  { %8659 = vmatprep.mubr.msk.f32.mxu0 %vm14_vm0, %v10690_v41  ;;  %8150 = vmatprep.mubr.msk.f32.mxu1 %vm14_vm0, %v385_v45  ;;  %v10784_v45 = vld [vmem:[#allocation2 + $0x50] sm:$0xff]  ;;  %v7256_v41 = vld [vmem:[%s12172_s1 + $0x1e8] sm:$0xff] }
  0xb5   :  { %8660 = vmatmul.mubr.msk.f32.gmra.mrb[26].mxu0 %vm14_vm0, %v10698_v43  ;;  %8151 = vmatmul.mubr.msk.f32.gmra.mrb[60].mxu1 %vm14_vm0, %v386_v48  ;;  %v10788_v48 = vld [vmem:[#allocation2 + $0x21a] sm:$0xff]  ;;  %v7255_v43 = vld [vmem:[%s12172_s1 + $0x1e0] sm:$0xff] }
  0xb6   :  { %8662 = vmatprep.mubr.msk.f32.mxu0 %vm14_vm0, %v10700_v47  ;;  %8153 = vmatprep.mubr.msk.f32.mxu1 %vm14_vm0, %v387_v49  ;;  %12232 = vst [vmem:[#allocation17_spill] sm:$0xff] %v10788_v48  ;;  %v10790_v49 = vld [vmem:[#allocation2 + $0x60] sm:$0xff] }
  0xb9   :  { %8663 = vmatmul.mubr.msk.f32.gmra.mrb[28].mxu0 %vm14_vm0, %v10708_v30  ;;  %8154 = vmatmul.mubr.msk.f32.gmra.mrb[62].mxu1 %vm14_vm0, %v388_v51  ;;  %v10794_v51 = vpack.c.bf16 %v6964_v42, %v6963_v40  ;;  %v10857_v40 = vld [vmem:[#allocation2 + $0xc0] sm:$0xff]  ;;  %v10859_v42 = vld [vmem:[#allocation2 + $0x28a] sm:$0xff]  ;;  %v286_v30 = vld [vmem:[#allocation2 + $0x1b8] sm:$0xff] }
  0xba   :  { %8665 = vmatprep.mubr.msk.f32.mxu0 %vm14_vm0, %v3724_v50  ;;  %8172 = vmatprep.mubr.msk.f32.mxu1 %vm14_vm0, %v253_v55  ;;  %v10792_v50 = vld [vmem:[#allocation2 + $0x22a] sm:$0xff]  ;;  %v10806_v55 = vld [vmem:[#allocation2 + $0x232] sm:$0xff]  ;;  %12241 = vst [vmem:[#allocation26_spill] sm:$0xff] %v10859_v42 }
  0xbb   :  { %12233 = vst [vmem:[#allocation18_spill] sm:$0xff] %v10792_v50  ;;  %12234 = vst [vmem:[#allocation19_spill] sm:$0xff] %v10806_v55 }
  0xbd   :  { %8666 = vmatmul.mubr.msk.f32.gmra.mrb[30].mxu0 %vm14_vm0, %v3725_v53  ;;  %8173 = vmatmul.mubr.msk.f32.vlgmr.msra.gmra.mrb[0].mxu1 %vm14_vm0, %v254_v60  ;;  %v10802_v53 = vld [vmem:[#allocation2 + $0x68] sm:$0xff]  ;;  %v10819_v60 = vld [vmem:[#allocation2 + $0x80] sm:$0xff] }
  0xbe   :  { %8668 = vmatprep.mubr.msk.f32.mxu0 %vm14_vm0, %v10715_v56  ;;  %9087 = vmatpush3.bf16.msra.mxu1 %v10516_v24  ;;  %v6897_v24 = vld [vmem:[%s12172_s1 + $0xb0] sm:$0xff] }
  0xbf   :  { %8175 = vmatprep.mubr.msk.f32.mxu1 %vm14_vm0, %v255_v1  ;;  %9089 = vmatprep.subr.bf16.mxu1 %v9088_v5  ;;  %v9096_v37 = vpack.c.bf16 %v6898_v25, %v6897_v24  ;;  %v10823_v1 = vld [vmem:[#allocation2 + $0x24a] sm:$0xff]  ;;  %v10843_v24 = vld [vmem:[#allocation2 + $0x272] sm:$0xff]  ;;  %v7253_v56 = vld [vmem:[%s12172_s1 + $0x1d0] sm:$0xff] }
  0xc0   :  { %12236 = vst [vmem:[#allocation21_spill] sm:$0xff] %v10823_v1  ;;  %12239 = vst [vmem:[#allocation24_spill] sm:$0xff] %v10843_v24  ;;  %v10851_v25 = vld [vmem:[#allocation2 + $0xb0] sm:$0xff] }
  0xc1   :  { %8669 = vmatmul.mubr.msk.f32.gmra.mrb[32].mxu0 %vm14_vm0, %v10728_v63  ;;  %8176 = vmatmul.mubr.msk.f32.gmra.mrb[2].mxu1 %vm14_vm0, %v256_v12  ;;  %v10839_v12 = vld [vmem:[#allocation2 + $0x262] sm:$0xff]  ;;  %v3757_v63 = vld [vmem:[#allocation2 + $0x33a] sm:$0xff] }
  0xc2   :  { %8671 = vmatprep.mubr.msk.f32.mxu0 %vm14_vm0, %v10730_v3  ;;  %8178 = vmatprep.mubr.msk.f32.mxu1 %vm14_vm0, %v10747_v17  ;;  %12238 = vst [vmem:[#allocation23_spill] sm:$0xff] %v10839_v12  ;;  %v3756_v3 = vld [vmem:[#allocation2 + $0x332] sm:$0xff] }
  0xc3   :  { %9091 = vmatpush3.bf16.msra.mxu1 %v9088_v5  ;;  %v10825_v5 = vld [vmem:[#allocation2 + $0x90] sm:$0xff] }
  0xc4   :  { %9093 = vmatprep.subr.bf16.mxu1 %v9092_v22 }
  0xc5   :  { %8672 = vmatmul.mubr.msk.f32.gmra.mrb[34].mxu0 %vm14_vm0, %v10745_v15  ;;  %8179 = vmatmul.mubr.msk.f32.gmra.mrb[4].mxu1 %vm14_vm0, %v10762_v27  ;;  %v10969_v15 = vld [vmem:[#allocation2 + $0x168] sm:$0xff] }
  0xc6   :  { %8674 = vmatprep.mubr.msk.f32.mxu0 %vm14_vm0, %v10749_v20  ;;  %8181 = vmatprep.mubr.msk.f32.mxu1 %vm14_vm0, %v10768_v32  ;;  %v10955_v20 = vld [vmem:[#allocation2 + $0x31a] sm:$0xff] }
  0xc7   :  { %9095 = vmatpush3.bf16.msra.mxu1 %v9092_v22  ;;  %v10841_v22 = vld [vmem:[#allocation2 + $0xa8] sm:$0xff]  ;;  %12253 = vst [vmem:[#allocation38_spill] sm:$0xff] %v10955_v20 }
  0xc8   :  { %9097 = vmatprep.subr.bf16.mxu1 %v9096_v37 }
  0xc9   :  { %8675 = vmatmul.mubr.msk.f32.gmra.mrb[36].mxu0 %vm14_vm0, %v10766_v29  ;;  %8182 = vmatmul.mubr.msk.f32.gmra.mrb[6].mxu1 %vm14_vm0, %v10784_v45  ;;  %v10953_v29 = vld [vmem:[#allocation2 + $0x150] sm:$0xff] }
  0xca   :  { %8677 = vmatprep.mubr.msk.f32.mxu0 %vm14_vm0, %v10770_v34  ;;  %8184 = vmatprep.mubr.msk.f32.mxu1 %vm14_vm0, %v10790_v49  ;;  %v10939_v34 = vld [vmem:[#allocation2 + $0x302] sm:$0xff] }
  0xcb   :  { %9099 = vmatpush3.bf16.msra.mxu1 %v9096_v37  ;;  %v10855_v37 = vld [vmem:[#allocation2 + $0x27a] sm:$0xff]  ;;  %12251 = vst [vmem:[#allocation36_spill] sm:$0xff] %v10939_v34 }
  0xcc   :  { %9101 = vmatprep.subr.bf16.mxu1 %v10794_v51  ;;  %12240 = vst [vmem:[#allocation25_spill] sm:$0xff] %v10855_v37 }
  0xcd   :  { %8678 = vmatmul.mubr.msk.f32.gmra.mrb[38].mxu0 %vm14_vm0, %v10788_v48  ;;  %8185 = vmatmul.mubr.msk.f32.gmra.mrb[8].mxu1 %vm14_vm0, %v10802_v53  ;;  %v10937_v48 = vld [vmem:[#allocation2 + $0x138] sm:$0xff] }
  0xce   :  { %8680 = vmatprep.mubr.msk.f32.mxu0 %vm14_vm0, %v10792_v50  ;;  %8187 = vmatprep.mubr.msk.f32.mxu1 %vm14_vm0, %v10808_v57  ;;  %v10923_v50 = vld [vmem:[#allocation2 + $0x2ea] sm:$0xff] }
  0xcf   :  { %12249 = vst [vmem:[#allocation34_spill] sm:$0xff] %v10923_v50 }
  0xd1   :  { %8681 = vmatmul.mubr.msk.f32.gmra.mrb[40].mxu0 %vm14_vm0, %v10806_v55  ;;  %8188 = vmatmul.mubr.msk.f32.gmra.mrb[10].mxu1 %vm14_vm0, %v10819_v60  ;;  %v10921_v55 = vld [vmem:[#allocation2 + $0x120] sm:$0xff] }
  0xd2   :  { %8683 = vmatprep.mubr.msk.f32.mxu0 %vm14_vm0, %v10810_v58  ;;  %8190 = vmatprep.mubr.msk.f32.mxu1 %vm14_vm0, %v10825_v5  ;;  %v10907_v58 = vld [vmem:[#allocation2 + $0x2d2] sm:$0xff] }
  0xd3   :  { %12247 = vst [vmem:[#allocation32_spill] sm:$0xff] %v10907_v58 }
  0xd5   :  { %8684 = vmatmul.mubr.msk.f32.gmra.mrb[42].mxu0 %vm14_vm0, %v10823_v1  ;;  %8191 = vmatmul.mubr.msk.f32.gmra.mrb[12].mxu1 %vm14_vm0, %v10835_v10  ;;  %v10905_v1 = vld [vmem:[#allocation2 + $0x108] sm:$0xff] }
  0xd6   :  { %8686 = vmatprep.mubr.msk.f32.mxu0 %vm14_vm0, %v10827_v7  ;;  %8193 = vmatprep.mubr.msk.f32.mxu1 %vm14_vm0, %v10841_v22  ;;  %v10891_v7 = vld [vmem:[#allocation2 + $0x2ba] sm:$0xff] }
  0xd7   :  { %12245 = vst [vmem:[#allocation30_spill] sm:$0xff] %v10891_v7 }
  0xd9   :  { %8687 = vmatmul.mubr.msk.f32.gmra.mrb[44].mxu0 %vm14_vm0, %v10839_v12  ;;  %8194 = vmatmul.mubr.msk.f32.gmra.mrb[14].mxu1 %vm14_vm0, %v10851_v25  ;;  %v10889_v12 = vld [vmem:[#allocation2 + $0xf0] sm:$0xff] }
  0xda   :  { %8689 = vmatprep.mubr.msk.f32.mxu0 %vm14_vm0, %v10843_v24  ;;  %8196 = vmatprep.mubr.msk.f32.mxu1 %vm14_vm0, %v10857_v40  ;;  %v10875_v24 = vld [vmem:[#allocation2 + $0x2a2] sm:$0xff] }
  0xdb   :  { %12243 = vst [vmem:[#allocation28_spill] sm:$0xff] %v10875_v24 }
  0xdd   :  { %8690 = vmatmul.mubr.msk.f32.gmra.mrb[46].mxu0 %vm14_vm0, %v10855_v37  ;;  %8197 = vmatmul.mubr.msk.f32.gmra.mrb[16].mxu1 %vm14_vm0, %v10867_v35  ;;  %v10883_v37 = vld [vmem:[#allocation2 + $0xe0] sm:$0xff] }
  0xde   :  { %8692 = vmatprep.mubr.msk.f32.mxu0 %vm14_vm0, %v10859_v42  ;;  %8199 = vmatprep.mubr.msk.f32.mxu1 %vm14_vm0, %v10873_v13  ;;  %v10887_v42 = vld [vmem:[#allocation2 + $0x2aa] sm:$0xff] }
  0xdf   :  { %12244 = vst [vmem:[#allocation29_spill] sm:$0xff] %v10887_v42 }
  0xe1   :  { %8693 = vmatmul.mubr.msk.f32.gmra.mrb[48].mxu0 %vm14_vm0, %v10871_v19  ;;  %8200 = vmatmul.mubr.msk.f32.gmra.mrb[18].mxu1 %vm14_vm0, %v10883_v37  ;;  %v10899_v19 = vld [vmem:[#allocation2 + $0xf8] sm:$0xff] }
  0xe2   :  { %8695 = vmatprep.mubr.msk.f32.mxu0 %vm14_vm0, %v10875_v24  ;;  %8202 = vmatprep.mubr.msk.f32.mxu1 %vm14_vm0, %v10889_v12  ;;  %v10903_v24 = vld [vmem:[#allocation2 + $0x2c2] sm:$0xff] }
  0xe3   :  { %12246 = vst [vmem:[#allocation31_spill] sm:$0xff] %v10903_v24 }
  0xe5   :  { %8696 = vmatmul.mubr.msk.f32.gmra.mrb[50].mxu0 %vm14_vm0, %v10887_v42  ;;  %8203 = vmatmul.mubr.msk.f32.gmra.mrb[20].mxu1 %vm14_vm0, %v10899_v19  ;;  %v10915_v42 = vld [vmem:[#allocation2 + $0x110] sm:$0xff] }
  0xe6   :  { %8698 = vmatprep.mubr.msk.f32.mxu0 %vm14_vm0, %v10891_v7  ;;  %8205 = vmatprep.mubr.msk.f32.mxu1 %vm14_vm0, %v10905_v1  ;;  %v10919_v7 = vld [vmem:[#allocation2 + $0x2da] sm:$0xff] }
  0xe7   :  { %12248 = vst [vmem:[#allocation33_spill] sm:$0xff] %v10919_v7 }
  0xe9   :  { %8699 = vmatmul.mubr.msk.f32.gmra.mrb[52].mxu0 %vm14_vm0, %v10903_v24  ;;  %8206 = vmatmul.mubr.msk.f32.gmra.mrb[22].mxu1 %vm14_vm0, %v10915_v42  ;;  %v10931_v24 = vld [vmem:[#allocation2 + $0x128] sm:$0xff] }
  0xea   :  { %8701 = vmatprep.mubr.msk.f32.mxu0 %vm14_vm0, %v10907_v58  ;;  %8208 = vmatprep.mubr.msk.f32.mxu1 %vm14_vm0, %v10921_v55  ;;  %v10935_v58 = vld [vmem:[#allocation2 + $0x2f2] sm:$0xff] }
  0xeb   :  { %12250 = vst [vmem:[#allocation35_spill] sm:$0xff] %v10935_v58 }
  0xed   :  { %8702 = vmatmul.mubr.msk.f32.gmra.mrb[54].mxu0 %vm14_vm0, %v10919_v7  ;;  %8209 = vmatmul.mubr.msk.f32.gmra.mrb[24].mxu1 %vm14_vm0, %v10931_v24  ;;  %v10947_v7 = vld [vmem:[#allocation2 + $0x140] sm:$0xff] }
  0xee   :  { %8704 = vmatprep.mubr.msk.f32.mxu0 %vm14_vm0, %v10923_v50  ;;  %8211 = vmatprep.mubr.msk.f32.mxu1 %vm14_vm0, %v10937_v48  ;;  %v10951_v50 = vld [vmem:[#allocation2 + $0x30a] sm:$0xff] }
  0xef   :  { %12252 = vst [vmem:[#allocation37_spill] sm:$0xff] %v10951_v50 }
  0xf1   :  { %8705 = vmatmul.mubr.msk.f32.gmra.mrb[56].mxu0 %vm14_vm0, %v10935_v58  ;;  %8212 = vmatmul.mubr.msk.f32.gmra.mrb[26].mxu1 %vm14_vm0, %v10947_v7  ;;  %v10963_v58 = vld [vmem:[#allocation2 + $0x158] sm:$0xff] }
  0xf2   :  { %8707 = vmatprep.mubr.msk.f32.mxu0 %vm14_vm0, %v10939_v34  ;;  %8214 = vmatprep.mubr.msk.f32.mxu1 %vm14_vm0, %v10953_v29  ;;  %v10967_v34 = vld [vmem:[#allocation2 + $0x322] sm:$0xff] }
  0xf3   :  { %12254 = vst [vmem:[#allocation39_spill] sm:$0xff] %v10967_v34 }
  0xf5   :  { %8708 = vmatmul.mubr.msk.f32.gmra.mrb[58].mxu0 %vm14_vm0, %v10951_v50  ;;  %8215 = vmatmul.mubr.msk.f32.gmra.mrb[28].mxu1 %vm14_vm0, %v10963_v58  ;;  %v10977_v50 = vld [vmem:[#allocation2 + $0x170] sm:$0xff] }
  0xf6   :  { %8710 = vmatprep.mubr.msk.f32.mxu0 %vm14_vm0, %v10955_v20  ;;  %8217 = vmatprep.mubr.msk.f32.mxu1 %vm14_vm0, %v10969_v15  ;;  %v285_v20 = vld [vmem:[#allocation2 + $0x1b0] sm:$0xff] }
  0xf9   :  { %8711 = vmatmul.mubr.msk.f32.gmra.mrb[60].mxu0 %vm14_vm0, %v10967_v34  ;;  %8218 = vmatmul.mubr.msk.f32.gmra.mrb[30].mxu1 %vm14_vm0, %v10977_v50  ;;  %v7254_v34 = vld [vmem:[%s12172_s1 + $0x1d8] sm:$0xff] }
  0xfa   :  { %8713 = vmatprep.mubr.msk.f32.mxu0 %vm14_vm0, %v3756_v3  ;;  %8220 = vmatprep.mubr.msk.f32.mxu1 %vm14_vm0, %v285_v20  ;;  %v287_v3 = vld [vmem:[#allocation2 + $0x1c8] sm:$0xff]  ;;  %v9168_v47 = vpack.c.bf16 %v7254_v34, %v7253_v56  ;;  %v9172_v56 = vpack.c.bf16 %v7256_v41, %v7255_v43  ;;  %v11022_v41 = vld [vmem:[#allocation2 + $0x1f8] sm:$0xff]  ;;  %v11040_v34 = vld [vmem:[#allocation2 + $0x210] sm:$0xff] }
  0xfb   :  { %v7258_v20 = vld [vmem:[%s12172_s1 + $0x1f8] sm:$0xff] }
  0xfd   :  { %8714 = vmatmul.mubr.msk.f32.gmra.mrb[62].mxu0 %vm14_vm0, %v3757_v63  ;;  %8221 = vmatmul.mubr.msk.f32.gmra.mrb[32].mxu1 %vm14_vm0, %v286_v30  ;;  %v288_v63 = vld [vmem:[#allocation2 + $0x1d0] sm:$0xff]  ;;  %v11005_v30 = vld [vmem:[#allocation2 + $0x1e0] sm:$0xff] }
  0xfe   :  { %8732 = vmatprep.mubr.msk.f32.mxu0 %vm14_vm0, %v10747_v17  ;;  %8223 = vmatprep.mubr.msk.f32.mxu1 %vm14_vm0, %v287_v3  ;;  %v7257_v17 = vld [vmem:[%s12172_s1 + $0x1f0] sm:$0xff] }
  0xff   :  { %v9176_v43 = vpack.c.bf16 %v7258_v20, %v7257_v17  ;;  %v11165_v3 = vld [vmem:[#allocation2 + $0x180] sm:$0xff] }
 0x100   :  { %12255 = vst [vmem:[#allocation40_spill] sm:$0xff] %v11165_v3  ;;  %v1552_v17 = vld [vmem:[#allocation2 + $0x2] sm:$0xff] }
 0x101   :  { %8733 = vmatmul.mubr.msk.f32.vlgmr.msra.gmra.mrb[0].mxu0 %vm14_vm0, %v10762_v27  ;;  %8224 = vmatmul.mubr.msk.f32.gmra.mrb[34].mxu1 %vm14_vm0, %v288_v63  ;;  %v7323_v27 = vld [vmem:[%s12172_s1 + $0x200] sm:$0xff]  ;;  %v4439_v63 = vld [vmem:[#allocation2 + $0x198] sm:$0xff]  ;;  %v6965_v20 = vld [vmem:[%s12172_s1 + $0xd0] sm:$0xff] }
 0x102   :  { %9167 = vmatpush3.bf16.msra.mxu0 %v10599_v62  ;;  %8735 = vmatprep.mubr.msk.f32.mxu0 %vm14_vm0, %v10768_v32  ;;  %v11018_v62 = vld [vmem:[#allocation2 + $0x1e8] sm:$0xff]  ;;  %v7324_v32 = vld [vmem:[%s12172_s1 + $0x208] sm:$0xff] }
 0x103   :  { %9169 = vmatprep.subr.bf16.mxu0 %v9168_v47  ;;  %8226 = vmatprep.mubr.msk.f32.mxu1 %vm14_vm0, %v11005_v30 }
 0x105   :  { %8736 = vmatmul.mubr.msk.f32.gmra.mrb[2].mxu0 %vm14_vm0, %v10784_v45  ;;  %8227 = vmatmul.mubr.msk.f32.gmra.mrb[36].mxu1 %vm14_vm0, %v11018_v62  ;;  %v11042_v45 = vpack.c.bf16 %v7324_v32, %v7323_v27  ;;  %v1553_v27 = vld [vmem:[#allocation2 + $0xa] sm:$0xff]  ;;  %v1554_v32 = vld [vmem:[#allocation2 + $0x1a] sm:$0xff] }
 0x106   :  { %8738 = vmatprep.mubr.msk.f32.mxu0 %vm14_vm0, %v10790_v49  ;;  %9171 = vmatpush3.bf16.msra.mxu0 %v9168_v47  ;;  %v11036_v47 = vld [vmem:[#allocation2 + $0x200] sm:$0xff]  ;;  %v11050_v49 = vld [vmem:[#allocation2 + $0x218] sm:$0xff] }
 0x107   :  { %9173 = vmatprep.subr.bf16.mxu0 %v9172_v56  ;;  %8229 = vmatprep.mubr.msk.f32.mxu1 %vm14_vm0, %v11022_v41 }
 0x109   :  { %8739 = vmatmul.mubr.msk.f32.gmra.mrb[4].mxu0 %vm14_vm0, %v10802_v53  ;;  %8230 = vmatmul.mubr.msk.f32.gmra.mrb[38].mxu1 %vm14_vm0, %v11036_v47  ;;  %v11054_v53 = vld [vmem:[#allocation2 + $0x228] sm:$0xff] }
 0x10a   :  { %8741 = vmatprep.mubr.msk.f32.mxu0 %vm14_vm0, %v10808_v57  ;;  %9175 = vmatpush3.bf16.msra.mxu0 %v9172_v56  ;;  %v11063_v57 = vld [vmem:[#allocation2 + $0x230] sm:$0xff]  ;;  %v4440_v56 = vld [vmem:[#allocation2 + $0x1a0] sm:$0xff] }
 0x10b   :  { %9177 = vmatprep.subr.bf16.mxu0 %v9176_v43  ;;  %8232 = vmatprep.mubr.msk.f32.mxu1 %vm14_vm0, %v11040_v34 }
 0x10d   :  { %8742 = vmatmul.mubr.msk.f32.gmra.mrb[6].mxu0 %vm14_vm0, %v10819_v60  ;;  %8233 = vmatmul.mubr.msk.f32.gmra.mrb[40].mxu1 %vm14_vm0, %v11050_v49  ;;  %v11067_v60 = vld [vmem:[#allocation2 + $0x240] sm:$0xff] }
 0x10e   :  { %8744 = vmatprep.mubr.msk.f32.mxu0 %vm14_vm0, %v10825_v5  ;;  %9179 = vmatpush3.bf16.msra.mxu0 %v9176_v43  ;;  %v11075_v5 = vld [vmem:[#allocation2 + $0x248] sm:$0xff] }
 0x10f   :  { %9181 = vmatprep.subr.bf16.mxu0 %v11042_v45  ;;  %8235 = vmatprep.mubr.msk.f32.mxu1 %vm14_vm0, %v11054_v53  ;;  %v6966_v43 = vld [vmem:[%s12172_s1 + $0xd8] sm:$0xff] }
 0x111   :  { %8745 = vmatmul.mubr.msk.f32.gmra.mrb[8].mxu0 %vm14_vm0, %v10835_v10  ;;  %8236 = vmatmul.mubr.msk.f32.gmra.mrb[42].mxu1 %vm14_vm0, %v11063_v57  ;;  %v11079_v10 = vld [vmem:[#allocation2 + $0x258] sm:$0xff] }
 0x112   :  { %8747 = vmatprep.mubr.msk.f32.mxu0 %vm14_vm0, %v10841_v22  ;;  %8238 = vmatprep.mubr.msk.f32.mxu1 %vm14_vm0, %v11067_v60  ;;  %v11087_v22 = vld [vmem:[#allocation2 + $0x260] sm:$0xff] }
 0x115   :  { %8748 = vmatmul.mubr.msk.f32.gmra.mrb[10].mxu0 %vm14_vm0, %v10851_v25  ;;  %8239 = vmatmul.mubr.msk.f32.gmra.mrb[44].mxu1 %vm14_vm0, %v11075_v5  ;;  %v11091_v25 = vld [vmem:[#allocation2 + $0x270] sm:$0xff] }
 0x116   :  { %8750 = vmatprep.mubr.msk.f32.mxu0 %vm14_vm0, %v10857_v40  ;;  %8241 = vmatprep.mubr.msk.f32.mxu1 %vm14_vm0, %v11079_v10  ;;  %v11103_v40 = vld [vmem:[#allocation2 + $0x288] sm:$0xff] }
 0x119   :  { %8751 = vmatmul.mubr.msk.f32.gmra.mrb[12].mxu0 %vm14_vm0, %v10867_v35  ;;  %8242 = vmatmul.mubr.msk.f32.gmra.mrb[46].mxu1 %vm14_vm0, %v11087_v22  ;;  %v11099_v35 = vld [vmem:[#allocation2 + $0x278] sm:$0xff] }
 0x11a   :  { %8753 = vmatprep.mubr.msk.f32.mxu0 %vm14_vm0, %v10873_v13  ;;  %8244 = vmatprep.mubr.msk.f32.mxu1 %vm14_vm0, %v11091_v25  ;;  %v11111_v13 = vld [vmem:[#allocation2 + $0x290] sm:$0xff] }
 0x11d   :  { %8754 = vmatmul.mubr.msk.f32.gmra.mrb[14].mxu0 %vm14_vm0, %v10883_v37  ;;  %8245 = vmatmul.mubr.msk.f32.gmra.mrb[48].mxu1 %vm14_vm0, %v11099_v35  ;;  %v11115_v37 = vld [vmem:[#allocation2 + $0x2a0] sm:$0xff] }
 0x11e   :  { %8756 = vmatprep.mubr.msk.f32.mxu0 %vm14_vm0, %v10889_v12  ;;  %8247 = vmatprep.mubr.msk.f32.mxu1 %vm14_vm0, %v11103_v40  ;;  %v11127_v12 = vld [vmem:[#allocation2 + $0x2b8] sm:$0xff] }
 0x121   :  { %8757 = vmatmul.mubr.msk.f32.gmra.mrb[16].mxu0 %vm14_vm0, %v10899_v19  ;;  %8248 = vmatmul.mubr.msk.f32.gmra.mrb[50].mxu1 %vm14_vm0, %v11111_v13  ;;  %v11123_v19 = vld [vmem:[#allocation2 + $0x2a8] sm:$0xff] }
 0x122   :  { %8759 = vmatprep.mubr.msk.f32.mxu0 %vm14_vm0, %v10905_v1  ;;  %8250 = vmatprep.mubr.msk.f32.mxu1 %vm14_vm0, %v11115_v37  ;;  %v11135_v1 = vld [vmem:[#allocation2 + $0x2c0] sm:$0xff] }
 0x125   :  { %8760 = vmatmul.mubr.msk.f32.gmra.mrb[18].mxu0 %vm14_vm0, %v10915_v42  ;;  %8251 = vmatmul.mubr.msk.f32.gmra.mrb[52].mxu1 %vm14_vm0, %v11123_v19  ;;  %v11139_v42 = vld [vmem:[#allocation2 + $0x2d0] sm:$0xff] }
 0x126   :  { %8762 = vmatprep.mubr.msk.f32.mxu0 %vm14_vm0, %v10921_v55  ;;  %8253 = vmatprep.mubr.msk.f32.mxu1 %vm14_vm0, %v11127_v12  ;;  %v11147_v55 = vld [vmem:[#allocation2 + $0x2d8] sm:$0xff] }
 0x129   :  { %8763 = vmatmul.mubr.msk.f32.gmra.mrb[20].mxu0 %vm14_vm0, %v10931_v24  ;;  %8254 = vmatmul.mubr.msk.f32.gmra.mrb[54].mxu1 %vm14_vm0, %v11135_v1  ;;  %v11151_v24 = vld [vmem:[#allocation2 + $0x2e8] sm:$0xff] }
 0x12a   :  { %8765 = vmatprep.mubr.msk.f32.mxu0 %vm14_vm0, %v10937_v48  ;;  %8256 = vmatprep.mubr.msk.f32.mxu1 %vm14_vm0, %v11139_v42  ;;  %v11159_v48 = vld [vmem:[#allocation2 + $0x2f0] sm:$0xff] }
 0x12d   :  { %8766 = vmatmul.mubr.msk.f32.gmra.mrb[22].mxu0 %vm14_vm0, %v10947_v7  ;;  %8257 = vmatmul.mubr.msk.f32.gmra.mrb[56].mxu1 %vm14_vm0, %v11147_v55  ;;  %v11163_v7 = vld [vmem:[#allocation2 + $0x300] sm:$0xff] }
 0x12e   :  { %8768 = vmatprep.mubr.msk.f32.mxu0 %vm14_vm0, %v10953_v29  ;;  %8259 = vmatprep.mubr.msk.f32.mxu1 %vm14_vm0, %v11151_v24  ;;  %v11173_v29 = vld [vmem:[#allocation2 + $0x308] sm:$0xff] }
 0x131   :  { %8769 = vmatmul.mubr.msk.f32.gmra.mrb[24].mxu0 %vm14_vm0, %v10963_v58  ;;  %8260 = vmatmul.mubr.msk.f32.gmra.mrb[58].mxu1 %vm14_vm0, %v11159_v48  ;;  %v11177_v58 = vld [vmem:[#allocation2 + $0x188] sm:$0xff] }
 0x132   :  { %8771 = vmatprep.mubr.msk.f32.mxu0 %vm14_vm0, %v10969_v15  ;;  %8262 = vmatprep.mubr.msk.f32.mxu1 %vm14_vm0, %v11163_v7  ;;  %12256 = vst [vmem:[#allocation41_spill] sm:$0xff] %v11177_v58  ;;  %v11179_v15 = vld [vmem:[#allocation2 + $0x318] sm:$0xff] }
 0x135   :  { %8772 = vmatmul.mubr.msk.f32.gmra.mrb[26].mxu0 %vm14_vm0, %v10977_v50  ;;  %8263 = vmatmul.mubr.msk.f32.gmra.mrb[60].mxu1 %vm14_vm0, %v11173_v29  ;;  %v11187_v50 = vld [vmem:[#allocation2 + $0x320] sm:$0xff] }
 0x136   :  { %8774 = vmatprep.mubr.msk.f32.mxu0 %vm14_vm0, %v11165_v3  ;;  %8265 = vmatprep.mubr.msk.f32.mxu1 %vm14_vm0, %v11179_v15  ;;  %v6968_v3 = vld [vmem:[%s12172_s1 + $0xe8] sm:$0xff] }
 0x139   :  { %8775 = vmatmul.mubr.msk.f32.gmra.mrb[28].mxu0 %vm14_vm0, %v11177_v58  ;;  %8266 = vmatmul.mubr.msk.f32.gmra.mrb[62].mxu1 %vm14_vm0, %v11187_v50  ;;  %v6967_v58 = vld [vmem:[%s12172_s1 + $0xe0] sm:$0xff] }
 0x13a   :  { %8777 = vmatprep.mubr.msk.f32.mxu0 %vm14_vm0, %v4439_v63  ;;  %8284 = vmatprep.mubr.msk.f32.mxu1 %vm14_vm0, %v1552_v17  ;;  %v9104_v63 = vpack.c.bf16 %v6966_v43, %v6965_v20  ;;  %v6969_v17 = vld [vmem:[%s12172_s1 + $0xf0] sm:$0xff]  ;;  %v12276_v20 = vld [vmem:[#allocation25_spill] sm:$0xff]  ;;  %v12277_v43 = vld [vmem:[#allocation26_spill] sm:$0xff] }
 0x13d   :  { %8778 = vmatmul.mubr.msk.f32.gmra.mrb[30].mxu0 %vm14_vm0, %v4440_v56  ;;  %8285 = vmatmul.mubr.msk.f32.vlgmr.msra.gmra.mrb[0].mxu1 %vm14_vm0, %v1553_v27  ;;  %v1555_v56 = vld [vmem:[#allocation2 + $0x22] sm:$0xff]  ;;  %v5142_v27 = vld [vmem:[#allocation2 + $0x111] sm:$0xff] }
 0x13e   :  { %8780 = vmatprep.mubr.msk.f32.mxu0 %vm14_vm0, %v11005_v30  ;;  %9103 = vmatpush3.bf16.msra.mxu1 %v10794_v51  ;;  %v9108_v30 = vpack.c.bf16 %v6968_v3, %v6967_v58  ;;  %v5139_v3 = vld [vmem:[#allocation2 + $0xf1] sm:$0xff]  ;;  %v12275_v58 = vld [vmem:[#allocation24_spill] sm:$0xff] }
 0x13f   :  { %8287 = vmatprep.mubr.msk.f32.mxu1 %vm14_vm0, %v1554_v32  ;;  %9105 = vmatprep.subr.bf16.mxu1 %v9104_v63  ;;  %v5143_v32 = vld [vmem:[#allocation2 + $0x121] sm:$0xff] }
 0x141   :  { %8781 = vmatmul.mubr.msk.f32.gmra.mrb[32].mxu0 %vm14_vm0, %v11018_v62  ;;  %8288 = vmatmul.mubr.msk.f32.gmra.mrb[2].mxu1 %vm14_vm0, %v1555_v56  ;;  %v6970_v62 = vld [vmem:[%s12172_s1 + $0xf8] sm:$0xff] }
 0x142   :  { %8783 = vmatprep.mubr.msk.f32.mxu0 %vm14_vm0, %v11022_v41  ;;  %8290 = vmatprep.mubr.msk.f32.mxu1 %vm14_vm0, %v10541_v39  ;;  %v9112_v51 = vpack.c.bf16 %v6970_v62, %v6969_v17  ;;  %v11317_v39 = vld [vmem:[#allocation2 + $0x330] sm:$0xff]  ;;  %v7330_v41 = vld [vmem:[%s12172_s1 + $0x238] sm:$0xff]  ;;  %v5145_v17 = vld [vmem:[#allocation2 + $0x139] sm:$0xff] }
 0x143   :  { %9107 = vmatpush3.bf16.msra.mxu1 %v9104_v63  ;;  %v12278_v63 = vld [vmem:[#allocation27_spill] sm:$0xff]  ;;  %v12279_v56 = vld [vmem:[#allocation28_spill] sm:$0xff]  ;;  %v12280_v62 = vld [vmem:[#allocation29_spill] sm:$0xff] }
 0x144   :  { %9109 = vmatprep.subr.bf16.mxu1 %v9108_v30 }
 0x145   :  { %8784 = vmatmul.mubr.msk.f32.gmra.mrb[34].mxu0 %vm14_vm0, %v11036_v47  ;;  %8291 = vmatmul.mubr.msk.f32.gmra.mrb[4].mxu1 %vm14_vm0, %v10555_v44  ;;  %v12257_v44 = vld [vmem:[#allocation6_spill] sm:$0xff]  ;;  %v12263_v47 = vld [vmem:[#allocation12_spill] sm:$0xff] }
 0x146   :  { %8786 = vmatprep.mubr.msk.f32.mxu0 %vm14_vm0, %v11040_v34  ;;  %8293 = vmatprep.mubr.msk.f32.mxu1 %vm14_vm0, %v10557_v46  ;;  %v11327_v46 = vld [vmem:[#allocation2 + $0x338] sm:$0xff]  ;;  %v5128_v34 = vld [vmem:[#allocation2 + $0x69] sm:$0xff] }
 0x147   :  { %9111 = vmatpush3.bf16.msra.mxu1 %v9108_v30  ;;  %v5144_v30 = vld [vmem:[#allocation2 + $0x129] sm:$0xff] }
 0x148   :  { %9113 = vmatprep.subr.bf16.mxu1 %v9112_v51 }
 0x149   :  { %8787 = vmatmul.mubr.msk.f32.gmra.mrb[36].mxu0 %vm14_vm0, %v11050_v49  ;;  %8294 = vmatmul.mubr.msk.f32.gmra.mrb[6].mxu1 %vm14_vm0, %v10577_v52  ;;  %v4471_v52 = vld [vmem:[#allocation2 + $0x348] sm:$0xff] }
 0x14a   :  { %8789 = vmatprep.mubr.msk.f32.mxu0 %vm14_vm0, %v11054_v53  ;;  %8296 = vmatprep.mubr.msk.f32.mxu1 %vm14_vm0, %v10581_v54  ;;  %v12258_v54 = vld [vmem:[#allocation7_spill] sm:$0xff]  ;;  %v12264_v53 = vld [vmem:[#allocation13_spill] sm:$0xff] }
 0x14b   :  { %9115 = vmatpush3.bf16.msra.mxu1 %v9112_v51  ;;  %v12281_v51 = vld [vmem:[#allocation30_spill] sm:$0xff] }
 0x14c   :  { %9196 = vmatprep.subr.bf16.mxu1 %v10109_v8 }
 0x14d   :  { %8790 = vmatmul.mubr.msk.f32.gmra.mrb[38].mxu0 %vm14_vm0, %v11063_v57  ;;  %8297 = vmatmul.mubr.msk.f32.gmra.mrb[8].mxu1 %vm14_vm0, %v10595_v59  ;;  %v12259_v59 = vld [vmem:[#allocation8_spill] sm:$0xff]  ;;  %v12265_v57 = vld [vmem:[#allocation14_spill] sm:$0xff] }
 0x14e   :  { %8792 = vmatprep.mubr.msk.f32.mxu0 %vm14_vm0, %v11067_v60  ;;  %8299 = vmatprep.mubr.msk.f32.mxu1 %vm14_vm0, %v10597_v61  ;;  %v4472_v61 = vld [vmem:[#allocation2 + $0x350] sm:$0xff]  ;;  %v5130_v60 = vld [vmem:[#allocation2 + $0x81] sm:$0xff] }
 0x151   :  { %8793 = vmatmul.mubr.msk.f32.gmra.mrb[40].mxu0 %vm14_vm0, %v11075_v5  ;;  %8300 = vmatmul.mubr.msk.f32.gmra.mrb[10].mxu1 %vm14_vm0, %v10607_v0  ;;  %v1584_v0 = vld [vmem:[#allocation2 + $0x1b2] sm:$0xff] }
 0x152   :  { %8795 = vmatprep.mubr.msk.f32.mxu0 %vm14_vm0, %v11079_v10  ;;  %8302 = vmatprep.mubr.msk.f32.mxu1 %vm14_vm0, %v10609_v2  ;;  %v5123_v2 = vld [vmem:[#allocation2 + $0x31] sm:$0xff]  ;;  %v12266_v10 = vld [vmem:[#allocation15_spill] sm:$0xff] }
 0x153   :  { %v5131_v5 = vld [vmem:[#allocation2 + $0x91] sm:$0xff] }
 0x155   :  { %8796 = vmatmul.mubr.msk.f32.gmra.mrb[42].mxu0 %vm14_vm0, %v11087_v22  ;;  %8303 = vmatmul.mubr.msk.f32.gmra.mrb[12].mxu1 %vm14_vm0, %v10618_v4  ;;  %v12260_v4 = vld [vmem:[#allocation9_spill] sm:$0xff]  ;;  %v12267_v22 = vld [vmem:[#allocation16_spill] sm:$0xff] }
 0x156   :  { %8798 = vmatprep.mubr.msk.f32.mxu0 %vm14_vm0, %v11091_v25  ;;  %8305 = vmatprep.mubr.msk.f32.mxu1 %vm14_vm0, %v10620_v6  ;;  %v7325_v6 = vld [vmem:[%s12172_s1 + $0x210] sm:$0xff] }
 0x157   :  { %v5132_v25 = vld [vmem:[#allocation2 + $0x99] sm:$0xff] }
 0x159   :  { %8799 = vmatmul.mubr.msk.f32.gmra.mrb[44].mxu0 %vm14_vm0, %v11099_v35  ;;  %8306 = vmatmul.mubr.msk.f32.gmra.mrb[14].mxu1 %vm14_vm0, %v10628_v9  ;;  %v7326_v9 = vld [vmem:[%s12172_s1 + $0x218] sm:$0xff] }
 0x15a   :  { %8801 = vmatprep.mubr.msk.f32.mxu0 %vm14_vm0, %v11103_v40  ;;  %8308 = vmatprep.mubr.msk.f32.mxu1 %vm14_vm0, %v10630_v11  ;;  %v1585_v11 = vld [vmem:[#allocation2 + $0x1ba] sm:$0xff]  ;;  %v5133_v35 = vld [vmem:[#allocation2 + $0xa9] sm:$0xff] }
 0x15b   :  { %v12268_v40 = vld [vmem:[#allocation17_spill] sm:$0xff] }
 0x15d   :  { %8802 = vmatmul.mubr.msk.f32.gmra.mrb[46].mxu0 %vm14_vm0, %v11111_v13  ;;  %8309 = vmatmul.mubr.msk.f32.gmra.mrb[16].mxu1 %vm14_vm0, %v10638_v14  ;;  %v5124_v14 = vld [vmem:[#allocation2 + $0x39] sm:$0xff] }
 0x15e   :  { %8804 = vmatprep.mubr.msk.f32.mxu0 %vm14_vm0, %v11115_v37  ;;  %8311 = vmatprep.mubr.msk.f32.mxu1 %vm14_vm0, %v10640_v16  ;;  %v5125_v16 = vld [vmem:[#allocation2 + $0x49] sm:$0xff]  ;;  %v12269_v13 = vld [vmem:[#allocation18_spill] sm:$0xff] }
 0x15f   :  { %v5134_v37 = vld [vmem:[#allocation2 + $0xb1] sm:$0xff] }
 0x161   :  { %8805 = vmatmul.mubr.msk.f32.gmra.mrb[48].mxu0 %vm14_vm0, %v11123_v19  ;;  %8312 = vmatmul.mubr.msk.f32.gmra.mrb[18].mxu1 %vm14_vm0, %v10648_v18  ;;  %v9184_v18 = vpack.c.bf16 %v7326_v9, %v7325_v6  ;;  %v5135_v19 = vld [vmem:[#allocation2 + $0xc1] sm:$0xff]  ;;  %v5150_v6 = vld [vmem:[#allocation2 + $0x171] sm:$0xff] }
 0x162   :  { %8807 = vmatprep.mubr.msk.f32.mxu0 %vm14_vm0, %v11127_v12  ;;  %8314 = vmatprep.mubr.msk.f32.mxu1 %vm14_vm0, %v10650_v21  ;;  %v7327_v21 = vld [vmem:[%s12172_s1 + $0x220] sm:$0xff]  ;;  %v12270_v12 = vld [vmem:[#allocation19_spill] sm:$0xff] }
 0x163   :  { %v5151_v9 = vld [vmem:[#allocation2 + $0x181] sm:$0xff] }
 0x165   :  { %8808 = vmatmul.mubr.msk.f32.gmra.mrb[50].mxu0 %vm14_vm0, %v11135_v1  ;;  %8315 = vmatmul.mubr.msk.f32.gmra.mrb[20].mxu1 %vm14_vm0, %v10658_v23  ;;  %v7328_v23 = vld [vmem:[%s12172_s1 + $0x228] sm:$0xff]  ;;  %v12271_v1 = vld [vmem:[#allocation20_spill] sm:$0xff] }
 0x166   :  { %8810 = vmatprep.mubr.msk.f32.mxu0 %vm14_vm0, %v11139_v42  ;;  %8317 = vmatprep.mubr.msk.f32.mxu1 %vm14_vm0, %v10660_v26  ;;  %v12261_v26 = vld [vmem:[#allocation10_spill] sm:$0xff]  ;;  %v5136_v42 = vld [vmem:[#allocation2 + $0xc9] sm:$0xff] }
 0x169   :  { %8811 = vmatmul.mubr.msk.f32.gmra.mrb[52].mxu0 %vm14_vm0, %v11147_v55  ;;  %8318 = vmatmul.mubr.msk.f32.gmra.mrb[22].mxu1 %vm14_vm0, %v10668_v28  ;;  %v5126_v28 = vld [vmem:[#allocation2 + $0x51] sm:$0xff]  ;;  %v5137_v55 = vld [vmem:[#allocation2 + $0xd9] sm:$0xff] }
 0x16a   :  { %8813 = vmatprep.mubr.msk.f32.mxu0 %vm14_vm0, %v11151_v24  ;;  %8320 = vmatprep.mubr.msk.f32.mxu1 %vm14_vm0, %v10670_v31  ;;  %v5127_v31 = vld [vmem:[#allocation2 + $0x61] sm:$0xff]  ;;  %v12272_v24 = vld [vmem:[#allocation21_spill] sm:$0xff] }
 0x16d   :  { %8814 = vmatmul.mubr.msk.f32.gmra.mrb[54].mxu0 %vm14_vm0, %v11159_v48  ;;  %8321 = vmatmul.mubr.msk.f32.gmra.mrb[24].mxu1 %vm14_vm0, %v10678_v33  ;;  %v9188_v33 = vpack.c.bf16 %v7328_v23, %v7327_v21  ;;  %v12273_v48 = vld [vmem:[#allocation22_spill] sm:$0xff]  ;;  %v12288_v21 = vld [vmem:[#allocation37_spill] sm:$0xff] }
 0x16e   :  { %8816 = vmatprep.mubr.msk.f32.mxu0 %vm14_vm0, %v11163_v7  ;;  %8323 = vmatprep.mubr.msk.f32.mxu1 %vm14_vm0, %v10680_v36  ;;  %v12262_v36 = vld [vmem:[#allocation11_spill] sm:$0xff]  ;;  %v12289_v23 = vld [vmem:[#allocation38_spill] sm:$0xff] }
 0x16f   :  { %v5138_v7 = vld [vmem:[#allocation2 + $0xe1] sm:$0xff] }
 0x171   :  { %8817 = vmatmul.mubr.msk.f32.gmra.mrb[56].mxu0 %vm14_vm0, %v11173_v29  ;;  %8324 = vmatmul.mubr.msk.f32.gmra.mrb[26].mxu1 %vm14_vm0, %v10688_v38  ;;  %v7329_v38 = vld [vmem:[%s12172_s1 + $0x230] sm:$0xff] }
 0x172   :  { %8819 = vmatprep.mubr.msk.f32.mxu0 %vm14_vm0, %v11179_v15  ;;  %8326 = vmatprep.mubr.msk.f32.mxu1 %vm14_vm0, %v12257_v44  ;;  %v9192_v49 = vpack.c.bf16 %v7330_v41, %v7329_v38  ;;  %v12274_v29 = vld [vmem:[#allocation23_spill] sm:$0xff]  ;;  %v11457_v38 = vld [vmem:[#allocation2 + $0x1e9] sm:$0xff] }
 0x173   :  { %v5140_v15 = vld [vmem:[#allocation2 + $0xf9] sm:$0xff]  ;;  %v5146_v44 = vld [vmem:[#allocation2 + $0x141] sm:$0xff]  ;;  %v2268_v41 = vld [vmem:[#allocation2 + $0x30] sm:$0xff] }
 0x175   :  { %8820 = vmatmul.mubr.msk.f32.gmra.mrb[58].mxu0 %vm14_vm0, %v11187_v50  ;;  %8327 = vmatmul.mubr.msk.f32.gmra.mrb[28].mxu1 %vm14_vm0, %v12258_v54  ;;  %v5141_v50 = vld [vmem:[#allocation2 + $0x109] sm:$0xff]  ;;  %v12282_v54 = vld [vmem:[#allocation31_spill] sm:$0xff] }
 0x176   :  { %8822 = vmatprep.mubr.msk.f32.mxu0 %vm14_vm0, %v11317_v39  ;;  %8329 = vmatprep.mubr.msk.f32.mxu1 %vm14_vm0, %v12259_v59  ;;  %v12283_v59 = vld [vmem:[#allocation32_spill] sm:$0xff] }
 0x179   :  { %8823 = vmatmul.mubr.msk.f32.gmra.mrb[60].mxu0 %vm14_vm0, %v11327_v46  ;;  %8330 = vmatmul.mubr.msk.f32.gmra.mrb[30].mxu1 %vm14_vm0, %v12260_v4  ;;  %v12285_v4 = vld [vmem:[#allocation34_spill] sm:$0xff] }
 0x17a   :  { %8825 = vmatprep.mubr.msk.f32.mxu0 %vm14_vm0, %v4471_v52  ;;  %8332 = vmatprep.mubr.msk.f32.mxu1 %vm14_vm0, %v1584_v0  ;;  %v5147_v52 = vld [vmem:[#allocation2 + $0x151] sm:$0xff]  ;;  %v5149_v0 = vld [vmem:[#allocation2 + $0x169] sm:$0xff] }
 0x17d   :  { %8826 = vmatmul.mubr.msk.f32.gmra.mrb[62].mxu0 %vm14_vm0, %v4472_v61  ;;  %8333 = vmatmul.mubr.msk.f32.gmra.mrb[32].mxu1 %vm14_vm0, %v1585_v11  ;;  %v5148_v61 = vld [vmem:[#allocation2 + $0x159] sm:$0xff] }
 0x17e   :  { %8844 = vmatprep.mubr.msk.f32.mxu0 %vm14_vm0, %v5123_v2  ;;  %8335 = vmatprep.mubr.msk.f32.mxu1 %vm14_vm0, %v12261_v26  ;;  %v12284_v2 = vld [vmem:[#allocation33_spill] sm:$0xff]  ;;  %v12286_v11 = vld [vmem:[#allocation35_spill] sm:$0xff] }
 0x17f   :  { %v5154_v26 = vld [vmem:[#allocation2 + $0x1a1] sm:$0xff] }
 0x181   :  { %8845 = vmatmul.mubr.msk.f32.vlgmr.msra.gmra.mrb[0].mxu0 %vm14_vm0, %v5124_v14  ;;  %8336 = vmatmul.mubr.msk.f32.gmra.mrb[34].mxu1 %vm14_vm0, %v12262_v36  ;;  %v12287_v14 = vld [vmem:[#allocation36_spill] sm:$0xff]  ;;  %v2267_v36 = vld [vmem:[#allocation2 + $0x20] sm:$0xff] }
 0x182   :  { %9183 = vmatpush3.bf16.msra.mxu0 %v11042_v45  ;;  %8847 = vmatprep.mubr.msk.f32.mxu0 %vm14_vm0, %v5125_v16  ;;  %v5129_v45 = vld [vmem:[#allocation2 + $0x79] sm:$0xff]  ;;  %v5152_v16 = vld [vmem:[#allocation2 + $0x189] sm:$0xff] }
 0x183   :  { %9185 = vmatprep.subr.bf16.mxu0 %v9184_v18  ;;  %8338 = vmatprep.mubr.msk.f32.mxu1 %vm14_vm0, %v12263_v47  ;;  %v11459_v47 = vld [vmem:[#allocation2 + $0x1f9] sm:$0xff] }
 0x185   :  { %8848 = vmatmul.mubr.msk.f32.gmra.mrb[2].mxu0 %vm14_vm0, %v5126_v28  ;;  %8339 = vmatmul.mubr.msk.f32.gmra.mrb[36].mxu1 %vm14_vm0, %v12264_v53  ;;  %v2266_v28 = vld [vmem:[#allocation2 + $0x18] sm:$0xff] }
 0x186   :  { %8850 = vmatprep.mubr.msk.f32.mxu0 %vm14_vm0, %v5127_v31  ;;  %9187 = vmatpush3.bf16.msra.mxu0 %v9184_v18  ;;  %v5153_v18 = vld [vmem:[#allocation2 + $0x199] sm:$0xff]  ;;  %v11449_v31 = vld [vmem:[#allocation2 + $0x1e1] sm:$0xff]  ;;  %v11470_v53 = vld [vmem:[#allocation2 + $0x211] sm:$0xff] }
 0x187   :  { %9189 = vmatprep.subr.bf16.mxu0 %v9188_v33  ;;  %8341 = vmatprep.mubr.msk.f32.mxu1 %vm14_vm0, %v12265_v57  ;;  %v12291_v57 = vld [vmem:[#allocation3_spill] sm:$0xff] }
 0x189   :  { %8851 = vmatmul.mubr.msk.f32.gmra.mrb[4].mxu0 %vm14_vm0, %v5128_v34  ;;  %8342 = vmatmul.mubr.msk.f32.gmra.mrb[38].mxu1 %vm14_vm0, %v12266_v10  ;;  %v2269_v34 = vld [vmem:[#allocation2 + $0x38] sm:$0xff]  ;;  %v11482_v10 = vld [vmem:[#allocation2 + $0x229] sm:$0xff] }
 0x18a   :  { %8853 = vmatprep.mubr.msk.f32.mxu0 %vm14_vm0, %v5129_v45  ;;  %9191 = vmatpush3.bf16.msra.mxu0 %v9188_v33  ;;  %v12290_v33 = vld [vmem:[#allocation39_spill] sm:$0xff] }
 0x18b   :  { %9193 = vmatprep.subr.bf16.mxu0 %v9192_v49  ;;  %8344 = vmatprep.mubr.msk.f32.mxu1 %vm14_vm0, %v12267_v22  ;;  %v11468_v45 = vld [vmem:[#allocation2 + $0x201] sm:$0xff] }
 0x18c   :  { %v12292_v22 = vld [vmem:[#allocation4_spill] sm:$0xff] }
 0x18d   :  { %8854 = vmatmul.mubr.msk.f32.gmra.mrb[6].mxu0 %vm14_vm0, %v5130_v60  ;;  %8345 = vmatmul.mubr.msk.f32.gmra.mrb[40].mxu1 %vm14_vm0, %v12268_v40  ;;  %v11479_v60 = vld [vmem:[#allocation2 + $0x219] sm:$0xff] }
 0x18e   :  { %8856 = vmatprep.mubr.msk.f32.mxu0 %vm14_vm0, %v5131_v5  ;;  %9195 = vmatpush3.bf16.msra.mxu0 %v9192_v49  ;;  %v2270_v49 = vld [vmem:[#allocation2 + $0x48] sm:$0xff]  ;;  %v2272_v5 = vld [vmem:[#allocation2 + $0x60] sm:$0xff]  ;;  %v2274_v40 = vld [vmem:[#allocation2 + $0x78] sm:$0xff] }
 0x18f   :  { %8347 = vmatprep.mubr.msk.f32.mxu1 %vm14_vm0, %v12269_v13  ;;  %v11494_v13 = vld [vmem:[#allocation2 + $0x241] sm:$0xff] }
 0x191   :  { %8857 = vmatmul.mubr.msk.f32.gmra.mrb[8].mxu0 %vm14_vm0, %v5132_v25  ;;  %8348 = vmatmul.mubr.msk.f32.gmra.mrb[42].mxu1 %vm14_vm0, %v12270_v12  ;;  %v2273_v25 = vld [vmem:[#allocation2 + $0x68] sm:$0xff] }
 0x192   :  { %8859 = vmatprep.mubr.msk.f32.mxu0 %vm14_vm0, %v5133_v35  ;;  %8350 = vmatprep.mubr.msk.f32.mxu1 %vm14_vm0, %v12271_v1  ;;  %v11491_v35 = vld [vmem:[#allocation2 + $0x231] sm:$0xff]  ;;  %v11503_v12 = vld [vmem:[#allocation2 + $0x249] sm:$0xff] }
 0x193   :  { %v2276_v1 = vld [vmem:[#allocation2 + $0x90] sm:$0xff] }
 0x195   :  { %8860 = vmatmul.mubr.msk.f32.gmra.mrb[10].mxu0 %vm14_vm0, %v5134_v37  ;;  %8351 = vmatmul.mubr.msk.f32.gmra.mrb[44].mxu1 %vm14_vm0, %v12272_v24  ;;  %v12293_v37 = vld [vmem:[#allocation5_spill] sm:$0xff]  ;;  %v11514_v24 = vld [vmem:[#allocation2 + $0x261] sm:$0xff] }
 0x196   :  { %8862 = vmatprep.mubr.msk.f32.mxu0 %vm14_vm0, %v5135_v19  ;;  %8353 = vmatprep.mubr.msk.f32.mxu1 %vm14_vm0, %v12273_v48  ;;  %v2275_v19 = vld [vmem:[#allocation2 + $0x80] sm:$0xff]  ;;  %v2278_v48 = vld [vmem:[#allocation2 + $0xa8] sm:$0xff] }
 0x199   :  { %8863 = vmatmul.mubr.msk.f32.gmra.mrb[12].mxu0 %vm14_vm0, %v5136_v42  ;;  %8354 = vmatmul.mubr.msk.f32.gmra.mrb[46].mxu1 %vm14_vm0, %v12274_v29  ;;  %v11506_v42 = vld [vmem:[#allocation2 + $0x259] sm:$0xff] }
 0x19a   :  { %8865 = vmatprep.mubr.msk.f32.mxu0 %vm14_vm0, %v5137_v55  ;;  %8356 = vmatprep.mubr.msk.f32.mxu1 %vm14_vm0, %v12275_v58  ;;  %v2277_v55 = vld [vmem:[#allocation2 + $0x98] sm:$0xff]  ;;  %v2280_v58 = vld [vmem:[#allocation2 + $0xc0] sm:$0xff] }
 0x19b   :  { %v11524_v29 = vld [vmem:[#allocation2 + $0x279] sm:$0xff] }
 0x19d   :  { %8866 = vmatmul.mubr.msk.f32.gmra.mrb[14].mxu0 %vm14_vm0, %v5138_v7  ;;  %8357 = vmatmul.mubr.msk.f32.gmra.mrb[48].mxu1 %vm14_vm0, %v12276_v20  ;;  %v11516_v7 = vld [vmem:[#allocation2 + $0x271] sm:$0xff] }
 0x19e   :  { %8868 = vmatprep.mubr.msk.f32.mxu0 %vm14_vm0, %v5139_v3  ;;  %8359 = vmatprep.mubr.msk.f32.mxu1 %vm14_vm0, %v12277_v43  ;;  %v2279_v3 = vld [vmem:[#allocation2 + $0xb0] sm:$0xff]  ;;  %v2282_v43 = vld [vmem:[#allocation2 + $0xd8] sm:$0xff] }
 0x19f   :  { %v11534_v20 = vld [vmem:[#allocation2 + $0x291] sm:$0xff] }
 0x1a1   :  { %8869 = vmatmul.mubr.msk.f32.gmra.mrb[16].mxu0 %vm14_vm0, %v5140_v15  ;;  %8360 = vmatmul.mubr.msk.f32.gmra.mrb[50].mxu1 %vm14_vm0, %v12278_v63  ;;  %v11526_v15 = vld [vmem:[#allocation2 + $0x289] sm:$0xff] }
 0x1a2   :  { %8871 = vmatprep.mubr.msk.f32.mxu0 %vm14_vm0, %v5141_v50  ;;  %8362 = vmatprep.mubr.msk.f32.mxu1 %vm14_vm0, %v12279_v56  ;;  %v2281_v50 = vld [vmem:[#allocation2 + $0xc8] sm:$0xff]  ;;  %v2284_v56 = vld [vmem:[#allocation2 + $0xf0] sm:$0xff] }
 0x1a3   :  { %v11544_v63 = vld [vmem:[#allocation2 + $0x2a9] sm:$0xff] }
 0x1a5   :  { %8872 = vmatmul.mubr.msk.f32.gmra.mrb[18].mxu0 %vm14_vm0, %v5142_v27  ;;  %8363 = vmatmul.mubr.msk.f32.gmra.mrb[52].mxu1 %vm14_vm0, %v12280_v62  ;;  %v11536_v27 = vld [vmem:[#allocation2 + $0x2a1] sm:$0xff] }
 0x1a6   :  { %8874 = vmatprep.mubr.msk.f32.mxu0 %vm14_vm0, %v5143_v32  ;;  %8365 = vmatprep.mubr.msk.f32.mxu1 %vm14_vm0, %v12281_v51  ;;  %v2283_v32 = vld [vmem:[#allocation2 + $0xe0] sm:$0xff]  ;;  %v2286_v51 = vld [vmem:[#allocation2 + $0x108] sm:$0xff] }
 0x1a7   :  { %v11554_v62 = vld [vmem:[#allocation2 + $0x2c1] sm:$0xff] }
 0x1a9   :  { %8875 = vmatmul.mubr.msk.f32.gmra.mrb[20].mxu0 %vm14_vm0, %v5144_v30  ;;  %8366 = vmatmul.mubr.msk.f32.gmra.mrb[54].mxu1 %vm14_vm0, %v12282_v54  ;;  %v11546_v30 = vld [vmem:[#allocation2 + $0x2b9] sm:$0xff] }
 0x1aa   :  { %8877 = vmatprep.mubr.msk.f32.mxu0 %vm14_vm0, %v5145_v17  ;;  %8368 = vmatprep.mubr.msk.f32.mxu1 %vm14_vm0, %v12283_v59  ;;  %v2285_v17 = vld [vmem:[#allocation2 + $0xf8] sm:$0xff]  ;;  %v2288_v59 = vld [vmem:[#allocation2 + $0x120] sm:$0xff] }
 0x1ab   :  { %v11564_v54 = vld [vmem:[#allocation2 + $0x2d9] sm:$0xff] }
 0x1ad   :  { %8878 = vmatmul.mubr.msk.f32.gmra.mrb[22].mxu0 %vm14_vm0, %v5146_v44  ;;  %8369 = vmatmul.mubr.msk.f32.gmra.mrb[56].mxu1 %vm14_vm0, %v12284_v2  ;;  %v11556_v44 = vld [vmem:[#allocation2 + $0x2d1] sm:$0xff] }
 0x1ae   :  { %8880 = vmatprep.mubr.msk.f32.mxu0 %vm14_vm0, %v5147_v52  ;;  %8371 = vmatprep.mubr.msk.f32.mxu1 %vm14_vm0, %v12285_v4  ;;  %v2287_v52 = vld [vmem:[#allocation2 + $0x110] sm:$0xff]  ;;  %v2290_v4 = vld [vmem:[#allocation2 + $0x138] sm:$0xff] }
 0x1af   :  { %v11574_v2 = vld [vmem:[#allocation2 + $0x2f1] sm:$0xff] }
 0x1b1   :  { %8881 = vmatmul.mubr.msk.f32.gmra.mrb[24].mxu0 %vm14_vm0, %v5148_v61  ;;  %8372 = vmatmul.mubr.msk.f32.gmra.mrb[58].mxu1 %vm14_vm0, %v12286_v11  ;;  %v11566_v61 = vld [vmem:[#allocation2 + $0x2e9] sm:$0xff] }
 0x1b2   :  { %8883 = vmatprep.mubr.msk.f32.mxu0 %vm14_vm0, %v5149_v0  ;;  %8374 = vmatprep.mubr.msk.f32.mxu1 %vm14_vm0, %v12287_v14  ;;  %v2289_v0 = vld [vmem:[#allocation2 + $0x128] sm:$0xff]  ;;  %v2292_v14 = vld [vmem:[#allocation2 + $0x150] sm:$0xff] }
 0x1b3   :  { %v11584_v11 = vld [vmem:[#allocation2 + $0x309] sm:$0xff] }
 0x1b5   :  { %8884 = vmatmul.mubr.msk.f32.gmra.mrb[26].mxu0 %vm14_vm0, %v5150_v6  ;;  %8375 = vmatmul.mubr.msk.f32.gmra.mrb[60].mxu1 %vm14_vm0, %v12288_v21  ;;  %v11576_v6 = vld [vmem:[#allocation2 + $0x301] sm:$0xff] }
 0x1b6   :  { %8886 = vmatprep.mubr.msk.f32.mxu0 %vm14_vm0, %v5151_v9  ;;  %8377 = vmatprep.mubr.msk.f32.mxu1 %vm14_vm0, %v12289_v23  ;;  %v2291_v9 = vld [vmem:[#allocation2 + $0x140] sm:$0xff]  ;;  %v2294_v23 = vld [vmem:[#allocation2 + $0x168] sm:$0xff] }
 0x1b7   :  { %v11594_v21 = vld [vmem:[#allocation2 + $0x321] sm:$0xff] }
 0x1b9   :  { %8887 = vmatmul.mubr.msk.f32.gmra.mrb[28].mxu0 %vm14_vm0, %v5152_v16  ;;  %8378 = vmatmul.mubr.msk.f32.gmra.mrb[62].mxu1 %vm14_vm0, %v12290_v33  ;;  %v11586_v16 = vld [vmem:[#allocation2 + $0x319] sm:$0xff] }
 0x1ba   :  { %8889 = vmatprep.mubr.msk.f32.mxu0 %vm14_vm0, %v5153_v18  ;;  %8396 = vmatprep.mubr.msk.f32.mxu1 %vm14_vm0, %v2266_v28  ;;  %v2293_v18 = vld [vmem:[#allocation2 + $0x158] sm:$0xff]  ;;  %v2295_v28 = vld [vmem:[#allocation2 + $0x170] sm:$0xff] }
 0x1bb   :  { %v11604_v33 = vld [vmem:[#allocation2 + $0x339] sm:$0xff] }
 0x1bd   :  { %8890 = vmatmul.mubr.msk.f32.gmra.mrb[30].mxu0 %vm14_vm0, %v5154_v26  ;;  %8397 = vmatmul.mubr.msk.f32.vlgmr.msra.gmra.mrb[0].mxu1 %vm14_vm0, %v2267_v36  ;;  %v11596_v26 = vld [vmem:[#allocation2 + $0x331] sm:$0xff]  ;;  %v5185_v36 = vld [vmem:[#allocation2 + $0x349] sm:$0xff] }
 0x1be   :  { %8892 = vmatprep.mubr.msk.f32.mxu0 %vm14_vm0, %v11449_v31  ;;  %9200 = vmatpush3.bf16.msra.mxu1 %v10109_v8  ;;  %v2271_v8 = vld [vmem:[#allocation2 + $0x50] sm:$0xff] }
 0x1bf   :  { %8399 = vmatprep.mubr.msk.f32.mxu1 %vm14_vm0, %v2268_v41  ;;  %9197 = vmatprep.subr.bf16.mxu1 %v12291_v57  ;;  %v12294_v41 = vld [vmem:[#allocation40_spill] sm:$0xff] }
 0x1c1   :  { %8893 = vmatmul.mubr.msk.f32.gmra.mrb[32].mxu0 %vm14_vm0, %v11457_v38  ;;  %8400 = vmatmul.mubr.msk.f32.gmra.mrb[2].mxu1 %vm14_vm0, %v2269_v34  ;;  %v5186_v34 = vld [vmem:[#allocation2 + $0x351] sm:$0xff] }
 0x1c2   :  { %8895 = vmatprep.mubr.msk.f32.mxu0 %vm14_vm0, %v11459_v47  ;;  %8402 = vmatprep.mubr.msk.f32.mxu1 %vm14_vm0, %v2270_v49  ;;  %v2298_v49 = vld [vmem:[#allocation2 + $0x1c8] sm:$0xff] }
 0x1c3   :  { %9201 = vmatpush3.bf16.msra.mxu1 %v12291_v57  ;;  %v5837_v57 = vld [vmem:[#allocation2 + $0x32] sm:$0xff] }
 0x1c4   :  { %9198 = vmatprep.subr.bf16.mxu1 %v12292_v22 }
 0x1c5   :  { %8896 = vmatmul.mubr.msk.f32.gmra.mrb[34].mxu0 %vm14_vm0, %v11468_v45  ;;  %8403 = vmatmul.mubr.msk.f32.gmra.mrb[4].mxu1 %vm14_vm0, %v2271_v8  ;;  %v12295_v8 = vld [vmem:[#allocation41_spill] sm:$0xff] }
 0x1c6   :  { %8898 = vmatprep.mubr.msk.f32.mxu0 %vm14_vm0, %v11470_v53  ;;  %8405 = vmatprep.mubr.msk.f32.mxu1 %vm14_vm0, %v2272_v5  ;;  %v2299_v5 = vld [vmem:[#allocation2 + $0x1d0] sm:$0xff] }
 0x1c7   :  { %9202 = vmatpush3.bf16.msra.mxu1 %v12292_v22  ;;  %v5838_v22 = vld [vmem:[#allocation2 + $0x3a] sm:$0xff] }
 0x1c8   :  { %9199 = vmatprep.subr.bf16.mxu1 %v12293_v37 }
 0x1c9   :  { %8899 = vmatmul.mubr.msk.f32.gmra.mrb[36].mxu0 %vm14_vm0, %v11479_v60  ;;  %8406 = vmatmul.mubr.msk.f32.gmra.mrb[6].mxu1 %vm14_vm0, %v2273_v25  ;;  %v2300_v25 = vld [vmem:[#allocation2 + $0x1e0] sm:$0xff] }
 0x1ca   :  { %8901 = vmatprep.mubr.msk.f32.mxu0 %vm14_vm0, %v11482_v10  ;;  %8408 = vmatprep.mubr.msk.f32.mxu1 %vm14_vm0, %v2274_v40  ;;  %v5839_v40 = vld [vmem:[#allocation2 + $0x4a] sm:$0xff] }
 0x1cb   :  { %9203 = vmatpush3.bf16.msra.mxu1 %v12293_v37  ;;  %v2301_v37 = vld [vmem:[#allocation2 + $0x1e8] sm:$0xff] }
 0x1cd   :  { %8902 = vmatmul.mubr.msk.f32.gmra.mrb[38].mxu0 %vm14_vm0, %v11491_v35  ;;  %8409 = vmatmul.mubr.msk.f32.gmra.mrb[8].mxu1 %vm14_vm0, %v2275_v19  ;;  %v5840_v19 = vld [vmem:[#allocation2 + $0x52] sm:$0xff] }
 0x1ce   :  { %8904 = vmatprep.mubr.msk.f32.mxu0 %vm14_vm0, %v11494_v13  ;;  %8411 = vmatprep.mubr.msk.f32.mxu1 %vm14_vm0, %v2276_v1  ;;  %v2302_v1 = vld [vmem:[#allocation2 + $0x1f8] sm:$0xff] }
 0x1d1   :  { %8905 = vmatmul.mubr.msk.f32.gmra.mrb[40].mxu0 %vm14_vm0, %v11503_v12  ;;  %8412 = vmatmul.mubr.msk.f32.gmra.mrb[10].mxu1 %vm14_vm0, %v2277_v55  ;;  %v5841_v55 = vld [vmem:[#allocation2 + $0x62] sm:$0xff] }
 0x1d2   :  { %8907 = vmatprep.mubr.msk.f32.mxu0 %vm14_vm0, %v11506_v42  ;;  %8414 = vmatprep.mubr.msk.f32.mxu1 %vm14_vm0, %v2278_v48  ;;  %v2303_v48 = vld [vmem:[#allocation2 + $0x200] sm:$0xff] }
 0x1d5   :  { %8908 = vmatmul.mubr.msk.f32.gmra.mrb[42].mxu0 %vm14_vm0, %v11514_v24  ;;  %8415 = vmatmul.mubr.msk.f32.gmra.mrb[12].mxu1 %vm14_vm0, %v2279_v3  ;;  %v5842_v3 = vld [vmem:[#allocation2 + $0x6a] sm:$0xff] }
 0x1d6   :  { %8910 = vmatprep.mubr.msk.f32.mxu0 %vm14_vm0, %v11516_v7  ;;  %8417 = vmatprep.mubr.msk.f32.mxu1 %vm14_vm0, %v2280_v58  ;;  %v2304_v58 = vld [vmem:[#allocation2 + $0x210] sm:$0xff] }
 0x1d9   :  { %8911 = vmatmul.mubr.msk.f32.gmra.mrb[44].mxu0 %vm14_vm0, %v11524_v29  ;;  %8418 = vmatmul.mubr.msk.f32.gmra.mrb[14].mxu1 %vm14_vm0, %v2281_v50  ;;  %v5843_v50 = vld [vmem:[#allocation2 + $0x7a] sm:$0xff] }
 0x1da   :  { %8913 = vmatprep.mubr.msk.f32.mxu0 %vm14_vm0, %v11526_v15  ;;  %8420 = vmatprep.mubr.msk.f32.mxu1 %vm14_vm0, %v2282_v43  ;;  %v2305_v43 = vld [vmem:[#allocation2 + $0x218] sm:$0xff] }
 0x1dd   :  { %8914 = vmatmul.mubr.msk.f32.gmra.mrb[46].mxu0 %vm14_vm0, %v11534_v20  ;;  %8421 = vmatmul.mubr.msk.f32.gmra.mrb[16].mxu1 %vm14_vm0, %v2283_v32  ;;  %v5844_v32 = vld [vmem:[#allocation2 + $0x82] sm:$0xff] }
 0x1de   :  { %8916 = vmatprep.mubr.msk.f32.mxu0 %vm14_vm0, %v11536_v27  ;;  %8423 = vmatprep.mubr.msk.f32.mxu1 %vm14_vm0, %v2284_v56  ;;  %v2306_v56 = vld [vmem:[#allocation2 + $0x228] sm:$0xff] }
 0x1e1   :  { %8917 = vmatmul.mubr.msk.f32.gmra.mrb[48].mxu0 %vm14_vm0, %v11544_v63  ;;  %8424 = vmatmul.mubr.msk.f32.gmra.mrb[18].mxu1 %vm14_vm0, %v2285_v17  ;;  %v5845_v17 = vld [vmem:[#allocation2 + $0x92] sm:$0xff] }
 0x1e2   :  { %8919 = vmatprep.mubr.msk.f32.mxu0 %vm14_vm0, %v11546_v30  ;;  %8426 = vmatprep.mubr.msk.f32.mxu1 %vm14_vm0, %v2286_v51  ;;  %v2307_v51 = vld [vmem:[#allocation2 + $0x230] sm:$0xff] }
 0x1e5   :  { %8920 = vmatmul.mubr.msk.f32.gmra.mrb[50].mxu0 %vm14_vm0, %v11554_v62  ;;  %8427 = vmatmul.mubr.msk.f32.gmra.mrb[20].mxu1 %vm14_vm0, %v2287_v52  ;;  %v5846_v52 = vld [vmem:[#allocation2 + $0x9a] sm:$0xff] }
 0x1e6   :  { %8922 = vmatprep.mubr.msk.f32.mxu0 %vm14_vm0, %v11556_v44  ;;  %8429 = vmatprep.mubr.msk.f32.mxu1 %vm14_vm0, %v2288_v59  ;;  %v2308_v59 = vld [vmem:[#allocation2 + $0x240] sm:$0xff] }
 0x1e9   :  { %8923 = vmatmul.mubr.msk.f32.gmra.mrb[52].mxu0 %vm14_vm0, %v11564_v54  ;;  %8430 = vmatmul.mubr.msk.f32.gmra.mrb[22].mxu1 %vm14_vm0, %v2289_v0  ;;  %v5847_v0 = vld [vmem:[#allocation2 + $0xaa] sm:$0xff] }
 0x1ea   :  { %8925 = vmatprep.mubr.msk.f32.mxu0 %vm14_vm0, %v11566_v61  ;;  %8432 = vmatprep.mubr.msk.f32.mxu1 %vm14_vm0, %v2290_v4  ;;  %v2309_v4 = vld [vmem:[#allocation2 + $0x248] sm:$0xff] }
 0x1ed   :  { %8926 = vmatmul.mubr.msk.f32.gmra.mrb[54].mxu0 %vm14_vm0, %v11574_v2  ;;  %8433 = vmatmul.mubr.msk.f32.gmra.mrb[24].mxu1 %vm14_vm0, %v2291_v9  ;;  %v5848_v9 = vld [vmem:[#allocation2 + $0xb2] sm:$0xff] }
 0x1ee   :  { %8928 = vmatprep.mubr.msk.f32.mxu0 %vm14_vm0, %v11576_v6  ;;  %8435 = vmatprep.mubr.msk.f32.mxu1 %vm14_vm0, %v2292_v14  ;;  %v2310_v14 = vld [vmem:[#allocation2 + $0x258] sm:$0xff] }
 0x1f1   :  { %8929 = vmatmul.mubr.msk.f32.gmra.mrb[56].mxu0 %vm14_vm0, %v11584_v11  ;;  %8436 = vmatmul.mubr.msk.f32.gmra.mrb[26].mxu1 %vm14_vm0, %v2293_v18  ;;  %v5849_v18 = vld [vmem:[#allocation2 + $0xc2] sm:$0xff] }
 0x1f2   :  { %8931 = vmatprep.mubr.msk.f32.mxu0 %vm14_vm0, %v11586_v16  ;;  %8438 = vmatprep.mubr.msk.f32.mxu1 %vm14_vm0, %v2294_v23  ;;  %v2311_v23 = vld [vmem:[#allocation2 + $0x260] sm:$0xff] }
 0x1f5   :  { %8932 = vmatmul.mubr.msk.f32.gmra.mrb[58].mxu0 %vm14_vm0, %v11594_v21  ;;  %8439 = vmatmul.mubr.msk.f32.gmra.mrb[28].mxu1 %vm14_vm0, %v2295_v28  ;;  %v5850_v28 = vld [vmem:[#allocation2 + $0xca] sm:$0xff] }
 0x1f6   :  { %8934 = vmatprep.mubr.msk.f32.mxu0 %vm14_vm0, %v11596_v26  ;;  %8441 = vmatprep.mubr.msk.f32.mxu1 %vm14_vm0, %v12294_v41  ;;  %v5851_v41 = vld [vmem:[#allocation2 + $0xda] sm:$0xff] }
 0x1f9   :  { %8935 = vmatmul.mubr.msk.f32.gmra.mrb[60].mxu0 %vm14_vm0, %v11604_v33  ;;  %8442 = vmatmul.mubr.msk.f32.gmra.mrb[30].mxu1 %vm14_vm0, %v12295_v8  ;;  %v5853_v8 = vld [vmem:[#allocation2 + $0xf2] sm:$0xff] }
 0x1fa   :  { %8937 = vmatprep.mubr.msk.f32.mxu0 %vm14_vm0, %v5185_v36  ;;  %8444 = vmatprep.mubr.msk.f32.mxu1 %vm14_vm0, %v2298_v49  ;;  %v2312_v36 = vld [vmem:[#allocation2 + $0x270] sm:$0xff]  ;;  %v5852_v49 = vld [vmem:[#allocation2 + $0xe2] sm:$0xff] }
 0x1fd   :  { %8938 = vmatmul.mubr.msk.f32.gmra.mrb[62].mxu0 %vm14_vm0, %v5186_v34  ;;  %8445 = vmatmul.mubr.msk.f32.gmra.mrb[32].mxu1 %vm14_vm0, %v2299_v5  ;;  %v2313_v34 = vld [vmem:[#allocation2 + $0x278] sm:$0xff]  ;;  %v2315_v5 = vld [vmem:[#allocation2 + $0x290] sm:$0xff] }
 0x1fe   :  { %8956 = vmatprep.mubr.msk.f32.mxu0 %vm14_vm0, %v5837_v57  ;;  %8447 = vmatprep.mubr.msk.f32.mxu1 %vm14_vm0, %v2300_v25  ;;  %v2314_v57 = vld [vmem:[#allocation2 + $0x288] sm:$0xff]  ;;  %v2316_v25 = vld [vmem:[#allocation2 + $0x2a0] sm:$0xff] }
 0x201   :  { %8957 = vmatmul.mubr.msk.f32.vlgmr.msra.gmra.mrb[0].mxu0 %vm14_vm0, %v5838_v22  ;;  %8448 = vmatmul.mubr.msk.f32.gmra.mrb[34].mxu1 %vm14_vm0, %v2301_v37  ;;  %v5854_v22 = vld [vmem:[#allocation2 + $0xfa] sm:$0xff]  ;;  %v2317_v37 = vld [vmem:[#allocation2 + $0x2a8] sm:$0xff] }
 0x202   :  { %8959 = vmatprep.mubr.msk.f32.mxu0 %vm14_vm0, %v5839_v40  ;;  %8450 = vmatprep.mubr.msk.f32.mxu1 %vm14_vm0, %v2302_v1  ;;  %v5855_v40 = vld [vmem:[#allocation2 + $0x10a] sm:$0xff]  ;;  %v2318_v1 = vld [vmem:[#allocation2 + $0x2b8] sm:$0xff] }
 0x205   :  { %8960 = vmatmul.mubr.msk.f32.gmra.mrb[2].mxu0 %vm14_vm0, %v5840_v19  ;;  %8451 = vmatmul.mubr.msk.f32.gmra.mrb[36].mxu1 %vm14_vm0, %v2303_v48  ;;  %v5856_v19 = vld [vmem:[#allocation2 + $0x112] sm:$0xff]  ;;  %v2319_v48 = vld [vmem:[#allocation2 + $0x2c0] sm:$0xff] }
 0x206   :  { %8962 = vmatprep.mubr.msk.f32.mxu0 %vm14_vm0, %v5841_v55  ;;  %8453 = vmatprep.mubr.msk.f32.mxu1 %vm14_vm0, %v2304_v58  ;;  %v5857_v55 = vld [vmem:[#allocation2 + $0x122] sm:$0xff]  ;;  %v2320_v58 = vld [vmem:[#allocation2 + $0x2d0] sm:$0xff] }
 0x209   :  { %8963 = vmatmul.mubr.msk.f32.gmra.mrb[4].mxu0 %vm14_vm0, %v5842_v3  ;;  %8454 = vmatmul.mubr.msk.f32.gmra.mrb[38].mxu1 %vm14_vm0, %v2305_v43  ;;  %v5858_v3 = vld [vmem:[#allocation2 + $0x12a] sm:$0xff]  ;;  %v2321_v43 = vld [vmem:[#allocation2 + $0x2d8] sm:$0xff] }
 0x20a   :  { %8965 = vmatprep.mubr.msk.f32.mxu0 %vm14_vm0, %v5843_v50  ;;  %8456 = vmatprep.mubr.msk.f32.mxu1 %vm14_vm0, %v2306_v56  ;;  %v5859_v50 = vld [vmem:[#allocation2 + $0x13a] sm:$0xff]  ;;  %v2322_v56 = vld [vmem:[#allocation2 + $0x2e8] sm:$0xff] }
 0x20d   :  { %8966 = vmatmul.mubr.msk.f32.gmra.mrb[6].mxu0 %vm14_vm0, %v5844_v32  ;;  %8457 = vmatmul.mubr.msk.f32.gmra.mrb[40].mxu1 %vm14_vm0, %v2307_v51  ;;  %v5860_v32 = vld [vmem:[#allocation2 + $0x142] sm:$0xff]  ;;  %v2323_v51 = vld [vmem:[#allocation2 + $0x2f0] sm:$0xff] }
 0x20e   :  { %8968 = vmatprep.mubr.msk.f32.mxu0 %vm14_vm0, %v5845_v17  ;;  %8459 = vmatprep.mubr.msk.f32.mxu1 %vm14_vm0, %v2308_v59  ;;  %v5861_v17 = vld [vmem:[#allocation2 + $0x152] sm:$0xff]  ;;  %v2324_v59 = vld [vmem:[#allocation2 + $0x300] sm:$0xff] }
 0x211   :  { %8969 = vmatmul.mubr.msk.f32.gmra.mrb[8].mxu0 %vm14_vm0, %v5846_v52  ;;  %8460 = vmatmul.mubr.msk.f32.gmra.mrb[42].mxu1 %vm14_vm0, %v2309_v4  ;;  %v5862_v52 = vld [vmem:[#allocation2 + $0x15a] sm:$0xff]  ;;  %v2325_v4 = vld [vmem:[#allocation2 + $0x308] sm:$0xff] }
 0x212   :  { %8971 = vmatprep.mubr.msk.f32.mxu0 %vm14_vm0, %v5847_v0  ;;  %8462 = vmatprep.mubr.msk.f32.mxu1 %vm14_vm0, %v2310_v14  ;;  %v5863_v0 = vld [vmem:[#allocation2 + $0x16a] sm:$0xff]  ;;  %v2326_v14 = vld [vmem:[#allocation2 + $0x318] sm:$0xff] }
 0x215   :  { %8972 = vmatmul.mubr.msk.f32.gmra.mrb[10].mxu0 %vm14_vm0, %v5848_v9  ;;  %8463 = vmatmul.mubr.msk.f32.gmra.mrb[44].mxu1 %vm14_vm0, %v2311_v23  ;;  %v5864_v9 = vld [vmem:[#allocation2 + $0x172] sm:$0xff]  ;;  %v2327_v23 = vld [vmem:[#allocation2 + $0x320] sm:$0xff] }
 0x216   :  { %8974 = vmatprep.mubr.msk.f32.mxu0 %vm14_vm0, %v5849_v18  ;;  %8465 = vmatprep.mubr.msk.f32.mxu1 %vm14_vm0, %v2312_v36  ;;  %v5865_v18 = vld [vmem:[#allocation2 + $0x182] sm:$0xff]  ;;  %v5867_v36 = vld [vmem:[#allocation2 + $0x19a] sm:$0xff] }
 0x219   :  { %8975 = vmatmul.mubr.msk.f32.gmra.mrb[12].mxu0 %vm14_vm0, %v5850_v28  ;;  %8466 = vmatmul.mubr.msk.f32.gmra.mrb[46].mxu1 %vm14_vm0, %v2313_v34  ;;  %v5866_v28 = vld [vmem:[#allocation2 + $0x18a] sm:$0xff] }
 0x21a   :  { %8977 = vmatprep.mubr.msk.f32.mxu0 %vm14_vm0, %v5851_v41  ;;  %8468 = vmatprep.mubr.msk.f32.mxu1 %vm14_vm0, %v2314_v57  ;;  %v5868_v41 = vld [vmem:[#allocation2 + $0x1a2] sm:$0xff]  ;;  %v3013_v57 = vld [vmem:[#allocation2 + $0x1d1] sm:$0xff] }
 0x21b   :  { %v3012_v34 = vld [vmem:[#allocation2 + $0x1c9] sm:$0xff] }
 0x21d   :  { %8978 = vmatmul.mubr.msk.f32.gmra.mrb[14].mxu0 %vm14_vm0, %v5852_v49  ;;  %8469 = vmatmul.mubr.msk.f32.gmra.mrb[48].mxu1 %vm14_vm0, %v2315_v5  ;;  %v5869_v49 = vld [vmem:[#allocation2 + $0x1e2] sm:$0xff]  ;;  %v5871_v5 = vld [vmem:[#allocation2 + $0x1fa] sm:$0xff] }
 0x21e   :  { %8980 = vmatprep.mubr.msk.f32.mxu0 %vm14_vm0, %v5853_v8  ;;  %8471 = vmatprep.mubr.msk.f32.mxu1 %vm14_vm0, %v2316_v25  ;;  %v5870_v8 = vld [vmem:[#allocation2 + $0x1ea] sm:$0xff] }
 0x21f   :  { %v5875_v25 = vld [vmem:[#allocation2 + $0x22a] sm:$0xff] }
 0x221   :  { %8981 = vmatmul.mubr.msk.f32.gmra.mrb[16].mxu0 %vm14_vm0, %v5854_v22  ;;  %8472 = vmatmul.mubr.msk.f32.gmra.mrb[50].mxu1 %vm14_vm0, %v2317_v37  ;;  %v5874_v22 = vld [vmem:[#allocation2 + $0x21a] sm:$0xff] }
 0x222   :  { %8983 = vmatprep.mubr.msk.f32.mxu0 %vm14_vm0, %v5855_v40  ;;  %8474 = vmatprep.mubr.msk.f32.mxu1 %vm14_vm0, %v2318_v1 }
 0x225   :  { %8984 = vmatmul.mubr.msk.f32.gmra.mrb[18].mxu0 %vm14_vm0, %v5856_v19  ;;  %8475 = vmatmul.mubr.msk.f32.gmra.mrb[52].mxu1 %vm14_vm0, %v2319_v48 }
 0x226   :  { %8986 = vmatprep.mubr.msk.f32.mxu0 %vm14_vm0, %v5857_v55  ;;  %8477 = vmatprep.mubr.msk.f32.mxu1 %vm14_vm0, %v2320_v58 }
 0x229   :  { %8987 = vmatmul.mubr.msk.f32.gmra.mrb[20].mxu0 %vm14_vm0, %v5858_v3  ;;  %8478 = vmatmul.mubr.msk.f32.gmra.mrb[54].mxu1 %vm14_vm0, %v2321_v43 }
 0x22a   :  { %8989 = vmatprep.mubr.msk.f32.mxu0 %vm14_vm0, %v5859_v50  ;;  %8480 = vmatprep.mubr.msk.f32.mxu1 %vm14_vm0, %v2322_v56 }
 0x22d   :  { %8990 = vmatmul.mubr.msk.f32.gmra.mrb[22].mxu0 %vm14_vm0, %v5860_v32  ;;  %8481 = vmatmul.mubr.msk.f32.gmra.mrb[56].mxu1 %vm14_vm0, %v2323_v51 }
 0x22e   :  { %8992 = vmatprep.mubr.msk.f32.mxu0 %vm14_vm0, %v5861_v17  ;;  %8483 = vmatprep.mubr.msk.f32.mxu1 %vm14_vm0, %v2324_v59 }
 0x231   :  { %8993 = vmatmul.mubr.msk.f32.gmra.mrb[24].mxu0 %vm14_vm0, %v5862_v52  ;;  %8484 = vmatmul.mubr.msk.f32.gmra.mrb[58].mxu1 %vm14_vm0, %v2325_v4 }
 0x232   :  { %8995 = vmatprep.mubr.msk.f32.mxu0 %vm14_vm0, %v5863_v0  ;;  %8486 = vmatprep.mubr.msk.f32.mxu1 %vm14_vm0, %v2326_v14 }
 0x235   :  { %8996 = vmatmul.mubr.msk.f32.gmra.mrb[26].mxu0 %vm14_vm0, %v5864_v9  ;;  %8487 = vmatmul.mubr.msk.f32.gmra.mrb[60].mxu1 %vm14_vm0, %v2327_v23 }
 0x236   :  { %8998 = vmatprep.mubr.msk.f32.mxu0 %vm14_vm0, %v5865_v18  ;;  %8489 = vmatprep.mubr.msk.f32.mxu1 %vm14_vm0, %v11317_v39  ;;  %v5872_v39 = vld [vmem:[#allocation2 + $0x202] sm:$0xff] }
 0x239   :  { %8999 = vmatmul.mubr.msk.f32.gmra.mrb[28].mxu0 %vm14_vm0, %v5866_v28  ;;  %8490 = vmatmul.mubr.msk.f32.gmra.mrb[62].mxu1 %vm14_vm0, %v11327_v46  ;;  %v5873_v46 = vld [vmem:[#allocation2 + $0x212] sm:$0xff] }
 0x23a   :  { %9001 = vmatprep.mubr.msk.f32.mxu0 %vm14_vm0, %v5867_v36  ;;  %8556 = vmatprep.mubr.msk.f32.mxu1 %vm14_vm0, %v3012_v34 }
 0x23d   :  { %9002 = vmatmul.mubr.msk.f32.gmra.mrb[30].mxu0 %vm14_vm0, %v5868_v41  ;;  %8557 = vmatmul.mubr.msk.f32.vlgmr.msra.gmra.mrb[32].mxu1 %vm14_vm0, %v3013_v57 }
 0x23e   :  { %9004 = vmatprep.mubr.msk.f32.mxu0 %vm14_vm0, %v5869_v49  ;;  %8559 = vmatprep.mubr.msk.f32.mxu1 %vm14_vm0, %v11449_v31  ;;  %v5876_v31 = vld [vmem:[#allocation2 + $0x232] sm:$0xff] }
 0x241   :  { %9005 = vmatmul.mubr.msk.f32.gmra.mrb[32].mxu0 %vm14_vm0, %v5870_v8  ;;  %8560 = vmatmul.mubr.msk.f32.gmra.mrb[34].mxu1 %vm14_vm0, %v11457_v38  ;;  %v5877_v38 = vld [vmem:[#allocation2 + $0x242] sm:$0xff]  ;;  %v11826_v8 = vld [vmem:[%s12174_s2] ss:$0 sm:$0xff] }
 0x242   :  { %9007 = vmatprep.mubr.msk.f32.mxu0 %vm14_vm0, %v5871_v5  ;;  %8562 = vmatprep.mubr.msk.f32.mxu1 %vm14_vm0, %v11459_v47  ;;  %v5878_v47 = vld [vmem:[#allocation2 + $0x24a] sm:$0xff] }
 0x245   :  { %9008 = vmatmul.mubr.msk.f32.gmra.mrb[34].mxu0 %vm14_vm0, %v5872_v39  ;;  %8563 = vmatmul.mubr.msk.f32.gmra.mrb[36].mxu1 %vm14_vm0, %v11468_v45  ;;  %v5879_v45 = vld [vmem:[#allocation2 + $0x25a] sm:$0xff] }
 0x246   :  { %9010 = vmatprep.mubr.msk.f32.mxu0 %vm14_vm0, %v5873_v46  ;;  %8565 = vmatprep.mubr.msk.f32.mxu1 %vm14_vm0, %v11470_v53  ;;  %v5880_v53 = vld [vmem:[#allocation2 + $0x262] sm:$0xff] }
 0x249   :  { %9011 = vmatmul.mubr.msk.f32.gmra.mrb[36].mxu0 %vm14_vm0, %v5874_v22  ;;  %8566 = vmatmul.mubr.msk.f32.gmra.mrb[38].mxu1 %vm14_vm0, %v11479_v60  ;;  %v5881_v60 = vld [vmem:[#allocation2 + $0x272] sm:$0xff] }
 0x24a   :  { %9013 = vmatprep.mubr.msk.f32.mxu0 %vm14_vm0, %v5875_v25  ;;  %8568 = vmatprep.mubr.msk.f32.mxu1 %vm14_vm0, %v11482_v10  ;;  %v5882_v10 = vld [vmem:[#allocation2 + $0x27a] sm:$0xff] }
 0x24d   :  { %9014 = vmatmul.mubr.msk.f32.gmra.mrb[38].mxu0 %vm14_vm0, %v5876_v31  ;;  %8569 = vmatmul.mubr.msk.f32.gmra.mrb[40].mxu1 %vm14_vm0, %v11491_v35  ;;  %v5883_v35 = vld [vmem:[#allocation2 + $0x28a] sm:$0xff] }
 0x24e   :  { %9016 = vmatprep.mubr.msk.f32.mxu0 %vm14_vm0, %v5877_v38  ;;  %8571 = vmatprep.mubr.msk.f32.mxu1 %vm14_vm0, %v11494_v13  ;;  %v5884_v13 = vld [vmem:[#allocation2 + $0x292] sm:$0xff] }
 0x251   :  { %9017 = vmatmul.mubr.msk.f32.gmra.mrb[40].mxu0 %vm14_vm0, %v5878_v47  ;;  %8572 = vmatmul.mubr.msk.f32.gmra.mrb[42].mxu1 %vm14_vm0, %v11503_v12  ;;  %v5885_v12 = vld [vmem:[#allocation2 + $0x2a2] sm:$0xff] }
 0x252   :  { %9019 = vmatprep.mubr.msk.f32.mxu0 %vm14_vm0, %v5879_v45  ;;  %8574 = vmatprep.mubr.msk.f32.mxu1 %vm14_vm0, %v11506_v42  ;;  %v5886_v42 = vld [vmem:[#allocation2 + $0x2aa] sm:$0xff] }
 0x255   :  { %9020 = vmatmul.mubr.msk.f32.gmra.mrb[42].mxu0 %vm14_vm0, %v5880_v53  ;;  %8575 = vmatmul.mubr.msk.f32.gmra.mrb[44].mxu1 %vm14_vm0, %v11514_v24  ;;  %v5887_v24 = vld [vmem:[#allocation2 + $0x2ba] sm:$0xff] }
 0x256   :  { %9022 = vmatprep.mubr.msk.f32.mxu0 %vm14_vm0, %v5881_v60  ;;  %8577 = vmatprep.mubr.msk.f32.mxu1 %vm14_vm0, %v11516_v7  ;;  %v5888_v7 = vld [vmem:[#allocation2 + $0x2c2] sm:$0xff] }
 0x259   :  { %9023 = vmatmul.mubr.msk.f32.gmra.mrb[44].mxu0 %vm14_vm0, %v5882_v10  ;;  %8578 = vmatmul.mubr.msk.f32.gmra.mrb[46].mxu1 %vm14_vm0, %v11524_v29  ;;  %v5889_v29 = vld [vmem:[#allocation2 + $0x2d2] sm:$0xff] }
 0x25a   :  { %9025 = vmatprep.mubr.msk.f32.mxu0 %vm14_vm0, %v5883_v35  ;;  %8580 = vmatprep.mubr.msk.f32.mxu1 %vm14_vm0, %v11526_v15  ;;  %v5890_v15 = vld [vmem:[#allocation2 + $0x2da] sm:$0xff] }
 0x25d   :  { %9026 = vmatmul.mubr.msk.f32.gmra.mrb[46].mxu0 %vm14_vm0, %v5884_v13  ;;  %8581 = vmatmul.mubr.msk.f32.gmra.mrb[48].mxu1 %vm14_vm0, %v11534_v20  ;;  %v5891_v20 = vld [vmem:[#allocation2 + $0x2ea] sm:$0xff] }
 0x25e   :  { %9028 = vmatprep.mubr.msk.f32.mxu0 %vm14_vm0, %v5885_v12  ;;  %8583 = vmatprep.mubr.msk.f32.mxu1 %vm14_vm0, %v11536_v27  ;;  %v5892_v27 = vld [vmem:[#allocation2 + $0x2f2] sm:$0xff] }
 0x261   :  { %9029 = vmatmul.mubr.msk.f32.gmra.mrb[48].mxu0 %vm14_vm0, %v5886_v42  ;;  %8584 = vmatmul.mubr.msk.f32.gmra.mrb[50].mxu1 %vm14_vm0, %v11544_v63  ;;  %v5893_v63 = vld [vmem:[#allocation2 + $0x302] sm:$0xff] }
 0x262   :  { %9031 = vmatprep.mubr.msk.f32.mxu0 %vm14_vm0, %v5887_v24  ;;  %8586 = vmatprep.mubr.msk.f32.mxu1 %vm14_vm0, %v11546_v30  ;;  %v5894_v30 = vld [vmem:[#allocation2 + $0x30a] sm:$0xff] }
 0x265   :  { %9032 = vmatmul.mubr.msk.f32.gmra.mrb[50].mxu0 %vm14_vm0, %v5888_v7  ;;  %8587 = vmatmul.mubr.msk.f32.gmra.mrb[52].mxu1 %vm14_vm0, %v11554_v62  ;;  %v5895_v62 = vld [vmem:[#allocation2 + $0x31a] sm:$0xff] }
 0x266   :  { %9034 = vmatprep.mubr.msk.f32.mxu0 %vm14_vm0, %v5889_v29  ;;  %8589 = vmatprep.mubr.msk.f32.mxu1 %vm14_vm0, %v11556_v44  ;;  %v5896_v44 = vld [vmem:[#allocation2 + $0x322] sm:$0xff] }
 0x269   :  { %9035 = vmatmul.mubr.msk.f32.gmra.mrb[52].mxu0 %vm14_vm0, %v5890_v15  ;;  %8590 = vmatmul.mubr.msk.f32.gmra.mrb[54].mxu1 %vm14_vm0, %v11564_v54  ;;  %v5897_v54 = vld [vmem:[#allocation2 + $0x332] sm:$0xff] }
 0x26a   :  { %9037 = vmatprep.mubr.msk.f32.mxu0 %vm14_vm0, %v5891_v20  ;;  %8592 = vmatprep.mubr.msk.f32.mxu1 %vm14_vm0, %v11566_v61  ;;  %v5898_v61 = vld [vmem:[#allocation2 + $0x33a] sm:$0xff] }
 0x26d   :  { %9038 = vmatmul.mubr.msk.f32.gmra.mrb[54].mxu0 %vm14_vm0, %v5892_v27  ;;  %8593 = vmatmul.mubr.msk.f32.gmra.mrb[56].mxu1 %vm14_vm0, %v11574_v2  ;;  %v5899_v2 = vld [vmem:[#allocation2 + $0x34a] sm:$0xff] }
 0x26e   :  { %9040 = vmatprep.mubr.msk.f32.mxu0 %vm14_vm0, %v5893_v63  ;;  %8595 = vmatprep.mubr.msk.f32.mxu1 %vm14_vm0, %v11576_v6  ;;  %v5900_v6 = vld [vmem:[#allocation2 + $0x352] sm:$0xff] }
 0x271   :  { %9041 = vmatmul.mubr.msk.f32.gmra.mrb[56].mxu0 %vm14_vm0, %v5894_v30  ;;  %8596 = vmatmul.mubr.msk.f32.gmra.mrb[58].mxu1 %vm14_vm0, %v11584_v11 }
 0x272   :  { %9043 = vmatprep.mubr.msk.f32.mxu0 %vm14_vm0, %v5895_v62  ;;  %8598 = vmatprep.mubr.msk.f32.mxu1 %vm14_vm0, %v11586_v16 }
 0x275   :  { %9044 = vmatmul.mubr.msk.f32.gmra.mrb[58].mxu0 %vm14_vm0, %v5896_v44  ;;  %8599 = vmatmul.mubr.msk.f32.gmra.mrb[60].mxu1 %vm14_vm0, %v11594_v21 }
 0x276   :  { %9046 = vmatprep.mubr.msk.f32.mxu0 %vm14_vm0, %v5897_v54  ;;  %8601 = vmatprep.mubr.msk.f32.mxu1 %vm14_vm0, %v11596_v26 }
 0x279   :  { %9047 = vmatmul.mubr.msk.f32.gmra.mrb[60].mxu0 %vm14_vm0, %v5898_v61  ;;  %8602 = vmatmul.mubr.msk.f32.gmra.mrb[62].mxu1 %vm14_vm0, %v11604_v33 }
 0x27a   :  { %9049 = vmatprep.mubr.msk.f32.mxu0 %vm14_vm0, %v5899_v2 }
 0x27d   :  { %9050 = vmatmul.mubr.msk.f32.gmra.mrb[62].mxu0 %vm14_vm0, %v5900_v6 }
 0x290   :  { %v8398_v11 = vpop.f32.mrb[0].mxu1 }
 0x291   :  { %v2597_v16 = vpop.f32.mrb[1].mxu1 }
 0x294   :  { %v8401_v40 = vpop.f32.mrb[2].mxu1 }
 0x295   :  { %v2607_v37 = vpop.f32.mrb[3].mxu1 }
 0x298   :  { %v8404_v19 = vpop.f32.mrb[4].mxu1 }
 0x299   :  { %v2617_v1 = vpop.f32.mrb[5].mxu1 }
 0x29c   :  { %v8407_v21 = vpop.f32.mrb[6].mxu1 }
 0x29d   :  { %v2627_v55 = vpop.f32.mrb[7].mxu1 }
 0x2a0   :  { %v11775_v48 = vpop.f32.mrb[8].mxu1 }
 0x2a1   :  { %v11777_v3 = vpop.f32.mrb[9].mxu1 }
 0x2a4   :  { %v11779_v26 = vpop.f32.mrb[10].mxu1 }
 0x2a5   :  { %v11781_v58 = vpop.f32.mrb[11].mxu1 }
 0x2a8   :  { %v11783_v50 = vpop.f32.mrb[12].mxu1 }
 0x2a9   :  { %v11785_v33 = vpop.f32.mrb[13].mxu1 }
 0x2ac   :  { %v11787_v43 = vpop.f32.mrb[14].mxu1 }
 0x2ad   :  { %v11789_v32 = vpop.f32.mrb[15].mxu1 }
 0x2b0   :  { %v11791_v56 = vpop.f32.mrb[16].mxu1 }
 0x2b1   :  { %v11793_v17 = vpop.f32.mrb[17].mxu1 }
 0x2b4   :  { %v11795_v51 = vpop.f32.mrb[18].mxu1 }
 0x2b5   :  { %v11797_v52 = vpop.f32.mrb[19].mxu1 }
 0x2b8   :  { %v11799_v59 = vpop.f32.mrb[20].mxu1 }
 0x2b9   :  { %v11801_v0 = vpop.f32.mrb[21].mxu1 }
 0x2bc   :  { %v11803_v4 = vpop.f32.mrb[22].mxu1 }
 0x2bd   :  { %v11805_v9 = vpop.f32.mrb[23].mxu1 }
 0x2c0   :  { %v11807_v14 = vpop.f32.mrb[24].mxu1 }
 0x2c1   :  { %v11809_v18 = vpop.f32.mrb[25].mxu1 }
 0x2c4   :  { %v11811_v23 = vpop.f32.mrb[26].mxu1 }
 0x2c5   :  { %v11813_v28 = vpop.f32.mrb[27].mxu1 }
 0x2c8   :  { %v11815_v36 = vpop.f32.mrb[28].mxu1 }
 0x2c9   :  { %v11817_v41 = vpop.f32.mrb[29].mxu1 }
 0x2cc   :  { %v11819_v34 = vpop.f32.mrb[30].mxu1 }
 0x2cd   :  { %v11821_v49 = vpop.f32.mrb[31].mxu1 }
 0x2d4   :  { %v8958_v57 = vpop.f32.mrb[0].mxu0 }
 0x2d5   :  { %v9204_v5 = vadd.f32 %v8958_v57, %v8398_v11  ;;  %v6168_v39 = vpop.f32.mrb[1].mxu0 }
 0x2d6   :  { %v9205_v46 = vadd.f32 %v6168_v39, %v2597_v16 }
 0x2d7   :  { %v6559_v22 = vadd.f32 %v9204_v5, %v11826_v8 }
 0x2d8   :  { %v6558_v25 = vadd.f32 %v9205_v46, %v11826_v8  ;;  %v8961_v31 = vpop.f32.mrb[2].mxu0 }
 0x2d9   :  { %9717 = vtanh.f32 %v6559_v22  ;;  %v9206_v38 = vadd.f32 %v8961_v31, %v8401_v40  ;;  %v6178_v47 = vpop.f32.mrb[3].mxu0 }
 0x2da   :  { %9719 = vtanh.f32 %v6558_v25  ;;  %v9207_v45 = vadd.f32 %v6178_v47, %v2607_v37 }
 0x2db   :  { %v6561_v53 = vadd.f32 %v9206_v38, %v11826_v8 }
 0x2dc   :  { %v6560_v60 = vadd.f32 %v9207_v45, %v11826_v8  ;;  %v8964_v10 = vpop.f32.mrb[4].mxu0 }
 0x2dd   :  { %9721 = vtanh.f32 %v6561_v53  ;;  %v9208_v35 = vadd.f32 %v8964_v10, %v8404_v19  ;;  %v6188_v13 = vpop.f32.mrb[5].mxu0 }
 0x2de   :  { %9723 = vtanh.f32 %v6560_v60  ;;  %v9209_v12 = vadd.f32 %v6188_v13, %v2617_v1 }
 0x2df   :  { %v6563_v42 = vadd.f32 %v9208_v35, %v11826_v8 }
 0x2e0   :  { %v6562_v24 = vadd.f32 %v9209_v12, %v11826_v8  ;;  %v8967_v7 = vpop.f32.mrb[6].mxu0 }
 0x2e1   :  { %9725 = vtanh.f32 %v6563_v42  ;;  %v9210_v29 = vadd.f32 %v8967_v7, %v8407_v21  ;;  %v6198_v15 = vpop.f32.mrb[7].mxu0 }
 0x2e2   :  { %9727 = vtanh.f32 %v6562_v24  ;;  %v9211_v20 = vadd.f32 %v6198_v15, %v2627_v55 }
 0x2e3   :  { %v9718_v27 = vpop.eup %9717  ;;  %v6565_v63 = vadd.f32 %v9210_v29, %v11826_v8 }
 0x2e4   :  { %v9720_v30 = vpop.eup %9719  ;;  %6688 = vst.msk [vmem:[%s12175_s3 + $0x8] sm:$0xff] %vm6686_vm2, %v9718_v27  ;;  %v6564_v62 = vadd.f32 %v9211_v20, %v11826_v8  ;;  %v8970_v44 = vpop.f32.mrb[8].mxu0 }
 0x2e5   :  { %6687 = vst.msk [vmem:[%s12175_s3] sm:$0xff] %vm6686_vm2, %v9720_v30  ;;  %9729 = vtanh.f32 %v6565_v63  ;;  %v9212_v54 = vadd.f32 %v8970_v44, %v11775_v48  ;;  %v6208_v61 = vpop.f32.mrb[9].mxu0 }
 0x2e6   :  { %9731 = vtanh.f32 %v6564_v62  ;;  %v9213_v2 = vadd.f32 %v6208_v61, %v11777_v3 }
 0x2e7   :  { %v9722_v6 = vpop.eup %9721  ;;  %v6567_v11 = vadd.f32 %v9212_v54, %v11826_v8 }
 0x2e8   :  { %v9724_v16 = vpop.eup %9723  ;;  %6690 = vst.msk [vmem:[%s12175_s3 + $0x18] sm:$0xff] %vm6686_vm2, %v9722_v6  ;;  %v6566_v40 = vadd.f32 %v9213_v2, %v11826_v8  ;;  %v8973_v37 = vpop.f32.mrb[10].mxu0 }
 0x2e9   :  { %6689 = vst.msk [vmem:[%s12175_s3 + $0x10] sm:$0xff] %vm6686_vm2, %v9724_v16  ;;  %9733 = vtanh.f32 %v6567_v11  ;;  %v9214_v19 = vadd.f32 %v8973_v37, %v11779_v26  ;;  %v6218_v1 = vpop.f32.mrb[11].mxu0 }
 0x2ea   :  { %9735 = vtanh.f32 %v6566_v40  ;;  %v9215_v21 = vadd.f32 %v6218_v1, %v11781_v58 }
 0x2eb   :  { %v9726_v55 = vpop.eup %9725  ;;  %v6569_v48 = vadd.f32 %v9214_v19, %v11826_v8 }
 0x2ec   :  { %v9728_v3 = vpop.eup %9727  ;;  %6692 = vst.msk [vmem:[%s12175_s3 + $0x28] sm:$0xff] %vm6686_vm2, %v9726_v55  ;;  %v6568_v57 = vadd.f32 %v9215_v21, %v11826_v8  ;;  %v8976_v5 = vpop.f32.mrb[12].mxu0 }
 0x2ed   :  { %6691 = vst.msk [vmem:[%s12175_s3 + $0x20] sm:$0xff] %vm6686_vm2, %v9728_v3  ;;  %9737 = vtanh.f32 %v6569_v48  ;;  %v9216_v26 = vadd.f32 %v8976_v5, %v11783_v50  ;;  %v6228_v58 = vpop.f32.mrb[13].mxu0 }
 0x2ee   :  { %9739 = vtanh.f32 %v6568_v57  ;;  %v9217_v39 = vadd.f32 %v6228_v58, %v11785_v33 }
 0x2ef   :  { %v9730_v46 = vpop.eup %9729  ;;  %v6571_v22 = vadd.f32 %v9216_v26, %v11826_v8 }
 0x2f0   :  { %v9732_v25 = vpop.eup %9731  ;;  %6694 = vst.msk [vmem:[%s12175_s3 + $0x38] sm:$0xff] %vm6686_vm2, %v9730_v46  ;;  %v6570_v31 = vadd.f32 %v9217_v39, %v11826_v8  ;;  %v8979_v38 = vpop.f32.mrb[14].mxu0 }
 0x2f1   :  { %6693 = vst.msk [vmem:[%s12175_s3 + $0x30] sm:$0xff] %vm6686_vm2, %v9732_v25  ;;  %9741 = vtanh.f32 %v6571_v22  ;;  %v9218_v50 = vadd.f32 %v8979_v38, %v11787_v43  ;;  %v6238_v33 = vpop.f32.mrb[15].mxu0 }
 0x2f2   :  { %9743 = vtanh.f32 %v6570_v31  ;;  %v9219_v47 = vadd.f32 %v6238_v33, %v11789_v32 }
 0x2f3   :  { %v9734_v45 = vpop.eup %9733  ;;  %v6573_v53 = vadd.f32 %v9218_v50, %v11826_v8 }
 0x2f4   :  { %v9736_v60 = vpop.eup %9735  ;;  %6696 = vst.msk [vmem:[%s12175_s3 + $0x48] sm:$0xff] %vm6686_vm2, %v9734_v45  ;;  %v6572_v10 = vadd.f32 %v9219_v47, %v11826_v8  ;;  %v8982_v35 = vpop.f32.mrb[16].mxu0 }
 0x2f5   :  { %6695 = vst.msk [vmem:[%s12175_s3 + $0x40] sm:$0xff] %vm6686_vm2, %v9736_v60  ;;  %9745 = vtanh.f32 %v6573_v53  ;;  %v9220_v43 = vadd.f32 %v8982_v35, %v11791_v56  ;;  %v6248_v32 = vpop.f32.mrb[17].mxu0 }
 0x2f6   :  { %9747 = vtanh.f32 %v6572_v10  ;;  %v9221_v13 = vadd.f32 %v6248_v32, %v11793_v17 }
 0x2f7   :  { %v9738_v12 = vpop.eup %9737  ;;  %v6575_v42 = vadd.f32 %v9220_v43, %v11826_v8 }
 0x2f8   :  { %v9740_v24 = vpop.eup %9739  ;;  %6698 = vst.msk [vmem:[%s12175_s3 + $0x58] sm:$0xff] %vm6686_vm2, %v9738_v12  ;;  %v6574_v7 = vadd.f32 %v9221_v13, %v11826_v8  ;;  %v8985_v29 = vpop.f32.mrb[18].mxu0 }
 0x2f9   :  { %6697 = vst.msk [vmem:[%s12175_s3 + $0x50] sm:$0xff] %vm6686_vm2, %v9740_v24  ;;  %9749 = vtanh.f32 %v6575_v42  ;;  %v9222_v56 = vadd.f32 %v8985_v29, %v11795_v51  ;;  %v6258_v17 = vpop.f32.mrb[19].mxu0 }
 0x2fa   :  { %9751 = vtanh.f32 %v6574_v7  ;;  %v9223_v15 = vadd.f32 %v6258_v17, %v11797_v52 }
 0x2fb   :  { %v9742_v20 = vpop.eup %9741  ;;  %v6577_v27 = vadd.f32 %v9222_v56, %v11826_v8 }
 0x2fc   :  { %v9744_v63 = vpop.eup %9743  ;;  %6700 = vst.msk [vmem:[%s12175_s3 + $0x68] sm:$0xff] %vm6686_vm2, %v9742_v20  ;;  %v6576_v30 = vadd.f32 %v9223_v15, %v11826_v8  ;;  %v8988_v62 = vpop.f32.mrb[20].mxu0 }
 0x2fd   :  { %6699 = vst.msk [vmem:[%s12175_s3 + $0x60] sm:$0xff] %vm6686_vm2, %v9744_v63  ;;  %9753 = vtanh.f32 %v6577_v27  ;;  %v9224_v51 = vadd.f32 %v8988_v62, %v11799_v59  ;;  %v6268_v52 = vpop.f32.mrb[21].mxu0 }
 0x2fe   :  { %9755 = vtanh.f32 %v6576_v30  ;;  %v9225_v44 = vadd.f32 %v6268_v52, %v11801_v0 }
 0x2ff   :  { %v9746_v54 = vpop.eup %9745  ;;  %v6579_v61 = vadd.f32 %v9224_v51, %v11826_v8 }
 0x300   :  { %v9748_v2 = vpop.eup %9747  ;;  %6702 = vst.msk [vmem:[%s12175_s3 + $0x78] sm:$0xff] %vm6686_vm2, %v9746_v54  ;;  %v6578_v6 = vadd.f32 %v9225_v44, %v11826_v8  ;;  %v8991_v11 = vpop.f32.mrb[22].mxu0 }
 0x301   :  { %6701 = vst.msk [vmem:[%s12175_s3 + $0x70] sm:$0xff] %vm6686_vm2, %v9748_v2  ;;  %9757 = vtanh.f32 %v6579_v61  ;;  %v9226_v59 = vadd.f32 %v8991_v11, %v11803_v4  ;;  %v6278_v0 = vpop.f32.mrb[23].mxu0 }
 0x302   :  { %9759 = vtanh.f32 %v6578_v6  ;;  %v9227_v16 = vadd.f32 %v6278_v0, %v11805_v9 }
 0x303   :  { %v9750_v40 = vpop.eup %9749  ;;  %v6581_v37 = vadd.f32 %v9226_v59, %v11826_v8 }
 0x304   :  { %v9752_v19 = vpop.eup %9751  ;;  %6704 = vst.msk [vmem:[%s12175_s3 + $0x88] sm:$0xff] %vm6686_vm2, %v9750_v40  ;;  %v6580_v1 = vadd.f32 %v9227_v16, %v11826_v8  ;;  %v8994_v21 = vpop.f32.mrb[24].mxu0 }
 0x305   :  { %6703 = vst.msk [vmem:[%s12175_s3 + $0x80] sm:$0xff] %vm6686_vm2, %v9752_v19  ;;  %9761 = vtanh.f32 %v6581_v37  ;;  %v9228_v4 = vadd.f32 %v8994_v21, %v11807_v14  ;;  %v6288_v9 = vpop.f32.mrb[25].mxu0 }
 0x306   :  { %9763 = vtanh.f32 %v6580_v1  ;;  %v9229_v55 = vadd.f32 %v6288_v9, %v11809_v18 }
 0x307   :  { %v9754_v48 = vpop.eup %9753  ;;  %v6583_v3 = vadd.f32 %v9228_v4, %v11826_v8 }
 0x308   :  { %v9756_v57 = vpop.eup %9755  ;;  %6706 = vst.msk [vmem:[%s12175_s3 + $0x98] sm:$0xff] %vm6686_vm2, %v9754_v48  ;;  %v6582_v5 = vadd.f32 %v9229_v55, %v11826_v8  ;;  %v8997_v26 = vpop.f32.mrb[26].mxu0 }
 0x309   :  { %6705 = vst.msk [vmem:[%s12175_s3 + $0x90] sm:$0xff] %vm6686_vm2, %v9756_v57  ;;  %9765 = vtanh.f32 %v6583_v3  ;;  %v9230_v14 = vadd.f32 %v8997_v26, %v11811_v23  ;;  %v6298_v18 = vpop.f32.mrb[27].mxu0 }
 0x30a   :  { %9767 = vtanh.f32 %v6582_v5  ;;  %v9231_v58 = vadd.f32 %v6298_v18, %v11813_v28 }
 0x30b   :  { %v9758_v39 = vpop.eup %9757  ;;  %v6585_v46 = vadd.f32 %v9230_v14, %v11826_v8 }
 0x30c   :  { %v9760_v22 = vpop.eup %9759  ;;  %6708 = vst.msk [vmem:[%s12175_s3 + $0xa8] sm:$0xff] %vm6686_vm2, %v9758_v39  ;;  %v6584_v25 = vadd.f32 %v9231_v58, %v11826_v8  ;;  %v9000_v31 = vpop.f32.mrb[28].mxu0 }
 0x30d   :  { %6707 = vst.msk [vmem:[%s12175_s3 + $0xa0] sm:$0xff] %vm6686_vm2, %v9760_v22  ;;  %9769 = vtanh.f32 %v6585_v46  ;;  %v9232_v23 = vadd.f32 %v9000_v31, %v11815_v36  ;;  %v6308_v28 = vpop.f32.mrb[29].mxu0 }
 0x30e   :  { %9771 = vtanh.f32 %v6584_v25  ;;  %v9233_v38 = vadd.f32 %v6308_v28, %v11817_v41 }
 0x30f   :  { %v9762_v50 = vpop.eup %9761  ;;  %v6587_v33 = vadd.f32 %v9232_v23, %v11826_v8 }
 0x310   :  { %v9764_v47 = vpop.eup %9763  ;;  %6710 = vst.msk [vmem:[%s12175_s3 + $0xb8] sm:$0xff] %vm6686_vm2, %v9762_v50  ;;  %v6586_v45 = vadd.f32 %v9233_v38, %v11826_v8  ;;  %v9003_v53 = vpop.f32.mrb[30].mxu0 }
 0x311   :  { %6709 = vst.msk [vmem:[%s12175_s3 + $0xb0] sm:$0xff] %vm6686_vm2, %v9764_v47  ;;  %9773 = vtanh.f32 %v6587_v33  ;;  %v9234_v36 = vadd.f32 %v9003_v53, %v11819_v34  ;;  %v6318_v41 = vpop.f32.mrb[31].mxu0  ;;  %v8558_v43 = vpop.f32.mrb[32].mxu1 }
 0x312   :  { %9775 = vtanh.f32 %v6586_v45  ;;  %v9235_v60 = vadd.f32 %v6318_v41, %v11821_v49  ;;  %v3471_v42 = vpop.f32.mrb[33].mxu1 }
 0x313   :  { %v9766_v10 = vpop.eup %9765  ;;  %v6589_v35 = vadd.f32 %v9234_v36, %v11826_v8 }
 0x314   :  { %v9768_v32 = vpop.eup %9767  ;;  %6712 = vst.msk [vmem:[%s12175_s3 + $0xc8] sm:$0xff] %vm6686_vm2, %v9766_v10  ;;  %v6588_v13 = vadd.f32 %v9235_v60, %v11826_v8  ;;  %v9006_v12 = vpop.f32.mrb[32].mxu0 }
 0x315   :  { %6711 = vst.msk [vmem:[%s12175_s3 + $0xc0] sm:$0xff] %vm6686_vm2, %v9768_v32  ;;  %9777 = vtanh.f32 %v6589_v35  ;;  %v9236_v34 = vadd.f32 %v9006_v12, %v8558_v43  ;;  %v6328_v49 = vpop.f32.mrb[33].mxu0  ;;  %v8561_v56 = vpop.f32.mrb[34].mxu1 }
 0x316   :  { %9779 = vtanh.f32 %v6588_v13  ;;  %v9237_v24 = vadd.f32 %v6328_v49, %v3471_v42  ;;  %v3481_v27 = vpop.f32.mrb[35].mxu1 }
 0x317   :  { %v9770_v7 = vpop.eup %9769  ;;  %v6591_v29 = vadd.f32 %v9236_v34, %v11826_v8 }
 0x318   :  { %v9772_v17 = vpop.eup %9771  ;;  %6714 = vst.msk [vmem:[%s12175_s3 + $0xd8] sm:$0xff] %vm6686_vm2, %v9770_v7  ;;  %v6590_v15 = vadd.f32 %v9237_v24, %v11826_v8  ;;  %v9009_v20 = vpop.f32.mrb[34].mxu0 }
 0x319   :  { %6713 = vst.msk [vmem:[%s12175_s3 + $0xd0] sm:$0xff] %vm6686_vm2, %v9772_v17  ;;  %9781 = vtanh.f32 %v6591_v29  ;;  %v9238_v63 = vadd.f32 %v9009_v20, %v8561_v56  ;;  %v6338_v30 = vpop.f32.mrb[35].mxu0  ;;  %v8564_v44 = vpop.f32.mrb[36].mxu1 }
 0x31a   :  { %9783 = vtanh.f32 %v6590_v15  ;;  %v9239_v62 = vadd.f32 %v6338_v30, %v3481_v27  ;;  %v3491_v6 = vpop.f32.mrb[37].mxu1 }
 0x31b   :  { %v9774_v51 = vpop.eup %9773  ;;  %v6593_v52 = vadd.f32 %v9238_v63, %v11826_v8 }
 0x31c   :  { %v9776_v54 = vpop.eup %9775  ;;  %6716 = vst.msk [vmem:[%s12175_s3 + $0xe8] sm:$0xff] %vm6686_vm2, %v9774_v51  ;;  %v6592_v61 = vadd.f32 %v9239_v62, %v11826_v8  ;;  %v9012_v2 = vpop.f32.mrb[36].mxu0 }
 0x31d   :  { %6715 = vst.msk [vmem:[%s12175_s3 + $0xe0] sm:$0xff] %vm6686_vm2, %v9776_v54  ;;  %9785 = vtanh.f32 %v6593_v52  ;;  %v9240_v11 = vadd.f32 %v9012_v2, %v8564_v44  ;;  %v6348_v59 = vpop.f32.mrb[37].mxu0  ;;  %v8567_v37 = vpop.f32.mrb[38].mxu1 }
 0x31e   :  { %9787 = vtanh.f32 %v6592_v61  ;;  %v9241_v0 = vadd.f32 %v6348_v59, %v3491_v6  ;;  %v3501_v4 = vpop.f32.mrb[39].mxu1 }
 0x31f   :  { %v9778_v16 = vpop.eup %9777  ;;  %v6595_v40 = vadd.f32 %v9240_v11, %v11826_v8 }
 0x320   :  { %v9780_v19 = vpop.eup %9779  ;;  %6718 = vst.msk [vmem:[%s12175_s3 + $0xf8] sm:$0xff] %vm6686_vm2, %v9778_v16  ;;  %v6594_v1 = vadd.f32 %v9241_v0, %v11826_v8  ;;  %v9015_v21 = vpop.f32.mrb[38].mxu0 }
 0x321   :  { %6717 = vst.msk [vmem:[%s12175_s3 + $0xf0] sm:$0xff] %vm6686_vm2, %v9780_v19  ;;  %9789 = vtanh.f32 %v6595_v40  ;;  %v9242_v9 = vadd.f32 %v9015_v21, %v8567_v37  ;;  %v6358_v55 = vpop.f32.mrb[39].mxu0  ;;  %v8570_v5 = vpop.f32.mrb[40].mxu1 }
 0x322   :  { %9791 = vtanh.f32 %v6594_v1  ;;  %v9243_v48 = vadd.f32 %v6358_v55, %v3501_v4  ;;  %v3511_v58 = vpop.f32.mrb[41].mxu1 }
 0x323   :  { %v9782_v3 = vpop.eup %9781  ;;  %v6597_v57 = vadd.f32 %v9242_v9, %v11826_v8 }
 0x324   :  { %v9784_v26 = vpop.eup %9783  ;;  %6720 = vst.msk [vmem:[%s12175_s3 + $0x108] sm:$0xff] %vm6686_vm2, %v9782_v3  ;;  %v6596_v14 = vadd.f32 %v9243_v48, %v11826_v8  ;;  %v9018_v18 = vpop.f32.mrb[40].mxu0 }
 0x325   :  { %6719 = vst.msk [vmem:[%s12175_s3 + $0x100] sm:$0xff] %vm6686_vm2, %v9784_v26  ;;  %9793 = vtanh.f32 %v6597_v57  ;;  %v9244_v39 = vadd.f32 %v9018_v18, %v8570_v5  ;;  %v6368_v46 = vpop.f32.mrb[41].mxu0  ;;  %v8573_v23 = vpop.f32.mrb[42].mxu1 }
 0x326   :  { %9795 = vtanh.f32 %v6596_v14  ;;  %v9245_v22 = vadd.f32 %v6368_v46, %v3511_v58  ;;  %v3521_v33 = vpop.f32.mrb[43].mxu1 }
 0x327   :  { %v9786_v25 = vpop.eup %9785  ;;  %v6599_v31 = vadd.f32 %v9244_v39, %v11826_v8 }
 0x328   :  { %v9788_v28 = vpop.eup %9787  ;;  %6722 = vst.msk [vmem:[%s12175_s3 + $0x118] sm:$0xff] %vm6686_vm2, %v9786_v25  ;;  %v6598_v38 = vadd.f32 %v9245_v22, %v11826_v8  ;;  %v9021_v50 = vpop.f32.mrb[42].mxu0 }
 0x329   :  { %6721 = vst.msk [vmem:[%s12175_s3 + $0x110] sm:$0xff] %vm6686_vm2, %v9788_v28  ;;  %9797 = vtanh.f32 %v6599_v31  ;;  %v9246_v47 = vadd.f32 %v9021_v50, %v8573_v23  ;;  %v6378_v45 = vpop.f32.mrb[43].mxu0  ;;  %v8576_v60 = vpop.f32.mrb[44].mxu1 }
 0x32a   :  { %9799 = vtanh.f32 %v6598_v38  ;;  %v9247_v53 = vadd.f32 %v6378_v45, %v3521_v33  ;;  %v3531_v32 = vpop.f32.mrb[45].mxu1 }
 0x32b   :  { %v9790_v36 = vpop.eup %9789  ;;  %v6601_v41 = vadd.f32 %v9246_v47, %v11826_v8 }
 0x32c   :  { %v9792_v10 = vpop.eup %9791  ;;  %6724 = vst.msk [vmem:[%s12175_s3 + $0x128] sm:$0xff] %vm6686_vm2, %v9790_v36  ;;  %v6600_v35 = vadd.f32 %v9247_v53, %v11826_v8  ;;  %v9024_v43 = vpop.f32.mrb[44].mxu0 }
 0x32d   :  { %6723 = vst.msk [vmem:[%s12175_s3 + $0x120] sm:$0xff] %vm6686_vm2, %v9792_v10  ;;  %9801 = vtanh.f32 %v6601_v41  ;;  %v9248_v13 = vadd.f32 %v9024_v43, %v8576_v60  ;;  %v6388_v12 = vpop.f32.mrb[45].mxu0  ;;  %v8579_v24 = vpop.f32.mrb[46].mxu1 }
 0x32e   :  { %9803 = vtanh.f32 %v6600_v35  ;;  %v9249_v42 = vadd.f32 %v6388_v12, %v3531_v32  ;;  %v3541_v17 = vpop.f32.mrb[47].mxu1 }
 0x32f   :  { %v9794_v34 = vpop.eup %9793  ;;  %v6603_v49 = vadd.f32 %v9248_v13, %v11826_v8 }
 0x330   :  { %v9796_v7 = vpop.eup %9795  ;;  %6726 = vst.msk [vmem:[%s12175_s3 + $0x138] sm:$0xff] %vm6686_vm2, %v9794_v34  ;;  %v6602_v29 = vadd.f32 %v9249_v42, %v11826_v8  ;;  %v9027_v56 = vpop.f32.mrb[46].mxu0 }
 0x331   :  { %6725 = vst.msk [vmem:[%s12175_s3 + $0x130] sm:$0xff] %vm6686_vm2, %v9796_v7  ;;  %9805 = vtanh.f32 %v6603_v49  ;;  %v9250_v15 = vadd.f32 %v9027_v56, %v8579_v24  ;;  %v6398_v20 = vpop.f32.mrb[47].mxu0  ;;  %v8582_v62 = vpop.f32.mrb[48].mxu1 }
 0x332   :  { %9807 = vtanh.f32 %v6602_v29  ;;  %v9251_v27 = vadd.f32 %v6398_v20, %v3541_v17  ;;  %v3551_v54 = vpop.f32.mrb[49].mxu1 }
 0x333   :  { %v9798_v63 = vpop.eup %9797  ;;  %v6605_v30 = vadd.f32 %v9250_v15, %v11826_v8 }
 0x334   :  { %v9800_v51 = vpop.eup %9799  ;;  %6728 = vst.msk [vmem:[%s12175_s3 + $0x148] sm:$0xff] %vm6686_vm2, %v9798_v63  ;;  %v6604_v52 = vadd.f32 %v9251_v27, %v11826_v8  ;;  %v9030_v44 = vpop.f32.mrb[48].mxu0 }
 0x335   :  { %6727 = vst.msk [vmem:[%s12175_s3 + $0x140] sm:$0xff] %vm6686_vm2, %v9800_v51  ;;  %9809 = vtanh.f32 %v6605_v30  ;;  %v9252_v61 = vadd.f32 %v9030_v44, %v8582_v62  ;;  %v6408_v2 = vpop.f32.mrb[49].mxu0  ;;  %v8585_v0 = vpop.f32.mrb[50].mxu1 }
 0x336   :  { %9811 = vtanh.f32 %v6604_v52  ;;  %v9253_v6 = vadd.f32 %v6408_v2, %v3551_v54  ;;  %v3561_v19 = vpop.f32.mrb[51].mxu1 }
 0x337   :  { %v9802_v11 = vpop.eup %9801  ;;  %v6607_v59 = vadd.f32 %v9252_v61, %v11826_v8 }
 0x338   :  { %v9804_v16 = vpop.eup %9803  ;;  %6730 = vst.msk [vmem:[%s12175_s3 + $0x158] sm:$0xff] %vm6686_vm2, %v9802_v11  ;;  %v6606_v40 = vadd.f32 %v9253_v6, %v11826_v8  ;;  %v9033_v37 = vpop.f32.mrb[50].mxu0 }
 0x339   :  { %6729 = vst.msk [vmem:[%s12175_s3 + $0x150] sm:$0xff] %vm6686_vm2, %v9804_v16  ;;  %9813 = vtanh.f32 %v6607_v59  ;;  %v9254_v1 = vadd.f32 %v9033_v37, %v8585_v0  ;;  %v6418_v21 = vpop.f32.mrb[51].mxu0  ;;  %v8588_v48 = vpop.f32.mrb[52].mxu1 }
 0x33a   :  { %9815 = vtanh.f32 %v6606_v40  ;;  %v9255_v4 = vadd.f32 %v6418_v21, %v3561_v19  ;;  %v3571_v26 = vpop.f32.mrb[53].mxu1 }
 0x33b   :  { %v9806_v9 = vpop.eup %9805  ;;  %v6609_v55 = vadd.f32 %v9254_v1, %v11826_v8 }
 0x33c   :  { %v9808_v3 = vpop.eup %9807  ;;  %6732 = vst.msk [vmem:[%s12175_s3 + $0x168] sm:$0xff] %vm6686_vm2, %v9806_v9  ;;  %v6608_v57 = vadd.f32 %v9255_v4, %v11826_v8  ;;  %v9036_v5 = vpop.f32.mrb[52].mxu0 }
 0x33d   :  { %6731 = vst.msk [vmem:[%s12175_s3 + $0x160] sm:$0xff] %vm6686_vm2, %v9808_v3  ;;  %9817 = vtanh.f32 %v6609_v55  ;;  %v9256_v14 = vadd.f32 %v9036_v5, %v8588_v48  ;;  %v6428_v18 = vpop.f32.mrb[53].mxu0  ;;  %v8591_v22 = vpop.f32.mrb[54].mxu1 }
 0x33e   :  { %9819 = vtanh.f32 %v6608_v57  ;;  %v9257_v58 = vadd.f32 %v6428_v18, %v3571_v26  ;;  %v3581_v28 = vpop.f32.mrb[55].mxu1 }
 0x33f   :  { %v9810_v39 = vpop.eup %9809  ;;  %v6611_v46 = vadd.f32 %v9256_v14, %v11826_v8 }
 0x340   :  { %v9812_v25 = vpop.eup %9811  ;;  %6734 = vst.msk [vmem:[%s12175_s3 + $0x178] sm:$0xff] %vm6686_vm2, %v9810_v39  ;;  %v6610_v31 = vadd.f32 %v9257_v58, %v11826_v8  ;;  %v9039_v23 = vpop.f32.mrb[54].mxu0 }
 0x341   :  { %6733 = vst.msk [vmem:[%s12175_s3 + $0x170] sm:$0xff] %vm6686_vm2, %v9812_v25  ;;  %9821 = vtanh.f32 %v6611_v46  ;;  %v9258_v38 = vadd.f32 %v9039_v23, %v8591_v22  ;;  %v6438_v50 = vpop.f32.mrb[55].mxu0  ;;  %v8594_v53 = vpop.f32.mrb[56].mxu1 }
 0x342   :  { %9823 = vtanh.f32 %v6610_v31  ;;  %v9259_v33 = vadd.f32 %v6438_v50, %v3581_v28  ;;  %v3591_v10 = vpop.f32.mrb[57].mxu1 }
 0x343   :  { %v9814_v47 = vpop.eup %9813  ;;  %v6613_v45 = vadd.f32 %v9258_v38, %v11826_v8 }
 0x344   :  { %v9816_v36 = vpop.eup %9815  ;;  %6736 = vst.msk [vmem:[%s12175_s3 + $0x188] sm:$0xff] %vm6686_vm2, %v9814_v47  ;;  %v6612_v41 = vadd.f32 %v9259_v33, %v11826_v8  ;;  %v9042_v60 = vpop.f32.mrb[56].mxu0 }
 0x345   :  { %6735 = vst.msk [vmem:[%s12175_s3 + $0x180] sm:$0xff] %vm6686_vm2, %v9816_v36  ;;  %9825 = vtanh.f32 %v6613_v45  ;;  %v9260_v35 = vadd.f32 %v9042_v60, %v8594_v53  ;;  %v6448_v43 = vpop.f32.mrb[57].mxu0  ;;  %v8597_v42 = vpop.f32.mrb[58].mxu1 }
 0x346   :  { %9827 = vtanh.f32 %v6612_v41  ;;  %v9261_v32 = vadd.f32 %v6448_v43, %v3591_v10  ;;  %v3601_v7 = vpop.f32.mrb[59].mxu1 }
 0x347   :  { %v9818_v13 = vpop.eup %9817  ;;  %v6615_v12 = vadd.f32 %v9260_v35, %v11826_v8 }
 0x348   :  { %v9820_v34 = vpop.eup %9819  ;;  %6738 = vst.msk [vmem:[%s12175_s3 + $0x198] sm:$0xff] %vm6686_vm2, %v9818_v13  ;;  %v6614_v49 = vadd.f32 %v9261_v32, %v11826_v8  ;;  %v9045_v24 = vpop.f32.mrb[58].mxu0 }
 0x349   :  { %6737 = vst.msk [vmem:[%s12175_s3 + $0x190] sm:$0xff] %vm6686_vm2, %v9820_v34  ;;  %9829 = vtanh.f32 %v6615_v12  ;;  %v9262_v29 = vadd.f32 %v9045_v24, %v8597_v42  ;;  %v6458_v56 = vpop.f32.mrb[59].mxu0  ;;  %v8600_v27 = vpop.f32.mrb[60].mxu1 }
 0x34a   :  { %9831 = vtanh.f32 %v6614_v49  ;;  %v9263_v17 = vadd.f32 %v6458_v56, %v3601_v7  ;;  %v3611_v51 = vpop.f32.mrb[61].mxu1 }
 0x34b   :  { %v9822_v15 = vpop.eup %9821  ;;  %v6617_v20 = vadd.f32 %v9262_v29, %v11826_v8 }
 0x34c   :  { %v9824_v63 = vpop.eup %9823  ;;  %6740 = vst.msk [vmem:[%s12175_s3 + $0x1a8] sm:$0xff] %vm6686_vm2, %v9822_v15  ;;  %v6616_v30 = vadd.f32 %v9263_v17, %v11826_v8  ;;  %v9048_v62 = vpop.f32.mrb[60].mxu0 }
 0x34d   :  { %6739 = vst.msk [vmem:[%s12175_s3 + $0x1a0] sm:$0xff] %vm6686_vm2, %v9824_v63  ;;  %9833 = vtanh.f32 %v6617_v20  ;;  %v9264_v52 = vadd.f32 %v9048_v62, %v8600_v27  ;;  %v6468_v44 = vpop.f32.mrb[61].mxu0  ;;  %v8603_v6 = vpop.f32.mrb[62].mxu1 }
 0x34e   :  { %9835 = vtanh.f32 %v6616_v30  ;;  %v9265_v54 = vadd.f32 %v6468_v44, %v3611_v51  ;;  %v3621_v16 = vpop.f32.mrb[63].mxu1 }
 0x34f   :  { %v9826_v61 = vpop.eup %9825  ;;  %v6619_v2 = vadd.f32 %v9264_v52, %v11826_v8 }
 0x350   :  { %v9828_v11 = vpop.eup %9827  ;;  %6742 = vst.msk [vmem:[%s12175_s3 + $0x1b8] sm:$0xff] %vm6686_vm2, %v9826_v61  ;;  %v6618_v59 = vadd.f32 %v9265_v54, %v11826_v8  ;;  %v9051_v0 = vpop.f32.mrb[62].mxu0 }
 0x351   :  { %6741 = vst.msk [vmem:[%s12175_s3 + $0x1b0] sm:$0xff] %vm6686_vm2, %v9828_v11  ;;  %9837 = vtanh.f32 %v6619_v2  ;;  %v9266_v40 = vadd.f32 %v9051_v0, %v8603_v6  ;;  %v6478_v37 = vpop.f32.mrb[63].mxu0 }
 0x352   :  { %9839 = vtanh.f32 %v6618_v59  ;;  %v9267_v19 = vadd.f32 %v6478_v37, %v3621_v16 }
 0x353   :  { %v9830_v1 = vpop.eup %9829  ;;  %v6621_v21 = vadd.f32 %v9266_v40, %v11826_v8 }
 0x354   :  { %v9832_v4 = vpop.eup %9831  ;;  %6744 = vst.msk [vmem:[%s12175_s3 + $0x1c8] sm:$0xff] %vm6686_vm2, %v9830_v1  ;;  %v6620_v9 = vadd.f32 %v9267_v19, %v11826_v8 }
 0x355   :  { %6743 = vst.msk [vmem:[%s12175_s3 + $0x1c0] sm:$0xff] %vm6686_vm2, %v9832_v4  ;;  %9841 = vtanh.f32 %v6621_v21 }
 0x356   :  { %9843 = vtanh.f32 %v6620_v9 }
 0x357   :  { %v9834_v55 = vpop.eup %9833 }
 0x358   :  { %v9836_v48 = vpop.eup %9835  ;;  %6746 = vst.msk [vmem:[%s12175_s3 + $0x1d8] sm:$0xff] %vm6686_vm2, %v9834_v55 }
 0x359   :  { %6745 = vst.msk [vmem:[%s12175_s3 + $0x1d0] sm:$0xff] %vm6686_vm2, %v9836_v48 }
 0x35b   :  { %v9838_v8 = vpop.eup %9837 }
 0x35c   :  { %v9840_v3 = vpop.eup %9839  ;;  %6748 = vst.msk [vmem:[%s12175_s3 + $0x1e8] sm:$0xff] %vm6686_vm2, %v9838_v8 }
 0x35d   :  { %6747 = vst.msk [vmem:[%s12175_s3 + $0x1e0] sm:$0xff] %vm6686_vm2, %v9840_v3 }
 0x35f   :  { %v9842_v57 = vpop.eup %9841 }
 0x360   :  { %v9844_v5 = vpop.eup %9843  ;;  %6750 = vst.msk [vmem:[%s12175_s3 + $0x1f8] sm:$0xff] %vm6686_vm2, %v9842_v57 }
 0x361   :  { %6749 = vst.msk [vmem:[%s12175_s3 + $0x1f0] sm:$0xff] %vm6686_vm2, %v9844_v5 }

</bundles_post_ra>
